<compile_context>
chip_gen: v7x
topology: tpu7x:2x2x1
jax: 0.10.0
libtpu: 0.0.40
codegen_flags: <defaults>
</compile_context>

<pallas_src>
import jax
import jax.numpy as jnp
from jax.experimental import pallas as pl
from jax.experimental.pallas import tpu as pltpu


def _round_up(v, m=128):
    return ((v + m - 1) // m) * m


def _gelu_exact(x):
    # matches torch.nn.GELU() (erf-based, not tanh approximation); f32 math
    return 0.5 * x * (1.0 + jax.lax.erf(x * jnp.float32(0.7071067811865475)))


def cab_kernel(xp_ref, w1_ref, b1_ref, w2_ref, b2_ref, wd_ref, bd_ref,
               wu_ref, bu_ref, o_ref, mid_ref):
    H = o_ref.shape[1]
    W = o_ref.shape[2]
    CP = o_ref.shape[3]          # lane-padded (128) output channels
    CPi = xp_ref.shape[3]        # lane-padded (128) input channels
    CPm = mid_ref.shape[2]       # lane-padded (128) mid channels

    # ---- conv1: 3x3 as a single MXU matmul over a lane-aligned bf16 im2col
    # buffer.  Slice the ref directly (no full-block value materialization).
    cols1 = [xp_ref[0, dy:dy + H, dx:dx + W, :].reshape(H * W, CPi)
             for dy in range(3) for dx in range(3)]
    im2col1 = jnp.concatenate(cols1, axis=-1)                     # (H*W, 9*CPi) bf16
    acc1 = jnp.dot(im2col1, w1_ref[...],
                   preferred_element_type=jnp.float32) + b1_ref[...]   # (H*W, CPm) f32
    mid = _gelu_exact(acc1).reshape(H, W, CPm)

    # ---- padded mid scratch (bf16): zero the 1-wide spatial border, store the
    # interior (cast once here, on the small tile, not on the 9x im2col buffer).
    zrow = jnp.zeros((1, W + 2, CPm), mid_ref.dtype)
    zcol = jnp.zeros((H, 1, CPm), mid_ref.dtype)
    mid_ref[0:1, :, :] = zrow
    mid_ref[H + 1:H + 2, :, :] = zrow
    mid_ref[1:H + 1, 0:1, :] = zcol
    mid_ref[1:H + 1, W + 1:W + 2, :] = zcol
    mid_ref[1:H + 1, 1:W + 1, :] = mid.astype(mid_ref.dtype)

    # ---- conv2: 3x3 as a single MXU matmul, bf16 im2col built straight from
    # the bf16 scratch ref; output N-dim is a full 128-lane tile.
    cols2 = [mid_ref[dy:dy + H, dx:dx + W, :].reshape(H * W, CPm)
             for dy in range(3) for dx in range(3)]
    im2col2 = jnp.concatenate(cols2, axis=-1)                     # (H*W, 9*CPm) bf16
    acc2 = jnp.dot(im2col2, w2_ref[...],
                   preferred_element_type=jnp.float32) + b2_ref[...]   # (H*W, CP) f32

    # ---- ChannelAttention: GAP -> squeeze -> ReLU -> expand -> sigmoid -> scale.
    # Tiny (1,C)x(C,Cs) / (1,Cs)x(Cs,C) contractions stay on the VPU/XLU.
    # Padded lanes of acc2 / wd / wu / bu are exactly zero, so padded output
    # lanes stay 0 and the wrapper slice [..., :C] is exact.
    pooled = jnp.mean(acc2, axis=0, keepdims=True)                       # (1, CP)
    s = jnp.sum(pooled * wd_ref[...], axis=1, keepdims=True) + bd_ref[...]   # (Cs, 1)
    s = jnp.maximum(s, 0.0)
    att = jax.nn.sigmoid(jnp.sum(s * wu_ref[...], axis=0, keepdims=True)
                         + bu_ref[...])                                  # (1, CP)

    o_ref[0] = (acc2 * att).reshape(H, W, CP).astype(o_ref.dtype)


def cab_forward(x_nchw, params):
    """x_nchw: (N, C, H, W) float32.  params: torch-layout weights (see main)."""
    w1, b1, w2, b2, wd, bd, wu, bu = params
    N, C, H, W = x_nchw.shape
    Cm = w1.shape[0]
    Cs = wd.shape[0]
    CP = _round_up(C)            # 128-lane-aligned in/out channels
    CPm = _round_up(Cm)          # 128-lane-aligned mid channels

    # NCHW -> NHWC; spatial zero-pad for the 3x3 convs; channel zero-pad to a
    # full 128-lane tile so the in-kernel im2col concat is lane-aligned.
    # Carried in bf16: halves the input DMA and the in-kernel slice/concat work.
    x = jnp.transpose(x_nchw, (0, 2, 3, 1))
    xp = jnp.pad(x, ((0, 0), (1, 1), (1, 1), (0, CP - C))).astype(jnp.bfloat16)

    # Conv weights packed as (9*Cin_pad, Cout_pad) bf16 matmul weights with
    # exactly-zero pad rows/cols; biases / attention weights stay f32 and are
    # lane-padded with zeros so padded output lanes remain 0.
    w1_hwio = jnp.transpose(w1, (2, 3, 1, 0))                            # (3,3,C,Cm)
    w1_full = jnp.zeros((3, 3, CP, CPm), jnp.float32).at[:, :, :C, :Cm].set(w1_hwio)
    w1_p = w1_full.reshape(9 * CP, CPm).astype(jnp.bfloat16)

    w2_hwio = jnp.transpose(w2, (2, 3, 1, 0))                            # (3,3,Cm,C)
    w2_full = jnp.zeros((3, 3, CPm, CP), jnp.float32).at[:, :, :Cm, :C].set(w2_hwio)
    w2_p = w2_full.reshape(9 * CPm, CP).astype(jnp.bfloat16)

    b1_p = jnp.zeros((1, CPm), jnp.float32).at[0, :Cm].set(b1)
    b2_p = jnp.zeros((1, CP), jnp.float32).at[0, :C].set(b2)
    wd_p = jnp.zeros((Cs, CP), jnp.float32).at[:, :C].set(wd[:, :, 0, 0])
    bd_p = bd.reshape(Cs, 1).astype(jnp.float32)
    wu_p = jnp.zeros((Cs, CP), jnp.float32).at[:, :C].set(wu[:, :, 0, 0].T)
    bu_p = jnp.zeros((1, CP), jnp.float32).at[0, :C].set(bu)

    def full(a):
        return pl.BlockSpec(a.shape, lambda n: (0,) * a.ndim)

    out_nhwc = pl.pallas_call(
        cab_kernel,
        out_shape=jax.ShapeDtypeStruct((N, H, W, CP), jnp.float32),
        grid=(N,),
        in_specs=[
            pl.BlockSpec((1, H + 2, W + 2, CP), lambda n: (n, 0, 0, 0)),
            full(w1_p), full(b1_p), full(w2_p), full(b2_p),
            full(wd_p), full(bd_p), full(wu_p), full(bu_p),
        ],
        out_specs=pl.BlockSpec((1, H, W, CP), lambda n: (n, 0, 0, 0)),
        scratch_shapes=[pltpu.VMEM((H + 2, W + 2, CPm), jnp.bfloat16)],
        # batch axis is independent -> "parallel" lets v7x shard images across
        # its two TensorCores (no effect on single-TC v5e/v6e).
        compiler_params=pltpu.CompilerParams(dimension_semantics=("parallel",)),
    )(xp, w1_p, b1_p, w2_p, b2_p, wd_p, bd_p, wu_p, bu_p)

    # slice off the lane padding, back to NCHW
    return jnp.transpose(out_nhwc[..., :C], (0, 3, 1, 2))


def cab_reference(x_nchw, params):
    """Pure-JAX reference (XLA conv) used only for a correctness check."""
    w1, b1, w2, b2, wd, bd, wu, bu = params
    x = jnp.transpose(x_nchw, (0, 2, 3, 1))
    dn = ('NHWC', 'HWIO', 'NHWC')
    y = jax.lax.conv_general_dilated(x, jnp.transpose(w1, (2, 3, 1, 0)),
                                     (1, 1), 'SAME', dimension_numbers=dn) + b1
    y = jax.nn.gelu(y, approximate=False)
    y = jax.lax.conv_general_dilated(y, jnp.transpose(w2, (2, 3, 1, 0)),
                                     (1, 1), 'SAME', dimension_numbers=dn) + b2
    pooled = jnp.mean(y, axis=(1, 2), keepdims=True)                     # (N,1,1,C)
    s = jnp.maximum(jnp.einsum('nijc,cs->nijs', pooled, wd[:, :, 0, 0].T) + bd, 0.0)
    att = jax.nn.sigmoid(jnp.einsum('nijs,sc->nijc', s, wu[:, :, 0, 0].T) + bu)
    return jnp.transpose(y * att, (0, 3, 1, 2))


if __name__ == "__main__":
    # CAB(num_feat=60, compress_ratio=3, squeeze_factor=30)  -> Cm=20, Cs=2
    N, C, H, W = 2, 60, 16, 16
    Cm, Cs = C // 3, C // 30

    key = jax.random.PRNGKey(0)
    kx, k1, k2, k3, k4, k5, k6, k7, k8 = jax.random.split(key, 9)

    x = jax.random.normal(kx, (N, C, H, W), jnp.float32)

    # deterministic synthetic parameters, torch Conv2d layout (Cout, Cin, kH, kW)
    params = (
        0.1 * jax.random.normal(k1, (Cm, C, 3, 3), jnp.float32),   # conv1 weight
        0.1 * jax.random.normal(k2, (Cm,), jnp.float32),           # conv1 bias
        0.1 * jax.random.normal(k3, (C, Cm, 3, 3), jnp.float32),   # conv2 weight
        0.1 * jax.random.normal(k4, (C,), jnp.float32),            # conv2 bias
        0.1 * jax.random.normal(k5, (Cs, C, 1, 1), jnp.float32),   # squeeze 1x1 weight
        0.1 * jax.random.normal(k6, (Cs,), jnp.float32),           # squeeze bias
        0.1 * jax.random.normal(k7, (C, Cs, 1, 1), jnp.float32),   # expand 1x1 weight
        0.1 * jax.random.normal(k8, (C,), jnp.float32),            # expand bias
    )

    out = cab_forward(x, params)
    jax.block_until_ready(out)

    ref = cab_reference(x, params)
    jax.block_until_ready(ref)
    assert out.shape == (N, C, H, W)
    # bf16 MXU operands / bf16 activations in the kernel -> bf16-appropriate
    # tolerance vs the f32 reference.
    assert jnp.allclose(out, ref, rtol=5e-2, atol=5e-2), (
        f"max abs diff {jnp.max(jnp.abs(out - ref))}")

    print("KERNEL_OK")
</pallas_src>

<mosaic_0001>
module attributes {stable_mosaic.version = 11 : i64} {
  func.func @cab_kernel(%arg0: i32, %arg1: memref<1x18x18x128xbf16, #tpu.memory_space<vmem>>, %arg2: memref<1152x128xbf16, #tpu.memory_space<vmem>>, %arg3: memref<1x128xf32, #tpu.memory_space<vmem>>, %arg4: memref<1152x128xbf16, #tpu.memory_space<vmem>>, %arg5: memref<1x128xf32, #tpu.memory_space<vmem>>, %arg6: memref<2x128xf32, #tpu.memory_space<vmem>>, %arg7: memref<2x1xf32, #tpu.memory_space<vmem>>, %arg8: memref<2x128xf32, #tpu.memory_space<vmem>>, %arg9: memref<1x128xf32, #tpu.memory_space<vmem>>, %arg10: memref<1x16x16x128xf32, #tpu.memory_space<vmem>>, %arg11: memref<18x18x128xbf16, #tpu.memory_space<vmem>>) attributes {dimension_semantics = [#tpu.dimension_semantics<parallel>], iteration_bounds = array<i64: 2>, scalar_prefetch = 0 : i64, scratch_operands = 1 : i64, tpu.core_type = #tpu.core_type<tc>, window_params = [{transform_indices = @transform_0, window_bounds = array<i64: 1, 18, 18, 128>}, {pipeline_mode = #tpu.pipeline_mode<synchronous>, transform_indices = @transform_1, window_bounds = array<i64: 1152, 128>}, {pipeline_mode = #tpu.pipeline_mode<synchronous>, transform_indices = @transform_2, window_bounds = array<i64: 1, 128>}, {pipeline_mode = #tpu.pipeline_mode<synchronous>, transform_indices = @transform_3, window_bounds = array<i64: 1152, 128>}, {pipeline_mode = #tpu.pipeline_mode<synchronous>, transform_indices = @transform_4, window_bounds = array<i64: 1, 128>}, {pipeline_mode = #tpu.pipeline_mode<synchronous>, transform_indices = @transform_5, window_bounds = array<i64: 2, 128>}, {pipeline_mode = #tpu.pipeline_mode<synchronous>, transform_indices = @transform_6, window_bounds = array<i64: 2, 1>}, {pipeline_mode = #tpu.pipeline_mode<synchronous>, transform_indices = @transform_7, window_bounds = array<i64: 2, 128>}, {pipeline_mode = #tpu.pipeline_mode<synchronous>, transform_indices = @transform_8, window_bounds = array<i64: 1, 128>}, {transform_indices = @transform_9, window_bounds = array<i64: 1, 16, 16, 128>}]} {
    %c0 = arith.constant 0 : index
    %c0_0 = arith.constant 0 : index
    %c0_1 = arith.constant 0 : index
    %c0_2 = arith.constant 0 : index
    %0 = vector.load %arg1[%c0, %c0_0, %c0_1, %c0_2] : memref<1x18x18x128xbf16, #tpu.memory_space<vmem>>, vector<1x16x16x128xbf16>
    %1 = vector.shape_cast %0 : vector<1x16x16x128xbf16> to vector<16x16x128xbf16>
    %2 = vector.shape_cast %1 : vector<16x16x128xbf16> to vector<256x128xbf16>
    %c0_3 = arith.constant 0 : index
    %c0_4 = arith.constant 0 : index
    %c1 = arith.constant 1 : index
    %c0_5 = arith.constant 0 : index
    %3 = vector.load %arg1[%c0_3, %c0_4, %c1, %c0_5] : memref<1x18x18x128xbf16, #tpu.memory_space<vmem>>, vector<1x16x16x128xbf16>
    %4 = vector.shape_cast %3 : vector<1x16x16x128xbf16> to vector<16x16x128xbf16>
    %5 = vector.shape_cast %4 : vector<16x16x128xbf16> to vector<256x128xbf16>
    %c0_6 = arith.constant 0 : index
    %c0_7 = arith.constant 0 : index
    %c2 = arith.constant 2 : index
    %c0_8 = arith.constant 0 : index
    %6 = vector.load %arg1[%c0_6, %c0_7, %c2, %c0_8] : memref<1x18x18x128xbf16, #tpu.memory_space<vmem>>, vector<1x16x16x128xbf16>
    %7 = vector.shape_cast %6 : vector<1x16x16x128xbf16> to vector<16x16x128xbf16>
    %8 = vector.shape_cast %7 : vector<16x16x128xbf16> to vector<256x128xbf16>
    %c0_9 = arith.constant 0 : index
    %c1_10 = arith.constant 1 : index
    %c0_11 = arith.constant 0 : index
    %c0_12 = arith.constant 0 : index
    %9 = vector.load %arg1[%c0_9, %c1_10, %c0_11, %c0_12] : memref<1x18x18x128xbf16, #tpu.memory_space<vmem>>, vector<1x16x16x128xbf16>
    %10 = vector.shape_cast %9 : vector<1x16x16x128xbf16> to vector<16x16x128xbf16>
    %11 = vector.shape_cast %10 : vector<16x16x128xbf16> to vector<256x128xbf16>
    %c0_13 = arith.constant 0 : index
    %c1_14 = arith.constant 1 : index
    %c1_15 = arith.constant 1 : index
    %c0_16 = arith.constant 0 : index
    %12 = vector.load %arg1[%c0_13, %c1_14, %c1_15, %c0_16] : memref<1x18x18x128xbf16, #tpu.memory_space<vmem>>, vector<1x16x16x128xbf16>
    %13 = vector.shape_cast %12 : vector<1x16x16x128xbf16> to vector<16x16x128xbf16>
    %14 = vector.shape_cast %13 : vector<16x16x128xbf16> to vector<256x128xbf16>
    %c0_17 = arith.constant 0 : index
    %c1_18 = arith.constant 1 : index
    %c2_19 = arith.constant 2 : index
    %c0_20 = arith.constant 0 : index
    %15 = vector.load %arg1[%c0_17, %c1_18, %c2_19, %c0_20] : memref<1x18x18x128xbf16, #tpu.memory_space<vmem>>, vector<1x16x16x128xbf16>
    %16 = vector.shape_cast %15 : vector<1x16x16x128xbf16> to vector<16x16x128xbf16>
    %17 = vector.shape_cast %16 : vector<16x16x128xbf16> to vector<256x128xbf16>
    %c0_21 = arith.constant 0 : index
    %c2_22 = arith.constant 2 : index
    %c0_23 = arith.constant 0 : index
    %c0_24 = arith.constant 0 : index
    %18 = vector.load %arg1[%c0_21, %c2_22, %c0_23, %c0_24] : memref<1x18x18x128xbf16, #tpu.memory_space<vmem>>, vector<1x16x16x128xbf16>
    %19 = vector.shape_cast %18 : vector<1x16x16x128xbf16> to vector<16x16x128xbf16>
    %20 = vector.shape_cast %19 : vector<16x16x128xbf16> to vector<256x128xbf16>
    %c0_25 = arith.constant 0 : index
    %c2_26 = arith.constant 2 : index
    %c1_27 = arith.constant 1 : index
    %c0_28 = arith.constant 0 : index
    %21 = vector.load %arg1[%c0_25, %c2_26, %c1_27, %c0_28] : memref<1x18x18x128xbf16, #tpu.memory_space<vmem>>, vector<1x16x16x128xbf16>
    %22 = vector.shape_cast %21 : vector<1x16x16x128xbf16> to vector<16x16x128xbf16>
    %23 = vector.shape_cast %22 : vector<16x16x128xbf16> to vector<256x128xbf16>
    %c0_29 = arith.constant 0 : index
    %c2_30 = arith.constant 2 : index
    %c2_31 = arith.constant 2 : index
    %c0_32 = arith.constant 0 : index
    %24 = vector.load %arg1[%c0_29, %c2_30, %c2_31, %c0_32] : memref<1x18x18x128xbf16, #tpu.memory_space<vmem>>, vector<1x16x16x128xbf16>
    %25 = vector.shape_cast %24 : vector<1x16x16x128xbf16> to vector<16x16x128xbf16>
    %26 = vector.shape_cast %25 : vector<16x16x128xbf16> to vector<256x128xbf16>
    %27 = tpu.concatenate %2, %5, %8, %11, %14, %17, %20, %23, %26 in 1 : vector<256x128xbf16>, vector<256x128xbf16>, vector<256x128xbf16>, vector<256x128xbf16>, vector<256x128xbf16>, vector<256x128xbf16>, vector<256x128xbf16>, vector<256x128xbf16>, vector<256x128xbf16> -> vector<256x1152xbf16>
    %c0_33 = arith.constant 0 : index
    %c0_34 = arith.constant 0 : index
    %28 = vector.load %arg2[%c0_33, %c0_34] : memref<1152x128xbf16, #tpu.memory_space<vmem>>, vector<1152x128xbf16>
    %cst = arith.constant dense<0.000000e+00> : vector<256x128xf32>
    %29 = tpu.matmul %27, %28, %cst {dimension_numbers = #tpu.dot_dimension_numbers<[1], [0], [0], [1], [0, 0, 1, 1], [], []>} : vector<256x1152xbf16>, vector<1152x128xbf16>, vector<256x128xf32> -> vector<256x128xf32>
    %c0_35 = arith.constant 0 : index
    %c0_36 = arith.constant 0 : index
    %30 = vector.load %arg3[%c0_35, %c0_36] : memref<1x128xf32, #tpu.memory_space<vmem>>, vector<1x128xf32>
    %31 = vector.broadcast %30 : vector<1x128xf32> to vector<256x128xf32>
    %32 = arith.addf %29, %31 : vector<256x128xf32>
    %cst_37 = arith.constant 5.000000e-01 : f32
    %33 = vector.broadcast %cst_37 : f32 to vector<256x128xf32>
    %34 = arith.mulf %33, %32 : vector<256x128xf32>
    %cst_38 = arith.constant 0.707106769 : f32
    %35 = vector.broadcast %cst_38 : f32 to vector<256x128xf32>
    %36 = arith.mulf %32, %35 : vector<256x128xf32>
    %37 = math.erf %36 : vector<256x128xf32>
    %cst_39 = arith.constant 1.000000e+00 : f32
    %38 = vector.broadcast %cst_39 : f32 to vector<256x128xf32>
    %39 = arith.addf %38, %37 : vector<256x128xf32>
    %40 = arith.mulf %34, %39 : vector<256x128xf32>
    %41 = vector.shape_cast %40 : vector<256x128xf32> to vector<16x16x128xf32>
    %cst_40 = arith.constant 0.000000e+00 : bf16
    %42 = vector.broadcast %cst_40 : bf16 to vector<1x18x128xbf16>
    %cst_41 = arith.constant 0.000000e+00 : bf16
    %43 = vector.broadcast %cst_41 : bf16 to vector<16x1x128xbf16>
    %c0_42 = arith.constant 0 : index
    %c0_43 = arith.constant 0 : index
    %c0_44 = arith.constant 0 : index
    %44 = vector.load %arg11[%c0_42, %c0_43, %c0_44] : memref<18x18x128xbf16, #tpu.memory_space<vmem>>, vector<1x18x128xbf16>
    tpu.vector_store %arg11[%c0_42, %c0_43, %c0_44], %42 {strides = array<i32>} : memref<18x18x128xbf16, #tpu.memory_space<vmem>>, vector<1x18x128xbf16>,
    %c17 = arith.constant 17 : index
    %c0_45 = arith.constant 0 : index
    %c0_46 = arith.constant 0 : index
    %45 = vector.load %arg11[%c17, %c0_45, %c0_46] : memref<18x18x128xbf16, #tpu.memory_space<vmem>>, vector<1x18x128xbf16>
    tpu.vector_store %arg11[%c17, %c0_45, %c0_46], %42 {strides = array<i32>} : memref<18x18x128xbf16, #tpu.memory_space<vmem>>, vector<1x18x128xbf16>,
    %c1_47 = arith.constant 1 : index
    %c0_48 = arith.constant 0 : index
    %c0_49 = arith.constant 0 : index
    %46 = vector.load %arg11[%c1_47, %c0_48, %c0_49] : memref<18x18x128xbf16, #tpu.memory_space<vmem>>, vector<16x1x128xbf16>
    tpu.vector_store %arg11[%c1_47, %c0_48, %c0_49], %43 {strides = array<i32>} : memref<18x18x128xbf16, #tpu.memory_space<vmem>>, vector<16x1x128xbf16>,
    %c1_50 = arith.constant 1 : index
    %c17_51 = arith.constant 17 : index
    %c0_52 = arith.constant 0 : index
    %47 = vector.load %arg11[%c1_50, %c17_51, %c0_52] : memref<18x18x128xbf16, #tpu.memory_space<vmem>>, vector<16x1x128xbf16>
    tpu.vector_store %arg11[%c1_50, %c17_51, %c0_52], %43 {strides = array<i32>} : memref<18x18x128xbf16, #tpu.memory_space<vmem>>, vector<16x1x128xbf16>,
    %48 = arith.truncf %41 : vector<16x16x128xf32> to vector<16x16x128xbf16>
    %c1_53 = arith.constant 1 : index
    %c1_54 = arith.constant 1 : index
    %c0_55 = arith.constant 0 : index
    %49 = vector.load %arg11[%c1_53, %c1_54, %c0_55] : memref<18x18x128xbf16, #tpu.memory_space<vmem>>, vector<16x16x128xbf16>
    tpu.vector_store %arg11[%c1_53, %c1_54, %c0_55], %48 {strides = array<i32>} : memref<18x18x128xbf16, #tpu.memory_space<vmem>>, vector<16x16x128xbf16>,
    %c0_56 = arith.constant 0 : index
    %c0_57 = arith.constant 0 : index
    %c0_58 = arith.constant 0 : index
    %50 = vector.load %arg11[%c0_56, %c0_57, %c0_58] : memref<18x18x128xbf16, #tpu.memory_space<vmem>>, vector<16x16x128xbf16>
    %51 = vector.shape_cast %50 : vector<16x16x128xbf16> to vector<256x128xbf16>
    %c0_59 = arith.constant 0 : index
    %c1_60 = arith.constant 1 : index
    %c0_61 = arith.constant 0 : index
    %52 = vector.load %arg11[%c0_59, %c1_60, %c0_61] : memref<18x18x128xbf16, #tpu.memory_space<vmem>>, vector<16x16x128xbf16>
    %53 = vector.shape_cast %52 : vector<16x16x128xbf16> to vector<256x128xbf16>
    %c0_62 = arith.constant 0 : index
    %c2_63 = arith.constant 2 : index
    %c0_64 = arith.constant 0 : index
    %54 = vector.load %arg11[%c0_62, %c2_63, %c0_64] : memref<18x18x128xbf16, #tpu.memory_space<vmem>>, vector<16x16x128xbf16>
    %55 = vector.shape_cast %54 : vector<16x16x128xbf16> to vector<256x128xbf16>
    %c1_65 = arith.constant 1 : index
    %c0_66 = arith.constant 0 : index
    %c0_67 = arith.constant 0 : index
    %56 = vector.load %arg11[%c1_65, %c0_66, %c0_67] : memref<18x18x128xbf16, #tpu.memory_space<vmem>>, vector<16x16x128xbf16>
    %57 = vector.shape_cast %56 : vector<16x16x128xbf16> to vector<256x128xbf16>
    %c1_68 = arith.constant 1 : index
    %c1_69 = arith.constant 1 : index
    %c0_70 = arith.constant 0 : index
    %58 = vector.load %arg11[%c1_68, %c1_69, %c0_70] : memref<18x18x128xbf16, #tpu.memory_space<vmem>>, vector<16x16x128xbf16>
    %59 = vector.shape_cast %58 : vector<16x16x128xbf16> to vector<256x128xbf16>
    %c1_71 = arith.constant 1 : index
    %c2_72 = arith.constant 2 : index
    %c0_73 = arith.constant 0 : index
    %60 = vector.load %arg11[%c1_71, %c2_72, %c0_73] : memref<18x18x128xbf16, #tpu.memory_space<vmem>>, vector<16x16x128xbf16>
    %61 = vector.shape_cast %60 : vector<16x16x128xbf16> to vector<256x128xbf16>
    %c2_74 = arith.constant 2 : index
    %c0_75 = arith.constant 0 : index
    %c0_76 = arith.constant 0 : index
    %62 = vector.load %arg11[%c2_74, %c0_75, %c0_76] : memref<18x18x128xbf16, #tpu.memory_space<vmem>>, vector<16x16x128xbf16>
    %63 = vector.shape_cast %62 : vector<16x16x128xbf16> to vector<256x128xbf16>
    %c2_77 = arith.constant 2 : index
    %c1_78 = arith.constant 1 : index
    %c0_79 = arith.constant 0 : index
    %64 = vector.load %arg11[%c2_77, %c1_78, %c0_79] : memref<18x18x128xbf16, #tpu.memory_space<vmem>>, vector<16x16x128xbf16>
    %65 = vector.shape_cast %64 : vector<16x16x128xbf16> to vector<256x128xbf16>
    %c2_80 = arith.constant 2 : index
    %c2_81 = arith.constant 2 : index
    %c0_82 = arith.constant 0 : index
    %66 = vector.load %arg11[%c2_80, %c2_81, %c0_82] : memref<18x18x128xbf16, #tpu.memory_space<vmem>>, vector<16x16x128xbf16>
    %67 = vector.shape_cast %66 : vector<16x16x128xbf16> to vector<256x128xbf16>
    %68 = tpu.concatenate %51, %53, %55, %57, %59, %61, %63, %65, %67 in 1 : vector<256x128xbf16>, vector<256x128xbf16>, vector<256x128xbf16>, vector<256x128xbf16>, vector<256x128xbf16>, vector<256x128xbf16>, vector<256x128xbf16>, vector<256x128xbf16>, vector<256x128xbf16> -> vector<256x1152xbf16>
    %c0_83 = arith.constant 0 : index
    %c0_84 = arith.constant 0 : index
    %69 = vector.load %arg4[%c0_83, %c0_84] : memref<1152x128xbf16, #tpu.memory_space<vmem>>, vector<1152x128xbf16>
    %cst_85 = arith.constant dense<0.000000e+00> : vector<256x128xf32>
    %70 = tpu.matmul %68, %69, %cst_85 {dimension_numbers = #tpu.dot_dimension_numbers<[1], [0], [0], [1], [0, 0, 1, 1], [], []>} : vector<256x1152xbf16>, vector<1152x128xbf16>, vector<256x128xf32> -> vector<256x128xf32>
    %c0_86 = arith.constant 0 : index
    %c0_87 = arith.constant 0 : index
    %71 = vector.load %arg5[%c0_86, %c0_87] : memref<1x128xf32, #tpu.memory_space<vmem>>, vector<1x128xf32>
    %72 = vector.broadcast %71 : vector<1x128xf32> to vector<256x128xf32>
    %73 = arith.addf %70, %72 : vector<256x128xf32>
    %cst_88 = arith.constant dense<0.000000e+00> : vector<128xf32>
    %74 = vector.multi_reduction <add>, %73, %cst_88 [0] : vector<256x128xf32> to vector<128xf32>
    %75 = vector.shape_cast %74 : vector<128xf32> to vector<1x128xf32>
    %cst_89 = arith.constant 2.560000e+02 : f32
    %76 = vector.broadcast %cst_89 : f32 to vector<1x128xf32>
    %77 = arith.divf %75, %76 : vector<1x128xf32>
    %c0_90 = arith.constant 0 : index
    %c0_91 = arith.constant 0 : index
    %78 = vector.load %arg6[%c0_90, %c0_91] : memref<2x128xf32, #tpu.memory_space<vmem>>, vector<2x128xf32>
    %79 = vector.broadcast %77 : vector<1x128xf32> to vector<2x128xf32>
    %80 = arith.mulf %79, %78 : vector<2x128xf32>
    %cst_92 = arith.constant dense<0.000000e+00> : vector<2xf32>
    %81 = vector.multi_reduction <add>, %80, %cst_92 [1] : vector<2x128xf32> to vector<2xf32>
    %82 = vector.shape_cast %81 : vector<2xf32> to vector<2x1xf32>
    %c0_93 = arith.constant 0 : index
    %c0_94 = arith.constant 0 : index
    %83 = vector.load %arg7[%c0_93, %c0_94] : memref<2x1xf32, #tpu.memory_space<vmem>>, vector<2x1xf32>
    %84 = arith.addf %82, %83 : vector<2x1xf32>
    %cst_95 = arith.constant 0.000000e+00 : f32
    %85 = vector.broadcast %cst_95 : f32 to vector<2x1xf32>
    %86 = arith.maximumf %84, %85 : vector<2x1xf32>
    %c0_96 = arith.constant 0 : index
    %c0_97 = arith.constant 0 : index
    %87 = vector.load %arg8[%c0_96, %c0_97] : memref<2x128xf32, #tpu.memory_space<vmem>>, vector<2x128xf32>
    %88 = vector.broadcast %86 : vector<2x1xf32> to vector<2x128xf32>
    %89 = arith.mulf %88, %87 : vector<2x128xf32>
    %cst_98 = arith.constant dense<0.000000e+00> : vector<128xf32>
    %90 = vector.multi_reduction <add>, %89, %cst_98 [0] : vector<2x128xf32> to vector<128xf32>
    %91 = vector.shape_cast %90 : vector<128xf32> to vector<1x128xf32>
    %c0_99 = arith.constant 0 : index
    %c0_100 = arith.constant 0 : index
    %92 = vector.load %arg9[%c0_99, %c0_100] : memref<1x128xf32, #tpu.memory_space<vmem>>, vector<1x128xf32>
    %93 = arith.addf %91, %92 : vector<1x128xf32>
    %94 = arith.negf %93 : vector<1x128xf32>
    %95 = math.exp %94 : vector<1x128xf32>
    %cst_101 = arith.constant 1.000000e+00 : f32
    %96 = vector.broadcast %cst_101 : f32 to vector<1x128xf32>
    %97 = arith.addf %96, %95 : vector<1x128xf32>
    %98 = arith.divf %96, %97 : vector<1x128xf32>
    %99 = vector.broadcast %98 : vector<1x128xf32> to vector<256x128xf32>
    %100 = arith.mulf %73, %99 : vector<256x128xf32>
    %101 = vector.shape_cast %100 : vector<256x128xf32> to vector<16x16x128xf32>
    %c0_102 = arith.constant 0 : index
    %c0_103 = arith.constant 0 : index
    %c0_104 = arith.constant 0 : index
    %c0_105 = arith.constant 0 : index
    %102 = vector.load %arg10[%c0_102, %c0_103, %c0_104, %c0_105] : memref<1x16x16x128xf32, #tpu.memory_space<vmem>>, vector<1x16x16x128xf32>
    %103 = vector.shape_cast %102 : vector<1x16x16x128xf32> to vector<16x16x128xf32>
    %104 = vector.shape_cast %101 : vector<16x16x128xf32> to vector<1x16x16x128xf32>
    tpu.vector_store %arg10[%c0_102, %c0_103, %c0_104, %c0_105], %104 {strides = array<i32>} : memref<1x16x16x128xf32, #tpu.memory_space<vmem>>, vector<1x16x16x128xf32>,
    return
  }
  func.func @transform_0(%arg0: i32) -> (i32, i32, i32, i32) {
    %c0_i32 = arith.constant 0 : i32
    %c0_i32_0 = arith.constant 0 : i32
    %c0_i32_1 = arith.constant 0 : i32
    %c0_i32_2 = arith.constant 0 : i32
    return %arg0, %c0_i32, %c0_i32_0, %c0_i32_1 : i32, i32, i32, i32
  }
  func.func @transform_1(%arg0: i32) -> (i32, i32) {
    %c0_i32 = arith.constant 0 : i32
    %c0_i32_0 = arith.constant 0 : i32
    %c0_i32_1 = arith.constant 0 : i32
    return %c0_i32, %c0_i32_0 : i32, i32
  }
  func.func @transform_2(%arg0: i32) -> (i32, i32) {
    %c0_i32 = arith.constant 0 : i32
    %c0_i32_0 = arith.constant 0 : i32
    %c0_i32_1 = arith.constant 0 : i32
    return %c0_i32, %c0_i32_0 : i32, i32
  }
  func.func @transform_3(%arg0: i32) -> (i32, i32) {
    %c0_i32 = arith.constant 0 : i32
    %c0_i32_0 = arith.constant 0 : i32
    %c0_i32_1 = arith.constant 0 : i32
    return %c0_i32, %c0_i32_0 : i32, i32
  }
  func.func @transform_4(%arg0: i32) -> (i32, i32) {
    %c0_i32 = arith.constant 0 : i32
    %c0_i32_0 = arith.constant 0 : i32
    %c0_i32_1 = arith.constant 0 : i32
    return %c0_i32, %c0_i32_0 : i32, i32
  }
  func.func @transform_5(%arg0: i32) -> (i32, i32) {
    %c0_i32 = arith.constant 0 : i32
    %c0_i32_0 = arith.constant 0 : i32
    %c0_i32_1 = arith.constant 0 : i32
    return %c0_i32, %c0_i32_0 : i32, i32
  }
  func.func @transform_6(%arg0: i32) -> (i32, i32) {
    %c0_i32 = arith.constant 0 : i32
    %c0_i32_0 = arith.constant 0 : i32
    %c0_i32_1 = arith.constant 0 : i32
    return %c0_i32, %c0_i32_0 : i32, i32
  }
  func.func @transform_7(%arg0: i32) -> (i32, i32) {
    %c0_i32 = arith.constant 0 : i32
    %c0_i32_0 = arith.constant 0 : i32
    %c0_i32_1 = arith.constant 0 : i32
    return %c0_i32, %c0_i32_0 : i32, i32
  }
  func.func @transform_8(%arg0: i32) -> (i32, i32) {
    %c0_i32 = arith.constant 0 : i32
    %c0_i32_0 = arith.constant 0 : i32
    %c0_i32_1 = arith.constant 0 : i32
    return %c0_i32, %c0_i32_0 : i32, i32
  }
  func.func @transform_9(%arg0: i32) -> (i32, i32, i32, i32) {
    %c0_i32 = arith.constant 0 : i32
    %c0_i32_0 = arith.constant 0 : i32
    %c0_i32_1 = arith.constant 0 : i32
    %c0_i32_2 = arith.constant 0 : i32
    return %arg0, %c0_i32, %c0_i32_0, %c0_i32_1 : i32, i32, i32, i32
  }
}

</mosaic_0001>

<bundles_post_ra>
// kernel: tpu_custom_call.1
= control target key start
LH: loop header
LB: loop body
LE: loop exit
PB: predicated region body
PF: predicated region fallthrough
CT: control target
= control target key end

     0   :  { %14 = vsyncpa [#allocation4], 0  ;;  %s15788_s0 = inlined_call_operand.vmem [shape: bf16[2,18,18,128], index: 0, kind: input, shape index: {}]   ;;  %s15789_s1 = inlined_call_operand.vmem [shape: bf16[1152,128], index: 1, kind: input, shape index: {}]   ;;  %s15790_s2 = inlined_call_operand.vmem [shape: f32[1,128], index: 2, kind: input, shape index: {}]   ;;  %s15791_s3 = inlined_call_operand.hbm [shape: bf16[1152,128], index: 3, kind: input, shape index: {}]   ;;  %s15792_s4 = inlined_call_operand.vmem [shape: f32[1,128], index: 4, kind: input, shape index: {}]   ;;  %s15793_s5 = inlined_call_operand.vmem [shape: f32[2,128], index: 5, kind: input, shape index: {}]   ;;  %s15794_s6 = inlined_call_operand.vmem [shape: f32[2,1], index: 6, kind: input, shape index: {}]   ;;  %s15795_s7 = inlined_call_operand.vmem [shape: f32[2,128], index: 7, kind: input, shape index: {}]   ;;  %s15796_s8 = inlined_call_operand.vmem [shape: f32[1,128], index: 8, kind: input, shape index: {}]   ;;  %s15797_s9 = inlined_call_operand.hbm [shape: f32[2,16,16,128], index: 9, kind: output, shape index: {}]  }
   0x1   :  { %15 = vsyncpa [#allocation5], 0 }
   0x2   :  { %17 = vsyncpa [#allocation5 + $0x1], 0  ;;  %s11423_s30 = smov 0   ;;  %s11425_s10 = smov 0  }
   0x3   :  { %s11427_s11 = smov 0   ;;  %s11429_s12 = smov 0  }
   0x4 LB: > { %s11444_s13 = sadd.s32 4294967295, %s11364_s12   ;;  %s9055_s14 = sadd.s32 4294967294, %s11364_s12   ;;  %s11364_s12 = sphi %s11429_s12, %s16064_s12   ;;  %s11360_s11 = sphi %s11427_s11, %s16063_s11   ;;  %s11356_s10 = sphi %s11425_s10, %s16062_s10   ;;  %s11352_s30 = sphi %s11423_s30, %s16061_s30  }
   0x5   : > { %s11448_s15 = sadd.s32 1, %s11364_s12   ;;  %s224_s16 = sadd.s32 1, %s11360_s11 }
   0x6   : > { %s221_s17 = ssub.s32 %s11364_s12, %s11448_s15  ;;  %p234_p0 = scmp.ne.s32.totalorder %s11360_s11, %s11356_s10 }
   0x7   : > { %p222_p1 = scmp.eq.s32.totalorder %s221_s17, 0  ;;  %p235_p2 = scmp.eq.s32.totalorder %s11444_s13, 1 }
   0x8   : > { %p240_p3 = scmp.ne.s32.totalorder %s11356_s10, %s11352_s30  ;;  %p241_p4 = scmp.eq.s32.totalorder %s9055_s14, 1 }
   0x9   : > { %s11459_s18 = scalar_select %p222_p1, %s11360_s11, %s224_s16  }
   0xa   : > { %p11461_p5 = por %p235_p2, %p234_p0  ;;  %p11465_p6 = por %p241_p4, %p240_p3 }
   0xb   : > { %p9056_p7 = scmp.ge.s32.totalorder %s11364_s12, 1  ;;  %p248_p8 = scmp.lt.s32.totalorder %s11364_s12, 3 }
   0xc   : > { %s15837_s19 = scalar_select %p11461_p5, 1, 0 }
   0xd   : > { %s15838_s20 = scalar_select %p11465_p6, 1, 0 }
   0xe   : > { %p15798_p9 = scmp.eq.s32.totalorder %s11444_s13, 0  ;;  %p11472_p10 = pnand %p9056_p7, %p248_p8 }
   0xf   : > { %s11366_s22 = smov [#allocation3]   ;;  %s11270_s27 = scalar_lea.hbm %s15791_s3, 9216 }
  0x10   : > { %s15839_s21 = scalar_select %p11472_p10, 1, 0 }
  0x11   : > { %s266_s23 = sshll.u32 %s11366_s22, 4  ;;  %p10839_p11 = pneg %p11472_p10  ;;  %s267_s23 = int_to_ptr.vmem [resolvable:$true] %s266_s23 }
  0x12   : > { %p11271_p13 = scmp.ne.s32.totalorder %s15791_s3, %s11270_s27  ;;  %p11277_p3 = scmp.lt.u32.totalorder %s11270_s27, %s15791_s3 }
  0x13   : > { %p11480_p12 = pnand %p15798_p9, %p10839_p11 }
  0x15   : > { %p11272_p0 = pneg %p11480_p12 }
  0x17   : > { %p11273_p1 = pnand %p11272_p0, %p11271_p13 }
  0x19   : > { %p11274_p2 = pneg %p11273_p1 }
  0x1b   : > { %p11279_p4 = pnand %p11277_p3, %p11274_p2 }
  0x1d   : > { %11282 = shalt.err (!%p11279_p4)
}
  0x1e   : > { %s11283_s17 = scalar_lea.vmem %s267_s23, 9216  ;;  %p11291_p9 = scmp.lt.s32.totalorder %s267_s23, %s267_s23 }
  0x1f   : > { %p11284_p7 = scmp.ne.s32.totalorder %s267_s23, %s11283_s17  ;;  %p11292_p6 = scmp.lt.s32.totalorder %s11283_s17, %s11283_s17 }
  0x21   : > { %p11286_p8 = pnand %p11284_p7, %p11272_p0  ;;  %p11293_p5 = por %p11292_p6, %p11291_p9 }
  0x23   : > { %p11287_p11 = pneg %p11286_p8 }
  0x25   : > { %p11294_p10 = pnand %p11293_p5, %p11287_p11 }
  0x27   : > { %11297 = shalt.err (!%p11294_p10)
}
  0x28   : > { %s11367_s22 = smov 64   ;;  %s11368_s25 = smov 4  }
  0x29   : > { %10842 = dma.hbm_to_vmem [thread:$0]  (!%p11480_p12), %s15791_s3, 9216, %s267_s23, [#allocation4], %s11367_s22, %s11367_s22, %s11368_s25  }
  0x2a   : > { %p15841_p13 = scmp.ne.s32.totalorder %s15839_s21, 0 }
  0x2c   : > { %305 = sbr.rel (%p15841_p13) target bundleno = 1639 (0x667), region = 56 }
  0x33   : > { %p15842_p1 = scmp.eq.s32.totalorder %s11444_s13, 0 }
  0x35   : > { %11343 = dma.done.wait (%p15842_p1), [#allocation4], 9216   ;;  %p15843_p0 = pmov %p15842_p1 }
  0x36   : > { %v10889_v0 = vld [vmem:[%s15789_s1 + $0x40] sm:$0xff]   ;;  %v10893_v4 = vld [vmem:[%s15789_s1 + $0x48] sm:$0xff]   ;;  %v10897_v8 = vld [vmem:[%s15789_s1 + $0x50] sm:$0xff]   ;;  %p341_p5 = scmp.lt.s32.totalorder %s11444_s13, 1  ;;  %vm395_vm0 = vsmask.f32 3328 }
  0x37   : > { %11345 = vsyncadd (%p15843_p0), [#allocation4], 4294958080  ;;  %v10890_v1 = vld [vmem:[%s15789_s1] sm:$0xff]   ;;  %9792 = vmatprep.subr.bf16.mxu0 %v10889_v0  ;;  %v10894_v5 = vld [vmem:[%s15789_s1 + $0x8] sm:$0xff]   ;;  %vm396_vm1 = vsmask.f32 7440 }
  0x38   : > { %v10891_v2 = vld [vmem:[%s15789_s1 + $0xc0] sm:$0xff]   ;;  %9793 = vmatpush3.bf16.msra.mxu0 %v10890_v1  ;;  %v10895_v6 = vld [vmem:[%s15789_s1 + $0xc8] sm:$0xff]   ;;  %v10898_v9 = vld [vmem:[%s15789_s1 + $0x10] sm:$0xff]   ;;  %s342_s21 = scalar_select %p341_p5, %s11444_s13, 1  ;;  %vm846_vm2 = vcmask 1042432   ;;  %vm847_vm3 = vcmask 1046532  }
  0x39   : > { %v10892_v3 = vld [vmem:[%s15789_s1 + $0x80] sm:$0xff]   ;;  %9904 = vmatprep.subr.bf16.mxu1 %v10891_v2  ;;  %9794 = vmatprep.subr.bf16.mxu0 %v10893_v4  ;;  %v10896_v7 = vld [vmem:[%s15789_s1 + $0x88] sm:$0xff]   ;;  %v10899_v10 = vld [vmem:[%s15789_s1 + $0xd0] sm:$0xff]   ;;  %v15844_v54 = vmov 0  ;;  %vm4359_vm6 = vcmask 1040384   ;;  %vm4878_vm11 = vcmask 1043456  }
  0x3a   : > { %9905 = vmatpush3.bf16.msra.mxu1 %v10892_v3  ;;  %v10900_v11 = vld [vmem:[%s15789_s1 + $0x90] sm:$0xff]   ;;  %v10901_v12 = vld [vmem:[%s15789_s1 + $0x58] sm:$0xff]   ;;  %v10905_v16 = vld [vmem:[%s15789_s1 + $0x60] sm:$0xff]   ;;  %s10832_s16 = smul.u32 216, %s342_s21  ;;  %vm4360_vm7 = vsmask.f32 256 }
  0x3b   : > { %9906 = vmatprep.subr.bf16.mxu1 %v10895_v6  ;;  %v10902_v13 = vld [vmem:[%s15789_s1 + $0x18] sm:$0xff]   ;;  %v10906_v17 = vld [vmem:[%s15789_s1 + $0x20] sm:$0xff]   ;;  %v10909_v20 = vld [vmem:[%s15789_s1 + $0x68] sm:$0xff]   ;;  %vm4410_vm9 = vsmask.f32 7938  ;;  %vm8870_vm15 = vcmask 1041408  }
  0x3c   : > { %9795 = vmatpush3.bf16.msra.mxu0 %v10894_v5  ;;  %v10903_v14 = vld [vmem:[%s15789_s1 + $0xd8] sm:$0xff]   ;;  %v10907_v18 = vld [vmem:[%s15789_s1 + $0xe0] sm:$0xff]   ;;  %v10910_v21 = vld [vmem:[%s15789_s1 + $0x28] sm:$0xff]   ;;  %s11598_s14 = scalar_lea.vmem %s15788_s0, %s10832_s16  ;;  %vm4556_vm12 = vsmask.f32 4368  ;;  %s9791_s17 = sshll.u32 %s11444_s13, 12 }
  0x3d   : > { %9796 = vmatprep.subr.bf16.mxu0 %v10897_v8  ;;  %v10904_v15 = vld [vmem:[%s15789_s1 + $0x98] sm:$0xff]   ;;  %v10908_v19 = vld [vmem:[%s15789_s1 + $0xa0] sm:$0xff]   ;;  %v10911_v22 = vld [vmem:[%s15789_s1 + $0xe8] sm:$0xff]   ;;  %s15725_s25 = scalar_lea.hbm %s15797_s9, %s9791_s17  ;;  %p16059_p9 = scmp.ne.s32.totalorder %s15837_s19, 0 }
  0x3e   : > { %9907 = vmatpush3.bf16.msra.mxu1 %v10896_v7  ;;  %v10912_v23 = vld [vmem:[%s15789_s1 + $0xa8] sm:$0xff]   ;;  %v10913_v24 = vld [vmem:[%s15789_s1 + $0x70] sm:$0xff]   ;;  %v10917_v28 = vld [vmem:[%s15789_s1 + $0x78] sm:$0xff]   ;;  %s11370_s21 = smov [#allocation6]  }
  0x3f   : > { %9908 = vmatprep.subr.bf16.mxu1 %v10899_v10  ;;  %v10914_v25 = vld [vmem:[%s15789_s1 + $0x30] sm:$0xff]   ;;  %v10918_v29 = vld [vmem:[%s15789_s1 + $0x38] sm:$0xff]   ;;  %v11607_v31 = vld [vmem:[%s11598_s14] sm:$0xf]  ;;  %s11302_s27 = sshll.u32 %s11370_s21, 4  ;;  %s11303_s27 = int_to_ptr.vmem [resolvable:$false] %s11302_s27 }
  0x40   : > { %9797 = vmatpush3.bf16.msra.mxu0 %v10898_v9  ;;  %v10915_v26 = vld [vmem:[%s15789_s1 + $0xf0] sm:$0xff]   ;;  %v10919_v30 = vld [vmem:[%s15789_s1 + $0xf8] sm:$0xff]   ;;  %v11610_v32 = vld [vmem:[%s11598_s14 + $0x4] sm:$0xf]  ;;  %v399_v34 = vshrl.u32 %v11607_v31, 16  ;;  %v402_v35 = vshll.u32 %v11607_v31, 16 }
  0x41   : > { %9798 = vmatprep.subr.bf16.mxu0 %v10901_v12  ;;  %v10916_v27 = vld [vmem:[%s15789_s1 + $0xb0] sm:$0xff]   ;;  %v379_v33 = vld [vmem:[%s11598_s14 + $0x8] sm:$0x1]  ;;  %v408_v36 = vshll.u32 %v11610_v32, 16  ;;  %v412_v37 = vshrl.u32 %v11610_v32, 16  ;;  %v10920_v39 = vld [vmem:[%s15789_s1 + $0xb8] sm:$0xff]   ;;  %v9239_v47 = vcombine.low %v11607_v31, %v11610_v32 }
  0x42   : > { %9909 = vmatpush3.bf16.msra.mxu1 %v10900_v11  ;;  %v418_v38 = vshll.u32 %v379_v33, 16  ;;  %v10922_v40 = vld [vmem:[%s15789_s1 + $0x140] sm:$0xff]   ;;  %v401_v41 = vrot.slane %v399_v34, 4  ;;  %v404_v42 = vrot.slane %v402_v35, 5  ;;  %v854_v46 = vrot.slane %v379_v33, 5  ;;  %vm11631_vm4 = vmor %vm395_vm0, %vm396_vm1  ;;  %s11304_s29 = scalar_lea.vmem %s11303_s27, 8192 }
  0x43   : > { %9910 = vmatprep.subr.bf16.mxu1 %v10903_v14  ;;  %v410_v43 = vrot.slane %v408_v36, 5  ;;  %v414_v44 = vrot.slane %v412_v37, 4  ;;  %v9079_v48 = vld [vmem:[%s11598_s14 + $0xc] sm:$0xf]  ;;  %v11627_v51 = vld [vmem:[%s11598_s14 + $0x10] sm:$0xf]  ;;  %vm11642_vm5 = vmor %vm846_vm2, %vm847_vm3 }
  0x44   : > { %9799 = vmatpush3.bf16.msra.mxu0 %v10902_v13  ;;  %v420_v45 = vrot.slane %v418_v38, 5  ;;  %v405_v49 = vor.u32 %v404_v42, %v401_v41  ;;  %v1011_v52 = vshrl.u32 %v9079_v48, 16  ;;  %v1014_v53 = vshll.u32 %v9079_v48, 16  ;;  %v782_v63 = vld [vmem:[%s11598_s14] sm:$0xe]  ;;  %v10934_v41 = vld [vmem:[%s15789_s1 + $0x150] sm:$0xff]   ;;  %vm13383_vm8 = vmand %vm4359_vm6, %vm4360_vm7 }
  0x45   : > { %9800 = vmatprep.subr.bf16.mxu0 %v10905_v16  ;;  %v415_v50 = vor.u32 %v414_v44, %v410_v43  ;;  %v15845_v54 = vsel %vm11631_vm4, 4294967295, %v15844_v54  ;;  %v1020_v55 = vshll.u32 %v11627_v51, 16  ;;  %v1024_v56 = vshrl.u32 %v11627_v51, 16  ;;  %v11650_v5 = vld [vmem:[%s11598_s14 + $0xc] sm:$0xf]  ;;  %v10924_v14 = vld [vmem:[%s15789_s1 + $0x100] sm:$0xff]   ;;  %vm13397_vm10 = vmand %vm4359_vm6, %vm4410_vm9 }
  0x46   : > { %9911 = vmatpush3.bf16.msra.mxu1 %v10904_v15  ;;  %15846 = vst [vmem:[#allocation9_spill] sm:$0xff] %v15845_v54  ;;  %v9287_v58 = vcombine.low %v9079_v48, %v11627_v51  ;;  %v406_v59 = vrot.slane %v405_v49, 4  ;;  %v1013_v61 = vrot.slane %v1011_v52, 4  ;;  %v1016_v62 = vrot.slane %v1014_v53, 5  ;;  %v11657_v9 = vld [vmem:[%s11598_s14 + $0x10] sm:$0xf]  ;;  %vm13568_vm13 = vmand %vm4878_vm11, %vm4410_vm9 }
  0x47   : > { %9912 = vmatprep.subr.bf16.mxu1 %v10907_v18  ;;  %v416_v60 = vrot.slane %v415_v50, 4  ;;  %v11646_v1 = vrot.slane %v1020_v55, 5  ;;  %v1026_v2 = vrot.slane %v1024_v56, 4  ;;  %v9063_v3 = vrot.slane %v782_v63, 9  ;;  %v380_v10 = vld [vmem:[%s11598_s14 + $0x14] sm:$0x1]  ;;  %vm13579_vm14 = vmor %vm4360_vm7, %vm4556_vm12 }
  0x48   : > { %9801 = vmatpush3.bf16.msra.mxu0 %v10906_v17  ;;  %3579 = vmatprep.mubr.bf16.mxu1 %v9287_v58  ;;  %v851_v4 = vrot.slane %v11610_v32, 5  ;;  %v411_v6 = vsel %vm11631_vm4, %v406_v59, %v410_v43  ;;  %v1017_v8 = vor.u32 %v1016_v62, %v1013_v61  ;;  %v423_v11 = vshrl.u32 %v11650_v5, 16  ;;  %v783_v31 = vld [vmem:[%s11598_s14 + $0xc] sm:$0xe]  ;;  %v11692_v35 = vld [vmem:[%s11598_s14 + $0x18] sm:$0xf] }
  0x49   : > { %9802 = vmatprep.subr.bf16.mxu0 %v10909_v20  ;;  %v421_v7 = vsel %vm11631_vm4, %v416_v60, %v420_v45  ;;  %v1027_v13 = vor.u32 %v1026_v2, %v11646_v1  ;;  %v432_v20 = vshll.u32 %v11657_v9, 16  ;;  %v10930_v32 = vld [vmem:[%s15789_s1 + $0x108] sm:$0xff]   ;;  %v9240_v38 = vcombine.low %v11650_v5, %v11657_v9  ;;  %v10936_v58 = vld [vmem:[%s15789_s1 + $0x110] sm:$0xff]   ;;  %v10940_v63 = vld [vmem:[%s15789_s1 + $0x158] sm:$0xff]  }
  0x4a   : > { %9913 = vmatpush3.bf16.msra.mxu1 %v10908_v19  ;;  %v9255_v12 = vcombine.low %v411_v6, %v421_v7  ;;  %v852_v15 = vsel %vm11642_vm5, %v9063_v3, %v851_v4  ;;  %v853_v16 = vrot.slane %v851_v4, 4  ;;  %v11667_v17 = vrot.slane %v1017_v8, 4  ;;  %v9083_v6 = vld [vmem:[%s11598_s14 + $0x24] sm:$0xf]  ;;  %v11728_v7 = vld [vmem:[%s11598_s14 + $0x28] sm:$0xf] }
  0x4b   : > { %9914 = vmatprep.subr.bf16.mxu1 %v10911_v22  ;;  %v425_v18 = vrot.slane %v423_v11, 4  ;;  %v426_v19 = vshll.u32 %v11650_v5, 16  ;;  %v11689_v33 = vrot.slane %v1027_v13, 4  ;;  %v9064_v44 = vrot.slane %v783_v31, 9  ;;  %v12174_v57 = vld [vmem:[%s11598_s14 + $0x90] sm:$0xf] }
  0x4c   : > { %9803 = vmatpush3.bf16.msra.mxu0 %v10910_v21  ;;  %v10928_v21 = vld [vmem:[%s15789_s1 + $0x148] sm:$0xff]   ;;  %3418 = vmatprep.mubr.bf16.mxu0 %v9255_v12  ;;  %v855_v22 = vsel %vm11642_vm5, %v853_v16, %v854_v46  ;;  %v858_v45 = vrot.slane %v11657_v9, 5  ;;  %v11705_v46 = vld [vmem:[%s11598_s14 + $0x20] sm:$0x1]  ;;  %v861_v49 = vrot.slane %v380_v10, 5  ;;  %v447_v50 = vshrl.u32 %v11692_v35, 16 }
  0x4d   : > { %9804 = vmatprep.subr.bf16.mxu0 %v10913_v24  ;;  %v442_v24 = vshll.u32 %v380_v10, 16  ;;  %v450_v56 = vshll.u32 %v11692_v35, 16  ;;  %v466_v5 = vshll.u32 %v11705_v46, 16  ;;  %v784_v12 = vld [vmem:[%s11598_s14 + $0x18] sm:$0xe] }
  0x4e   : > { %9915 = vmatpush3.bf16.msra.mxu1 %v10912_v23  ;;  %v436_v23 = vshrl.u32 %v11657_v9, 16  ;;  %v859_v53 = vsel %vm11642_vm5, %v9064_v44, %v858_v45  ;;  %v860_v55 = vrot.slane %v858_v45, 4  ;;  %v449_v60 = vrot.slane %v447_v50, 4  ;;  %v11769_v44 = vld [vmem:[%s11598_s14 + $0x34] sm:$0xf]  ;;  %v10952_v50 = vld [vmem:[%s15789_s1 + $0x168] sm:$0xff]  }
  0x4f   : > { %9916 = vmatprep.subr.bf16.mxu1 %v10915_v26  ;;  %v11679_v26 = vld [vmem:[%s11598_s14 + $0x1c] sm:$0xf]  ;;  %v444_v37 = vrot.slane %v442_v24, 5  ;;  %v452_v4 = vrot.slane %v450_v56, 5  ;;  %v11746_v24 = vld [vmem:[%s11598_s14 + $0x28] sm:$0xf] }
  0x50   : > { %9805 = vmatpush3.bf16.msra.mxu0 %v10914_v25  ;;  %v9081_v25 = vld [vmem:[%s11598_s14 + $0x18] sm:$0xf]  ;;  %v438_v34 = vrot.slane %v436_v23, 4  ;;  %v862_v3 = vsel %vm11642_vm5, %v860_v55, %v861_v49  ;;  %v9289_v23 = vcombine.low %v9083_v6, %v11728_v7  ;;  %v785_v49 = vld [vmem:[%s11598_s14 + $0x24] sm:$0xe] }
  0x51   : > { %9806 = vmatprep.subr.bf16.mxu0 %v10917_v28  ;;  %v9271_v28 = vcombine.low %v852_v15, %v855_v22  ;;  %v1035_v43 = vshrl.u32 %v9081_v25, 16  ;;  %v1038_v48 = vshll.u32 %v9081_v25, 16  ;;  %v9272_v9 = vcombine.low %v859_v53, %v862_v3 }
  0x52   : > { %9917 = vmatpush3.bf16.msra.mxu1 %v10916_v27  ;;  %v453_v16 = vor.u32 %v452_v4, %v449_v60  ;;  %v11790_v4 = vld [vmem:[%s11598_s14 + $0x30] sm:$0xf]  ;;  %v793_v27 = vld [vmem:[%s11598_s14 + $0x84] sm:$0xe] }
  0x53   : > { %9918 = vmatprep.subr.bf16.mxu1 %v10919_v30  ;;  %v434_v30 = vrot.slane %v432_v20, 5  ;;  %v11731_v13 = vrot.slane %v1035_v43, 4  ;;  %v11766_v43 = vld [vmem:[%s11598_s14 + $0x30] sm:$0xf] }
  0x54   : > { %9807 = vmatpush3.bf16.msra.mxu0 %v10918_v29  ;;  %v428_v29 = vrot.slane %v426_v19, 5  ;;  %v10942_v19 = vld [vmem:[%s15789_s1 + $0x118] sm:$0xff]  }
  0x55   : > { %10016 = vmatprep.subr.bf16.mxu0 %v10922_v40  ;;  %v11698_v40 = vld [vmem:[%s11598_s14 + $0x1c] sm:$0xf]  ;;  %v439_v42 = vor.u32 %v438_v34, %v434_v30  ;;  %v10948_v34 = vld [vmem:[%s15789_s1 + $0x120] sm:$0xff]  }
  0x56   : > { %9919 = vmatpush3.bf16.msra.mxu1 %v10920_v39  ;;  %v429_v36 = vor.u32 %v428_v29, %v425_v18  ;;  %v9288_v39 = vcombine.low %v9081_v25, %v11679_v26  ;;  %v456_v61 = vshll.u32 %v11698_v40, 16  ;;  %v460_v62 = vshrl.u32 %v11698_v40, 16  ;;  %v11737_v18 = vld [vmem:[%s11598_s14 + $0x24] sm:$0xf] }
  0x57   : > { %3419 = vmatmul.mubr.bf16.vlgmr.msra.gmra.mrb[0].mxu0 %v9239_v47  ;;  %v440_v52 = vrot.slane %v439_v42, 4  ;;  %v9241_v22 = vcombine.low %v11692_v35, %v11698_v40  ;;  %v10946_v25 = vld [vmem:[%s15789_s1 + $0x160] sm:$0xff]   ;;  %v1059_v29 = vshrl.u32 %v9083_v6, 16  ;;  %v865_v31 = vrot.slane %v11698_v40, 5 }
  0x58   : > { %10017 = vmatpush3.bf16.msra.mxu0 %v10924_v14  ;;  %v430_v47 = vrot.slane %v429_v36, 4  ;;  %v458_v10 = vrot.slane %v456_v61, 5  ;;  %v462_v11 = vrot.slane %v460_v62, 4  ;;  %v11733_v14 = vrot.slane %v1038_v48, 5 }
  0x59   : > { %3580 = vmatmul.mubr.bf16.vlgmr.msra.gmra.mrb[0].mxu1 %v9271_v28  ;;  %10018 = vmatprep.subr.bf16.mxu0 %v10928_v21  ;;  %v445_v2 = vsel %vm11631_vm4, %v440_v52, %v444_v37  ;;  %v468_v21 = vrot.slane %v466_v5, 5  ;;  %v454_v28 = vrot.slane %v453_v16, 4  ;;  %v1062_v36 = vshll.u32 %v9083_v6, 16  ;;  %v10954_v5 = vld [vmem:[%s15789_s1 + $0x128] sm:$0xff]  }
  0x5a   : > { %3587 = vmatprep.mubr.bf16.mxu1 %v9288_v39  ;;  %v435_v59 = vsel %vm11631_vm4, %v430_v47, %v434_v30  ;;  %v463_v20 = vor.u32 %v462_v11, %v458_v10  ;;  %v9065_v30 = vrot.slane %v784_v12, 9  ;;  %v868_v37 = vrot.slane %v11705_v46, 5  ;;  %v11798_v11 = vld [vmem:[%s11598_s14 + $0x34] sm:$0xf] }
  0x5b   : > { %v9256_v8 = vcombine.low %v435_v59, %v445_v2  ;;  %v459_v39 = vsel %vm11631_vm4, %v454_v28, %v458_v10  ;;  %v474_v42 = vshll.u32 %v11737_v18, 16  ;;  %v480_v47 = vshll.u32 %v11746_v24, 16 }
  0x5c   : > { %10019 = vmatpush3.bf16.msra.mxu0 %v10930_v32  ;;  %v11753_v32 = vld [vmem:[%s11598_s14 + $0x2c] sm:$0x1]  ;;  %v464_v35 = vrot.slane %v463_v20, 4  ;;  %v866_v40 = vsel %vm11642_vm5, %v9065_v30, %v865_v31  ;;  %v484_v48 = vshrl.u32 %v11746_v24, 16  ;;  %v11783_v62 = vrot.slane %v1059_v29, 4 }
  0x5d   : > { %10020 = vmatprep.subr.bf16.mxu0 %v10934_v41  ;;  %3426 = vmatprep.mubr.bf16.mxu0 %v9256_v8  ;;  %v867_v41 = vrot.slane %v865_v31, 4  ;;  %v476_v55 = vrot.slane %v474_v42, 5  ;;  %v490_v56 = vshll.u32 %v11753_v32, 16  ;;  %v482_v60 = vrot.slane %v480_v47, 5  ;;  %v11815_v31 = vld [vmem:[%s11598_s14 + $0x3c] sm:$0xf] }
  0x5e   : > { %v469_v45 = vsel %vm11631_vm4, %v464_v35, %v468_v21  ;;  %v486_v61 = vrot.slane %v484_v48, 4  ;;  %v9242_v3 = vcombine.low %v11737_v18, %v11746_v24  ;;  %v9066_v10 = vrot.slane %v785_v49, 9  ;;  %v11832_v49 = vld [vmem:[%s11598_s14 + $0x3c] sm:$0xf] }
  0x5f   : > { %3427 = vmatmul.mubr.bf16.gmra.mrb[4].mxu0 %v9240_v38  ;;  %v471_v38 = vshrl.u32 %v11737_v18, 16  ;;  %v9257_v52 = vcombine.low %v459_v39, %v469_v45  ;;  %v869_v53 = vsel %vm11642_vm5, %v867_v41, %v868_v37  ;;  %v492_v8 = vrot.slane %v490_v56, 5  ;;  %v10958_v39 = vld [vmem:[%s15789_s1 + $0x170] sm:$0xff]  }
  0x60   : > { %10021 = vmatpush3.bf16.msra.mxu0 %v10936_v58  ;;  %v9273_v59 = vcombine.low %v866_v40, %v869_v53  ;;  %v487_v6 = vor.u32 %v486_v61, %v482_v60  ;;  %v1083_v16 = vshrl.u32 %v11766_v43, 16  ;;  %v1086_v18 = vshll.u32 %v11766_v43, 16 }
  0x61   : > { %3588 = vmatmul.mubr.bf16.gmra.mrb[4].mxu1 %v9272_v9  ;;  %10022 = vmatprep.subr.bf16.mxu0 %v10940_v63  ;;  %v473_v46 = vrot.slane %v471_v38, 4  ;;  %v11785_v63 = vrot.slane %v1062_v36, 5  ;;  %v9290_v9 = vcombine.low %v11766_v43, %v11769_v44  ;;  %v875_v21 = vrot.slane %v11753_v32, 5  ;;  %v786_v38 = vld [vmem:[%s11598_s14 + $0x30] sm:$0xe] }
  0x62   : > { %3595 = vmatprep.mubr.bf16.mxu1 %v9289_v23  ;;  %3434 = vmatprep.mubr.bf16.mxu0 %v9257_v52  ;;  %v488_v20 = vrot.slane %v487_v6, 4  ;;  %v11805_v23 = vld [vmem:[%s11598_s14 + $0x38] sm:$0x1]  ;;  %v498_v28 = vshll.u32 %v11790_v4, 16  ;;  %v508_v37 = vshrl.u32 %v11798_v11, 16  ;;  %v11837_v52 = vrot.slane %v1083_v16, 4 }
  0x63   : > { %v477_v2 = vor.u32 %v476_v55, %v473_v46  ;;  %v514_v43 = vshll.u32 %v11805_v23, 16  ;;  %v11839_v53 = vrot.slane %v1086_v18, 5  ;;  %v9243_v56 = vcombine.low %v11790_v4, %v11798_v11 }
  0x64   : > { %10023 = vmatpush3.bf16.msra.mxu0 %v10942_v19  ;;  %v872_v19 = vrot.slane %v11746_v24, 5  ;;  %v504_v24 = vshll.u32 %v11798_v11, 16  ;;  %v493_v32 = vsel %vm11631_vm4, %v488_v20, %v492_v8  ;;  %v500_v36 = vrot.slane %v498_v28, 5  ;;  %v10962_v28 = vld [vmem:[%s15789_s1 + $0x180] sm:$0xff]  }
  0x65   : > { %10024 = vmatprep.subr.bf16.mxu0 %v10946_v25  ;;  %v478_v12 = vrot.slane %v477_v2, 4  ;;  %v495_v25 = vshrl.u32 %v11790_v4, 16  ;;  %v510_v48 = vrot.slane %v508_v37, 4  ;;  %v516_v55 = vrot.slane %v514_v43, 5 }
  0x66   : > { %v873_v29 = vsel %vm11642_vm5, %v9066_v10, %v872_v19  ;;  %v874_v30 = vrot.slane %v872_v19, 4  ;;  %v506_v42 = vrot.slane %v504_v24, 5  ;;  %v9067_v2 = vrot.slane %v786_v38, 9  ;;  %v11853_v10 = vld [vmem:[%s11598_s14 + $0x44] sm:$0x1] }
  0x67   : > { %3435 = vmatmul.mubr.bf16.gmra.mrb[8].mxu0 %v9241_v22  ;;  %v483_v22 = vsel %vm11631_vm4, %v478_v12, %v482_v60  ;;  %v497_v35 = vrot.slane %v495_v25, 4  ;;  %v1107_v6 = vshrl.u32 %v11815_v31, 16  ;;  %v1110_v8 = vshll.u32 %v11815_v31, 16  ;;  %v10961_v19 = vld [vmem:[%s15789_s1 + $0x1c0] sm:$0xff]   ;;  %v11867_v25 = vld [vmem:[%s11598_s14 + $0x48] sm:$0xf] }
  0x68   : > { %10025 = vmatpush3.bf16.msra.mxu0 %v10948_v34  ;;  %v11818_v34 = vld [vmem:[%s11598_s14 + $0x40] sm:$0xf]  ;;  %v9258_v40 = vcombine.low %v483_v22, %v493_v32  ;;  %v876_v41 = vsel %vm11642_vm5, %v874_v30, %v875_v21  ;;  %v511_v60 = vor.u32 %v510_v48, %v506_v42  ;;  %v882_v4 = vrot.slane %v11805_v23, 5  ;;  %10128 = vmatprep.subr.bf16.mxu1 %v10961_v19  ;;  %v10963_v32 = vld [vmem:[%s15789_s1 + $0x1c8] sm:$0xff]   ;;  %v10968_v19 = vld [vmem:[%s15789_s1 + $0x190] sm:$0xff]  }
  0x69   : > { %3596 = vmatmul.mubr.bf16.gmra.mrb[8].mxu1 %v9273_v59  ;;  %10026 = vmatprep.subr.bf16.mxu0 %v10952_v50  ;;  %v9274_v46 = vcombine.low %v873_v29, %v876_v41  ;;  %v501_v47 = vor.u32 %v500_v36, %v497_v35  ;;  %v10960_v50 = vld [vmem:[%s15789_s1 + $0x130] sm:$0xff]   ;;  %v9291_v61 = vcombine.low %v11815_v31, %v11818_v34  ;;  %v519_v18 = vshrl.u32 %v11832_v49, 16  ;;  %v11876_v31 = vld [vmem:[%s11598_s14 + $0x4c] sm:$0xf] }
  0x6a   : > { %3603 = vmatprep.mubr.bf16.mxu1 %v9290_v9  ;;  %3442 = vmatprep.mubr.bf16.mxu0 %v9258_v40  ;;  %v879_v9 = vrot.slane %v11798_v11, 5  ;;  %v512_v16 = vrot.slane %v511_v60, 4  ;;  %v538_v24 = vshll.u32 %v11853_v10, 16  ;;  %v11885_v40 = vld [vmem:[%s11598_s14 + $0x48] sm:$0xf]  ;;  %v11887_v41 = vrot.slane %v1107_v6, 4 }
  0x6b   : > { %v502_v59 = vrot.slane %v501_v47, 4  ;;  %v521_v29 = vrot.slane %v519_v18, 4  ;;  %10129 = vmatpush3.bf16.msra.mxu1 %v10962_v28  ;;  %v11891_v47 = vld [vmem:[%s11598_s14 + $0x4c] sm:$0xf]  ;;  %v1131_v60 = vshrl.u32 %v11867_v25, 16  ;;  %v1134_v18 = vshll.u32 %v11867_v25, 16 }
  0x6c   : > { %10027 = vmatpush3.bf16.msra.mxu0 %v10954_v5  ;;  %v11846_v5 = vld [vmem:[%s11598_s14 + $0x40] sm:$0xf]  ;;  %v880_v11 = vsel %vm11642_vm5, %v9067_v2, %v879_v9  ;;  %v881_v20 = vrot.slane %v879_v9, 4  ;;  %v517_v22 = vsel %vm11631_vm4, %v512_v16, %v516_v55  ;;  %10130 = vmatprep.subr.bf16.mxu1 %v10963_v32  ;;  %v10964_v48 = vld [vmem:[%s15789_s1 + $0x188] sm:$0xff]   ;;  %v10967_v2 = vld [vmem:[%s15789_s1 + $0x1d0] sm:$0xff]   ;;  %v9292_v9 = vcombine.low %v11867_v25, %v11876_v31 }
  0x6d   : > { %10028 = vmatprep.subr.bf16.mxu0 %v10958_v39  ;;  %v507_v12 = vsel %vm11631_vm4, %v502_v59, %v506_v42  ;;  %v528_v21 = vshll.u32 %v11846_v5, 16  ;;  %v532_v23 = vshrl.u32 %v11846_v5, 16  ;;  %v787_v39 = vld [vmem:[%s11598_s14 + $0x3c] sm:$0xe]  ;;  %v540_v59 = vrot.slane %v538_v24, 5 }
  0x6e   : > { %v9259_v35 = vcombine.low %v507_v12, %v517_v22  ;;  %v883_v36 = vsel %vm11642_vm5, %v881_v20, %v882_v4  ;;  %v9068_v4 = vrot.slane %v787_v39, 9  ;;  %v9244_v16 = vcombine.low %v11832_v49, %v11846_v5  ;;  %v10969_v22 = vld [vmem:[%s15789_s1 + $0x1d8] sm:$0xff]  }
  0x6f   : > { %3443 = vmatmul.mubr.bf16.gmra.mrb[12].mxu0 %v9242_v3  ;;  %v522_v3 = vshll.u32 %v11832_v49, 16  ;;  %v530_v37 = vrot.slane %v528_v21, 5  ;;  %v534_v38 = vrot.slane %v532_v23, 4  ;;  %v9275_v43 = vcombine.low %v880_v11, %v883_v36  ;;  %10131 = vmatpush3.bf16.msra.mxu1 %v10964_v48  ;;  %v11924_v21 = vld [vmem:[%s11598_s14 + $0x58] sm:$0xf] }
  0x70   : > { %10029 = vmatpush3.bf16.msra.mxu0 %v10960_v50  ;;  %3450 = vmatprep.mubr.bf16.mxu0 %v9259_v35  ;;  %v11896_v50 = vrot.slane %v1110_v8, 5  ;;  %v886_v8 = vrot.slane %v11846_v5, 5  ;;  %v543_v49 = vshrl.u32 %v11885_v40, 16  ;;  %v11921_v5 = vld [vmem:[%s11598_s14 + $0x54] sm:$0xf]  ;;  %v546_v23 = vshll.u32 %v11885_v40, 16 }
  0x71   : > { %3604 = vmatmul.mubr.bf16.gmra.mrb[12].mxu1 %v9274_v46  ;;  %v524_v30 = vrot.slane %v522_v3, 5  ;;  %v535_v55 = vor.u32 %v534_v38, %v530_v37  ;;  %v889_v3 = vrot.slane %v11853_v10, 5  ;;  %10132 = vmatprep.subr.bf16.mxu1 %v10967_v2  ;;  %v552_v25 = vshll.u32 %v11891_v47, 16  ;;  %v788_v35 = vld [vmem:[%s11598_s14 + $0x48] sm:$0xe]  ;;  %v10970_v2 = vld [vmem:[%s15789_s1 + $0x198] sm:$0xff]  }
  0x72   : > { %3611 = vmatprep.mubr.bf16.mxu1 %v9291_v61  ;;  %v11900_v61 = vld [vmem:[%s11598_s14 + $0x50] sm:$0x1]  ;;  %v888_v20 = vrot.slane %v886_v8, 4  ;;  %v556_v28 = vshrl.u32 %v11891_v47, 16  ;;  %v545_v24 = vrot.slane %v543_v49, 4  ;;  %v11943_v48 = vrot.slane %v1134_v18, 5 }
  0x73   : > { %v525_v46 = vor.u32 %v524_v30, %v521_v29  ;;  %v536_v12 = vrot.slane %v535_v55, 4  ;;  %v562_v32 = vshll.u32 %v11900_v61, 16  ;;  %v554_v38 = vrot.slane %v552_v25, 5  ;;  %10133 = vmatpush3.bf16.msra.mxu1 %v10968_v19  ;;  %v10974_v18 = vld [vmem:[%s15789_s1 + $0x138] sm:$0xff]  }
  0x74   : > { %v890_v30 = vsel %vm11642_vm5, %v888_v20, %v889_v3  ;;  %v558_v39 = vrot.slane %v556_v28, 4  ;;  %10134 = vmatprep.subr.bf16.mxu1 %v10969_v22  ;;  %v1155_v3 = vshrl.u32 %v11921_v5, 16  ;;  %v1158_v19 = vshll.u32 %v11921_v5, 16  ;;  %v12095_v42 = vld [vmem:[%s11598_s14 + $0x78] sm:$0xf] }
  0x75   : > { %v526_v6 = vrot.slane %v525_v46, 4  ;;  %v541_v10 = vsel %vm11631_vm4, %v536_v12, %v540_v59  ;;  %v11941_v46 = vrot.slane %v1131_v60, 4  ;;  %v564_v59 = vrot.slane %v562_v32, 5  ;;  %v11957_v12 = vld [vmem:[%s11598_s14 + $0x58] sm:$0xf] }
  0x76   : > { %v9245_v60 = vcombine.low %v11885_v40, %v11891_v47  ;;  %v896_v49 = vrot.slane %v11900_v61, 5  ;;  %v10975_v61 = vld [vmem:[%s15789_s1 + $0x1e0] sm:$0xff]  }
  0x77   : > { %3451 = vmatmul.mubr.bf16.gmra.mrb[16].mxu0 %v9243_v56  ;;  %v531_v11 = vsel %vm11631_vm4, %v526_v6, %v530_v37  ;;  %v887_v56 = vsel %vm11642_vm5, %v9068_v4, %v886_v8  ;;  %v548_v37 = vrot.slane %v546_v23, 5  ;;  %v10972_v6 = vld [vmem:[%s15789_s1 + $0x178] sm:$0xff]   ;;  %v559_v4 = vor.u32 %v558_v39, %v554_v38  ;;  %10135 = vmatpush3.bf16.msra.mxu1 %v10970_v2  ;;  %v11986_v32 = vld [vmem:[%s11598_s14 + $0x64] sm:$0xf] }
  0x78   : > { %v9260_v29 = vcombine.low %v531_v11, %v541_v10  ;;  %v9276_v36 = vcombine.low %v887_v56, %v890_v30  ;;  %v9293_v8 = vcombine.low %v11921_v5, %v11924_v21  ;;  %v9069_v11 = vrot.slane %v788_v35, 9  ;;  %10030 = vmatprep.subr.bf16.mxu0 %v10972_v6  ;;  %v11967_v10 = vld [vmem:[%s11598_s14 + $0x5c] sm:$0x1]  ;;  %v789_v35 = vld [vmem:[%s11598_s14 + $0x54] sm:$0xe]  ;;  %10136 = vmatprep.subr.bf16.mxu1 %v10975_v61 }
  0x79   : > { %3612 = vmatmul.mubr.bf16.gmra.mrb[16].mxu1 %v9275_v43  ;;  %v11939_v43 = vld [vmem:[%s11598_s14 + $0x54] sm:$0xf]  ;;  %v893_v56 = vrot.slane %v11891_v47, 5  ;;  %v560_v20 = vrot.slane %v559_v4, 4  ;;  %v576_v47 = vshll.u32 %v11957_v12, 16  ;;  %10031 = vmatpush3.bf16.msra.mxu0 %v10974_v18  ;;  %v11998_v18 = vrot.slane %v1158_v19, 5 }
  0x7a   : > { %3619 = vmatprep.mubr.bf16.mxu1 %v9292_v9  ;;  %3458 = vmatprep.mubr.bf16.mxu0 %v9260_v29  ;;  %v549_v9 = vor.u32 %v548_v37, %v545_v24  ;;  %v567_v23 = vshrl.u32 %v11939_v43, 16  ;;  %v570_v28 = vshll.u32 %v11939_v43, 16  ;;  %v580_v24 = vshrl.u32 %v11957_v12, 16  ;;  %v11994_v4 = vld [vmem:[%s11598_s14 + $0x60] sm:$0xf] }
  0x7b   : > { %v894_v25 = vsel %vm11642_vm5, %v9069_v11, %v893_v56  ;;  %v895_v5 = vrot.slane %v893_v56, 4  ;;  %v565_v29 = vsel %vm11631_vm4, %v560_v20, %v564_v59  ;;  %v578_v2 = vrot.slane %v576_v47, 5 }
  0x7c   : > { %v550_v40 = vrot.slane %v549_v9, 4  ;;  %v569_v30 = vrot.slane %v567_v23, 4  ;;  %v572_v39 = vrot.slane %v570_v28, 5  ;;  %v582_v9 = vrot.slane %v580_v24, 4 }
  0x7d   : > { %v897_v37 = vsel %vm11642_vm5, %v895_v5, %v896_v49  ;;  %v586_v59 = vshll.u32 %v11967_v10, 16  ;;  %v9246_v56 = vcombine.low %v11939_v43, %v11957_v12  ;;  %v12008_v5 = vld [vmem:[%s11598_s14 + $0x64] sm:$0xf]  ;;  %v900_v43 = vrot.slane %v11957_v12, 5 }
  0x7e   : > { %v555_v22 = vsel %vm11631_vm4, %v550_v40, %v554_v38  ;;  %v9277_v38 = vcombine.low %v894_v25, %v897_v37  ;;  %v573_v11 = vor.u32 %v572_v39, %v569_v30  ;;  %v10976_v40 = vld [vmem:[%s15789_s1 + $0x1a0] sm:$0xff]   ;;  %v583_v20 = vor.u32 %v582_v9, %v578_v2  ;;  %v12028_v39 = vld [vmem:[%s11598_s14 + $0x6c] sm:$0xf] }
  0x7f   : > { %3459 = vmatmul.mubr.bf16.gmra.mrb[20].mxu0 %v9244_v16  ;;  %v11975_v16 = vld [vmem:[%s11598_s14 + $0x60] sm:$0xf]  ;;  %v588_v49 = vrot.slane %v586_v59, 5  ;;  %v9070_v25 = vrot.slane %v789_v35, 9  ;;  %v903_v61 = vrot.slane %v11967_v10, 5  ;;  %v594_v30 = vshll.u32 %v11994_v4, 16  ;;  %10137 = vmatpush3.bf16.msra.mxu1 %v10976_v40 }
  0x80   : > { %v9294_v23 = vcombine.low %v11975_v16, %v11986_v32  ;;  %v1179_v19 = vshrl.u32 %v11975_v16, 16  ;;  %v1182_v28 = vshll.u32 %v11975_v16, 16  ;;  %v584_v47 = vrot.slane %v583_v20, 4  ;;  %v12037_v40 = vld [vmem:[%s11598_s14 + $0x70] sm:$0xf] }
  0x81   : > { %3620 = vmatmul.mubr.bf16.gmra.mrb[20].mxu1 %v9276_v36  ;;  %v9261_v36 = vcombine.low %v555_v22, %v565_v29  ;;  %v12015_v22 = vld [vmem:[%s11598_s14 + $0x68] sm:$0x1]  ;;  %v591_v29 = vshrl.u32 %v11994_v4, 16  ;;  %v901_v12 = vsel %vm11642_vm5, %v9070_v25, %v900_v43  ;;  %v600_v16 = vshll.u32 %v12008_v5, 16  ;;  %v790_v20 = vld [vmem:[%s11598_s14 + $0x60] sm:$0xe] }
  0x82   : > { %3627 = vmatprep.mubr.bf16.mxu1 %v9293_v8  ;;  %v11996_v8 = vrot.slane %v1155_v3, 4  ;;  %v574_v3 = vrot.slane %v573_v11, 4  ;;  %v589_v10 = vsel %vm11631_vm4, %v584_v47, %v588_v49  ;;  %v604_v37 = vshrl.u32 %v12008_v5, 16  ;;  %v10978_v47 = vld [vmem:[%s15789_s1 + $0x1a8] sm:$0xff]  }
  0x83   : > { %3466 = vmatprep.mubr.bf16.mxu0 %v9261_v36  ;;  %v593_v35 = vrot.slane %v591_v29, 4  ;;  %v596_v36 = vrot.slane %v594_v30, 5  ;;  %v602_v59 = vrot.slane %v600_v16, 5  ;;  %v610_v11 = vshll.u32 %v12015_v22, 16 }
  0x84   : > { %v579_v24 = vsel %vm11631_vm4, %v574_v3, %v578_v2  ;;  %v10977_v2 = vld [vmem:[%s15789_s1 + $0x1e8] sm:$0xff]   ;;  %v606_v3 = vrot.slane %v604_v37, 4  ;;  %v12049_v29 = vrot.slane %v1182_v28, 5  ;;  %v9295_v16 = vcombine.low %v12028_v39, %v12037_v40  ;;  %v12063_v37 = vld [vmem:[%s11598_s14 + $0x74] sm:$0x1] }
  0x85   : > { %v597_v25 = vor.u32 %v596_v36, %v593_v35  ;;  %10138 = vmatprep.subr.bf16.mxu1 %v10977_v2  ;;  %v612_v30 = vrot.slane %v610_v11, 5  ;;  %v12056_v35 = vld [vmem:[%s11598_s14 + $0x70] sm:$0xf]  ;;  %v1203_v36 = vshrl.u32 %v12028_v39, 16  ;;  %v907_v28 = vrot.slane %v12008_v5, 5 }
  0x86   : > { %10139 = vmatpush3.bf16.msra.mxu1 %v10978_v47 }
  0x87   : > { %3467 = vmatmul.mubr.bf16.gmra.mrb[24].mxu0 %v9245_v60  ;;  %v902_v60 = vrot.slane %v900_v43, 4  ;;  %v12042_v43 = vld [vmem:[%s11598_s14 + $0x6c] sm:$0xf] }
  0x88   : > { %v618_v11 = vshll.u32 %v12042_v43, 16 }
  0x89   : > { %3628 = vmatmul.mubr.bf16.gmra.mrb[24].mxu1 %v9277_v38  ;;  %v9262_v38 = vcombine.low %v579_v24, %v589_v10  ;;  %v904_v9 = vsel %vm11642_vm5, %v902_v60, %v903_v61  ;;  %v12047_v61 = vrot.slane %v1179_v19, 4  ;;  %v9247_v24 = vcombine.low %v11994_v4, %v12008_v5 }
  0x8a   : > { %3635 = vmatprep.mubr.bf16.mxu1 %v9294_v23  ;;  %v9278_v23 = vcombine.low %v901_v12, %v904_v9  ;;  %v598_v12 = vrot.slane %v597_v25, 4  ;;  %v607_v60 = vor.u32 %v606_v3, %v602_v59  ;;  %v9071_v10 = vrot.slane %v790_v20, 9  ;;  %v12077_v20 = vld [vmem:[%s11598_s14 + $0x78] sm:$0xf]  ;;  %v10982_v25 = vld [vmem:[%s15789_s1 + $0x1b0] sm:$0xff]  }
  0x8b   : > { %3474 = vmatprep.mubr.bf16.mxu0 %v9262_v38  ;;  %v1206_v19 = vshll.u32 %v12028_v39, 16  ;;  %v910_v4 = vrot.slane %v12015_v22, 5  ;;  %v615_v9 = vshrl.u32 %v12042_v43, 16  ;;  %v10981_v39 = vld [vmem:[%s15789_s1 + $0x1f0] sm:$0xff]   ;;  %v909_v22 = vrot.slane %v907_v28, 4 }
  0x8c   : > { %v603_v2 = vsel %vm11631_vm4, %v598_v12, %v602_v59  ;;  %v608_v38 = vrot.slane %v607_v60, 4  ;;  %v908_v5 = vsel %vm11642_vm5, %v9071_v10, %v907_v28  ;;  %v628_v59 = vshrl.u32 %v12056_v35, 16  ;;  %10140 = vmatprep.subr.bf16.mxu1 %v10981_v39  ;;  %v10983_v10 = vld [vmem:[%s15789_s1 + $0x1f8] sm:$0xff]  }
  0x8d   : > { %v617_v47 = vrot.slane %v615_v9, 4  ;;  %v620_v12 = vrot.slane %v618_v11, 5  ;;  %v634_v60 = vshll.u32 %v12063_v37, 16  ;;  %v911_v49 = vsel %vm11642_vm5, %v909_v22, %v910_v4  ;;  %10141 = vmatpush3.bf16.msra.mxu1 %v10982_v25  ;;  %v12101_v39 = vld [vmem:[%s11598_s14 + $0x7c] sm:$0xf] }
  0x8e   : > { %v613_v3 = vsel %vm11631_vm4, %v608_v38, %v612_v30  ;;  %v630_v55 = vrot.slane %v628_v59, 4  ;;  %v12097_v30 = vrot.slane %v1203_v36, 4  ;;  %v9279_v9 = vcombine.low %v908_v5, %v911_v49  ;;  %10142 = vmatprep.subr.bf16.mxu1 %v10983_v10  ;;  %v10984_v22 = vld [vmem:[%s15789_s1 + $0x1b8] sm:$0xff]   ;;  %v12111_v36 = vld [vmem:[%s15789_s1 + $0x200] sm:$0xff]  }
  0x8f   : > { %3475 = vmatmul.mubr.bf16.gmra.mrb[28].mxu0 %v9246_v56  ;;  %v624_v56 = vshll.u32 %v12056_v35, 16  ;;  %v9263_v28 = vcombine.low %v603_v2, %v613_v3  ;;  %v621_v11 = vor.u32 %v620_v12, %v617_v47  ;;  %v12103_v2 = vrot.slane %v1206_v19, 5  ;;  %v389_v12 = vld [vmem:[%s11598_s14 + $0x80] sm:$0x1]  ;;  %10736 = vmatprep.subr.bf16.mxu0 %v12111_v36 }
  0x90   : > { %v636_v4 = vrot.slane %v634_v60, 5  ;;  %v914_v19 = vrot.slane %v12056_v35, 5  ;;  %v1227_v59 = vshrl.u32 %v12077_v20, 16  ;;  %v1230_v25 = vshll.u32 %v12077_v20, 16 }
  0x91   : > { %3636 = vmatmul.mubr.bf16.gmra.mrb[28].mxu1 %v9278_v23  ;;  %v12080_v23 = vld [vmem:[%s11598_s14 + $0x7c] sm:$0xf]  ;;  %v626_v6 = vrot.slane %v624_v56, 5  ;;  %3482 = vmatprep.mubr.bf16.mxu0 %v9263_v28  ;;  %v622_v49 = vrot.slane %v621_v11, 4  ;;  %v917_v47 = vrot.slane %v12063_v37, 5  ;;  %v639_v28 = vshrl.u32 %v12095_v42, 16 }
  0x92   : > { %3643 = vmatprep.mubr.bf16.mxu1 %v9295_v16  ;;  %15849 = vst [vmem:[#allocation10_spill] sm:$0xff] %v12080_v23  ;;  %v791_v16 = vld [vmem:[%s11598_s14 + $0x6c] sm:$0xe]  ;;  %v9296_v5 = vcombine.low %v12077_v20, %v12080_v23  ;;  %v916_v10 = vrot.slane %v914_v19, 4  ;;  %v12128_v20 = vld [vmem:[%s11598_s14 + $0x88] sm:$0xf]  ;;  %10143 = vmatpush3.bf16.msra.mxu1 %v10984_v22 }
  0x93   : > { %v631_v3 = vor.u32 %v630_v55, %v626_v6  ;;  %v9072_v56 = vrot.slane %v791_v16, 9  ;;  %v627_v60 = vsel %vm11631_vm4, %v622_v49, %v626_v6  ;;  %15850 = vst [vmem:[#allocation11_spill] sm:$0xff] %v12128_v20  ;;  %v648_v11 = vshll.u32 %v12101_v39, 16 }
  0x94   : > { %v652_v6 = vshrl.u32 %v12101_v39, 16  ;;  %v918_v49 = vsel %vm11642_vm5, %v916_v10, %v917_v47  ;;  %v12143_v22 = vrot.slane %v1227_v59, 4  ;;  %v12149_v10 = vld [vmem:[%s11598_s14 + $0x88] sm:$0xf]  ;;  %v9074_v23 = vrot.slane %v793_v27, 9 }
  0x95   : > { %v632_v55 = vrot.slane %v631_v3, 4  ;;  %v915_v16 = vsel %vm11642_vm5, %v9072_v56, %v914_v19  ;;  %v658_v56 = vshll.u32 %v389_v12, 16  ;;  %v792_v19 = vld [vmem:[%s11598_s14 + $0x78] sm:$0xe]  ;;  %v650_v58 = vrot.slane %v648_v11, 5 }
  0x96   : > { %v9280_v38 = vcombine.low %v915_v16, %v918_v49  ;;  %v654_v15 = vrot.slane %v652_v6, 4  ;;  %15851 = vst [vmem:[#allocation12_spill] sm:$0xff] %v12143_v22  ;;  %v921_v49 = vrot.slane %v12101_v39, 5  ;;  %v690_v27 = vshll.u32 %v12174_v57, 16  ;;  %v12223_v22 = vld [vmem:[%s11598_s14 + $0xa0] sm:$0xf] }
  0x97   : > { %3483 = vmatmul.mubr.bf16.gmra.mrb[32].mxu0 %v9247_v24  ;;  %v637_v37 = vsel %vm11631_vm4, %v632_v55, %v636_v4  ;;  %v642_v24 = vshll.u32 %v12095_v42, 16  ;;  %v12139_v4 = vld [vmem:[%s11598_s14 + $0x84] sm:$0xf]  ;;  %v9248_v55 = vcombine.low %v12042_v43, %v12056_v35  ;;  %v12154_v43 = vld [vmem:[%s11598_s14 + $0x8c] sm:$0x1] }
  0x98   : > { %v9264_v3 = vcombine.low %v627_v60, %v637_v37  ;;  %v12145_v60 = vrot.slane %v1230_v25, 5  ;;  %v655_v16 = vor.u32 %v654_v15, %v650_v58  ;;  %v660_v37 = vrot.slane %v658_v56, 5  ;;  %v9101_v56 = vld [vmem:[%s11598_s14 + $0x90] sm:$0xf] }
  0x99   : > { %3644 = vmatmul.mubr.bf16.gmra.mrb[32].mxu1 %v9279_v9  ;;  %v9099_v9 = vld [vmem:[%s11598_s14 + $0x84] sm:$0xf]  ;;  %v644_v45 = vrot.slane %v642_v24, 5  ;;  %v924_v25 = vrot.slane %v389_v12, 5  ;;  %v663_v47 = vshrl.u32 %v12139_v4, 16 }
  0x9a   : > { %3651 = vmatprep.mubr.bf16.mxu1 %v9296_v5  ;;  %v641_v5 = vrot.slane %v639_v28, 4  ;;  %3490 = vmatprep.mubr.bf16.mxu0 %v9264_v3  ;;  %15852 = vst [vmem:[#allocation13_spill] sm:$0xff] %v12145_v60  ;;  %v9297_v24 = vcombine.low %v9099_v9, %v12128_v20  ;;  %v1251_v11 = vshrl.u32 %v9099_v9, 16  ;;  %v1254_v6 = vshll.u32 %v9099_v9, 16  ;;  %v12186_v60 = vld [vmem:[%s11598_s14 + $0x94] sm:$0xf] }
  0x9b   : > { %v9073_v3 = vrot.slane %v792_v19, 9  ;;  %v656_v59 = vrot.slane %v655_v16, 4  ;;  %v666_v9 = vshll.u32 %v12139_v4, 16  ;;  %v665_v19 = vrot.slane %v663_v47, 4 }
  0x9c   : > { %v645_v28 = vor.u32 %v644_v45, %v641_v5  ;;  %v923_v45 = vrot.slane %v921_v49, 4  ;;  %v672_v5 = vshll.u32 %v12149_v10, 16  ;;  %v682_v47 = vshll.u32 %v12154_v43, 16 }
  0x9d   : > { %v922_v15 = vsel %vm11642_vm5, %v9073_v3, %v921_v49  ;;  %v661_v12 = vsel %vm11631_vm4, %v656_v59, %v660_v37  ;;  %v668_v3 = vrot.slane %v666_v9, 5  ;;  %v12179_v59 = vrot.slane %v1251_v11, 4 }
  0x9e   : > { %v646_v35 = vrot.slane %v645_v28, 4  ;;  %v12168_v28 = vld [vmem:[%s11598_s14 + $0x94] sm:$0xf]  ;;  %v674_v49 = vrot.slane %v672_v5, 5  ;;  %v684_v5 = vrot.slane %v682_v47, 5  ;;  %v928_v11 = vrot.slane %v12149_v10, 5 }
  0x9f   : > { %3491 = vmatmul.mubr.bf16.gmra.mrb[36].mxu0 %v9248_v55  ;;  %v676_v55 = vshrl.u32 %v12149_v10, 16  ;;  %15853 = vst [vmem:[#allocation14_spill] sm:$0xff] %v12168_v28  ;;  %15854 = vst [vmem:[#allocation15_spill] sm:$0xff] %v12179_v59  ;;  %v12202_v47 = vld [vmem:[%s11598_s14 + $0xa0] sm:$0xf]  ;;  %v9250_v20 = vcombine.low %v12139_v4, %v12149_v10 }
  0xa0   : > { %15856 = vst [vmem:[#allocation17_spill] sm:$0xff] %v12202_v47 }
  0xa1   : > { %3652 = vmatmul.mubr.bf16.gmra.mrb[36].mxu1 %v9280_v38  ;;  %v651_v38 = vsel %vm11631_vm4, %v646_v35, %v650_v58  ;;  %v9249_v58 = vcombine.low %v12095_v42, %v12101_v39  ;;  %v678_v37 = vrot.slane %v676_v55, 4  ;;  %v1275_v39 = vshrl.u32 %v9101_v56, 16 }
  0xa2   : > { %3659 = vmatprep.mubr.bf16.mxu1 %v9297_v24  ;;  %v9265_v16 = vcombine.low %v651_v38, %v661_v12  ;;  %v925_v24 = vsel %vm11642_vm5, %v923_v45, %v924_v25  ;;  %v12181_v38 = vrot.slane %v1254_v6, 5  ;;  %v669_v45 = vor.u32 %v668_v3, %v665_v19  ;;  %v12190_v6 = vld [vmem:[%s11598_s14 + $0x98] sm:$0x1] }
  0xa3   : > { %v9281_v35 = vcombine.low %v922_v15, %v925_v24  ;;  %v679_v9 = vor.u32 %v678_v37, %v674_v49  ;;  %v9298_v12 = vcombine.low %v9101_v56, %v12168_v28  ;;  %v1278_v15 = vshll.u32 %v9101_v56, 16 }
  0xa4   : > { %3498 = vmatprep.mubr.bf16.mxu0 %v9265_v16  ;;  %15855 = vst [vmem:[#allocation16_spill] sm:$0xff] %v12181_v38  ;;  %v670_v42 = vrot.slane %v669_v45, 4  ;;  %v931_v19 = vrot.slane %v12154_v43, 5  ;;  %v687_v16 = vshrl.u32 %v12174_v57, 16  ;;  %v929_v56 = vsel %vm11642_vm5, %v9074_v23, %v928_v11  ;;  %v794_v43 = vld [vmem:[%s11598_s14 + $0x90] sm:$0xe] }
  0xa5   : > { %v680_v55 = vrot.slane %v679_v9, 4  ;;  %v930_v3 = vrot.slane %v928_v11, 4  ;;  %v696_v37 = vshll.u32 %v12186_v60, 16  ;;  %v700_v25 = vshrl.u32 %v12186_v60, 16  ;;  %v12212_v11 = vld [vmem:[%s11598_s14 + $0x9c] sm:$0xf] }
  0xa6   : > { %v675_v24 = vsel %vm11631_vm4, %v670_v42, %v674_v49  ;;  %v689_v9 = vrot.slane %v687_v16, 4  ;;  %v706_v23 = vshll.u32 %v12190_v6, 16  ;;  %v12218_v16 = vrot.slane %v1278_v15, 5 }
  0xa7   : > { %3499 = vmatmul.mubr.bf16.gmra.mrb[40].mxu0 %v9249_v58  ;;  %v685_v45 = vsel %vm11631_vm4, %v680_v55, %v684_v5  ;;  %v692_v58 = vrot.slane %v690_v27, 5  ;;  %v698_v42 = vrot.slane %v696_v37, 5  ;;  %v702_v5 = vrot.slane %v700_v25, 4 }
  0xa8   : > { %v9266_v49 = vcombine.low %v675_v24, %v685_v45  ;;  %v12216_v55 = vrot.slane %v1275_v39, 4  ;;  %15858 = vst [vmem:[#allocation19_spill] sm:$0xff] %v12218_v16  ;;  %v708_v27 = vrot.slane %v706_v23, 5  ;;  %v9075_v45 = vrot.slane %v794_v43, 9 }
  0xa9   : > { %3660 = vmatmul.mubr.bf16.gmra.mrb[40].mxu1 %v9281_v35  ;;  %v9103_v35 = vld [vmem:[%s11598_s14 + $0x9c] sm:$0xf]  ;;  %v693_v59 = vor.u32 %v692_v58, %v689_v9  ;;  %v935_v25 = vrot.slane %v12186_v60, 5  ;;  %v938_v39 = vrot.slane %v12190_v6, 5  ;;  %v711_v9 = vshrl.u32 %v12212_v11, 16 }
  0xaa   : > { %3667 = vmatprep.mubr.bf16.mxu1 %v9298_v12  ;;  %v932_v12 = vsel %vm11642_vm5, %v930_v3, %v931_v19  ;;  %3506 = vmatprep.mubr.bf16.mxu0 %v9266_v49  ;;  %15857 = vst [vmem:[#allocation18_spill] sm:$0xff] %v12216_v55  ;;  %v703_v3 = vor.u32 %v702_v5, %v698_v42  ;;  %v1299_v4 = vshrl.u32 %v9103_v35, 16  ;;  %v1302_v10 = vshll.u32 %v9103_v35, 16  ;;  %v9105_v49 = vld [vmem:[%s11598_s14 + $0xa8] sm:$0xf] }
  0xab   : > { %v9282_v38 = vcombine.low %v929_v56, %v932_v12  ;;  %v694_v24 = vrot.slane %v693_v59, 4  ;;  %v9299_v37 = vcombine.low %v9103_v35, %v12202_v47  ;;  %v392_v56 = vld [vmem:[%s11598_s14 + $0xa4] sm:$0x1]  ;;  %v714_v43 = vshll.u32 %v12212_v11, 16  ;;  %v12246_v19 = vld [vmem:[%s11598_s14 + $0xa8] sm:$0xf] }
  0xac   : > { %v704_v59 = vrot.slane %v703_v3, 4  ;;  %v936_v35 = vsel %vm11642_vm5, %v9075_v45, %v935_v25  ;;  %v937_v58 = vrot.slane %v935_v25, 4  ;;  %v720_v6 = vshll.u32 %v12223_v22, 16  ;;  %v795_v25 = vld [vmem:[%s11598_s14 + $0x9c] sm:$0xe] }
  0xad   : > { %v699_v15 = vsel %vm11631_vm4, %v694_v24, %v698_v42  ;;  %v713_v42 = vrot.slane %v711_v9, 4  ;;  %v716_v23 = vrot.slane %v714_v43, 5  ;;  %v730_v5 = vshll.u32 %v392_v56, 16  ;;  %v12252_v43 = vld [vmem:[%s11598_s14 + $0xac] sm:$0xf] }
  0xae   : > { %v709_v12 = vsel %vm11631_vm4, %v704_v59, %v708_v27  ;;  %v939_v3 = vsel %vm11642_vm5, %v937_v58, %v938_v39  ;;  %v9251_v28 = vcombine.low %v12174_v57, %v12186_v60  ;;  %v9076_v60 = vrot.slane %v795_v25, 9  ;;  %v12272_v25 = vld [vmem:[%s11598_s14 + $0xb8] sm:$0xf] }
  0xaf   : > { %3507 = vmatmul.mubr.bf16.gmra.mrb[44].mxu0 %v9250_v20  ;;  %v12240_v20 = vld [vmem:[%s11598_s14 + $0xac] sm:$0xf]  ;;  %v9267_v24 = vcombine.low %v699_v15, %v709_v12  ;;  %v9283_v59 = vcombine.low %v936_v35, %v939_v3  ;;  %v717_v9 = vor.u32 %v716_v23, %v713_v42  ;;  %v12254_v15 = vrot.slane %v1299_v4, 4  ;;  %15862 = vst [vmem:[#allocation23_spill] sm:$0xff] %v12272_v25  ;;  %v12296_v55 = vld [vmem:[%s11598_s14 + $0xb8] sm:$0xf] }
  0xb0   : > { %15859 = vst [vmem:[#allocation20_spill] sm:$0xff] %v12240_v20  ;;  %v12256_v12 = vrot.slane %v1302_v10, 5  ;;  %v732_v58 = vrot.slane %v730_v5, 5  ;;  %v9300_v57 = vcombine.low %v9105_v49, %v12240_v20  ;;  %v942_v35 = vrot.slane %v12223_v22, 5 }
  0xb1   : > { %3668 = vmatmul.mubr.bf16.gmra.mrb[44].mxu1 %v9282_v38  ;;  %v724_v38 = vshrl.u32 %v12223_v22, 16  ;;  %3514 = vmatprep.mubr.bf16.mxu0 %v9267_v24  ;;  %15860 = vst [vmem:[#allocation21_spill] sm:$0xff] %v12254_v15  ;;  %v1323_v23 = vshrl.u32 %v9105_v49, 16  ;;  %v1326_v24 = vshll.u32 %v9105_v49, 16  ;;  %v945_v4 = vrot.slane %v392_v56, 5 }
  0xb2   : > { %3675 = vmatprep.mubr.bf16.mxu1 %v9299_v37  ;;  %v722_v37 = vrot.slane %v720_v6, 5  ;;  %15861 = vst [vmem:[#allocation22_spill] sm:$0xff] %v12256_v12  ;;  %v12259_v6 = vld [vmem:[%s11598_s14 + $0xb0] sm:$0x1]  ;;  %v943_v5 = vsel %vm11642_vm5, %v9076_v60, %v942_v35  ;;  %v944_v3 = vrot.slane %v942_v35, 4  ;;  %v738_v56 = vshll.u32 %v12246_v19, 16 }
  0xb3   : > { %v726_v45 = vrot.slane %v724_v38, 4  ;;  %v718_v38 = vrot.slane %v717_v9, 4  ;;  %v12269_v9 = vld [vmem:[%s11598_s14 + $0xb4] sm:$0xf]  ;;  %v754_v27 = vshll.u32 %v12259_v6, 16  ;;  %v12288_v12 = vrot.slane %v1323_v23, 4 }
  0xb4   : > { %v946_v60 = vsel %vm11642_vm5, %v944_v3, %v945_v4  ;;  %v12290_v15 = vrot.slane %v1326_v24, 5  ;;  %v9301_v16 = vcombine.low %v12269_v9, %v12272_v25  ;;  %v949_v24 = vrot.slane %v12252_v43, 5 }
  0xb5   : > { %v727_v39 = vor.u32 %v726_v45, %v722_v37  ;;  %v723_v10 = vsel %vm11631_vm4, %v718_v38, %v722_v37  ;;  %v735_v45 = vshrl.u32 %v12246_v19, 16  ;;  %v744_v37 = vshll.u32 %v12252_v43, 16 }
  0xb6   : > { %15863 = vst [vmem:[#allocation24_spill] sm:$0xff] %v12290_v15  ;;  %v9284_v4 = vcombine.low %v943_v5, %v946_v60  ;;  %v952_v5 = vrot.slane %v12259_v6, 5 }
  0xb7   : > { %v728_v42 = vrot.slane %v727_v39, 4  ;;  %3515 = vmatmul.mubr.bf16.gmra.mrb[48].mxu0 %v9251_v28  ;;  %v796_v39 = vld [vmem:[%s11598_s14 + $0xa8] sm:$0xe]  ;;  %v737_v35 = vrot.slane %v735_v45, 4  ;;  %v12284_v28 = vld [vmem:[%s11598_s14 + $0xb4] sm:$0xf] }
  0xb8   : > { %v9077_v23 = vrot.slane %v796_v39, 9  ;;  %v768_v39 = vshll.u32 %v12296_v55, 16 }
  0xb9   : > { %3676 = vmatmul.mubr.bf16.gmra.mrb[48].mxu1 %v9283_v59  ;;  %v733_v49 = vsel %vm11631_vm4, %v728_v42, %v732_v58  ;;  %v748_v59 = vshrl.u32 %v12252_v43, 16  ;;  %v9252_v58 = vcombine.low %v12212_v11, %v12223_v22  ;;  %v746_v42 = vrot.slane %v744_v37, 5 }
  0xba   : > { %3683 = vmatprep.mubr.bf16.mxu1 %v9300_v57  ;;  %v9268_v38 = vcombine.low %v723_v10, %v733_v49  ;;  %v740_v57 = vrot.slane %v738_v56, 5  ;;  %v756_v49 = vrot.slane %v754_v27, 5  ;;  %v1347_v22 = vshrl.u32 %v12269_v9, 16  ;;  %v797_v10 = vld [vmem:[%s11598_s14 + $0xb4] sm:$0xe] }
  0xbb   : > { %v750_v47 = vrot.slane %v748_v59, 4  ;;  %v1350_v11 = vshll.u32 %v12269_v9, 16  ;;  %v950_v27 = vsel %vm11642_vm5, %v9077_v23, %v949_v24  ;;  %v951_v59 = vrot.slane %v949_v24, 4 }
  0xbc   : > { %3522 = vmatprep.mubr.bf16.mxu0 %v9268_v38  ;;  %v741_v3 = vor.u32 %v740_v57, %v737_v35  ;;  %v394_v38 = vld [vmem:[%s11598_s14 + $0xbc] sm:$0x1]  ;;  %v762_v9 = vshll.u32 %v12284_v28, 16  ;;  %v772_v57 = vshrl.u32 %v12296_v55, 16  ;;  %v770_v24 = vrot.slane %v768_v39, 5 }
  0xbd   : > { %v751_v45 = vor.u32 %v750_v47, %v746_v42  ;;  %v759_v47 = vshrl.u32 %v12284_v28, 16  ;;  %v12328_v39 = vrot.slane %v1350_v11, 5  ;;  %v15864_v11 = vrot.slane %v11627_v51, 5 }
  0xbe   : > { %v742_v56 = vrot.slane %v741_v3, 4  ;;  %v764_v23 = vrot.slane %v762_v9, 5  ;;  %v774_v20 = vrot.slane %v772_v57, 4  ;;  %v12326_v9 = vrot.slane %v1347_v22, 4 }
  0xbf   : > { %v752_v37 = vrot.slane %v751_v45, 4  ;;  %3523 = vmatmul.mubr.bf16.gmra.mrb[52].mxu0 %v9252_v58  ;;  %v761_v35 = vrot.slane %v759_v47, 4  ;;  %v953_v45 = vsel %vm11642_vm5, %v951_v59, %v952_v5  ;;  %v9110_v58 = vld [vmem:[%s11598_s14 + $0xc4] sm:$0xf]  ;;  %v9078_v59 = vrot.slane %v797_v10, 9 }
  0xc0   : > { %v747_v60 = vsel %vm11631_vm4, %v742_v56, %v746_v42  ;;  %v778_v42 = vshll.u32 %v394_v38, 16  ;;  %v9111_v56 = vld [vmem:[%s11598_s14 + $0x14] sm:$0x1] }
  0xc1   : > { %3684 = vmatmul.mubr.bf16.gmra.mrb[52].mxu1 %v9284_v4  ;;  %v757_v6 = vsel %vm11631_vm4, %v752_v37, %v756_v49  ;;  %v12314_v4 = vld [vmem:[%s11598_s14 + $0xc0] sm:$0xf]  ;;  %v9285_v37 = vcombine.low %v950_v27, %v953_v45  ;;  %v765_v47 = vor.u32 %v764_v23, %v761_v35  ;;  %v1030_v49 = vshll.u32 %v9111_v56, 16  ;;  %v12332_v27 = vld [vmem:[%s11598_s14 + $0x18] sm:$0xf] }
  0xc2   : > { %3691 = vmatprep.mubr.bf16.mxu1 %v9301_v16  ;;  %v9269_v3 = vcombine.low %v747_v60, %v757_v6  ;;  %v9253_v16 = vcombine.low %v12246_v19, %v12252_v43  ;;  %v9127_v60 = vld [vmem:[%s11598_s14 + $0xc] sm:$0xe]  ;;  %v775_v6 = vor.u32 %v774_v20, %v770_v24  ;;  %v780_v15 = vrot.slane %v778_v42, 5  ;;  %v12341_v45 = vld [vmem:[%s11598_s14 + $0x1c] sm:$0xf] }
  0xc3   : > { %v9302_v5 = vcombine.low %v12314_v4, %v9110_v58  ;;  %v766_v57 = vrot.slane %v765_v47, 4  ;;  %v959_v43 = vrot.slane %v394_v38, 5  ;;  %v9143_v25 = vrot.slane %v9127_v60, 9  ;;  %v9191_v60 = vld [vmem:[%s11598_s14 + $0x20] sm:$0x1] }
  0xc4   : > { %3530 = vmatprep.mubr.bf16.mxu0 %v9269_v3  ;;  %v956_v3 = vrot.slane %v12296_v55, 5  ;;  %v776_v19 = vrot.slane %v775_v6, 4  ;;  %v1462_v35 = vrot.slane %v15864_v11, 4  ;;  %v1032_v23 = vrot.slane %v1030_v49, 5 }
  0xc5   : > { %v771_v20 = vsel %vm11631_vm4, %v766_v57, %v770_v24  ;;  %v15865_v58 = vmov %v15864_v11  ;;  %v1463_v42 = vrot.slane %v9111_v56, 5  ;;  %v1620_v6 = vshrl.u32 %v12332_v27, 16 }
  0xc6   : > { %v957_v10 = vsel %vm11642_vm5, %v9078_v59, %v956_v3  ;;  %v958_v22 = vrot.slane %v956_v3, 4  ;;  %v781_v38 = vsel %vm11631_vm4, %v776_v19, %v780_v15  ;;  %v1461_v24 = vsel %vm11642_vm5, %v9143_v25, %v15865_v58  ;;  %v9128_v59 = vld [vmem:[%s11598_s14 + $0x18] sm:$0xe]  ;;  %v9112_v3 = vld [vmem:[%s11598_s14 + $0x20] sm:$0x1] }
  0xc7   : > { %3531 = vmatmul.mubr.bf16.gmra.mrb[56].mxu0 %v9253_v16  ;;  %v1623_v16 = vshll.u32 %v12332_v27, 16  ;;  %v9254_v15 = vcombine.low %v12284_v28, %v12296_v55  ;;  %v1464_v51 = vsel %vm11642_vm5, %v1462_v35, %v1463_v42  ;;  %v1033_v25 = vsel %vm11631_vm4, %v11689_v33, %v1032_v23  ;;  %v11197_v35 = vld [vmem:[%s11598_s14 + $0x1c] sm:$0xf] }
  0xc8   : > { %v960_v47 = vsel %vm11642_vm5, %v958_v22, %v959_v43  ;;  %v1629_v56 = vshll.u32 %v12341_v45, 16  ;;  %v1622_v55 = vrot.slane %v1620_v6, 4  ;;  %v9319_v19 = vcombine.low %v1461_v24, %v1464_v51  ;;  %v12378_v24 = vld [vmem:[%s11598_s14 + $0x24] sm:$0xf]  ;;  %v12383_v51 = vld [vmem:[%s11598_s14 + $0x28] sm:$0xf] }
  0xc9   : > { %3692 = vmatmul.mubr.bf16.gmra.mrb[56].mxu1 %v9285_v37  ;;  %v9270_v37 = vcombine.low %v771_v20, %v781_v38  ;;  %v9286_v49 = vcombine.low %v957_v10, %v960_v47  ;;  %v1625_v28 = vrot.slane %v1623_v16, 5  ;;  %v1633_v20 = vshrl.u32 %v12341_v45, 16 }
  0xca   : > { %3699 = vmatprep.mubr.bf16.mxu1 %v9302_v5  ;;  %v15866_v5 = vsel %vm11631_vm4, %v11667_v17, %v11646_v1  ;;  %v1631_v43 = vrot.slane %v1629_v56, 5  ;;  %v1639_v33 = vshll.u32 %v9191_v60, 16  ;;  %v9335_v10 = vcombine.low %v12332_v27, %v12341_v45 }
  0xcb   : > { %3538 = vmatprep.mubr.bf16.mxu0 %v9270_v37  ;;  %v12368_v57 = vcombine.low %v15866_v5, %v1033_v25  ;;  %v1626_v22 = vor.u32 %v1625_v28, %v1622_v55  ;;  %v9144_v11 = vrot.slane %v9128_v59, 9  ;;  %v1467_v38 = vrot.slane %v11197_v35, 5  ;;  %v9192_v25 = vld [vmem:[%s11598_s14 + $0x2c] sm:$0x1] }
  0xcc   : > { %v1635_v1 = vrot.slane %v1633_v20, 4  ;;  %v1470_v17 = vrot.slane %v9112_v3, 5  ;;  %v1041_v23 = vor.u32 %v11733_v14, %v11731_v13  ;;  %v1044_v58 = vshll.u32 %v11197_v35, 16  ;;  %v9129_v35 = vld [vmem:[%s11598_s14 + $0x24] sm:$0xe] }
  0xcd   : > { %v1627_v42 = vrot.slane %v1626_v22, 4  ;;  %v1641_v37 = vrot.slane %v1639_v33, 5  ;;  %v1469_v47 = vrot.slane %v1467_v38, 4  ;;  %v15867_v60 = vshrl.u32 %v11679_v26, 16 }
  0xce   : > { %v1636_v45 = vor.u32 %v1635_v1, %v1631_v43  ;;  %v1042_v6 = vrot.slane %v1041_v23, 4  ;;  %v1046_v16 = vrot.slane %v1044_v58, 5  ;;  %v1054_v59 = vshll.u32 %v9112_v3, 16  ;;  %v9113_v58 = vld [vmem:[%s11598_s14 + $0x2c] sm:$0x1] }
  0xcf   : > { %v1050_v27 = vrot.slane %v15867_v60, 4  ;;  %3539 = vmatmul.mubr.bf16.gmra.mrb[60].mxu0 %v9254_v15  ;;  %v1632_v13 = vsel %vm11631_vm4, %v1627_v42, %v1631_v43  ;;  %v1468_v14 = vsel %vm11642_vm5, %v9144_v11, %v1467_v38  ;;  %v1644_v56 = vshrl.u32 %v12378_v24, 16 }
  0xd0   : > { %3740 = vmatprep.mubr.bf16.mxu0 %v9319_v19  ;;  %v1647_v26 = vshll.u32 %v12378_v24, 16  ;;  %v1637_v15 = vrot.slane %v1636_v45, 4  ;;  %v1047_v5 = vsel %vm11631_vm4, %v1042_v6, %v1046_v16  ;;  %v1056_v28 = vrot.slane %v1054_v59, 5  ;;  %v11198_v59 = vld [vmem:[%s11598_s14 + $0x28] sm:$0xf] }
  0xd1   : > { %3700 = vmatmul.mubr.bf16.gmra.mrb[60].mxu1 %v9286_v49  ;;  %v1471_v49 = vsel %vm11642_vm5, %v1469_v47, %v1470_v17  ;;  %v1051_v55 = vor.u32 %v1050_v27, %v1046_v16  ;;  %v1646_v3 = vrot.slane %v1644_v56, 4  ;;  %v1653_v43 = vshll.u32 %v12383_v51, 16  ;;  %v10988_v27 = vld [vmem:[%s15789_s1 + $0x208] sm:$0xff]  }
  0xd2   : > { %v1649_v19 = vrot.slane %v1647_v26, 5  ;;  %v1642_v20 = vsel %vm11631_vm4, %v1637_v15, %v1641_v37  ;;  %v1657_v22 = vshrl.u32 %v12383_v51, 16  ;;  %v1663_v11 = vshll.u32 %v9192_v25, 16  ;;  %v12417_v26 = vld [vmem:[%s11598_s14 + $0x34] sm:$0xf] }
  0xd3   : > { %v1052_v33 = vrot.slane %v1051_v55, 4  ;;  %v9351_v38 = vcombine.low %v1632_v13, %v1642_v20  ;;  %v9320_v1 = vcombine.low %v1468_v14, %v1471_v49  ;;  %v1655_v23 = vrot.slane %v1653_v43, 5 }
  0xd4   : > { %v1650_v17 = vor.u32 %v1649_v19, %v1646_v3  ;;  %v1659_v47 = vrot.slane %v1657_v22, 4  ;;  %v1665_v60 = vrot.slane %v1663_v11, 5  ;;  %v9336_v37 = vcombine.low %v12378_v24, %v12383_v51  ;;  %v12414_v51 = vld [vmem:[%s11598_s14 + $0x30] sm:$0xf] }
  0xd5   : > { %v1057_v42 = vsel %vm11631_vm4, %v1052_v33, %v1056_v28  ;;  %3901 = vmatprep.mubr.bf16.mxu1 %v9351_v38  ;;  %v9145_v16 = vrot.slane %v9129_v35, 9  ;;  %v1474_v13 = vrot.slane %v11198_v59, 5  ;;  %v1477_v25 = vrot.slane %v9113_v58, 5  ;;  %v9130_v38 = vld [vmem:[%s11598_s14 + $0x30] sm:$0xe] }
  0xd6   : > { %v9304_v45 = vcombine.low %v1047_v5, %v1057_v42  ;;  %v1651_v6 = vrot.slane %v1650_v17, 4  ;;  %v1660_v14 = vor.u32 %v1659_v47, %v1655_v23  ;;  %v1065_v56 = vor.u32 %v11785_v63, %v11783_v62  ;;  %v9193_v62 = vld [vmem:[%s11598_s14 + $0x38] sm:$0x1]  ;;  %v10991_v63 = vld [vmem:[%s15789_s1 + $0x210] sm:$0xff]  }
  0xd7   : > { %3741 = vmatmul.mubr.bf16.vlgmr.msra.gmra.mrb[64].mxu0 %v12368_v57  ;;  %v1068_v24 = vshll.u32 %v11198_v59, 16  ;;  %v1475_v57 = vsel %vm11642_vm5, %v9145_v16, %v1474_v13  ;;  %v15868_v49 = vshrl.u32 %v11728_v7, 16  ;;  %v1078_v3 = vshll.u32 %v9113_v58, 16  ;;  %v9114_v42 = vld [vmem:[%s11598_s14 + $0x38] sm:$0x1] }
  0xd8   : > { %10737 = vmatpush3.bf16.msra.mxu0 %v12111_v36  ;;  %3748 = vmatprep.mubr.bf16.mxu0 %v9320_v1  ;;  %v1656_v15 = vsel %vm11631_vm4, %v1651_v6, %v1655_v23  ;;  %v1661_v55 = vrot.slane %v1660_v14, 4  ;;  %v1066_v28 = vrot.slane %v1065_v56, 4  ;;  %v1668_v43 = vshrl.u32 %v12414_v51, 16 }
  0xd9   : > { %3902 = vmatmul.mubr.bf16.vlgmr.msra.gmra.mrb[64].mxu1 %v9335_v10  ;;  %v1476_v10 = vrot.slane %v1474_v13, 4  ;;  %v1074_v5 = vrot.slane %v15868_v49, 4  ;;  %v1070_v36 = vrot.slane %v1068_v24, 5  ;;  %10738 = vmatprep.subr.bf16.mxu0 %v10988_v27  ;;  %v1671_v7 = vshll.u32 %v12414_v51, 16  ;;  %v12451_v49 = vld [vmem:[%s11598_s14 + $0x3c] sm:$0xf] }
  0xda   : > { %v1677_v20 = vshll.u32 %v12417_v26, 16  ;;  %v1666_v33 = vsel %vm11631_vm4, %v1661_v55, %v1665_v60  ;;  %v1080_v17 = vrot.slane %v1078_v3, 5  ;;  %v1670_v23 = vrot.slane %v1668_v43, 4  ;;  %v10994_v60 = vld [vmem:[%s15789_s1 + $0x218] sm:$0xff]   ;;  %v12456_v55 = vld [vmem:[%s11598_s14 + $0x40] sm:$0xf] }
  0xdb   : > { %v1478_v19 = vsel %vm11642_vm5, %v1476_v10, %v1477_v25  ;;  %v1071_v11 = vsel %vm11631_vm4, %v1066_v28, %v1070_v36  ;;  %v1075_v35 = vor.u32 %v1074_v5, %v1070_v36  ;;  %v9352_v1 = vcombine.low %v1656_v15, %v1666_v33 }
  0xdc   : > { %v9321_v22 = vcombine.low %v1475_v57, %v1478_v19  ;;  %v1673_v58 = vrot.slane %v1671_v7, 5  ;;  %10739 = vmatpush3.bf16.msra.mxu0 %v10988_v27  ;;  %v1679_v6 = vrot.slane %v1677_v20, 5  ;;  %v1681_v16 = vshrl.u32 %v12417_v26, 16  ;;  %v11199_v27 = vld [vmem:[%s11598_s14 + $0x34] sm:$0xf] }
  0xdd   : > { %v1076_v47 = vrot.slane %v1075_v35, 4  ;;  %v1687_v59 = vshll.u32 %v9193_v62, 16  ;;  %10740 = vmatprep.subr.bf16.mxu0 %v10991_v63  ;;  %3909 = vmatprep.mubr.bf16.mxu1 %v9352_v1  ;;  %v9337_v14 = vcombine.low %v12414_v51, %v12417_v26  ;;  %v9146_v25 = vrot.slane %v9130_v38, 9 }
  0xde   : > { %v1674_v13 = vor.u32 %v1673_v58, %v1670_v23  ;;  %v1481_v56 = vrot.slane %v11199_v27, 5  ;;  %v1683_v15 = vrot.slane %v1681_v16, 4  ;;  %v1484_v10 = vrot.slane %v9114_v42, 5 }
  0xdf   : > { %3749 = vmatmul.mubr.bf16.gmra.mrb[68].mxu0 %v9304_v45  ;;  %v1081_v24 = vsel %vm11631_vm4, %v1076_v47, %v1080_v17  ;;  %v1689_v57 = vrot.slane %v1687_v59, 5  ;;  %v1089_v28 = vor.u32 %v11839_v53, %v11837_v52  ;;  %v1092_v36 = vshll.u32 %v11199_v27, 16  ;;  %v9194_v53 = vld [vmem:[%s11598_s14 + $0x44] sm:$0x1]  ;;  %v9131_v17 = vld [vmem:[%s11598_s14 + $0x3c] sm:$0xe] }
  0xe0   : > { %3756 = vmatprep.mubr.bf16.mxu0 %v9321_v22  ;;  %v9305_v5 = vcombine.low %v1071_v11, %v1081_v24  ;;  %v1675_v62 = vrot.slane %v1674_v13, 4  ;;  %v1482_v51 = vsel %vm11642_vm5, %v9146_v25, %v1481_v56  ;;  %v1483_v26 = vrot.slane %v1481_v56, 4  ;;  %10741 = vmatpush3.bf16.msra.mxu0 %v10991_v63 }
  0xe1   : > { %3910 = vmatmul.mubr.bf16.gmra.mrb[68].mxu1 %v9336_v37  ;;  %v10997_v37 = vld [vmem:[%s15789_s1 + $0x220] sm:$0xff]   ;;  %v1684_v45 = vor.u32 %v1683_v15, %v1679_v6  ;;  %v15869_v3 = vshrl.u32 %v11769_v44, 16  ;;  %10742 = vmatprep.subr.bf16.mxu0 %v10994_v60  ;;  %v1102_v7 = vshll.u32 %v9114_v42, 16  ;;  %v1692_v20 = vshrl.u32 %v12451_v49, 16 }
  0xe2   : > { %v1680_v43 = vsel %vm11631_vm4, %v1675_v62, %v1679_v6  ;;  %v1485_v63 = vsel %vm11642_vm5, %v1483_v26, %v1484_v10  ;;  %v1090_v11 = vrot.slane %v1089_v28, 4  ;;  %v1094_v52 = vrot.slane %v1092_v36, 5  ;;  %v9115_v6 = vld [vmem:[%s11598_s14 + $0x44] sm:$0x1]  ;;  %v11200_v62 = vld [vmem:[%s11598_s14 + $0x40] sm:$0xf] }
  0xe3   : > { %v1098_v19 = vrot.slane %v15869_v3, 4  ;;  %v1685_v33 = vrot.slane %v1684_v45, 4  ;;  %v9322_v22 = vcombine.low %v1482_v51, %v1485_v63  ;;  %v1104_v35 = vrot.slane %v1102_v7, 5  ;;  %v12491_v3 = vld [vmem:[%s11598_s14 + $0x48] sm:$0xf] }
  0xe4   : > { %v1694_v44 = vrot.slane %v1692_v20, 4  ;;  %v1695_v38 = vshll.u32 %v12451_v49, 16  ;;  %v1701_v1 = vshll.u32 %v12456_v55, 16  ;;  %10743 = vmatpush3.bf16.msra.mxu0 %v10994_v60  ;;  %v1095_v58 = vsel %vm11631_vm4, %v1090_v11, %v1094_v52  ;;  %v11000_v60 = vld [vmem:[%s15789_s1 + $0x228] sm:$0xff]  }
  0xe5   : > { %v1690_v23 = vsel %vm11631_vm4, %v1685_v33, %v1689_v57  ;;  %v1099_v42 = vor.u32 %v1098_v19, %v1094_v52  ;;  %v1705_v47 = vshrl.u32 %v12456_v55, 16  ;;  %10744 = vmatprep.subr.bf16.mxu0 %v10997_v37  ;;  %v1711_v25 = vshll.u32 %v9194_v53, 16  ;;  %v12505_v11 = vld [vmem:[%s11598_s14 + $0x4c] sm:$0xf]  ;;  %v9195_v52 = vld [vmem:[%s11598_s14 + $0x50] sm:$0x1] }
  0xe6   : > { %v9353_v16 = vcombine.low %v1680_v43, %v1690_v23  ;;  %v1697_v59 = vrot.slane %v1695_v38, 5  ;;  %v1703_v13 = vrot.slane %v1701_v1, 5  ;;  %v9338_v24 = vcombine.low %v12451_v49, %v12456_v55  ;;  %v11003_v49 = vld [vmem:[%s15789_s1 + $0x230] sm:$0xff]   ;;  %v9132_v1 = vld [vmem:[%s11598_s14 + $0x48] sm:$0xe] }
  0xe7   : > { %3757 = vmatmul.mubr.bf16.gmra.mrb[72].mxu0 %v9305_v5  ;;  %v1100_v27 = vrot.slane %v1099_v42, 4  ;;  %v1707_v56 = vrot.slane %v1705_v47, 4  ;;  %v9147_v15 = vrot.slane %v9131_v17, 9  ;;  %v1713_v10 = vrot.slane %v1711_v25, 5  ;;  %v11006_v47 = vld [vmem:[%s15789_s1 + $0x238] sm:$0xff]  }
  0xe8   : > { %3917 = vmatprep.mubr.bf16.mxu1 %v9353_v16  ;;  %3764 = vmatprep.mubr.bf16.mxu0 %v9322_v22  ;;  %v1698_v57 = vor.u32 %v1697_v59, %v1694_v44  ;;  %v1488_v51 = vrot.slane %v11200_v62, 5  ;;  %v1491_v26 = vrot.slane %v9115_v6, 5  ;;  %v1113_v5 = vor.u32 %v11896_v50, %v11887_v41 }
  0xe9   : > { %3918 = vmatmul.mubr.bf16.gmra.mrb[72].mxu1 %v9337_v14  ;;  %v1105_v45 = vsel %vm11631_vm4, %v1100_v27, %v1104_v35  ;;  %v1708_v28 = vor.u32 %v1707_v56, %v1703_v13  ;;  %v1116_v36 = vshll.u32 %v11200_v62, 16  ;;  %10745 = vmatpush3.bf16.msra.mxu0 %v10997_v37  ;;  %v15870_v7 = vshrl.u32 %v11818_v34, 16  ;;  %v9116_v27 = vld [vmem:[%s11598_s14 + $0x50] sm:$0x1] }
  0xea   : > { %v9306_v55 = vcombine.low %v1095_v58, %v1105_v45  ;;  %v1699_v19 = vrot.slane %v1698_v57, 4  ;;  %v1489_v14 = vsel %vm11642_vm5, %v9147_v15, %v1488_v51  ;;  %v1490_v43 = vrot.slane %v1488_v51, 4  ;;  %10746 = vmatprep.subr.bf16.mxu0 %v11000_v60  ;;  %v11201_v15 = vld [vmem:[%s11598_s14 + $0x4c] sm:$0xf]  ;;  %v12527_v45 = vld [vmem:[%s11598_s14 + $0x54] sm:$0xf] }
  0xeb   : > { %v1709_v63 = vrot.slane %v1708_v28, 4  ;;  %v1114_v41 = vrot.slane %v1113_v5, 4  ;;  %v1118_v50 = vrot.slane %v1116_v36, 5  ;;  %v1122_v20 = vrot.slane %v15870_v7, 4 }
  0xec   : > { %v1704_v37 = vsel %vm11631_vm4, %v1699_v19, %v1703_v13  ;;  %v1492_v33 = vsel %vm11642_vm5, %v1490_v43, %v1491_v26  ;;  %v1126_v22 = vshll.u32 %v9115_v6, 16  ;;  %v1716_v53 = vshrl.u32 %v12491_v3, 16 }
  0xed   : > { %v1714_v35 = vsel %vm11631_vm4, %v1709_v63, %v1713_v10  ;;  %v9323_v44 = vcombine.low %v1489_v14, %v1492_v33  ;;  %v1119_v34 = vsel %vm11631_vm4, %v1114_v41, %v1118_v50  ;;  %v1123_v38 = vor.u32 %v1122_v20, %v1118_v50  ;;  %10747 = vmatpush3.bf16.msra.mxu0 %v11000_v60  ;;  %v12536_v50 = vld [vmem:[%s11598_s14 + $0x58] sm:$0xf] }
  0xee   : > { %v9354_v17 = vcombine.low %v1704_v37, %v1714_v35  ;;  %v1128_v23 = vrot.slane %v1126_v22, 5  ;;  %v1718_v58 = vrot.slane %v1716_v53, 4  ;;  %v1719_v42 = vshll.u32 %v12491_v3, 16  ;;  %10748 = vmatprep.subr.bf16.mxu0 %v11003_v49  ;;  %v9133_v53 = vld [vmem:[%s11598_s14 + $0x54] sm:$0xe] }
  0xef   : > { %3765 = vmatmul.mubr.bf16.gmra.mrb[76].mxu0 %v9306_v55  ;;  %v1124_v6 = vrot.slane %v1123_v38, 4  ;;  %v1725_v16 = vshll.u32 %v12505_v11, 16  ;;  %v1729_v59 = vshrl.u32 %v12505_v11, 16  ;;  %v1735_v13 = vshll.u32 %v9195_v52, 16 }
  0xf0   : > { %3925 = vmatprep.mubr.bf16.mxu1 %v9354_v17  ;;  %3772 = vmatprep.mubr.bf16.mxu0 %v9323_v44  ;;  %v1721_v25 = vrot.slane %v1719_v42, 5  ;;  %v9339_v60 = vcombine.low %v12491_v3, %v12505_v11  ;;  %v9148_v56 = vrot.slane %v9132_v1, 9  ;;  %v1495_v57 = vrot.slane %v11201_v15, 5  ;;  %v9196_v11 = vld [vmem:[%s11598_s14 + $0x5c] sm:$0x1] }
  0xf1   : > { %3926 = vmatmul.mubr.bf16.gmra.mrb[76].mxu1 %v9338_v24  ;;  %v1129_v10 = vsel %vm11631_vm4, %v1124_v6, %v1128_v23  ;;  %v1727_v62 = vrot.slane %v1725_v16, 5  ;;  %v1731_v51 = vrot.slane %v1729_v59, 4  ;;  %v1737_v26 = vrot.slane %v1735_v13, 5  ;;  %10749 = vmatpush3.bf16.msra.mxu0 %v11003_v49  ;;  %v9117_v42 = vld [vmem:[%s11598_s14 + $0x5c] sm:$0x1] }
  0xf2   : > { %v9307_v28 = vcombine.low %v1119_v34, %v1129_v10  ;;  %v1722_v5 = vor.u32 %v1721_v25, %v1718_v58  ;;  %v1496_v36 = vsel %vm11642_vm5, %v9148_v56, %v1495_v57  ;;  %v1497_v3 = vrot.slane %v1495_v57, 4  ;;  %10750 = vmatprep.subr.bf16.mxu0 %v11006_v47  ;;  %v11202_v56 = vld [vmem:[%s11598_s14 + $0x58] sm:$0xf] }
  0xf3   : > { %v1732_v55 = vor.u32 %v1731_v51, %v1727_v62  ;;  %v1498_v24 = vrot.slane %v9116_v27, 5  ;;  %v1137_v19 = vor.u32 %v11943_v48, %v11941_v46  ;;  %v1140_v14 = vshll.u32 %v11201_v15, 16 }
  0xf4   : > { %v1723_v43 = vrot.slane %v1722_v5, 4  ;;  %v15871_v63 = vshrl.u32 %v11876_v31, 16  ;;  %v1150_v49 = vshll.u32 %v9116_v27, 16  ;;  %v1740_v7 = vshrl.u32 %v12527_v45, 16 }
  0xf5   : > { %v1733_v20 = vrot.slane %v1732_v55, 4  ;;  %v1499_v37 = vsel %vm11642_vm5, %v1497_v3, %v1498_v24  ;;  %v1138_v33 = vrot.slane %v1137_v19, 4  ;;  %v1142_v22 = vrot.slane %v1140_v14, 5  ;;  %10751 = vmatpush3.bf16.msra.mxu0 %v11006_v47  ;;  %v12566_v3 = vld [vmem:[%s11598_s14 + $0x64] sm:$0xf] }
  0xf6   : > { %v1146_v41 = vrot.slane %v15871_v63, 4  ;;  %v1728_v46 = vsel %vm11631_vm4, %v1723_v43, %v1727_v62  ;;  %v9324_v48 = vcombine.low %v1496_v36, %v1499_v37  ;;  %v1152_v31 = vrot.slane %v1150_v49, 5  ;;  %v9197_v43 = vld [vmem:[%s11598_s14 + $0x68] sm:$0x1]  ;;  %v9134_v49 = vld [vmem:[%s11598_s14 + $0x60] sm:$0xe] }
  0xf7   : > { %v1742_v52 = vrot.slane %v1740_v7, 4  ;;  %3773 = vmatmul.mubr.bf16.gmra.mrb[80].mxu0 %v9307_v28  ;;  %v1738_v35 = vsel %vm11631_vm4, %v1733_v20, %v1737_v26  ;;  %v1143_v44 = vsel %vm11631_vm4, %v1138_v33, %v1142_v22  ;;  %v1743_v38 = vshll.u32 %v12527_v45, 16  ;;  %v12561_v26 = vld [vmem:[%s11598_s14 + $0x60] sm:$0xf]  ;;  %v9118_v33 = vld [vmem:[%s11598_s14 + $0x68] sm:$0x1] }
  0xf8   : > { %v1147_v34 = vor.u32 %v1146_v41, %v1142_v22  ;;  %v9355_v1 = vcombine.low %v1728_v46, %v1738_v35  ;;  %3780 = vmatprep.mubr.bf16.mxu0 %v9324_v48  ;;  %v1749_v17 = vshll.u32 %v12536_v50, 16  ;;  %v1753_v23 = vshrl.u32 %v12536_v50, 16 }
  0xf9   : > { %v1759_v58 = vshll.u32 %v9196_v11, 16  ;;  %v1745_v6 = vrot.slane %v1743_v38, 5  ;;  %v9340_v16 = vcombine.low %v12527_v45, %v12536_v50  ;;  %v9149_v59 = vrot.slane %v9133_v53, 9 }
  0xfa   : > { %v1148_v47 = vrot.slane %v1147_v34, 4  ;;  %3933 = vmatprep.mubr.bf16.mxu1 %v9355_v1  ;;  %v1751_v13 = vrot.slane %v1749_v17, 5  ;;  %v1755_v25 = vrot.slane %v1753_v23, 4  ;;  %v1502_v15 = vrot.slane %v11202_v56, 5 }
  0xfb   : > { %v1761_v27 = vrot.slane %v1759_v58, 5  ;;  %3934 = vmatmul.mubr.bf16.gmra.mrb[80].mxu1 %v9339_v60  ;;  %v1746_v10 = vor.u32 %v1745_v6, %v1742_v52  ;;  %v1505_v62 = vrot.slane %v9117_v42, 5  ;;  %v1161_v51 = vor.u32 %v11998_v18, %v11996_v8  ;;  %v11203_v58 = vld [vmem:[%s11598_s14 + $0x64] sm:$0xf] }
  0xfc   : > { %v1153_v57 = vsel %vm11631_vm4, %v1148_v47, %v1152_v31  ;;  %v1756_v28 = vor.u32 %v1755_v25, %v1751_v13  ;;  %v1503_v5 = vsel %vm11642_vm5, %v9149_v59, %v1502_v15  ;;  %v1504_v36 = vrot.slane %v1502_v15, 4  ;;  %v12589_v47 = vld [vmem:[%s11598_s14 + $0x6c] sm:$0xf] }
  0xfd   : > { %v9308_v45 = vcombine.low %v1143_v44, %v1153_v57  ;;  %v1747_v60 = vrot.slane %v1746_v10, 4  ;;  %v1162_v55 = vrot.slane %v1161_v51, 4  ;;  %v1164_v24 = vshll.u32 %v11202_v56, 16 }
  0xfe   : > { %v15872_v19 = vshrl.u32 %v11924_v21, 16  ;;  %v1757_v8 = vrot.slane %v1756_v28, 4  ;;  %v1506_v18 = vsel %vm11642_vm5, %v1504_v36, %v1505_v62  ;;  %v1174_v63 = vshll.u32 %v9117_v42, 16  ;;  %v9198_v36 = vld [vmem:[%s11598_s14 + $0x74] sm:$0x1] }
  0xff   : > { %v1764_v41 = vshrl.u32 %v12561_v26, 16  ;;  %3781 = vmatmul.mubr.bf16.gmra.mrb[84].mxu0 %v9308_v45  ;;  %v1752_v50 = vsel %vm11631_vm4, %v1747_v60, %v1751_v13  ;;  %v9325_v7 = vcombine.low %v1503_v5, %v1506_v18  ;;  %v1166_v20 = vrot.slane %v1164_v24, 5 }
 0x100   : > { %v1170_v14 = vrot.slane %v15872_v19, 4  ;;  %v1767_v37 = vshll.u32 %v12561_v26, 16  ;;  %v1762_v21 = vsel %vm11631_vm4, %v1757_v8, %v1761_v27  ;;  %v1176_v22 = vrot.slane %v1174_v63, 5  ;;  %v12594_v27 = vld [vmem:[%s11598_s14 + $0x70] sm:$0xf] }
 0x101   : > { %v1766_v11 = vrot.slane %v1764_v41, 4  ;;  %v1773_v46 = vshll.u32 %v12566_v3, 16  ;;  %v9356_v48 = vcombine.low %v1752_v50, %v1762_v21  ;;  %3788 = vmatprep.mubr.bf16.mxu0 %v9325_v7  ;;  %v1167_v31 = vsel %vm11631_vm4, %v1162_v55, %v1166_v20 }
 0x102   : > { %v1171_v52 = vor.u32 %v1170_v14, %v1166_v20  ;;  %v1769_v53 = vrot.slane %v1767_v37, 5  ;;  %v1777_v44 = vshrl.u32 %v12566_v3, 16  ;;  %v1783_v34 = vshll.u32 %v9197_v43, 16  ;;  %v9119_v14 = vld [vmem:[%s11598_s14 + $0x74] sm:$0x1] }
 0x103   : > { %v1775_v35 = vrot.slane %v1773_v46, 5  ;;  %v9341_v38 = vcombine.low %v12561_v26, %v12566_v3  ;;  %3941 = vmatprep.mubr.bf16.mxu1 %v9356_v48  ;;  %v9150_v23 = vrot.slane %v9134_v49, 9  ;;  %v1509_v42 = vrot.slane %v11203_v58, 5  ;;  %v9135_v3 = vld [vmem:[%s11598_s14 + $0x6c] sm:$0xe] }
 0x104   : > { %v1172_v1 = vrot.slane %v1171_v52, 4  ;;  %v1770_v17 = vor.u32 %v1769_v53, %v1766_v11  ;;  %3942 = vmatmul.mubr.bf16.gmra.mrb[84].mxu1 %v9340_v16  ;;  %v1779_v6 = vrot.slane %v1777_v44, 4  ;;  %v1785_v59 = vrot.slane %v1783_v34, 5  ;;  %v12620_v48 = vld [vmem:[%s11598_s14 + $0x78] sm:$0xf] }
 0x105   : > { %v1512_v13 = vrot.slane %v9118_v33, 5  ;;  %v1185_v25 = vor.u32 %v12049_v29, %v12047_v61  ;;  %v1510_v57 = vsel %vm11642_vm5, %v9150_v23, %v1509_v42  ;;  %v1511_v10 = vrot.slane %v1509_v42, 4  ;;  %v11204_v53 = vld [vmem:[%s11598_s14 + $0x70] sm:$0xf] }
 0x106   : > { %v1177_v56 = vsel %vm11631_vm4, %v1172_v1, %v1176_v22  ;;  %v1771_v15 = vrot.slane %v1770_v17, 4  ;;  %v1780_v62 = vor.u32 %v1779_v6, %v1775_v35  ;;  %v1188_v26 = vshll.u32 %v11203_v58, 16 }
 0x107   : > { %v9309_v16 = vcombine.low %v1167_v31, %v1177_v56  ;;  %v1186_v51 = vrot.slane %v1185_v25, 4  ;;  %v1513_v61 = vsel %vm11642_vm5, %v1511_v10, %v1512_v13  ;;  %v15873_v29 = vshrl.u32 %v11986_v32, 16  ;;  %v9199_v13 = vld [vmem:[%s11598_s14 + $0x80] sm:$0x1] }
 0x108   : > { %v1776_v45 = vsel %vm11631_vm4, %v1771_v15, %v1775_v35  ;;  %v1198_v5 = vshll.u32 %v9118_v33, 16  ;;  %v1781_v60 = vrot.slane %v1780_v62, 4  ;;  %v9326_v55 = vcombine.low %v1510_v57, %v1513_v61  ;;  %v9136_v57 = vld [vmem:[%s11598_s14 + $0x78] sm:$0xe] }
 0x109   : > { %v1194_v28 = vrot.slane %v15873_v29, 4  ;;  %3789 = vmatmul.mubr.bf16.gmra.mrb[88].mxu0 %v9309_v16  ;;  %v1190_v24 = vrot.slane %v1188_v26, 5  ;;  %v1788_v19 = vshrl.u32 %v12589_v47, 16  ;;  %v1791_v8 = vshll.u32 %v12589_v47, 16 }
 0x10a   : > { %v1200_v43 = vrot.slane %v1198_v5, 5  ;;  %v1797_v18 = vshll.u32 %v12594_v27, 16  ;;  %v1801_v63 = vshrl.u32 %v12594_v27, 16  ;;  %v1786_v32 = vsel %vm11631_vm4, %v1781_v60, %v1785_v59  ;;  %3796 = vmatprep.mubr.bf16.mxu0 %v9326_v55  ;;  %v12630_v59 = vld [vmem:[%s11598_s14 + $0x7c] sm:$0xf] }
 0x10b   : > { %v1191_v41 = vsel %vm11631_vm4, %v1186_v51, %v1190_v24  ;;  %v1195_v49 = vor.u32 %v1194_v28, %v1190_v24  ;;  %v1790_v50 = vrot.slane %v1788_v19, 4  ;;  %v9357_v7 = vcombine.low %v1776_v45, %v1786_v32  ;;  %v9120_v5 = vld [vmem:[%s11598_s14 + $0x80] sm:$0x1]  ;;  %v12650_v24 = vld [vmem:[%s11598_s14 + $0x84] sm:$0xf] }
 0x10c   : > { %v1793_v20 = vrot.slane %v1791_v8, 5  ;;  %v1799_v37 = vrot.slane %v1797_v18, 5  ;;  %v1803_v33 = vrot.slane %v1801_v63, 4  ;;  %v1807_v22 = vshll.u32 %v9198_v36, 16  ;;  %v11205_v8 = vld [vmem:[%s11598_s14 + $0x7c] sm:$0xf] }
 0x10d   : > { %v1196_v21 = vrot.slane %v1195_v49, 4  ;;  %v9342_v11 = vcombine.low %v12589_v47, %v12594_v27  ;;  %v9151_v46 = vrot.slane %v9135_v3, 9  ;;  %3949 = vmatprep.mubr.bf16.mxu1 %v9357_v7  ;;  %v1516_v35 = vrot.slane %v11204_v53, 5 }
 0x10e   : > { %v1794_v31 = vor.u32 %v1793_v20, %v1790_v50  ;;  %v1804_v52 = vor.u32 %v1803_v33, %v1799_v37  ;;  %v1519_v44 = vrot.slane %v9119_v14, 5  ;;  %3950 = vmatmul.mubr.bf16.gmra.mrb[88].mxu1 %v9341_v38  ;;  %v1809_v1 = vrot.slane %v1807_v22, 5  ;;  %v15875_v22 = vld [vmem:[#allocation12_spill] sm:$0xff] }
 0x10f   : > { %v1201_v34 = vsel %vm11631_vm4, %v1196_v21, %v1200_v43  ;;  %v1209_v17 = vor.u32 %v12103_v2, %v12097_v30  ;;  %v1212_v23 = vshll.u32 %v11204_v53, 16  ;;  %v1517_v6 = vsel %vm11642_vm5, %v9151_v46, %v1516_v35  ;;  %v15876_v46 = vld [vmem:[#allocation13_spill] sm:$0xff]  ;;  %v9200_v53 = vld [vmem:[%s11598_s14 + $0x8c] sm:$0x1] }
 0x110   : > { %v9310_v58 = vcombine.low %v1191_v41, %v1201_v34  ;;  %v1795_v42 = vrot.slane %v1794_v31, 4  ;;  %v1805_v47 = vrot.slane %v1804_v52, 4  ;;  %v1518_v25 = vrot.slane %v1516_v35, 4 }
 0x111   : > { %v1210_v27 = vrot.slane %v1209_v17, 4  ;;  %v1214_v38 = vrot.slane %v1212_v23, 5  ;;  %v15874_v56 = vshrl.u32 %v12037_v40, 16  ;;  %v1222_v10 = vshll.u32 %v9119_v14, 16 }
 0x112   : > { %3797 = vmatmul.mubr.bf16.gmra.mrb[92].mxu0 %v9310_v58  ;;  %v1800_v30 = vsel %vm11631_vm4, %v1795_v42, %v1799_v37  ;;  %v1810_v2 = vsel %vm11631_vm4, %v1805_v47, %v1809_v1  ;;  %v1812_v16 = vshrl.u32 %v12620_v48, 16  ;;  %v1520_v51 = vsel %vm11642_vm5, %v1518_v25, %v1519_v44  ;;  %v15877_v44 = vld [vmem:[#allocation10_spill] sm:$0xff] }
 0x113   : > { %v1218_v15 = vrot.slane %v15874_v56, 4  ;;  %v9358_v62 = vcombine.low %v1800_v30, %v1810_v2  ;;  %v1215_v40 = vsel %vm11631_vm4, %v1210_v27, %v1214_v38  ;;  %v9327_v45 = vcombine.low %v1517_v6, %v1520_v51  ;;  %v9137_v56 = vld [vmem:[%s11598_s14 + $0x84] sm:$0xe] }
 0x114   : > { %v1224_v61 = vrot.slane %v1222_v10, 5  ;;  %v1814_v29 = vrot.slane %v1812_v16, 4  ;;  %v1815_v28 = vshll.u32 %v12620_v48, 16  ;;  %v1821_v3 = vshll.u32 %v12630_v59, 16  ;;  %v9121_v10 = vld [vmem:[%s11598_s14 + $0x8c] sm:$0x1] }
 0x115   : > { %v1219_v26 = vor.u32 %v1218_v15, %v1214_v38  ;;  %3957 = vmatprep.mubr.bf16.mxu1 %v9358_v62  ;;  %v1825_v60 = vshrl.u32 %v12630_v59, 16  ;;  %v1831_v55 = vshll.u32 %v9199_v13, 16  ;;  %v1371_v19 = vshrl.u32 %v12314_v4, 16  ;;  %3804 = vmatprep.mubr.bf16.mxu0 %v9327_v45 }
 0x116   : > { %v1817_v14 = vrot.slane %v1815_v28, 5  ;;  %v9152_v43 = vrot.slane %v9136_v57, 9  ;;  %v1523_v18 = vrot.slane %v11205_v8, 5  ;;  %3958 = vmatmul.mubr.bf16.gmra.mrb[92].mxu1 %v9342_v11  ;;  %v1823_v32 = vrot.slane %v1821_v3, 5  ;;  %v12661_v11 = vld [vmem:[%s11598_s14 + $0x88] sm:$0xf] }
 0x117   : > { %v1220_v36 = vrot.slane %v1219_v26, 4  ;;  %v1827_v41 = vrot.slane %v1825_v60, 4  ;;  %v1833_v49 = vrot.slane %v1831_v55, 5  ;;  %v1526_v21 = vrot.slane %v9120_v5, 5 }
 0x118   : > { %v1818_v7 = vor.u32 %v1817_v14, %v1814_v29  ;;  %v1524_v20 = vsel %vm11642_vm5, %v9152_v43, %v1523_v18  ;;  %v1525_v37 = vrot.slane %v1523_v18, 4  ;;  %v1233_v31 = vor.u32 %v15876_v46, %v15875_v22  ;;  %v15879_v43 = vld [vmem:[#allocation15_spill] sm:$0xff]  ;;  %v9201_v46 = vld [vmem:[%s11598_s14 + $0x98] sm:$0x1] }
 0x119   : > { %v1225_v63 = vsel %vm11631_vm4, %v1220_v36, %v1224_v61  ;;  %v1828_v33 = vor.u32 %v1827_v41, %v1823_v32  ;;  %v1236_v52 = vshll.u32 %v11205_v8, 16  ;;  %v15878_v34 = vshrl.u32 %v15877_v44, 16  ;;  %v12683_v61 = vld [vmem:[%s11598_s14 + $0x90] sm:$0xf]  ;;  %v11206_v36 = vld [vmem:[%s11598_s14 + $0x88] sm:$0xf] }
 0x11a   : > { %v9311_v50 = vcombine.low %v1215_v40, %v1225_v63  ;;  %v1819_v35 = vrot.slane %v1818_v7, 4  ;;  %v1246_v17 = vshll.u32 %v9120_v5, 16  ;;  %v1836_v23 = vshrl.u32 %v12650_v24, 16  ;;  %v15880_v8 = vld [vmem:[#allocation16_spill] sm:$0xff] }
 0x11b   : > { %v1242_v1 = vrot.slane %v15878_v34, 4  ;;  %v1829_v58 = vrot.slane %v1828_v33, 4  ;;  %v1527_v42 = vsel %vm11642_vm5, %v1525_v37, %v1526_v21  ;;  %v1234_v47 = vrot.slane %v1233_v31, 4  ;;  %v12691_v63 = vld [vmem:[%s11598_s14 + $0x94] sm:$0xf]  ;;  %v15881_v33 = vld [vmem:[#allocation11_spill] sm:$0xff] }
 0x11c   : > { %3805 = vmatmul.mubr.bf16.gmra.mrb[96].mxu0 %v9311_v50  ;;  %v1238_v6 = vrot.slane %v1236_v52, 5  ;;  %v1824_v13 = vsel %vm11631_vm4, %v1819_v35, %v1823_v32  ;;  %v9343_v25 = vcombine.low %v12620_v48, %v12630_v59  ;;  %v9328_v27 = vcombine.low %v1524_v20, %v1527_v42 }
 0x11d   : > { %v1248_v38 = vrot.slane %v1246_v17, 5  ;;  %v1834_v15 = vsel %vm11631_vm4, %v1829_v58, %v1833_v49  ;;  %v1838_v30 = vrot.slane %v1836_v23, 4  ;;  %v1839_v2 = vshll.u32 %v12650_v24, 16  ;;  %v12705_v23 = vld [vmem:[%s11598_s14 + $0x98] sm:$0x1] }
 0x11e   : > { %v1243_v57 = vor.u32 %v1242_v1, %v1238_v6  ;;  %v9359_v16 = vcombine.low %v1824_v13, %v1834_v15  ;;  %3812 = vmatprep.mubr.bf16.mxu0 %v9328_v27  ;;  %v1845_v62 = vshll.u32 %v12661_v11, 16  ;;  %v1849_v51 = vshrl.u32 %v12661_v11, 16  ;;  %v9138_v13 = vld [vmem:[%s11598_s14 + $0x90] sm:$0xe] }
 0x11f   : > { %v1855_v48 = vshll.u32 %v9200_v53, 16  ;;  %v1239_v59 = vsel %vm11631_vm4, %v1234_v47, %v1238_v6  ;;  %v1841_v26 = vrot.slane %v1839_v2, 5  ;;  %v9153_v45 = vrot.slane %v9137_v56, 9 }
 0x120   : > { %v1244_v40 = vrot.slane %v1243_v57, 4  ;;  %3965 = vmatprep.mubr.bf16.mxu1 %v9359_v16  ;;  %v1847_v29 = vrot.slane %v1845_v62, 5  ;;  %v1851_v28 = vrot.slane %v1849_v51, 4  ;;  %v1530_v3 = vrot.slane %v11206_v36, 5  ;;  %v11207_v51 = vld [vmem:[%s11598_s14 + $0x94] sm:$0xf] }
 0x121   : > { %v1857_v5 = vrot.slane %v1855_v48, 5  ;;  %3966 = vmatmul.mubr.bf16.gmra.mrb[96].mxu1 %v9343_v25  ;;  %v1842_v55 = vor.u32 %v1841_v26, %v1838_v30  ;;  %v1533_v14 = vrot.slane %v9121_v10, 5  ;;  %v1257_v18 = vor.u32 %v15880_v8, %v15879_v43  ;;  %v12729_v8 = vld [vmem:[%s11598_s14 + $0x9c] sm:$0xf] }
 0x122   : > { %v1249_v60 = vsel %vm11631_vm4, %v1244_v40, %v1248_v38  ;;  %v1852_v41 = vor.u32 %v1851_v28, %v1847_v29  ;;  %v1531_v49 = vsel %vm11642_vm5, %v9153_v45, %v1530_v3  ;;  %v1532_v50 = vrot.slane %v1530_v3, 4 }
 0x123   : > { %v9312_v32 = vcombine.low %v1239_v59, %v1249_v60  ;;  %v1843_v7 = vrot.slane %v1842_v55, 4  ;;  %v1258_v20 = vrot.slane %v1257_v18, 4  ;;  %v1260_v37 = vshll.u32 %v11206_v36, 16  ;;  %v12718_v59 = vld [vmem:[%s11598_s14 + $0xc0] sm:$0xf] }
 0x124   : > { %v15882_v21 = vshrl.u32 %v15881_v33, 16  ;;  %v1853_v31 = vrot.slane %v1852_v41, 4  ;;  %v1534_v52 = vsel %vm11642_vm5, %v1532_v50, %v1533_v14  ;;  %v1270_v53 = vshll.u32 %v9121_v10, 16  ;;  %v12732_v18 = vld [vmem:[%s11598_s14 + $0xa0] sm:$0xf] }
 0x125   : > { %3813 = vmatmul.mubr.bf16.gmra.mrb[100].mxu0 %v9312_v32  ;;  %v1860_v35 = vshrl.u32 %v12683_v61, 16  ;;  %v1848_v44 = vsel %vm11631_vm4, %v1843_v7, %v1847_v29  ;;  %v9329_v34 = vcombine.low %v1531_v49, %v1534_v52  ;;  %v1262_v1 = vrot.slane %v1260_v37, 5  ;;  %v9202_v52 = vld [vmem:[%s11598_s14 + $0xa4] sm:$0x1] }
 0x126   : > { %v1266_v22 = vrot.slane %v15882_v21, 4  ;;  %v1863_v17 = vshll.u32 %v12683_v61, 16  ;;  %v1858_v58 = vsel %vm11631_vm4, %v1853_v31, %v1857_v5  ;;  %v9344_v42 = vcombine.low %v12650_v24, %v12661_v11 }
 0x127   : > { %v1862_v47 = vrot.slane %v1860_v35, 4  ;;  %v1869_v6 = vshll.u32 %v12691_v63, 16  ;;  %v9360_v25 = vcombine.low %v1848_v44, %v1858_v58  ;;  %3820 = vmatprep.mubr.bf16.mxu0 %v9329_v34  ;;  %v1272_v38 = vrot.slane %v1270_v53, 5 }
 0x128   : > { %v1267_v27 = vor.u32 %v1266_v22, %v1262_v1  ;;  %v1865_v56 = vrot.slane %v1863_v17, 5  ;;  %v1263_v15 = vsel %vm11631_vm4, %v1258_v20, %v1262_v1  ;;  %v1873_v30 = vshrl.u32 %v12691_v63, 16  ;;  %v15883_v22 = vld [vmem:[#allocation18_spill] sm:$0xff] }
 0x129   : > { %v1871_v57 = vrot.slane %v1869_v6, 5  ;;  %v1879_v2 = vshll.u32 %v9201_v46, 16  ;;  %3973 = vmatprep.mubr.bf16.mxu1 %v9360_v25  ;;  %v9154_v62 = vrot.slane %v9138_v13, 9  ;;  %v1537_v48 = vrot.slane %v11207_v51, 5  ;;  %v15884_v46 = vld [vmem:[#allocation19_spill] sm:$0xff]  ;;  %v15885_v1 = vld [vmem:[#allocation14_spill] sm:$0xff] }
 0x12a   : > { %v9808_v10 = vpop.f32.mrb[0].mxu0  ;;  %v1268_v24 = vrot.slane %v1267_v27, 4  ;;  %v1866_v11 = vor.u32 %v1865_v56, %v1862_v47  ;;  %v1374_v40 = vshll.u32 %v12718_v59, 16  ;;  %3974 = vmatmul.mubr.bf16.gmra.mrb[100].mxu1 %v9344_v42  ;;  %v1875_v26 = vrot.slane %v1873_v30, 4 }
 0x12b   : > { %v9809_v16 = vpop.f32.mrb[1].mxu0  ;;  %v1540_v5 = vrot.slane %v12705_v23, 5  ;;  %v1538_v14 = vsel %vm11642_vm5, %v9154_v62, %v1537_v48  ;;  %v1539_v43 = vrot.slane %v1537_v48, 4  ;;  %v1881_v49 = vrot.slane %v1879_v2, 5 }
 0x12c   : > { %v12721_v45 = vadd.f32 %v9809_v16, %v9808_v10  ;;  %v9811_v29 = vpop.f32.mrb[2].mxu0  ;;  %v9920_v28 = vpop.f32.mrb[0].mxu1  ;;  %v1273_v36 = vsel %vm11631_vm4, %v1268_v24, %v1272_v38  ;;  %v1867_v3 = vrot.slane %v1866_v11, 4  ;;  %v1876_v41 = vor.u32 %v1875_v26, %v1871_v57 }
 0x12d   : > { %v9812_v60 = vpop.f32.mrb[3].mxu0  ;;  %v9921_v55 = vpop.f32.mrb[1].mxu1  ;;  %v9313_v32 = vcombine.low %v1263_v15, %v1273_v36  ;;  %v9345_v20 = vcombine.low %v12683_v61, %v12691_v63  ;;  %v1541_v33 = vsel %vm11642_vm5, %v1539_v43, %v1540_v5  ;;  %v1281_v31 = vor.u32 %v15884_v46, %v15883_v22  ;;  %v12759_v15 = vld [vmem:[%s11598_s14 + $0xa4] sm:$0x1]  ;;  %v15887_v46 = vld [vmem:[#allocation21_spill] sm:$0xff] }
 0x12e   : > { %v12734_v50 = vadd.f32 %v9812_v60, %v9811_v29  ;;  %v9923_v7 = vpop.f32.mrb[2].mxu1  ;;  %v12738_v37 = vadd.f32 %v9921_v55, %v9920_v28  ;;  %v1872_v53 = vsel %vm11631_vm4, %v1867_v3, %v1871_v57  ;;  %v1877_v35 = vrot.slane %v1876_v41, 4  ;;  %v9139_v57 = vld [vmem:[%s11598_s14 + $0x9c] sm:$0xe]  ;;  %v11209_v41 = vld [vmem:[%s11598_s14 + $0xa0] sm:$0xf] }
 0x12f   : > { %v9924_v21 = vpop.f32.mrb[3].mxu1  ;;  %3821 = vmatmul.mubr.bf16.gmra.mrb[104].mxu0 %v9313_v32  ;;  %v9330_v44 = vcombine.low %v1538_v14, %v1541_v33  ;;  %v1282_v61 = vrot.slane %v1281_v31, 4  ;;  %v1284_v63 = vshll.u32 %v11207_v51, 16  ;;  %v15886_v17 = vshrl.u32 %v15885_v1, 16  ;;  %v15888_v31 = vld [vmem:[#allocation22_spill] sm:$0xff] }
 0x130   : > { %v12747_v34 = vadd.f32 %v9924_v21, %v9923_v7  ;;  %v1294_v42 = vshll.u32 %v12705_v23, 16  ;;  %v1882_v47 = vsel %vm11631_vm4, %v1877_v35, %v1881_v49  ;;  %v1884_v6 = vshrl.u32 %v12729_v8, 16  ;;  %v12778_v35 = vld [vmem:[%s11598_s14 + $0xc4] sm:$0xf] }
 0x131   : > { %v1290_v58 = vrot.slane %v15886_v17, 4  ;;  %3828 = vmatprep.mubr.bf16.mxu0 %v9330_v44  ;;  %v1887_v13 = vshll.u32 %v12729_v8, 16  ;;  %v1893_v25 = vshll.u32 %v12732_v18, 16  ;;  %v9361_v27 = vcombine.low %v1872_v53, %v1882_v47  ;;  %v12775_v53 = vld [vmem:[%s11598_s14 + $0xa8] sm:$0xf] }
 0x132   : > { %v1286_v38 = vrot.slane %v1284_v63, 5  ;;  %v1897_v56 = vshrl.u32 %v12732_v18, 16  ;;  %v1886_v30 = vrot.slane %v1884_v6, 4  ;;  %v1903_v10 = vshll.u32 %v9202_v52, 16  ;;  %v9814_v48 = vpop.f32.mrb[4].mxu0 }
 0x133   : > { %v1889_v2 = vrot.slane %v1887_v13, 5  ;;  %v1895_v23 = vrot.slane %v1893_v25, 5  ;;  %3981 = vmatprep.mubr.bf16.mxu1 %v9361_v27  ;;  %v1296_v62 = vrot.slane %v1294_v42, 5  ;;  %v9815_v5 = vpop.f32.mrb[5].mxu0  ;;  %v9155_v60 = vrot.slane %v9139_v57, 9 }
 0x134   : > { %v9926_v24 = vpop.f32.mrb[4].mxu1  ;;  %v1287_v11 = vsel %vm11631_vm4, %v1282_v61, %v1286_v38  ;;  %v1291_v16 = vor.u32 %v1290_v58, %v1286_v38  ;;  %v1899_v51 = vrot.slane %v1897_v56, 4  ;;  %3982 = vmatmul.mubr.bf16.gmra.mrb[104].mxu1 %v9345_v20  ;;  %v1905_v28 = vrot.slane %v1903_v10, 5  ;;  %v9817_v32 = vpop.f32.mrb[6].mxu0  ;;  %v12786_v17 = vld [vmem:[%s11598_s14 + $0xac] sm:$0xf] }
 0x135   : > { %v9927_v26 = vpop.f32.mrb[5].mxu1  ;;  %v1890_v29 = vor.u32 %v1889_v2, %v1886_v30  ;;  %v12766_v43 = vadd.f32 %v9815_v5, %v9814_v48  ;;  %v1544_v49 = vrot.slane %v11209_v41, 5  ;;  %v9818_v33 = vpop.f32.mrb[7].mxu0  ;;  %v1547_v21 = vrot.slane %v12759_v15, 5  ;;  %v9203_v58 = vld [vmem:[%s11598_s14 + $0xb0] sm:$0x1] }
 0x136   : > { %v12764_v36 = vadd.f32 %v9927_v26, %v9926_v24  ;;  %v9929_v3 = vpop.f32.mrb[6].mxu1  ;;  %v1292_v55 = vrot.slane %v1291_v16, 4  ;;  %v1900_v14 = vor.u32 %v1899_v51, %v1895_v23  ;;  %v1305_v52 = vor.u32 %v15888_v31, %v15887_v46  ;;  %v15889_v2 = vld [vmem:[#allocation17_spill] sm:$0xff]  ;;  %v9140_v26 = vld [vmem:[%s11598_s14 + $0xa8] sm:$0xe] }
 0x137   : > { %v9930_v7 = vpop.f32.mrb[7].mxu1  ;;  %v1891_v20 = vrot.slane %v1890_v29, 4  ;;  %v1384_v44 = vshrl.u32 %v12778_v35, 16  ;;  %v12783_v1 = vadd.f32 %v9818_v33, %v9817_v32  ;;  %v1545_v6 = vsel %vm11642_vm5, %v9155_v60, %v1544_v49  ;;  %v9124_v31 = vld [vmem:[%s11598_s14 + $0xb0] sm:$0x1] }
 0x138   : > { %v12770_v22 = vadd.f32 %v9930_v7, %v9929_v3  ;;  %v1297_v61 = vsel %vm11631_vm4, %v1292_v55, %v1296_v62  ;;  %v1901_v63 = vrot.slane %v1900_v14, 4  ;;  %v1546_v13 = vrot.slane %v1544_v49, 4 }
 0x139   : > { %v9314_v42 = vcombine.low %v1287_v11, %v1297_v61  ;;  %v1896_v47 = vsel %vm11631_vm4, %v1891_v20, %v1895_v23  ;;  %v9346_v27 = vcombine.low %v12729_v8, %v12732_v18  ;;  %v1306_v38 = vrot.slane %v1305_v52, 4 }
 0x13a   : > { %v1906_v25 = vsel %vm11631_vm4, %v1901_v63, %v1905_v28  ;;  %v1308_v56 = vshll.u32 %v11209_v41, 16  ;;  %v1548_v30 = vsel %vm11642_vm5, %v1546_v13, %v1547_v21  ;;  %v15890_v23 = vshrl.u32 %v15889_v2, 16  ;;  %v9820_v8 = vpop.f32.mrb[8].mxu0  ;;  %v11211_v13 = vld [vmem:[%s11598_s14 + $0xac] sm:$0xf] }
 0x13b   : > { %3829 = vmatmul.mubr.bf16.gmra.mrb[108].mxu0 %v9314_v42  ;;  %v9362_v57 = vcombine.low %v1896_v47, %v1906_v25  ;;  %v1318_v24 = vshll.u32 %v12759_v15, 16  ;;  %v9331_v16 = vcombine.low %v1545_v6, %v1548_v30  ;;  %v1908_v51 = vshrl.u32 %v12775_v53, 16  ;;  %v9821_v60 = vpop.f32.mrb[9].mxu0 }
 0x13c   : > { %v1314_v10 = vrot.slane %v15890_v23, 4  ;;  %v9932_v11 = vpop.f32.mrb[8].mxu1  ;;  %v1310_v62 = vrot.slane %v1308_v56, 5  ;;  %v1911_v48 = vshll.u32 %v12775_v53, 16  ;;  %v1917_v28 = vshll.u32 %v12786_v17, 16  ;;  %v9823_v41 = vpop.f32.mrb[10].mxu0 }
 0x13d   : > { %v9933_v18 = vpop.f32.mrb[9].mxu1  ;;  %3989 = vmatprep.mubr.bf16.mxu1 %v9362_v57  ;;  %v1320_v29 = vrot.slane %v1318_v24, 5  ;;  %v1921_v5 = vshrl.u32 %v12786_v17, 16  ;;  %v1927_v3 = vshll.u32 %v9203_v58, 16  ;;  %3836 = vmatprep.mubr.bf16.mxu0 %v9331_v16  ;;  %v1910_v14 = vrot.slane %v1908_v51, 4  ;;  %v9824_v46 = vpop.f32.mrb[11].mxu0 }
 0x13e   : > { %v9935_v15 = vpop.f32.mrb[10].mxu1  ;;  %3990 = vmatmul.mubr.bf16.gmra.mrb[108].mxu1 %v9346_v27  ;;  %v1315_v55 = vor.u32 %v1314_v10, %v1310_v62  ;;  %v1913_v32 = vrot.slane %v1911_v48, 5  ;;  %v1311_v7 = vsel %vm11631_vm4, %v1306_v38, %v1310_v62  ;;  %v1919_v20 = vrot.slane %v1917_v28, 5  ;;  %v12818_v27 = vld [vmem:[%s11598_s14 + $0xb4] sm:$0xf] }
 0x13f   : > { %v9936_v49 = vpop.f32.mrb[11].mxu1  ;;  %v1923_v33 = vrot.slane %v1921_v5, 4  ;;  %v1929_v21 = vrot.slane %v1927_v3, 5  ;;  %v12810_v63 = vadd.f32 %v9821_v60, %v9820_v8  ;;  %v12812_v58 = vadd.f32 %v9824_v46, %v9823_v41  ;;  %v12834_v16 = vld [vmem:[%s11598_s14 + $0xbc] sm:$0x1]  ;;  %v15891_v48 = vld [vmem:[#allocation24_spill] sm:$0xff] }
 0x140   : > { %v1316_v52 = vrot.slane %v1315_v55, 4  ;;  %v1914_v61 = vor.u32 %v1913_v32, %v1910_v14  ;;  %v12814_v47 = vadd.f32 %v9933_v18, %v9932_v11  ;;  %v9156_v6 = vrot.slane %v9140_v26, 9  ;;  %v12831_v11 = vld [vmem:[%s11598_s14 + $0xb8] sm:$0xf] }
 0x141   : > { %v1924_v42 = vor.u32 %v1923_v33, %v1919_v20  ;;  %v1551_v25 = vrot.slane %v11211_v13, 5  ;;  %v12822_v38 = vrot.slane %v1371_v19, 4  ;;  %v9347_v30 = vcombine.low %v12775_v53, %v12786_v17 }
 0x142   : > { %v1321_v56 = vsel %vm11631_vm4, %v1316_v52, %v1320_v29  ;;  %v1915_v57 = vrot.slane %v1914_v61, 4  ;;  %v1554_v62 = vrot.slane %v9124_v31, 5  ;;  %v12838_v51 = vadd.f32 %v9936_v49, %v9935_v15  ;;  %v9826_v17 = vpop.f32.mrb[12].mxu0  ;;  %v15892_v29 = vld [vmem:[#allocation20_spill] sm:$0xff] }
 0x143   : > { %v9315_v2 = vcombine.low %v1311_v7, %v1321_v56  ;;  %v1925_v23 = vrot.slane %v1924_v42, 4  ;;  %v1552_v10 = vsel %vm11642_vm5, %v9156_v6, %v1551_v25  ;;  %v1553_v24 = vrot.slane %v1551_v25, 4  ;;  %v9827_v60 = vpop.f32.mrb[13].mxu0 }
 0x144   : > { %v9938_v4 = vpop.f32.mrb[12].mxu1  ;;  %v1920_v19 = vsel %vm11631_vm4, %v1915_v57, %v1919_v20  ;;  %v1329_v53 = vor.u32 %v15891_v48, %v12288_v12  ;;  %v1332_v26 = vshll.u32 %v11211_v13, 16  ;;  %v15893_v28 = vshrl.u32 %v15892_v29, 16  ;;  %v9829_v41 = vpop.f32.mrb[14].mxu0  ;;  %v9125_v13 = vld [vmem:[%s11598_s14 + $0xbc] sm:$0x1] }
 0x145   : > { %v9939_v8 = vpop.f32.mrb[13].mxu1  ;;  %3837 = vmatmul.mubr.bf16.gmra.mrb[112].mxu0 %v9315_v2  ;;  %v1930_v18 = vsel %vm11631_vm4, %v1925_v23, %v1929_v21  ;;  %v1342_v3 = vshll.u32 %v9124_v31, 16  ;;  %v1555_v15 = vsel %vm11642_vm5, %v1553_v24, %v1554_v62  ;;  %v1932_v32 = vshrl.u32 %v12818_v27, 16  ;;  %v9830_v46 = vpop.f32.mrb[15].mxu0  ;;  %v9141_v31 = vld [vmem:[%s11598_s14 + $0xb4] sm:$0xe] }
 0x146   : > { %v1338_v5 = vrot.slane %v15893_v28, 4  ;;  %v9941_v55 = vpop.f32.mrb[14].mxu1  ;;  %v9363_v14 = vcombine.low %v1920_v19, %v1930_v18  ;;  %v1330_v12 = vrot.slane %v1329_v53, 4  ;;  %v12851_v7 = vrot.slane %v1374_v40, 5 }
 0x147   : > { %v9942_v49 = vpop.f32.mrb[15].mxu1  ;;  %v9332_v20 = vcombine.low %v1552_v10, %v1555_v15  ;;  %v1334_v33 = vrot.slane %v1332_v26, 5  ;;  %v1935_v21 = vshll.u32 %v12818_v27, 16  ;;  %v1934_v52 = vrot.slane %v1932_v32, 4  ;;  %v11212_v26 = vld [vmem:[%s11598_s14 + $0xb8] sm:$0xf] }
 0x148   : > { %3997 = vmatprep.mubr.bf16.mxu1 %v9363_v14  ;;  %v1941_v61 = vshll.u32 %v12831_v11, 16  ;;  %v1945_v42 = vshrl.u32 %v12831_v11, 16  ;;  %v1951_v6 = vshll.u32 %v12834_v16, 16  ;;  %v1344_v25 = vrot.slane %v1342_v3, 5  ;;  %v12875_v15 = vld [vmem:[%s11598_s14 + $0xc0] sm:$0xf] }
 0x149   : > { %3998 = vmatmul.mubr.bf16.gmra.mrb[112].mxu1 %v9347_v30  ;;  %3844 = vmatprep.mubr.bf16.mxu0 %v9332_v20  ;;  %v1335_v59 = vsel %vm11631_vm4, %v1330_v12, %v1334_v33  ;;  %v1339_v40 = vor.u32 %v1338_v5, %v1334_v33  ;;  %v1937_v56 = vrot.slane %v1935_v21, 5  ;;  %v12861_v10 = vadd.f32 %v9827_v60, %v9826_v17  ;;  %v12885_v21 = vld [vmem:[%s11598_s14 + $0xc8] sm:$0x1] }
 0x14a   : > { %v1943_v57 = vrot.slane %v1941_v61, 5  ;;  %v1947_v2 = vrot.slane %v1945_v42, 4  ;;  %v1953_v23 = vrot.slane %v1951_v6, 5  ;;  %v12863_v62 = vadd.f32 %v9830_v46, %v9829_v41  ;;  %v9832_v28 = vpop.f32.mrb[16].mxu0 }
 0x14b   : > { %v1340_v24 = vrot.slane %v1339_v40, 4  ;;  %v1938_v19 = vor.u32 %v1937_v56, %v1934_v52  ;;  %v12865_v30 = vadd.f32 %v9939_v8, %v9938_v4  ;;  %v9157_v18 = vrot.slane %v9141_v31, 9  ;;  %v12878_v4 = vld [vmem:[%s11598_s14 + $0xc4] sm:$0xf]  ;;  %v9833_v8 = vpop.f32.mrb[17].mxu0 }
 0x14c   : > { %v12867_v48 = vpop.f32.mrb[16].mxu1  ;;  %v1948_v53 = vor.u32 %v1947_v2, %v1943_v57  ;;  %v1558_v29 = vrot.slane %v11212_v26, 5  ;;  %v9348_v60 = vcombine.low %v12818_v27, %v12831_v11  ;;  %v1561_v14 = vrot.slane %v9125_v13, 5  ;;  %v9835_v46 = vpop.f32.mrb[18].mxu0 }
 0x14d   : > { %v9945_v5 = vpop.f32.mrb[17].mxu1  ;;  %v1345_v17 = vsel %vm11631_vm4, %v1340_v24, %v1344_v25  ;;  %v1939_v3 = vrot.slane %v1938_v19, 4  ;;  %v12889_v52 = vadd.f32 %v9942_v49, %v9941_v55  ;;  %v1353_v61 = vor.u32 %v12328_v39, %v12326_v9  ;;  %v9836_v6 = vpop.f32.mrb[19].mxu0  ;;  %v15895_v25 = vld [vmem:[#allocation23_spill] sm:$0xff] }
 0x14e   : > { %v12880_v12 = vpop.f32.mrb[18].mxu1  ;;  %v9316_v32 = vcombine.low %v1335_v59, %v1345_v17  ;;  %v1949_v41 = vrot.slane %v1948_v53, 4  ;;  %v1559_v20 = vsel %vm11642_vm5, %v9157_v18, %v1558_v29  ;;  %v1560_v33 = vrot.slane %v1558_v29, 4  ;;  %v9142_v53 = vld [vmem:[%s11598_s14 + $0xc0] sm:$0xe] }
 0x14f   : > { %v9948_v31 = vpop.f32.mrb[19].mxu1  ;;  %v1944_v27 = vsel %vm11631_vm4, %v1939_v3, %v1943_v57  ;;  %15894 = vst [vmem:[#allocation12_spill] sm:$0xff] %v12889_v52  ;;  %v1356_v42 = vshll.u32 %v11212_v26, 16  ;;  %v15896_v56 = vshrl.u32 %v15895_v25, 16  ;;  %v1366_v24 = vshll.u32 %v9125_v13, 16 }
 0x150   : > { %3845 = vmatmul.mubr.bf16.gmra.mrb[116].mxu0 %v9316_v32  ;;  %v1954_v59 = vsel %vm11631_vm4, %v1949_v41, %v1953_v23  ;;  %v1562_v40 = vsel %vm11642_vm5, %v1560_v33, %v1561_v14  ;;  %v1354_v49 = vrot.slane %v1353_v61, 4  ;;  %v12901_v9 = vld [vmem:[%s11598_s14 + $0x2c] sm:$0x1]  ;;  %v1956_v18 = vshrl.u32 %v12875_v15, 16  ;;  %v12910_v14 = vld [vmem:[%s11598_s14 + $0xc8] sm:$0x1] }
 0x151   : > { %v1362_v2 = vrot.slane %v15896_v56, 4  ;;  %v9364_v19 = vcombine.low %v1944_v27, %v1954_v59  ;;  %v9333_v55 = vcombine.low %v1559_v20, %v1562_v40  ;;  %v1358_v57 = vrot.slane %v1356_v42, 5  ;;  %v9208_v52 = vld [vmem:[%s11598_s14 + $0x24] sm:$0xe] }
 0x152   : > { %v1959_v23 = vshll.u32 %v12875_v15, 16  ;;  %v1965_v26 = vshll.u32 %v12878_v4, 16  ;;  %v1368_v13 = vrot.slane %v1366_v24, 5  ;;  %v1969_v17 = vshrl.u32 %v12878_v4, 16  ;;  %v12916_v61 = vpop.f32.mrb[20].mxu0 }
 0x153   : > { %4005 = vmatprep.mubr.bf16.mxu1 %v9364_v19  ;;  %3852 = vmatprep.mubr.bf16.mxu0 %v9333_v55  ;;  %v1363_v29 = vor.u32 %v1362_v2, %v1358_v57  ;;  %v1975_v3 = vshll.u32 %v12885_v21, 16  ;;  %v1359_v41 = vsel %vm11631_vm4, %v1354_v49, %v1358_v57  ;;  %v1958_v20 = vrot.slane %v1956_v18, 4  ;;  %v9839_v2 = vpop.f32.mrb[21].mxu0  ;;  %v12930_v57 = vld [vmem:[%s11598_s14 + $0xcc] sm:$0xf] }
 0x154   : > { %v12912_v32 = vpop.f32.mrb[20].mxu1  ;;  %4006 = vmatmul.mubr.bf16.gmra.mrb[116].mxu1 %v9348_v60  ;;  %v1961_v33 = vrot.slane %v1959_v23, 5  ;;  %v1967_v27 = vrot.slane %v1965_v26, 5  ;;  %v1971_v40 = vrot.slane %v1969_v17, 4  ;;  %v12920_v56 = vadd.f32 %v9833_v8, %v9832_v28  ;;  %v9841_v18 = vpop.f32.mrb[22].mxu0 }
 0x155   : > { %v12918_v42 = vpop.f32.mrb[21].mxu1  ;;  %v1364_v59 = vrot.slane %v1363_v29, 4  ;;  %v1977_v25 = vrot.slane %v1975_v3, 5  ;;  %v12924_v19 = vadd.f32 %v9836_v6, %v9835_v46  ;;  %v12927_v55 = vadd.f32 %v9945_v5, %v12867_v48  ;;  %v9842_v29 = vpop.f32.mrb[23].mxu0  ;;  %v12940_v46 = vld [vmem:[%s15790_s2] ss:$0 sm:$0xff] }
 0x156   : > { %v12922_v24 = vpop.f32.mrb[22].mxu1  ;;  %v1962_v60 = vor.u32 %v1961_v33, %v1958_v20  ;;  %v9158_v49 = vrot.slane %v9142_v53, 9  ;;  %v1972_v8 = vor.u32 %v1971_v40, %v1967_v27  ;;  %v1565_v26 = vrot.slane %v12778_v35, 5  ;;  %v12946_v17 = vld [vmem:[%s11598_s14 + $0xd0] sm:$0xf] }
 0x157   : > { %15897 = vst [vmem:[#allocation13_spill] sm:$0xff] %v12927_v55  ;;  %v12932_v23 = vpop.f32.mrb[23].mxu1  ;;  %v1369_v28 = vsel %vm11631_vm4, %v1364_v59, %v1368_v13  ;;  %v9349_v6 = vcombine.low %v12875_v15, %v12878_v4  ;;  %v1568_v53 = vrot.slane %v12910_v14, 5  ;;  %15898 = vst [vmem:[#allocation10_spill] sm:$0xff] %v12946_v17  ;;  %v12951_v33 = vadd.f32 %v9948_v31, %v12880_v12  ;;  %v12954_v59 = vld [vmem:[%s11598_s14 + $0xd4] sm:$0x1] }
 0x158   : > { %v9317_v48 = vcombine.low %v1359_v41, %v1369_v28  ;;  %v1963_v5 = vrot.slane %v1962_v60, 4  ;;  %v1973_v3 = vrot.slane %v1972_v8, 4  ;;  %v1566_v13 = vsel %vm11642_vm5, %v9158_v49, %v1565_v26  ;;  %15900 = vst [vmem:[#allocation16_spill] sm:$0xff] %v12954_v59 }
 0x159   : > { %v1567_v20 = vrot.slane %v1565_v26, 4  ;;  %15899 = vst [vmem:[#allocation15_spill] sm:$0xff] %v12951_v33  ;;  %v1377_v15 = vor.u32 %v12851_v7, %v12822_v38  ;;  %v1380_v40 = vshll.u32 %v12778_v35, 16  ;;  %v1386_v60 = vrot.slane %v1384_v44, 4 }
 0x15a   : > { %3853 = vmatmul.mubr.bf16.gmra.mrb[120].mxu0 %v9317_v48  ;;  %v1968_v41 = vsel %vm11631_vm4, %v1963_v5, %v1967_v27  ;;  %v1978_v49 = vsel %vm11631_vm4, %v1973_v3, %v1977_v25  ;;  %v1390_v31 = vshll.u32 %v12910_v14, 16  ;;  %v1980_v28 = vshrl.u32 %v12930_v57, 16  ;;  %v11009_v27 = vld [vmem:[#allocation3 + $0x40] sm:$0xff]   ;;  %v9844_v35 = vpop.f32.mrb[24].mxu0 }
 0x15b   : > { %v1569_v12 = vsel %vm11642_vm5, %v1567_v20, %v1568_v53  ;;  %v9365_v26 = vcombine.low %v1968_v41, %v1978_v49  ;;  %v1378_v7 = vrot.slane %v1377_v15, 4  ;;  %v1382_v48 = vrot.slane %v1380_v40, 5  ;;  %v9207_v5 = vld [vmem:[%s11598_s14 + $0x18] sm:$0xe]  ;;  %v9845_v20 = vpop.f32.mrb[25].mxu0  ;;  %10264 = vmatprep.subr.bf16.mxu1 %v11009_v27 }
 0x15c   : > { %v12969_v8 = vpop.f32.mrb[24].mxu1  ;;  %v9334_v38 = vcombine.low %v1566_v13, %v1569_v12  ;;  %v12976_v25 = vadd.f32 %v12721_v45, %v12940_v46  ;;  %v1982_v53 = vrot.slane %v1980_v28, 4  ;;  %v1983_v14 = vshll.u32 %v12930_v57, 16  ;;  %v9847_v45 = vpop.f32.mrb[26].mxu0  ;;  %v11010_v12 = vld [vmem:[#allocation3] sm:$0xff]  }
 0x15d   : > { %v12972_v44 = vpop.f32.mrb[25].mxu1  ;;  %v1989_v3 = vshll.u32 %v12946_v17, 16  ;;  %4013 = vmatprep.mubr.bf16.mxu1 %v9365_v26  ;;  %v1387_v13 = vor.u32 %v1386_v60, %v1382_v48  ;;  %v1392_v41 = vrot.slane %v1390_v31, 5  ;;  %v1993_v15 = vshrl.u32 %v12946_v17, 16  ;;  %v9848_v31 = vpop.f32.mrb[27].mxu0  ;;  %10265 = vmatpush3.bf16.msra.mxu1 %v11010_v12 }
 0x15e   : > { %v12980_v39 = vpop.f32.mrb[26].mxu1  ;;  %3860 = vmatprep.mubr.bf16.mxu0 %v9334_v38  ;;  %v1999_v40 = vshll.u32 %v12954_v59, 16  ;;  %v12988_v28 = vadd.f32 %v12734_v50, %v12940_v46  ;;  %4014 = vmatmul.mubr.bf16.gmra.mrb[120].mxu1 %v9349_v6  ;;  %v1985_v27 = vrot.slane %v1983_v14, 5  ;;  %v12991_v60 = vadd.f32 %v9839_v2, %v12916_v61  ;;  %v9209_v14 = vld [vmem:[%s11598_s14 + $0x30] sm:$0xe] }
 0x15f   : > { %v12984_v49 = vpop.f32.mrb[27].mxu1  ;;  %v1991_v26 = vrot.slane %v1989_v3, 5  ;;  %v1383_v38 = vsel %vm11631_vm4, %v1378_v7, %v1382_v48  ;;  %v1388_v59 = vrot.slane %v1387_v13, 4  ;;  %v1995_v33 = vrot.slane %v1993_v15, 4  ;;  %v11215_v15 = vld [vmem:[%s11598_s14 + $0x20] sm:$0x1] }
 0x160   : > { %v12995_v55 = vadd.f32 %v9842_v29, %v9841_v18  ;;  %v1986_v50 = vor.u32 %v1985_v27, %v1982_v53  ;;  %v9350_v6 = vcombine.low %v12930_v57, %v12946_v17  ;;  %v13002_v61 = vadd.f32 %v12918_v42, %v12912_v32  ;;  %v11214_v18 = vld [vmem:[%s11598_s14 + $0x1c] sm:$0xf] }
 0x161   : > { %v9223_v2 = vrot.slane %v9207_v5, 9  ;;  %v1393_v7 = vsel %vm11631_vm4, %v1388_v59, %v1392_v41  ;;  %v1996_v48 = vor.u32 %v1995_v33, %v1991_v26  ;;  %v2001_v3 = vrot.slane %v1999_v40, 5  ;;  %v9210_v33 = vld [vmem:[%s11598_s14 + $0x3c] sm:$0xe] }
 0x162   : > { %v2069_v29 = vrot.slane %v11214_v18, 5  ;;  %v9318_v13 = vcombine.low %v1383_v38, %v1393_v7  ;;  %v1987_v53 = vrot.slane %v1986_v50, 4  ;;  %v2072_v12 = vrot.slane %v11215_v15, 5  ;;  %v9850_v41 = vpop.f32.mrb[28].mxu0  ;;  %v11216_v50 = vld [vmem:[%s11598_s14 + $0x28] sm:$0xf] }
 0x163   : > { %v13011_v57 = vadd.f32 %v12932_v23, %v12922_v24  ;;  %v1997_v42 = vrot.slane %v1996_v48, 4  ;;  %v9224_v59 = vrot.slane %v9208_v52, 9  ;;  %v2076_v7 = vrot.slane %v11216_v50, 5  ;;  %v9851_v23 = vpop.f32.mrb[29].mxu0 }
 0x164   : > { %v9962_v32 = vpop.f32.mrb[28].mxu1  ;;  %v2070_v5 = vsel %vm11642_vm5, %v9223_v2, %v2069_v29  ;;  %v2071_v27 = vrot.slane %v2069_v29, 4  ;;  %3861 = vmatmul.mubr.bf16.gmra.mrb[124].mxu0 %v9318_v13  ;;  %v1992_v38 = vsel %vm11631_vm4, %v1987_v53, %v1991_v26  ;;  %v13019_v18 = vadd.f32 %v9845_v20, %v9844_v35  ;;  %v9853_v13 = vpop.f32.mrb[30].mxu0 }
 0x165   : > { %v9963_v40 = vpop.f32.mrb[29].mxu1  ;;  %v13021_v24 = vadd.f32 %v9848_v31, %v9847_v45  ;;  %v2002_v52 = vsel %vm11631_vm4, %v1997_v42, %v2001_v3  ;;  %v13029_v26 = vadd.f32 %v12972_v44, %v12969_v8  ;;  %v9225_v29 = vrot.slane %v9209_v14, 9  ;;  %v9854_v15 = vpop.f32.mrb[31].mxu0  ;;  %v9211_v3 = vld [vmem:[%s11598_s14 + $0x48] sm:$0xe] }
 0x166   : > { %v9965_v48 = vpop.f32.mrb[30].mxu1  ;;  %v2073_v2 = vsel %vm11642_vm5, %v2071_v27, %v2072_v12  ;;  %v9366_v20 = vcombine.low %v1992_v38, %v2002_v52  ;;  %v2077_v31 = vsel %vm11642_vm5, %v9224_v59, %v2076_v7  ;;  %v2078_v53 = vrot.slane %v2076_v7, 4  ;;  %v11217_v44 = vld [vmem:[%s11598_s14 + $0x34] sm:$0xf]  ;;  %v11218_v12 = vld [vmem:[%s11598_s14 + $0x38] sm:$0x1] }
 0x167   : > { %15901 = vst [vmem:[#allocation11_spill] sm:$0xff] %v13029_v26  ;;  %v9966_v35 = vpop.f32.mrb[31].mxu1  ;;  %v9367_v45 = vcombine.low %v2070_v5, %v2073_v2  ;;  %v13036_v42 = vadd.f32 %v12766_v43, %v12940_v46  ;;  %v13040_v8 = vadd.f32 %v12783_v1, %v12940_v46  ;;  %v2083_v14 = vrot.slane %v11217_v44, 5  ;;  %v11219_v1 = vld [vmem:[%s11598_s14 + $0x40] sm:$0xf] }
 0x168   : > { %v2086_v5 = vrot.slane %v11218_v12, 5  ;;  %4021 = vmatprep.mubr.bf16.mxu1 %v9366_v20  ;;  %v15902_v27 = vrot.slane %v12901_v9, 5  ;;  %v13050_v43 = vadd.f32 %v12984_v49, %v12980_v39  ;;  %v9226_v38 = vrot.slane %v9210_v33, 9  ;;  %v11220_v20 = vld [vmem:[%s11598_s14 + $0x44] sm:$0x1] }
 0x169   : > { %10752 = vmatprep.mubr.bf16.mxu0 %v9367_v45  ;;  %v2090_v50 = vrot.slane %v11219_v1, 5  ;;  %4022 = vmatmul.mubr.bf16.gmra.mrb[124].mxu1 %v9350_v6  ;;  %v2084_v52 = vsel %vm11642_vm5, %v9225_v29, %v2083_v14  ;;  %v2085_v2 = vrot.slane %v2083_v14, 4  ;;  %v2093_v9 = vrot.slane %v11220_v20, 5  ;;  %v13057_v45 = vld [vmem:[%s11598_s14 + $0x54] sm:$0xe] }
 0x16a   : > { %v2080_v59 = vsel %vm11642_vm5, %v2078_v53, %v15902_v27  ;;  %15903 = vst [vmem:[#allocation18_spill] sm:$0xff] %v13050_v43  ;;  %v13061_v53 = vadd.f32 %v12810_v63, %v12940_v46  ;;  %v13063_v49 = vadd.f32 %v9851_v23, %v9850_v41  ;;  %v13065_v33 = vadd.f32 %v9854_v15, %v9853_v13  ;;  %v11221_v14 = vld [vmem:[%s11598_s14 + $0x4c] sm:$0xf]  ;;  %v9856_v27 = vpop.f32.mrb[32].mxu0  ;;  %v13073_v1 = vld [vmem:[%s11598_s14 + $0x60] sm:$0xe] }
 0x16b   : > { %v9368_v7 = vcombine.low %v2077_v31, %v2080_v59  ;;  %v2092_v39 = vrot.slane %v2090_v50, 4  ;;  %v2087_v31 = vsel %vm11642_vm5, %v2085_v2, %v2086_v5  ;;  %v13069_v29 = vadd.f32 %v9963_v40, %v9962_v32  ;;  %v9857_v23 = vpop.f32.mrb[33].mxu0  ;;  %v11011_v15 = vld [vmem:[#allocation3 + $0x48] sm:$0xff]   ;;  %v11222_v2 = vld [vmem:[%s11598_s14 + $0x50] sm:$0x1] }
 0x16c   : > { %v9968_v6 = vpop.f32.mrb[32].mxu1  ;;  %v9227_v44 = vrot.slane %v9211_v3, 9  ;;  %v2097_v12 = vrot.slane %v11221_v14, 5  ;;  %v13077_v63 = vadd.f32 %v12812_v58, %v12940_v46  ;;  %v13081_v41 = vadd.f32 %v12861_v10, %v12940_v46  ;;  %v9859_v20 = vpop.f32.mrb[34].mxu0  ;;  %v11224_v14 = vld [vmem:[%s11598_s14 + $0x5c] sm:$0x1]  ;;  %10266 = vmatprep.subr.bf16.mxu1 %v11011_v15 }
 0x16d   : > { %15904 = vst [vmem:[#allocation19_spill] sm:$0xff] %v13069_v29  ;;  %v9969_v59 = vpop.f32.mrb[33].mxu1  ;;  %10753 = vmatmul.mubr.bf16.vlgmr.msra.gmra.mrb[128].mxu0 %v9368_v7  ;;  %v9369_v32 = vcombine.low %v2084_v52, %v2087_v31  ;;  %v2091_v40 = vsel %vm11642_vm5, %v9226_v38, %v2090_v50  ;;  %v2094_v3 = vsel %vm11642_vm5, %v2092_v39, %v2093_v9  ;;  %v2100_v10 = vrot.slane %v11222_v2, 5  ;;  %v11223_v50 = vld [vmem:[%s11598_s14 + $0x58] sm:$0xf]  ;;  %v9860_v17 = vpop.f32.mrb[35].mxu0 }
 0x16e   : > { %v9971_v13 = vpop.f32.mrb[34].mxu1  ;;  %v2098_v58 = vsel %vm11642_vm5, %v9227_v44, %v2097_v12  ;;  %v2099_v5 = vrot.slane %v2097_v12, 4  ;;  %v13090_v52 = vadd.f32 %v9966_v35, %v9965_v48  ;;  %v9228_v38 = vrot.slane %v13057_v45, 9  ;;  %v11012_v9 = vld [vmem:[#allocation3 + $0x8] sm:$0xff]   ;;  %v11226_v29 = vld [vmem:[%s11598_s14 + $0x68] sm:$0x1] }
 0x16f   : > { %v9972_v7 = vpop.f32.mrb[35].mxu1  ;;  %10756 = vmatprep.mubr.bf16.mxu0 %v9369_v32  ;;  %v2104_v31 = vrot.slane %v11223_v50, 5  ;;  %v2107_v54 = vrot.slane %v11224_v14, 5  ;;  %v9858_v44 = vadd.f32 %v9857_v23, %v9856_v27  ;;  %v9861_v12 = vadd.f32 %v9860_v17, %v9859_v20  ;;  %10267 = vmatpush3.bf16.msra.mxu1 %v11012_v9  ;;  %v11225_v15 = vld [vmem:[%s11598_s14 + $0x64] sm:$0xf] }
 0x170   : > { %15905 = vst [vmem:[#allocation14_spill] sm:$0xff] %v13090_v52  ;;  %v2101_v39 = vsel %vm11642_vm5, %v2099_v5, %v2100_v10  ;;  %v9970_v32 = vadd.f32 %v9969_v59, %v9968_v6  ;;  %v9370_v48 = vcombine.low %v2091_v40, %v2094_v3  ;;  %v9229_v2 = vrot.slane %v13073_v1, 9  ;;  %v9214_v26 = vld [vmem:[%s11598_s14 + $0x6c] sm:$0xe]  ;;  %v11227_v59 = vld [vmem:[%s11598_s14 + $0x70] sm:$0xf] }
 0x171   : > { %v9371_v35 = vcombine.low %v2098_v58, %v2101_v39  ;;  %v2106_v45 = vrot.slane %v2104_v31, 4  ;;  %v3485_v50 = vadd.f32 %v9858_v44, %v12940_v46  ;;  %v3488_v14 = vadd.f32 %v9861_v12, %v12940_v46 }
 0x172   : > { %v2111_v52 = vrot.slane %v11225_v15, 5  ;;  %v2114_v43 = vrot.slane %v11226_v29, 5  ;;  %v13105_v17 = vadd.f32 %v12863_v62, %v12940_v46  ;;  %v13109_v6 = vadd.f32 %v12920_v56, %v12940_v46  ;;  %v9862_v62 = vpop.f32.mrb[36].mxu0 }
 0x173   : > { %v9973_v27 = vadd.f32 %v9972_v7, %v9971_v13  ;;  %v2118_v1 = vrot.slane %v11227_v59, 5  ;;  %v2105_v23 = vsel %vm11642_vm5, %v9228_v38, %v2104_v31  ;;  %v2108_v29 = vsel %vm11642_vm5, %v2106_v45, %v2107_v54  ;;  %v9863_v54 = vpop.f32.mrb[37].mxu0  ;;  %v9215_v38 = vld [vmem:[%s11598_s14 + $0x78] sm:$0xe] }
 0x174   : > { %v9974_v40 = vpop.f32.mrb[36].mxu1  ;;  %v13116_v3 = vadd.f32 %v9970_v32, %v3485_v50  ;;  %v2113_v58 = vrot.slane %v2111_v52, 4  ;;  %v13120_v56 = vadd.f32 %v12924_v19, %v12940_v46  ;;  %v13124_v13 = vadd.f32 %v12991_v60, %v12940_v46  ;;  %v9865_v60 = vpop.f32.mrb[38].mxu0  ;;  %v11228_v32 = vld [vmem:[%s11598_s14 + $0x74] sm:$0x1] }
 0x175   : > { %v9975_v5 = vpop.f32.mrb[37].mxu1  ;;  %10757 = vmatmul.mubr.bf16.gmra.mrb[132].mxu0 %v9370_v48  ;;  %v13126_v10 = vadd.f32 %v9973_v27, %v3488_v14  ;;  %v9230_v20 = vrot.slane %v9214_v26, 9  ;;  %v2112_v31 = vsel %vm11642_vm5, %v9229_v2, %v2111_v52  ;;  %v9864_v9 = vadd.f32 %v9863_v54, %v9862_v62  ;;  %v9866_v45 = vpop.f32.mrb[39].mxu0  ;;  %v11229_v50 = vld [vmem:[%s11598_s14 + $0x7c] sm:$0xf] }
 0x176   : > { %v9977_v7 = vpop.f32.mrb[38].mxu1  ;;  %10760 = vmatprep.mubr.bf16.mxu0 %v9371_v35  ;;  %v2115_v19 = vsel %vm11642_vm5, %v2113_v58, %v2114_v43  ;;  %v9976_v39 = vadd.f32 %v9975_v5, %v9974_v40  ;;  %v9372_v12 = vcombine.low %v2105_v23, %v2108_v29  ;;  %v2120_v26 = vrot.slane %v2118_v1, 4  ;;  %v9216_v14 = vld [vmem:[%s11598_s14 + $0x84] sm:$0xe]  ;;  %v11230_v40 = vld [vmem:[%s11598_s14 + $0x80] sm:$0x1] }
 0x177   : > { %15906 = vst [vmem:[#allocation21_spill] sm:$0xff] %v13126_v10  ;;  %v9978_v44 = vpop.f32.mrb[39].mxu1  ;;  %v2121_v48 = vrot.slane %v11228_v32, 5  ;;  %v2125_v35 = vrot.slane %v11229_v50, 5  ;;  %v3493_v52 = vadd.f32 %v9864_v9, %v12940_v46  ;;  %v9867_v2 = vadd.f32 %v9866_v45, %v9865_v60  ;;  %v11231_v29 = vld [vmem:[%s11598_s14 + $0x88] sm:$0xf] }
 0x178   : > { %v9231_v43 = vrot.slane %v9215_v38, 9  ;;  %v9979_v15 = vadd.f32 %v9978_v44, %v9977_v7  ;;  %v9373_v27 = vcombine.low %v2112_v31, %v2115_v19  ;;  %v2128_v23 = vrot.slane %v11230_v40, 5  ;;  %v11232_v32 = vld [vmem:[%s11598_s14 + $0x8c] sm:$0x1]  ;;  %v9217_v10 = vld [vmem:[%s11598_s14 + $0x90] sm:$0xe] }
 0x179   : > { %v2127_v59 = vrot.slane %v2125_v35, 4  ;;  %v2132_v58 = vrot.slane %v11231_v29, 5  ;;  %v3496_v62 = vadd.f32 %v9867_v2, %v12940_v46  ;;  %v13140_v5 = vadd.f32 %v9976_v39, %v3493_v52  ;;  %v11233_v19 = vld [vmem:[%s11598_s14 + $0x94] sm:$0xf] }
 0x17a   : > { %v9232_v54 = vrot.slane %v9216_v14, 9  ;;  %v2135_v50 = vrot.slane %v11232_v32, 5  ;;  %v13146_v9 = vadd.f32 %v12995_v55, %v12940_v46  ;;  %v13150_v7 = vadd.f32 %v13019_v18, %v12940_v46  ;;  %v9868_v14 = vpop.f32.mrb[40].mxu0 }
 0x17b   : > { %v2134_v38 = vrot.slane %v2132_v58, 4  ;;  %v2139_v60 = vrot.slane %v11233_v19, 5  ;;  %v13155_v39 = vadd.f32 %v13021_v24, %v12940_v46  ;;  %v2119_v44 = vsel %vm11642_vm5, %v9230_v20, %v2118_v1  ;;  %v9869_v24 = vpop.f32.mrb[41].mxu0  ;;  %v11013_v19 = vld [vmem:[#allocation3 + $0x50] sm:$0xff]  }
 0x17c   : > { %v9980_v31 = vpop.f32.mrb[40].mxu1  ;;  %v2122_v45 = vsel %vm11642_vm5, %v2120_v26, %v2121_v48  ;;  %v13161_v55 = vadd.f32 %v9979_v15, %v3496_v62  ;;  %v2126_v52 = vsel %vm11642_vm5, %v9231_v43, %v2125_v35  ;;  %v2129_v2 = vsel %vm11642_vm5, %v2127_v59, %v2128_v23  ;;  %v9871_v35 = vpop.f32.mrb[42].mxu0  ;;  %v9218_v15 = vld [vmem:[%s11598_s14 + $0x9c] sm:$0xe]  ;;  %v11234_v59 = vld [vmem:[%s11598_s14 + $0x98] sm:$0x1]  ;;  %10268 = vmatprep.subr.bf16.mxu1 %v11013_v19 }
 0x17d   : > { %v9981_v18 = vpop.f32.mrb[41].mxu1  ;;  %10761 = vmatmul.mubr.bf16.gmra.mrb[136].mxu0 %v9372_v12  ;;  %v9233_v1 = vrot.slane %v9217_v10, 9  ;;  %v13169_v20 = vadd.f32 %v13063_v49, %v12940_v46  ;;  %v13173_v12 = vsel %vm11642_vm5, %v9232_v54, %v2132_v58  ;;  %v13177_v26 = vsel %vm11642_vm5, %v2134_v38, %v2135_v50  ;;  %v9872_v49 = vpop.f32.mrb[43].mxu0  ;;  %v9220_v62 = vld [vmem:[%s11598_s14 + $0xb4] sm:$0xe] }
 0x17e   : > { %v9982_v40 = vadd.f32 %v9981_v18, %v9980_v31  ;;  %v9983_v29 = vpop.f32.mrb[42].mxu1  ;;  %10764 = vmatprep.mubr.bf16.mxu0 %v9373_v27  ;;  %v9870_v48 = vadd.f32 %v9869_v24, %v9868_v14  ;;  %v13182_v10 = vadd.f32 %v13065_v33, %v12940_v46  ;;  %v2141_v27 = vrot.slane %v2139_v60, 4  ;;  %v9221_v31 = vld [vmem:[%s11598_s14 + $0xc0] sm:$0xe] }
 0x17f   : > { %v9984_v43 = vpop.f32.mrb[43].mxu1  ;;  %v2142_v23 = vrot.slane %v11234_v59, 5  ;;  %v9374_v54 = vcombine.low %v2119_v44, %v2122_v45  ;;  %v9375_v32 = vcombine.low %v2126_v52, %v2129_v2  ;;  %v9873_v38 = vadd.f32 %v9872_v49, %v9871_v35  ;;  %v11235_v24 = vld [vmem:[%s11598_s14 + $0xa0] sm:$0xf] }
 0x180   : > { %v9985_v58 = vadd.f32 %v9984_v43, %v9983_v29  ;;  %v3501_v50 = vadd.f32 %v9870_v48, %v12940_v46  ;;  %v13192_v14 = vsel %vm11642_vm5, %v9233_v1, %v2139_v60  ;;  %v9234_v18 = vrot.slane %v9218_v15, 9  ;;  %v9219_v29 = vld [vmem:[%s11598_s14 + $0xa8] sm:$0xe]  ;;  %v11236_v60 = vld [vmem:[%s11598_s14 + $0xa4] sm:$0x1] }
 0x181   : > { %v2146_v59 = vrot.slane %v11235_v24, 5  ;;  %v3504_v44 = vadd.f32 %v9873_v38, %v12940_v46  ;;  %v9236_v52 = vrot.slane %v9220_v62, 9  ;;  %v2160_v2 = vrot.slane %v12831_v11, 5  ;;  %v11014_v48 = vld [vmem:[#allocation3 + $0x10] sm:$0xff]  }
 0x182   : > { %v13197_v45 = vadd.f32 %v9982_v40, %v3501_v50  ;;  %v13202_v35 = vsel %vm11642_vm5, %v2141_v27, %v2142_v23  ;;  %v2149_v1 = vrot.slane %v11236_v60, 5  ;;  %v2163_v15 = vrot.slane %v12834_v16, 5  ;;  %v9874_v38 = vpop.f32.mrb[44].mxu0  ;;  %v11237_v62 = vld [vmem:[%s11598_s14 + $0xac] sm:$0xf]  ;;  %10269 = vmatpush3.bf16.msra.mxu1 %v11014_v48 }
 0x183   : > { %v9237_v49 = vrot.slane %v9221_v31, 9  ;;  %v13206_v24 = vadd.f32 %v9985_v58, %v3504_v44  ;;  %v9235_v50 = vrot.slane %v9219_v29, 9  ;;  %v2153_v33 = vrot.slane %v11237_v62, 5  ;;  %v9875_v27 = vpop.f32.mrb[45].mxu0 }
 0x184   : > { %v9986_v43 = vpop.f32.mrb[44].mxu1  ;;  %v13211_v11 = vsel %vm11642_vm5, %v9236_v52, %v2160_v2  ;;  %v2162_v60 = vrot.slane %v2160_v2, 4  ;;  %v2167_v16 = vrot.slane %v12878_v4, 5  ;;  %v2170_v58 = vrot.slane %v12885_v21, 5  ;;  %v9877_v48 = vpop.f32.mrb[46].mxu0 }
 0x185   : > { %v9987_v40 = vpop.f32.mrb[45].mxu1  ;;  %10765 = vmatmul.mubr.bf16.gmra.mrb[140].mxu0 %v9374_v54  ;;  %v9377_v31 = vcombine.low %v13192_v14, %v13202_v35  ;;  %v13219_v29 = vsel %vm11642_vm5, %v9234_v18, %v2146_v59  ;;  %v2148_v44 = vrot.slane %v2146_v59, 4  ;;  %v9876_v52 = vadd.f32 %v9875_v27, %v9874_v38  ;;  %v9878_v62 = vpop.f32.mrb[47].mxu0 }
 0x186   : > { %v9988_v23 = vadd.f32 %v9987_v40, %v9986_v43  ;;  %v9989_v19 = vpop.f32.mrb[46].mxu1  ;;  %10768 = vmatprep.mubr.bf16.mxu0 %v9375_v32  ;;  %v13223_v4 = vsel %vm11642_vm5, %v2162_v60, %v2163_v15  ;;  %v13227_v21 = vsel %vm11642_vm5, %v9237_v49, %v2167_v16  ;;  %v2169_v32 = vrot.slane %v2167_v16, 4 }
 0x187   : > { %v9990_v54 = vpop.f32.mrb[47].mxu1  ;;  %v3509_v14 = vadd.f32 %v9876_v52, %v12940_v46  ;;  %v9879_v18 = vadd.f32 %v9878_v62, %v9877_v48  ;;  %v2154_v59 = vsel %vm11642_vm5, %v9235_v50, %v2153_v33  ;;  %v9380_v2 = vcombine.low %v13211_v11, %v13223_v4  ;;  %v15910_v52 = vld [vmem:[#allocation15_spill] sm:$0xff]  ;;  %v15912_v62 = vld [vmem:[#allocation18_spill] sm:$0xff] }
 0x188   : > { %v9991_v43 = vadd.f32 %v9990_v54, %v9989_v19  ;;  %v2155_v35 = vrot.slane %v2153_v33, 4  ;;  %v13236_v38 = vsel %vm11642_vm5, %v2169_v32, %v2170_v58  ;;  %v13240_v15 = vadd.f32 %v12738_v37, %v12976_v25  ;;  %v11238_v19 = vld [vmem:[%s11598_s14 + $0xb0] sm:$0x1]  ;;  %v15911_v54 = vld [vmem:[#allocation11_spill] sm:$0xff] }
 0x189   : > { %v13244_v49 = vadd.f32 %v12747_v34, %v12988_v28  ;;  %v3512_v40 = vadd.f32 %v9879_v18, %v12940_v46  ;;  %v13247_v27 = vadd.f32 %v9988_v23, %v3509_v14  ;;  %v9381_v50 = vcombine.low %v13227_v21, %v13236_v38 }
 0x18a   : > { %v13253_v33 = vadd.f32 %v12764_v36, %v13036_v42  ;;  %v2156_v60 = vrot.slane %v11238_v19, 5  ;;  %v13258_v37 = vadd.f32 %v12770_v22, %v13040_v8  ;;  %v13262_v34 = vadd.f32 %v12814_v47, %v13061_v53  ;;  %v9880_v42 = vpop.f32.mrb[48].mxu0  ;;  %v15907_v22 = vld [vmem:[#allocation12_spill] sm:$0xff] }
 0x18b   : > { %v13266_v25 = vadd.f32 %v12838_v51, %v13077_v63  ;;  %v2150_v28 = vsel %vm11642_vm5, %v2148_v44, %v2149_v1  ;;  %v13270_v36 = vadd.f32 %v9991_v43, %v3512_v40  ;;  %v13274_v58 = vadd.f32 %v12865_v30, %v13081_v41  ;;  %v9881_v51 = vpop.f32.mrb[49].mxu0  ;;  %v15909_v1 = vld [vmem:[#allocation13_spill] sm:$0xff]  ;;  %v15913_v43 = vld [vmem:[#allocation19_spill] sm:$0xff] }
 0x18c   : > { %v9992_v16 = vpop.f32.mrb[48].mxu1  ;;  %v13278_v8 = vadd.f32 %v15907_v22, %v13105_v17  ;;  %v15908_v47 = vcombine.low %v13173_v12, %v13177_v26  ;;  %v13285_v44 = vadd.f32 %v15909_v1, %v13109_v6  ;;  %v13289_v48 = vadd.f32 %v15910_v52, %v13120_v56  ;;  %v9883_v17 = vpop.f32.mrb[50].mxu0 }
 0x18d   : > { %v9993_v23 = vpop.f32.mrb[49].mxu1  ;;  %v13293_v30 = vadd.f32 %v13002_v61, %v13124_v13  ;;  %v9882_v41 = vadd.f32 %v9881_v51, %v9880_v42  ;;  %v13297_v26 = vadd.f32 %v13011_v57, %v13146_v9  ;;  %v13301_v6 = vadd.f32 %v15911_v54, %v13150_v7  ;;  %v9884_v13 = vpop.f32.mrb[51].mxu0  ;;  %v15914_v57 = vld [vmem:[#allocation14_spill] sm:$0xff]  ;;  %v11015_v42 = vld [vmem:[#allocation3 + $0x58] sm:$0xff]   ;;  %v9222_v51 = vld [vmem:[%s11598_s14 + $0xcc] sm:$0xe] }
 0x18e   : > { %10769 = vmatmul.mubr.bf16.gmra.mrb[144].mxu0 %v15908_v47  ;;  %v9994_v53 = vadd.f32 %v9993_v23, %v9992_v16  ;;  %v9995_v63 = vpop.f32.mrb[50].mxu1  ;;  %v13305_v56 = vadd.f32 %v15912_v62, %v13155_v39  ;;  %v2157_v61 = vsel %vm11642_vm5, %v2155_v35, %v2156_v60  ;;  %v13311_v32 = vadd.f32 %v15913_v43, %v13169_v20  ;;  %v11016_v47 = vld [vmem:[#allocation3 + $0x18] sm:$0xff]   ;;  %s338_s14 = sand.u32 1, %s11356_s10  }
 0x18f   : > { %10772 = vmatprep.mubr.bf16.mxu0 %v9377_v31  ;;  %v9996_v12 = vpop.f32.mrb[51].mxu1  ;;  %v13315_v9 = vadd.f32 %v15914_v57, %v13182_v10  ;;  %v3517_v7 = vadd.f32 %v9882_v41, %v12940_v46  ;;  %v9885_v14 = vadd.f32 %v9884_v13, %v9883_v17  ;;  %v9378_v39 = vcombine.low %v13219_v29, %v2150_v28  ;;  %v15916_v62 = vld [vmem:[#allocation16_spill] sm:$0xff]  ;;  %s9061_s24 = sshll.u32 %s338_s14, 8  ;;  %s15747_s26 = scalar_lea.sflag [#allocation5], %s338_s14 }
 0x190   : > { %v9997_v31 = vadd.f32 %v9996_v12, %v9995_v63  ;;  %v9379_v18 = vcombine.low %v2154_v59, %v2157_v61  ;;  %v15915_v63 = vld [vmem:[#allocation10_spill] sm:$0xff]  ;;  %10270 = vmatprep.subr.bf16.mxu1 %v11015_v42  ;;  %v9238_v12 = vrot.slane %v9222_v51, 9  ;;  %v2177_v61 = vrot.slane %v15916_v62, 5  ;;  %v11017_v62 = vld [vmem:[#allocation3 + $0x60] sm:$0xff]   ;;  %s15682_s23 = scalar_lea.vmem [#allocation6], %s9061_s24 }
 0x191   : > { %v3520_v40 = vadd.f32 %v9885_v14, %v12940_v46  ;;  %v13320_v35 = vadd.f32 %v9994_v53, %v3517_v7  ;;  %v2174_v29 = vrot.slane %v15915_v63, 5  ;;  %10271 = vmatpush3.bf16.msra.mxu1 %v11016_v47  ;;  %s8981_s22 = sshll.u32 %s15682_s23, 4  ;;  %s15727_s22 = int_to_ptr.vmem [resolvable:$true] %s8981_s22 }
 0x192   : > { %v9886_v20 = vpop.f32.mrb[52].mxu0  ;;  %10272 = vmatprep.subr.bf16.mxu1 %v11017_v62  ;;  %s11298_s28 = scalar_lea.vmem %s15727_s22, 4096  ;;  %p11305_p2 = scmp.lt.s32.totalorder %s15727_s22, %s11303_s27 }
 0x193   : > { %v13322_v60 = vadd.f32 %v9997_v31, %v3520_v40  ;;  %v9887_v10 = vpop.f32.mrb[53].mxu0  ;;  %v2176_v54 = vrot.slane %v2174_v29, 4  ;;  %p11299_p6 = scmp.ne.s32.totalorder %s15727_s22, %s11298_s28  ;;  %p11306_p3 = scmp.lt.s32.totalorder %s11304_s29, %s11298_s28 }
 0x194   : > { %v9998_v19 = vpop.f32.mrb[52].mxu1  ;;  %v9888_v59 = vadd.f32 %v9887_v10, %v9886_v20  ;;  %v9889_v28 = vpop.f32.mrb[54].mxu0 }
 0x195   : > { %v9999_v16 = vpop.f32.mrb[53].mxu1  ;;  %v9890_v53 = vpop.f32.mrb[55].mxu0  ;;  %v2178_v20 = vsel %vm11642_vm5, %v2176_v54, %v2177_v61  ;;  %p11300_p10 = pnand %p11299_p6, %p16059_p9  ;;  %p11307_p4 = por %p11306_p3, %p11305_p2 }
 0x196   : > { %10773 = vmatmul.mubr.bf16.gmra.mrb[148].mxu0 %v9378_v39  ;;  %v10000_v23 = vadd.f32 %v9999_v16, %v9998_v19  ;;  %v10001_v22 = vpop.f32.mrb[54].mxu1  ;;  %v3525_v41 = vadd.f32 %v9888_v59, %v12940_v46  ;;  %v9891_v17 = vadd.f32 %v9890_v53, %v9889_v28  ;;  %v2175_v19 = vsel %vm11642_vm5, %v9238_v12, %v2174_v29 }
 0x197   : > { %10776 = vmatprep.mubr.bf16.mxu0 %v9379_v18  ;;  %v10002_v1 = vpop.f32.mrb[55].mxu1  ;;  %p11301_p12 = pneg %p11300_p10 }
 0x198   : > { %v10003_v52 = vadd.f32 %v10002_v1, %v10001_v22  ;;  %v3528_v13 = vadd.f32 %v9891_v17, %v12940_v46  ;;  %v13329_v31 = vadd.f32 %v10000_v23, %v3525_v41 }
 0x199   : > { %p11308_p7 = pnand %p11307_p4, %p11301_p12 }
 0x19a   : > { %v13331_v57 = vadd.f32 %v10003_v52, %v3528_v13  ;;  %v9892_v7 = vpop.f32.mrb[56].mxu0 }
 0x19b   : > { %v9893_v39 = vpop.f32.mrb[57].mxu0 }
 0x19c   : > { %v10004_v43 = vpop.f32.mrb[56].mxu1  ;;  %v9894_v16 = vadd.f32 %v9893_v39, %v9892_v7  ;;  %v9895_v42 = vpop.f32.mrb[58].mxu0 }
 0x19d   : > { %v10005_v14 = vpop.f32.mrb[57].mxu1  ;;  %v9896_v23 = vpop.f32.mrb[59].mxu0 }
 0x19e   : > { %10777 = vmatmul.mubr.bf16.gmra.mrb[152].mxu0 %v9380_v2  ;;  %v10006_v18 = vadd.f32 %v10005_v14, %v10004_v43  ;;  %v10007_v40 = vpop.f32.mrb[58].mxu1  ;;  %v3533_v11 = vadd.f32 %v9894_v16, %v12940_v46  ;;  %v9897_v4 = vadd.f32 %v9896_v23, %v9895_v42  ;;  %v9382_v2 = vcombine.low %v2175_v19, %v2178_v20  ;;  %v11018_v43 = vld [vmem:[#allocation3 + $0x20] sm:$0xff]  }
 0x19f   : > { %10780 = vmatprep.mubr.bf16.mxu0 %v9381_v50  ;;  %v10008_v10 = vpop.f32.mrb[59].mxu1  ;;  %10273 = vmatpush3.bf16.msra.mxu1 %v11018_v43 }
 0x1a0   : > { %v10009_v22 = vadd.f32 %v10008_v10, %v10007_v40  ;;  %v3536_v47 = vadd.f32 %v9897_v4, %v12940_v46  ;;  %v13345_v51 = vadd.f32 %v10006_v18, %v3533_v11 }
 0x1a2   : > { %v13347_v38 = vadd.f32 %v10009_v22, %v3536_v47  ;;  %v9898_v50 = vpop.f32.mrb[60].mxu0 }
 0x1a3   : > { %v9899_v29 = vpop.f32.mrb[61].mxu0 }
 0x1a4   : > { %v10010_v21 = vpop.f32.mrb[60].mxu1  ;;  %v9900_v1 = vadd.f32 %v9899_v29, %v9898_v50  ;;  %v9901_v53 = vpop.f32.mrb[62].mxu0 }
 0x1a5   : > { %v10011_v63 = vpop.f32.mrb[61].mxu1  ;;  %v9902_v41 = vpop.f32.mrb[63].mxu0 }
 0x1a6   : > { %10781 = vmatmul.mubr.bf16.gmra.mrb[156].mxu0 %v9382_v2  ;;  %v10012_v59 = vadd.f32 %v10011_v63, %v10010_v21  ;;  %v10013_v28 = vpop.f32.mrb[62].mxu1  ;;  %v3541_v12 = vadd.f32 %v9900_v1, %v12940_v46  ;;  %v9903_v54 = vadd.f32 %v9902_v41, %v9901_v53 }
 0x1a7   : > { %v10014_v52 = vpop.f32.mrb[63].mxu1 }
 0x1a8   : > { %v10015_v17 = vadd.f32 %v10014_v52, %v10013_v28  ;;  %v3544_v61 = vadd.f32 %v9903_v54, %v12940_v46  ;;  %v13351_v13 = vadd.f32 %v10012_v59, %v3541_v12 }
 0x1aa   : > { %v13353_v7 = vadd.f32 %v10015_v17, %v3544_v61  ;;  %v10032_v14 = vpop.f32.mrb[64].mxu0 }
 0x1ab   : > { %v10033_v18 = vpop.f32.mrb[65].mxu0 }
 0x1ac   : > { %v10144_v39 = vpop.f32.mrb[64].mxu1  ;;  %v10034_v19 = vadd.f32 %v10033_v18, %v10032_v14  ;;  %v10035_v20 = vpop.f32.mrb[66].mxu0 }
 0x1ad   : > { %v10145_v40 = vpop.f32.mrb[65].mxu1  ;;  %v10036_v10 = vpop.f32.mrb[67].mxu0 }
 0x1ae   : > { %v10146_v16 = vadd.f32 %v10145_v40, %v10144_v39  ;;  %v10147_v42 = vpop.f32.mrb[66].mxu1  ;;  %v3743_v22 = vadd.f32 %v10034_v19, %v13240_v15  ;;  %v10037_v46 = vadd.f32 %v10036_v10, %v10035_v20  ;;  %v11019_v20 = vld [vmem:[#allocation3 + $0x68] sm:$0xff]  }
 0x1af   : > { %v10148_v23 = vpop.f32.mrb[67].mxu1  ;;  %10274 = vmatprep.subr.bf16.mxu1 %v11019_v20 }
 0x1b0   : > { %v10149_v11 = vadd.f32 %v10148_v23, %v10147_v42  ;;  %v3746_v4 = vadd.f32 %v10037_v46, %v13244_v49  ;;  %v13357_v2 = vadd.f32 %v10146_v16, %v3743_v22 }
 0x1b2   : > { %v10038_v47 = vpop.f32.mrb[68].mxu0  ;;  %v13359_v50 = vadd.f32 %v10149_v11, %v3746_v4 }
 0x1b3   : > { %v10039_v63 = vpop.f32.mrb[69].mxu0 }
 0x1b4   : > { %v10150_v21 = vpop.f32.mrb[68].mxu1  ;;  %v10040_v59 = vadd.f32 %v10039_v63, %v10038_v47  ;;  %v10041_v28 = vpop.f32.mrb[70].mxu0 }
 0x1b5   : > { %v10151_v29 = vpop.f32.mrb[69].mxu1  ;;  %v10042_v52 = vpop.f32.mrb[71].mxu0 }
 0x1b6   : > { %v10152_v1 = vadd.f32 %v10151_v29, %v10150_v21  ;;  %v10153_v53 = vpop.f32.mrb[70].mxu1  ;;  %v3751_v15 = vadd.f32 %v10040_v59, %v13253_v33  ;;  %v10043_v17 = vadd.f32 %v10042_v52, %v10041_v28 }
 0x1b7   : > { %v10154_v41 = vpop.f32.mrb[71].mxu1 }
 0x1b8   : > { %v10155_v12 = vadd.f32 %v10154_v41, %v10153_v53  ;;  %v3754_v49 = vadd.f32 %v10043_v17, %v13258_v37  ;;  %v13363_v54 = vadd.f32 %v10152_v1, %v3751_v15  ;;  %v11020_v37 = vld [vmem:[#allocation3 + $0x28] sm:$0xff]  }
 0x1b9   : > { %10275 = vmatpush3.bf16.msra.mxu1 %v11020_v37 }
 0x1ba   : > { %v10044_v62 = vpop.f32.mrb[72].mxu0  ;;  %v13365_v61 = vadd.f32 %v10155_v12, %v3754_v49 }
 0x1bb   : > { %v10045_v43 = vpop.f32.mrb[73].mxu0 }
 0x1bc   : > { %v10046_v14 = vadd.f32 %v10045_v43, %v10044_v62  ;;  %v10047_v39 = vpop.f32.mrb[74].mxu0  ;;  %v10156_v18 = vpop.f32.mrb[72].mxu1 }
 0x1bd   : > { %v10048_v40 = vpop.f32.mrb[75].mxu0  ;;  %v10157_v19 = vpop.f32.mrb[73].mxu1 }
 0x1be   : > { %v3759_v16 = vadd.f32 %v10046_v14, %v13262_v34  ;;  %v10049_v42 = vadd.f32 %v10048_v40, %v10047_v39  ;;  %v10158_v33 = vadd.f32 %v10157_v19, %v10156_v18  ;;  %v10159_v10 = vpop.f32.mrb[74].mxu1 }
 0x1bf   : > { %v10160_v23 = vpop.f32.mrb[75].mxu1 }
 0x1c0   : > { %v3762_v22 = vadd.f32 %v10049_v42, %v13266_v25  ;;  %v10161_v46 = vadd.f32 %v10160_v23, %v10159_v10  ;;  %v13369_v11 = vadd.f32 %v10158_v33, %v3759_v16 }
 0x1c2   : > { %v10050_v4 = vpop.f32.mrb[76].mxu0  ;;  %v13371_v47 = vadd.f32 %v10161_v46, %v3762_v22 }
 0x1c3   : > { %v10051_v21 = vpop.f32.mrb[77].mxu0 }
 0x1c4   : > { %v10052_v63 = vadd.f32 %v10051_v21, %v10050_v4  ;;  %v10053_v29 = vpop.f32.mrb[78].mxu0  ;;  %v10162_v59 = vpop.f32.mrb[76].mxu1 }
 0x1c5   : > { %v10054_v34 = vpop.f32.mrb[79].mxu0  ;;  %v10163_v28 = vpop.f32.mrb[77].mxu1 }
 0x1c6   : > { %v3767_v1 = vadd.f32 %v10052_v63, %v13274_v58  ;;  %v10055_v53 = vadd.f32 %v10054_v34, %v10053_v29  ;;  %v10164_v52 = vadd.f32 %v10163_v28, %v10162_v59  ;;  %v10165_v41 = vpop.f32.mrb[78].mxu1 }
 0x1c7   : > { %v10166_v15 = vpop.f32.mrb[79].mxu1 }
 0x1c8   : > { %v3770_v25 = vadd.f32 %v10055_v53, %v13278_v8  ;;  %v10167_v17 = vadd.f32 %v10166_v15, %v10165_v41  ;;  %v13375_v12 = vadd.f32 %v10164_v52, %v3767_v1  ;;  %v4365_v8 = vld [vmem:[#allocation2 + $0x18] sm:$0x1] }
 0x1ca   : > { %v10056_v49 = vpop.f32.mrb[80].mxu0  ;;  %v13377_v62 = vadd.f32 %v10167_v17, %v3770_v25  ;;  %v15919_v25 = vmov 0 }
 0x1cb   : > { %v10057_v43 = vpop.f32.mrb[81].mxu0  ;;  %v15920_v25 = vsel %vm13397_vm10, 4294967295, %v15919_v25 }
 0x1cc   : > { %v10058_v14 = vadd.f32 %v10057_v43, %v10056_v49  ;;  %v10059_v39 = vpop.f32.mrb[82].mxu0  ;;  %15921 = vst [vmem:[#allocation22_spill] sm:$0xff] %v15920_v25  ;;  %v4362_v43 = vld [vmem:[#allocation2 + $0xc] sm:$0x1] }
 0x1cd   : > { %v10060_v18 = vpop.f32.mrb[83].mxu0 }
 0x1ce   : > { %v3775_v40 = vadd.f32 %v10058_v14, %v13285_v44  ;;  %v10168_v19 = vpop.f32.mrb[80].mxu1  ;;  %v10061_v58 = vadd.f32 %v10060_v18, %v10059_v39  ;;  %v4366_v44 = vsel %vm13383_vm8, 0, %v4365_v8  ;;  %v4363_v39 = vsel %vm13383_vm8, 0, %v4362_v43 }
 0x1cf   : > { %v10169_v20 = vpop.f32.mrb[81].mxu1  ;;  %4367 = vst [vmem:[#allocation2 + $0x18] sm:$0x1] %v4366_v44  ;;  %4364 = vst [vmem:[#allocation2 + $0xc] sm:$0x1] %v4363_v39 }
 0x1d0   : > { %v3778_v16 = vadd.f32 %v10061_v58, %v13289_v48  ;;  %v10170_v42 = vadd.f32 %v10169_v20, %v10168_v19  ;;  %v10171_v33 = vpop.f32.mrb[82].mxu1  ;;  %v4412_v58 = vld [vmem:[#allocation2 + $0x14] sm:$0x1] }
 0x1d1   : > { %v10172_v10 = vpop.f32.mrb[83].mxu1 }
 0x1d2   : > { %v10173_v37 = vadd.f32 %v10172_v10, %v10171_v33  ;;  %v10062_v22 = vpop.f32.mrb[84].mxu0  ;;  %v13389_v46 = vadd.f32 %v10170_v42, %v3775_v40  ;;  %v4413_v42 = vsel %vm13397_vm10, 0, %v4412_v58  ;;  %v4371_v33 = vld [vmem:[#allocation2 + $0x30] sm:$0x1]  ;;  %v4418_v58 = vld [vmem:[#allocation2 + $0x2c] sm:$0x1] }
 0x1d3   : > { %v10063_v48 = vpop.f32.mrb[85].mxu0  ;;  %4414 = vst [vmem:[#allocation2 + $0x14] sm:$0x1] %v4413_v42  ;;  %v11022_v42 = vld [vmem:[#allocation3 + $0x70] sm:$0xff]  }
 0x1d4   : > { %v10064_v4 = vadd.f32 %v10063_v48, %v10062_v22  ;;  %v10065_v21 = vpop.f32.mrb[86].mxu0  ;;  %v13391_v63 = vadd.f32 %v10173_v37, %v3778_v16  ;;  %v4372_v37 = vsel %vm13383_vm8, 0, %v4371_v33  ;;  %10276 = vmatprep.subr.bf16.mxu1 %v11022_v42 }
 0x1d5   : > { %v10066_v29 = vpop.f32.mrb[87].mxu0  ;;  %4373 = vst [vmem:[#allocation2 + $0x30] sm:$0x1] %v4372_v37  ;;  %v11023_v37 = vld [vmem:[#allocation3 + $0x80] sm:$0xff]  }
 0x1d6   : > { %v3783_v59 = vadd.f32 %v10064_v4, %v13293_v30  ;;  %v10067_v34 = vadd.f32 %v10066_v29, %v10065_v21  ;;  %v4368_v29 = vld [vmem:[#allocation2 + $0x24] sm:$0x1] }
 0x1d7   : > { %v10174_v28 = vpop.f32.mrb[84].mxu1 }
 0x1d8   : > { %v3786_v1 = vadd.f32 %v10067_v34, %v13297_v26  ;;  %v10175_v53 = vpop.f32.mrb[85].mxu1  ;;  %v4415_v26 = vld [vmem:[#allocation2 + $0x20] sm:$0x1] }
 0x1d9   : > { %v10176_v52 = vadd.f32 %v10175_v53, %v10174_v28  ;;  %v10177_v41 = vpop.f32.mrb[86].mxu1  ;;  %v4416_v19 = vsel %vm13397_vm10, 0, %v4415_v26  ;;  %v4369_v28 = vsel %vm13383_vm8, 0, %v4368_v29  ;;  %v4421_v53 = vld [vmem:[#allocation2 + $0x38] sm:$0x1] }
 0x1da   : > { %v10178_v15 = vpop.f32.mrb[87].mxu1  ;;  %4417 = vst [vmem:[#allocation2 + $0x20] sm:$0x1] %v4416_v19  ;;  %4370 = vst [vmem:[#allocation2 + $0x24] sm:$0x1] %v4369_v28 }
 0x1db   : > { %v10179_v17 = vadd.f32 %v10178_v15, %v10177_v41  ;;  %v13401_v14 = vadd.f32 %v10176_v52, %v3783_v59 }
 0x1dc   : > { %v10068_v49 = vpop.f32.mrb[88].mxu0 }
 0x1dd   : > { %v10069_v30 = vpop.f32.mrb[89].mxu0  ;;  %v13407_v20 = vadd.f32 %v10179_v17, %v3786_v1 }
 0x1de   : > { %v10070_v18 = vadd.f32 %v10069_v30, %v10068_v49  ;;  %v10071_v40 = vpop.f32.mrb[90].mxu0 }
 0x1df   : > { %v10072_v16 = vpop.f32.mrb[91].mxu0 }
 0x1e0   : > { %v3791_v8 = vadd.f32 %v10070_v18, %v13301_v6  ;;  %v10073_v10 = vadd.f32 %v10072_v16, %v10071_v40  ;;  %v11021_v16 = vld [vmem:[#allocation3 + $0xc0] sm:$0xff]  }
 0x1e1   : > { %v10180_v22 = vpop.f32.mrb[88].mxu1  ;;  %10376 = vmatprep.subr.bf16.mxu0 %v11021_v16 }
 0x1e2   : > { %v3794_v44 = vadd.f32 %v10073_v10, %v13305_v56  ;;  %v10181_v48 = vpop.f32.mrb[89].mxu1  ;;  %v4422_v56 = vsel %vm13397_vm10, 0, %v4421_v53  ;;  %v4419_v10 = vsel %vm13397_vm10, 0, %v4418_v58  ;;  %10377 = vmatpush3.bf16.msra.mxu0 %v11023_v37 }
 0x1e3   : > { %v10182_v4 = vadd.f32 %v10181_v48, %v10180_v22  ;;  %v10183_v21 = vpop.f32.mrb[90].mxu1  ;;  %4423 = vst [vmem:[#allocation2 + $0x38] sm:$0x1] %v4422_v56  ;;  %4420 = vst [vmem:[#allocation2 + $0x2c] sm:$0x1] %v4419_v10  ;;  %v11025_v48 = vld [vmem:[#allocation3 + $0xc8] sm:$0xff]  }
 0x1e4   : > { %v10184_v59 = vpop.f32.mrb[91].mxu1  ;;  %10378 = vmatprep.subr.bf16.mxu0 %v11025_v48 }
 0x1e5   : > { %v10074_v34 = vpop.f32.mrb[92].mxu0  ;;  %v10185_v1 = vadd.f32 %v10184_v59, %v10183_v21  ;;  %v13417_v52 = vadd.f32 %v10182_v4, %v3791_v8 }
 0x1e6   : > { %v10075_v6 = vpop.f32.mrb[93].mxu0 }
 0x1e7   : > { %v10076_v41 = vadd.f32 %v10075_v6, %v10074_v34  ;;  %v10077_v15 = vpop.f32.mrb[94].mxu0  ;;  %v13421_v49 = vadd.f32 %v10185_v1, %v3794_v44  ;;  %v11026_v34 = vld [vmem:[#allocation3 + $0x88] sm:$0xff]   ;;  %v4374_v1 = vld [vmem:[#allocation2 + $0x3c] sm:$0x1]  ;;  %v4427_v6 = vld [vmem:[#allocation2 + $0x50] sm:$0x1] }
 0x1e8   : > { %v10078_v17 = vpop.f32.mrb[95].mxu0  ;;  %v4375_v56 = vsel %vm13383_vm8, 0, %v4374_v1  ;;  %10379 = vmatpush3.bf16.msra.mxu0 %v11026_v34 }
 0x1e9   : > { %v3799_v43 = vadd.f32 %v10076_v41, %v13311_v32  ;;  %v10079_v30 = vadd.f32 %v10078_v17, %v10077_v15  ;;  %v10186_v39 = vpop.f32.mrb[92].mxu1  ;;  %v11024_v32 = vld [vmem:[#allocation3 + $0x30] sm:$0xff]   ;;  %v4428_v17 = vsel %vm13397_vm10, 0, %v4427_v6  ;;  %4376 = vst [vmem:[#allocation2 + $0x3c] sm:$0x1] %v4375_v56 }
 0x1ea   : > { %v10187_v18 = vpop.f32.mrb[93].mxu1  ;;  %10277 = vmatpush3.bf16.msra.mxu1 %v11024_v32  ;;  %4429 = vst [vmem:[#allocation2 + $0x50] sm:$0x1] %v4428_v17  ;;  %v4424_v32 = vld [vmem:[#allocation2 + $0x44] sm:$0x1] }
 0x1eb   : > { %v3802_v26 = vadd.f32 %v10079_v30, %v13315_v9  ;;  %v10188_v40 = vadd.f32 %v10187_v18, %v10186_v39  ;;  %v10189_v19 = vpop.f32.mrb[94].mxu1  ;;  %v4377_v9 = vld [vmem:[#allocation2 + $0x48] sm:$0x1]  ;;  %v4425_v48 = vsel %vm13397_vm10, 0, %v4424_v32 }
 0x1ec   : > { %v10190_v33 = vpop.f32.mrb[95].mxu1  ;;  %v4378_v59 = vsel %vm13383_vm8, 0, %v4377_v9  ;;  %4426 = vst [vmem:[#allocation2 + $0x44] sm:$0x1] %v4425_v48  ;;  %v4430_v48 = vld [vmem:[#allocation2 + $0x5c] sm:$0x1] }
 0x1ed   : > { %v10191_v22 = vadd.f32 %v10190_v33, %v10189_v19  ;;  %v13427_v4 = vadd.f32 %v10188_v40, %v3799_v43  ;;  %4379 = vst [vmem:[#allocation2 + $0x48] sm:$0x1] %v4378_v59  ;;  %v15922_v43 = vld [vmem:[#allocation21_spill] sm:$0xff] }
 0x1ef   : > { %v10080_v8 = vpop.f32.mrb[96].mxu0  ;;  %v13431_v53 = vadd.f32 %v10191_v22, %v3802_v26 }
 0x1f0   : > { %v10081_v44 = vpop.f32.mrb[97].mxu0 }
 0x1f1   : > { %v10082_v21 = vadd.f32 %v10081_v44, %v10080_v8  ;;  %v10083_v29 = vpop.f32.mrb[98].mxu0 }
 0x1f2   : > { %v10084_v28 = vpop.f32.mrb[99].mxu0 }
 0x1f3   : > { %v3807_v41 = vadd.f32 %v10082_v21, %v13116_v3  ;;  %v10085_v15 = vadd.f32 %v10084_v28, %v10083_v29 }
 0x1f4   : > { %v10192_v39 = vpop.f32.mrb[96].mxu1 }
 0x1f5   : > { %v3810_v30 = vadd.f32 %v10085_v15, %v15922_v43  ;;  %v10193_v18 = vpop.f32.mrb[97].mxu1 }
 0x1f6   : > { %v10194_v40 = vadd.f32 %v10193_v18, %v10192_v39  ;;  %v10195_v19 = vpop.f32.mrb[98].mxu1  ;;  %v11028_v39 = vld [vmem:[#allocation3 + $0x90] sm:$0xff]  }
 0x1f7   : > { %v10196_v26 = vpop.f32.mrb[99].mxu1 }
 0x1f8   : > { %v10086_v58 = vpop.f32.mrb[100].mxu0  ;;  %v10197_v16 = vadd.f32 %v10196_v26, %v10195_v19  ;;  %v13439_v42 = vadd.f32 %v10194_v40, %v3807_v41  ;;  %v11029_v40 = vld [vmem:[#allocation3 + $0xd8] sm:$0xff]   ;;  %v4383_v19 = vld [vmem:[#allocation2 + $0x60] sm:$0x1] }
 0x1f9   : > { %v10087_v3 = vpop.f32.mrb[101].mxu0  ;;  %v4384_v26 = vsel %vm13383_vm8, 0, %v4383_v19  ;;  %v11036_v19 = vld [vmem:[#allocation3 + $0xa8] sm:$0xff]  }
 0x1fa   : > { %v10088_v33 = vadd.f32 %v10087_v3, %v10086_v58  ;;  %v10089_v8 = vpop.f32.mrb[102].mxu0  ;;  %v13441_v37 = vadd.f32 %v10197_v16, %v3810_v30  ;;  %v11027_v30 = vld [vmem:[#allocation3 + $0xd0] sm:$0xff]   ;;  %4385 = vst [vmem:[#allocation2 + $0x60] sm:$0x1] %v4384_v26  ;;  %v11030_v3 = vld [vmem:[#allocation3 + $0x98] sm:$0xff]  }
 0x1fb   : > { %v10090_v10 = vpop.f32.mrb[103].mxu0  ;;  %10380 = vmatprep.subr.bf16.mxu0 %v11027_v30 }
 0x1fc   : > { %v3815_v22 = vadd.f32 %v10088_v33, %v13140_v5  ;;  %v10091_v44 = vadd.f32 %v10090_v10, %v10089_v8  ;;  %10381 = vmatpush3.bf16.msra.mxu0 %v11028_v39  ;;  %v4380_v33 = vld [vmem:[#allocation2 + $0x54] sm:$0x1] }
 0x1fd   : > { %v10198_v9 = vpop.f32.mrb[100].mxu1  ;;  %10382 = vmatprep.subr.bf16.mxu0 %v11029_v40  ;;  %v4381_v10 = vsel %vm13383_vm8, 0, %v4380_v33 }
 0x1fe   : > { %v3818_v21 = vadd.f32 %v10091_v44, %v13161_v55  ;;  %v10199_v29 = vpop.f32.mrb[101].mxu1  ;;  %4382 = vst [vmem:[#allocation2 + $0x54] sm:$0x1] %v4381_v10 }
 0x1ff   : > { %v10200_v59 = vadd.f32 %v10199_v29, %v10198_v9  ;;  %v10201_v34 = vpop.f32.mrb[102].mxu1  ;;  %v11031_v29 = vld [vmem:[#allocation3 + $0xe0] sm:$0xff]  }
 0x200   : > { %v10202_v28 = vpop.f32.mrb[103].mxu1  ;;  %10383 = vmatpush3.bf16.msra.mxu0 %v11030_v3 }
 0x201   : > { %v10203_v1 = vadd.f32 %v10202_v28, %v10201_v34  ;;  %v13447_v41 = vadd.f32 %v10200_v59, %v3815_v22  ;;  %v11032_v59 = vld [vmem:[#allocation3 + $0x78] sm:$0xff]   ;;  %v11033_v34 = vld [vmem:[#allocation3 + $0xa0] sm:$0xff]   ;;  %10384 = vmatprep.subr.bf16.mxu0 %v11031_v29 }
 0x202   : > { %v10092_v6 = vpop.f32.mrb[104].mxu0  ;;  %10278 = vmatprep.subr.bf16.mxu1 %v11032_v59  ;;  %v11037_v59 = vld [vmem:[#allocation3 + $0xf0] sm:$0xff]  }
 0x203   : > { %v10093_v15 = vpop.f32.mrb[105].mxu0  ;;  %v13449_v17 = vadd.f32 %v10203_v1, %v3818_v21  ;;  %v11034_v1 = vld [vmem:[#allocation3 + $0x38] sm:$0xff]  }
 0x204   : > { %v10094_v56 = vadd.f32 %v10093_v15, %v10092_v6  ;;  %v10095_v5 = vpop.f32.mrb[106].mxu0  ;;  %v11035_v6 = vld [vmem:[#allocation3 + $0xe8] sm:$0xff]   ;;  %v4389_v15 = vld [vmem:[#allocation2 + $0x78] sm:$0x1]  ;;  %10279 = vmatpush3.bf16.msra.mxu1 %v11034_v1  ;;  %10385 = vmatpush3.bf16.msra.mxu0 %v11033_v34  ;;  %v11038_v34 = vld [vmem:[#allocation3 + $0xb0] sm:$0xff]  }
 0x205   : > { %v10096_v43 = vpop.f32.mrb[107].mxu0  ;;  %10386 = vmatprep.subr.bf16.mxu0 %v11035_v6  ;;  %v11039_v1 = vld [vmem:[#allocation3 + $0xf8] sm:$0xff]  }
 0x206   : > { %v3823_v18 = vadd.f32 %v10094_v56, %v13197_v45  ;;  %v10097_v55 = vadd.f32 %v10096_v43, %v10095_v5  ;;  %v4433_v45 = vld [vmem:[#allocation2 + $0x68] sm:$0x1]  ;;  %v4390_v5 = vsel %vm13383_vm8, 0, %v4389_v15  ;;  %v4386_v43 = vld [vmem:[#allocation2 + $0x6c] sm:$0x1] }
 0x207   : > { %v10204_v58 = vpop.f32.mrb[104].mxu1  ;;  %v4434_v32 = vsel %vm13397_vm10, 0, %v4433_v45  ;;  %4391 = vst [vmem:[#allocation2 + $0x78] sm:$0x1] %v4390_v5  ;;  %v4439_v45 = vld [vmem:[#allocation2 + $0x80] sm:$0x1] }
 0x208   : > { %v3826_v16 = vadd.f32 %v10097_v55, %v13206_v24  ;;  %v10205_v8 = vpop.f32.mrb[105].mxu1  ;;  %4435 = vst [vmem:[#allocation2 + $0x68] sm:$0x1] %v4434_v32  ;;  %v4431_v24 = vsel %vm13397_vm10, 0, %v4430_v48  ;;  %v4387_v55 = vsel %vm13383_vm8, 0, %v4386_v43  ;;  %10387 = vmatpush3.bf16.msra.mxu0 %v11036_v19  ;;  %v4440_v32 = vsel %vm13397_vm10, 0, %v4439_v45 }
 0x209   : > { %v10206_v22 = vadd.f32 %v10205_v8, %v10204_v58  ;;  %v10207_v44 = vpop.f32.mrb[106].mxu1  ;;  %4432 = vst [vmem:[#allocation2 + $0x5c] sm:$0x1] %v4431_v24  ;;  %4388 = vst [vmem:[#allocation2 + $0x6c] sm:$0x1] %v4387_v55  ;;  %10388 = vmatprep.subr.bf16.mxu0 %v11037_v59 }
 0x20a   : > { %v10208_v9 = vpop.f32.mrb[107].mxu1  ;;  %4441 = vst [vmem:[#allocation2 + $0x80] sm:$0x1] %v4440_v32  ;;  %v4436_v24 = vld [vmem:[#allocation2 + $0x74] sm:$0x1] }
 0x20b   : > { %v10209_v21 = vadd.f32 %v10208_v9, %v10207_v44  ;;  %v13461_v28 = vadd.f32 %v10206_v22, %v3823_v18  ;;  %v4437_v29 = vsel %vm13397_vm10, 0, %v4436_v24  ;;  %v4395_v15 = vld [vmem:[#allocation2 + $0x90] sm:$0x1]  ;;  %v4445_v19 = vld [vmem:[#allocation2 + $0x98] sm:$0x1] }
 0x20c   : > { %4438 = vst [vmem:[#allocation2 + $0x74] sm:$0x1] %v4437_v29  ;;  %10389 = vmatpush3.bf16.msra.mxu0 %v11038_v34 }
 0x20d   : > { %v13465_v30 = vadd.f32 %v10209_v21, %v3826_v16  ;;  %10390 = vmatprep.subr.bf16.mxu0 %v11039_v1 }
 0x20e   : > { %v10098_v56 = vpop.f32.mrb[108].mxu0 }
 0x20f   : > { %v10099_v39 = vpop.f32.mrb[109].mxu0 }
 0x210   : > { %v10100_v18 = vadd.f32 %v10099_v39, %v10098_v56  ;;  %v10101_v40 = vpop.f32.mrb[110].mxu0  ;;  %v4392_v56 = vld [vmem:[#allocation2 + $0x84] sm:$0x1]  ;;  %v4396_v39 = vsel %vm13383_vm8, 0, %v4395_v15 }
 0x211   : > { %v10210_v26 = vpop.f32.mrb[108].mxu1  ;;  %v10102_v58 = vpop.f32.mrb[111].mxu0  ;;  %v4393_v55 = vsel %vm13383_vm8, 0, %v4392_v56  ;;  %4397 = vst [vmem:[#allocation2 + $0x90] sm:$0x1] %v4396_v39 }
 0x212   : > { %v3831_v3 = vadd.f32 %v10100_v18, %v13247_v27  ;;  %v10103_v33 = vadd.f32 %v10102_v58, %v10101_v40  ;;  %v10211_v8 = vpop.f32.mrb[109].mxu1  ;;  %v11040_v40 = vld [vmem:[#allocation3 + $0xb8] sm:$0xff]   ;;  %4394 = vst [vmem:[#allocation2 + $0x84] sm:$0x1] %v4393_v55 }
 0x213   : > { %v10212_v16 = vadd.f32 %v10211_v8, %v10210_v26  ;;  %v10213_v10 = vpop.f32.mrb[110].mxu1  ;;  %10391 = vmatpush3.bf16.msra.mxu0 %v11040_v40 }
 0x214   : > { %v3834_v22 = vadd.f32 %v10103_v33, %v13270_v36  ;;  %v10214_v44 = vpop.f32.mrb[111].mxu1  ;;  %v11369_v36 = vmov 0   ;;  %v4446_v33 = vsel %vm13397_vm10, 0, %v4445_v19 }
 0x215   : > { %v10215_v48 = vadd.f32 %v10214_v44, %v10213_v10  ;;  %v13473_v9 = vadd.f32 %v10212_v16, %v3831_v3  ;;  %4351 = vst [vmem:[#allocation2] sm:$0xf] %v11369_v36  ;;  %4352 = vst [vmem:[#allocation2 + $0x4] sm:$0xf] %v11369_v36  ;;  %10888 = vset.pattern.permute.xlu0 %v11369_v36 }
 0x216   : > { %4353 = vst [vmem:[#allocation2 + $0x8] sm:$0x1] %v11369_v36  ;;  %4355 = vst [vmem:[#allocation2 + $0xcc] sm:$0xf] %v11369_v36 }
 0x217   : > { %v13475_v21 = vadd.f32 %v10215_v48, %v3834_v22  ;;  %4356 = vst [vmem:[#allocation2 + $0xd0] sm:$0xf] %v11369_v36  ;;  %4357 = vst [vmem:[#allocation2 + $0xd4] sm:$0x1] %v11369_v36 }
 0x218   : > { %v10104_v27 = vpop.f32.mrb[112].mxu0  ;;  %4447 = vst [vmem:[#allocation2 + $0x98] sm:$0x1] %v4446_v33 }
 0x219   : > { %v10105_v6 = vpop.f32.mrb[113].mxu0 }
 0x21a   : > { %v10106_v5 = vadd.f32 %v10105_v6, %v10104_v27  ;;  %v10107_v43 = vpop.f32.mrb[114].mxu0 }
 0x21b   : > { %v10108_v18 = vpop.f32.mrb[115].mxu0 }
 0x21c   : > { %v3839_v26 = vadd.f32 %v10106_v5, %v13320_v35  ;;  %v10216_v58 = vpop.f32.mrb[112].mxu1  ;;  %v10109_v3 = vadd.f32 %v10108_v18, %v10107_v43  ;;  %v4992_v44 = vld [vmem:[#allocation2] sm:$0xf]  ;;  %v4993_v32 = vld [vmem:[#allocation2 + $0x4] sm:$0xf] }
 0x21d   : > { %v10217_v8 = vpop.f32.mrb[113].mxu1  ;;  %v5024_v24 = vld [vmem:[#allocation2 + $0x8] sm:$0x1]  ;;  %v5041_v27 = vshrl.u32 %v4992_v44, 16  ;;  %v5044_v35 = vshll.u32 %v4992_v44, 16  ;;  %v5050_v29 = vshll.u32 %v4993_v32, 16 }
 0x21e   : > { %v3842_v16 = vadd.f32 %v10109_v3, %v13322_v60  ;;  %v10218_v10 = vadd.f32 %v10217_v8, %v10216_v58  ;;  %v10219_v45 = vpop.f32.mrb[114].mxu1  ;;  %v5054_v59 = vshrl.u32 %v4993_v32, 16  ;;  %v5060_v34 = vshll.u32 %v5024_v24, 16 }
 0x21f   : > { %v10220_v22 = vpop.f32.mrb[115].mxu1  ;;  %v5043_v1 = vrot.slane %v5041_v27, 4  ;;  %v5046_v36 = vrot.slane %v5044_v35, 5  ;;  %v5052_v56 = vrot.slane %v5050_v29, 5  ;;  %v5493_v27 = vrot.slane %v5024_v24, 5 }
 0x220   : > { %v10221_v48 = vadd.f32 %v10220_v22, %v10219_v45  ;;  %v13487_v6 = vadd.f32 %v10218_v10, %v3839_v26  ;;  %v5056_v5 = vrot.slane %v5054_v59, 4  ;;  %v5062_v19 = vrot.slane %v5060_v34, 5  ;;  %v4442_v29 = vld [vmem:[#allocation2 + $0x8c] sm:$0x1]  ;;  %v5424_v59 = vld [vmem:[#allocation2] sm:$0xe] }
 0x221   : > { %v5047_v39 = vor.u32 %v5046_v36, %v5043_v1  ;;  %v5490_v26 = vrot.slane %v4993_v32, 5  ;;  %v9536_v35 = vcombine.low %v4992_v44, %v4993_v32 }
 0x222   : > { %v13489_v15 = vadd.f32 %v10221_v48, %v3842_v16  ;;  %v5057_v40 = vor.u32 %v5056_v5, %v5052_v56 }
 0x223   : > { %v10110_v60 = vpop.f32.mrb[116].mxu0  ;;  %v5048_v3 = vrot.slane %v5047_v39, 4  ;;  %v9488_v39 = vrot.slane %v5424_v59, 9  ;;  %v4401_v59 = vld [vmem:[#allocation2 + $0xa8] sm:$0x1] }
 0x224   : > { %v10111_v43 = vpop.f32.mrb[117].mxu0  ;;  %v5058_v22 = vrot.slane %v5057_v40, 4 }
 0x225   : > { %v10112_v55 = vadd.f32 %v10111_v43, %v10110_v60  ;;  %v10113_v18 = vpop.f32.mrb[118].mxu0  ;;  %v5053_v48 = vsel %vm11631_vm4, %v5048_v3, %v5052_v56 }
 0x226   : > { %v10114_v58 = vpop.f32.mrb[119].mxu0  ;;  %v5063_v60 = vsel %vm11631_vm4, %v5058_v22, %v5062_v19 }
 0x227   : > { %v3847_v33 = vadd.f32 %v10112_v55, %v13329_v31  ;;  %v10222_v8 = vpop.f32.mrb[116].mxu1  ;;  %v10115_v45 = vadd.f32 %v10114_v58, %v10113_v18  ;;  %v4443_v31 = vsel %vm13397_vm10, 0, %v4442_v29  ;;  %v9552_v43 = vcombine.low %v5053_v48, %v5063_v60  ;;  %v11044_v48 = vld [vmem:[#allocation3 + $0x140] sm:$0xff]  }
 0x228   : > { %v10223_v10 = vpop.f32.mrb[117].mxu1  ;;  %4444 = vst [vmem:[#allocation2 + $0x8c] sm:$0x1] %v4443_v31  ;;  %v5492_v55 = vrot.slane %v5490_v26, 4  ;;  %10488 = vmatprep.subr.bf16.mxu1 %v11044_v48  ;;  %v4398_v31 = vld [vmem:[#allocation2 + $0x9c] sm:$0x1] }
 0x229   : > { %v3850_v1 = vadd.f32 %v10115_v45, %v13331_v57  ;;  %v10224_v36 = vadd.f32 %v10223_v10, %v10222_v8  ;;  %v10225_v34 = vpop.f32.mrb[118].mxu1  ;;  %8056 = vmatprep.mubr.bf16.mxu1 %v9552_v43  ;;  %v13503_v57 = vsel %vm11642_vm5, %v9488_v39, %v5490_v26  ;;  %v4399_v43 = vsel %vm13383_vm8, 0, %v4398_v31  ;;  %v4451_v39 = vld [vmem:[#allocation2 + $0xb0] sm:$0x1] }
 0x22a   : > { %v10226_v5 = vpop.f32.mrb[119].mxu1  ;;  %v13507_v44 = vsel %vm11642_vm5, %v5492_v55, %v5493_v27  ;;  %8057 = vmatmul.mubr.bf16.vlgmr.msra.gmra.mrb[128].mxu1 %v9536_v35  ;;  %v11045_v27 = vld [vmem:[#allocation3 + $0x100] sm:$0xff]   ;;  %4400 = vst [vmem:[#allocation2 + $0x9c] sm:$0x1] %v4399_v43 }
 0x22b   : > { %v10227_v56 = vadd.f32 %v10226_v5, %v10225_v34  ;;  %v13499_v24 = vadd.f32 %v10224_v36, %v3847_v33  ;;  %10489 = vmatpush3.bf16.msra.mxu1 %v11045_v27 }
 0x22d   : > { %v10116_v32 = vpop.f32.mrb[120].mxu0  ;;  %v13511_v40 = vadd.f32 %v10227_v56, %v3850_v1  ;;  %v4402_v1 = vsel %vm13383_vm8, 0, %v4401_v59 }
 0x22e   : > { %v10117_v19 = vpop.f32.mrb[121].mxu0  ;;  %4403 = vst [vmem:[#allocation2 + $0xa8] sm:$0x1] %v4402_v1 }
 0x22f   : > { %v10118_v58 = vadd.f32 %v10117_v19, %v10116_v32  ;;  %v10119_v3 = vpop.f32.mrb[122].mxu0  ;;  %v4452_v32 = vsel %vm13397_vm10, 0, %v4451_v39  ;;  %v4448_v19 = vld [vmem:[#allocation2 + $0xa4] sm:$0x1] }
 0x230   : > { %v10120_v33 = vpop.f32.mrb[123].mxu0  ;;  %4453 = vst [vmem:[#allocation2 + $0xb0] sm:$0x1] %v4452_v32 }
 0x231   : > { %v3855_v8 = vadd.f32 %v10118_v58, %v13345_v51  ;;  %v10121_v45 = vadd.f32 %v10120_v33, %v10119_v3  ;;  %v10228_v22 = vpop.f32.mrb[120].mxu1  ;;  %v4449_v3 = vsel %vm13397_vm10, 0, %v4448_v19 }
 0x232   : > { %v10229_v10 = vpop.f32.mrb[121].mxu1  ;;  %4450 = vst [vmem:[#allocation2 + $0xa4] sm:$0x1] %v4449_v3 }
 0x233   : > { %v3858_v26 = vadd.f32 %v10121_v45, %v13347_v38  ;;  %v10230_v29 = vadd.f32 %v10229_v10, %v10228_v22  ;;  %v10231_v35 = vpop.f32.mrb[122].mxu1 }
 0x234   : > { %v10232_v36 = vpop.f32.mrb[123].mxu1 }
 0x235   : > { %v10233_v34 = vadd.f32 %v10232_v36, %v10231_v35  ;;  %v13517_v60 = vadd.f32 %v10230_v29, %v3855_v8 }
 0x237   : > { %v10122_v51 = vpop.f32.mrb[124].mxu0  ;;  %v13519_v5 = vadd.f32 %v10233_v34, %v3858_v26 }
 0x238   : > { %v10123_v38 = vpop.f32.mrb[125].mxu0 }
 0x239   : > { %15924 = vst [vmem:[#allocation17_spill] sm:$0xff] %v13519_v5  ;;  %v10124_v55 = vadd.f32 %v10123_v38, %v10122_v51  ;;  %v10125_v56 = vpop.f32.mrb[126].mxu0 }
 0x23a   : > { %v10126_v58 = vpop.f32.mrb[127].mxu0 }
 0x23b   : > { %v3863_v33 = vadd.f32 %v10124_v55, %v13351_v13  ;;  %v10127_v8 = vadd.f32 %v10126_v58, %v10125_v56  ;;  %v4407_v56 = vld [vmem:[#allocation2 + $0xc0] sm:$0x1] }
 0x23c   : > { %v10234_v45 = vpop.f32.mrb[124].mxu1  ;;  %v4408_v32 = vsel %vm13383_vm8, 0, %v4407_v56 }
 0x23d   : > { %v3866_v22 = vadd.f32 %v10127_v8, %v13353_v7  ;;  %v10235_v26 = vpop.f32.mrb[125].mxu1  ;;  %4409 = vst [vmem:[#allocation2 + $0xc0] sm:$0x1] %v4408_v32 }
 0x23e   : > { %v10236_v10 = vadd.f32 %v10235_v26, %v10234_v45  ;;  %v10237_v48 = vpop.f32.mrb[126].mxu1 }
 0x23f   : > { %v10238_v27 = vpop.f32.mrb[127].mxu1 }
 0x240   : > { %v10754_v29 = vpop.f32.mrb[128].mxu0  ;;  %v10239_v35 = vadd.f32 %v10238_v27, %v10237_v48  ;;  %v13530_v1 = vadd.f32 %v10236_v10, %v3863_v33 }
 0x241   : > { %v4073_v59 = vadd.f32 %v10754_v29, %v13363_v54  ;;  %v4064_v36 = vpop.f32.mrb[129].mxu0 }
 0x242   : > { %v4065_v34 = vadd.f32 %v4064_v36, %v13357_v2  ;;  %v10755_v51 = vpop.f32.mrb[130].mxu0  ;;  %v13534_v43 = vadd.f32 %v10239_v35, %v3866_v22 }
 0x243   : > { %v4225_v13 = vmul.f32 0.70710677, %v4073_v59  ;;  %v4076_v31 = vadd.f32 %v10755_v51, %v13365_v61  ;;  %v4067_v38 = vpop.f32.mrb[131].mxu0  ;;  %v4193_v26 = vmul.f32 0.5, %v4073_v59 }
 0x244   : > { %v4223_v7 = vmul.f32 0.70710677, %v4065_v34  ;;  %v4068_v39 = vadd.f32 %v4067_v38, %v13359_v50  ;;  %v4191_v10 = vmul.f32 0.5, %v4065_v34  ;;  %v4404_v38 = vld [vmem:[#allocation2 + $0xb4] sm:$0x1] }
 0x245   : > { %11129 = verf.f32 %v4225_v13  ;;  %v4226_v55 = vmul.f32 0.70710677, %v4076_v31  ;;  %v4194_v29 = vmul.f32 0.5, %v4076_v31 }
 0x246   : > { %11131 = verf.f32 %v4223_v7  ;;  %v4224_v54 = vmul.f32 0.70710677, %v4068_v39 }
 0x247   : > { %11133 = verf.f32 %v4226_v55 }
 0x248   : > { %11135 = verf.f32 %v4224_v54  ;;  %v10758_v2 = vpop.f32.mrb[132].mxu0 }
 0x249   : > { %v4089_v61 = vadd.f32 %v10758_v2, %v13375_v12  ;;  %v4080_v19 = vpop.f32.mrb[133].mxu0  ;;  %v4192_v12 = vmul.f32 0.5, %v4068_v39  ;;  %v4405_v39 = vsel %vm13383_vm8, 0, %v4404_v38 }
 0x24a   : > { %v4081_v58 = vadd.f32 %v4080_v19, %v13369_v11  ;;  %v10759_v3 = vpop.f32.mrb[134].mxu0  ;;  %4406 = vst [vmem:[#allocation2 + $0xb4] sm:$0x1] %v4405_v39 }
 0x24b   : > { %v4229_v33 = vmul.f32 0.70710677, %v4089_v61  ;;  %v4092_v50 = vadd.f32 %v10759_v3, %v13377_v62  ;;  %v4083_v8 = vpop.f32.mrb[135].mxu0  ;;  %v13543_v35 = vmul.f32 0.5, %v4089_v61 }
 0x24c   : > { %v4227_v45 = vmul.f32 0.70710677, %v4081_v58  ;;  %v4084_v22 = vadd.f32 %v4083_v8, %v13371_v47  ;;  %v13545_v62 = vmul.f32 0.5, %v4081_v58 }
 0x24d   : > { %11137 = verf.f32 %v4229_v33  ;;  %v4230_v48 = vmul.f32 0.70710677, %v4092_v50  ;;  %v13547_v13 = vmul.f32 0.5, %v4092_v50 }
 0x24e   : > { %11139 = verf.f32 %v4227_v45  ;;  %v4228_v11 = vmul.f32 0.70710677, %v4084_v22  ;;  %v13549_v34 = vmul.f32 0.5, %v4084_v22 }
 0x24f   : > { %v11130_v27 = vpop.eup %11129  ;;  %11141 = verf.f32 %v4230_v48 }
 0x250   : > { %v11132_v36 = vpop.eup %11131  ;;  %v4289_v51 = vadd.f32 1.0, %v11130_v27  ;;  %v10762_v47 = vpop.f32.mrb[136].mxu0  ;;  %11143 = verf.f32 %v4228_v11 }
 0x251   : > { %v11134_v59 = vpop.eup %11133  ;;  %v4287_v7 = vadd.f32 1.0, %v11132_v36  ;;  %v4105_v55 = vadd.f32 %v10762_v47, %v13401_v14  ;;  %v4096_v31 = vpop.f32.mrb[137].mxu0 }
 0x252   : > { %v11136_v56 = vpop.eup %11135  ;;  %v4321_v54 = vmul.f32 %v4289_v51, %v4193_v26  ;;  %v4290_v32 = vadd.f32 1.0, %v11134_v59  ;;  %v4097_v2 = vadd.f32 %v4096_v31, %v13389_v46  ;;  %v10763_v61 = vpop.f32.mrb[138].mxu0  ;;  %v4887_v51 = vld [vmem:[#allocation2 + $0x18] sm:$0xf]  ;;  %v11050_v59 = vld [vmem:[#allocation3 + $0x148] sm:$0xff]  }
 0x253   : > { %v4319_v19 = vmul.f32 %v4287_v7, %v4191_v10  ;;  %v4288_v58 = vadd.f32 1.0, %v11136_v56  ;;  %v4233_v3 = vmul.f32 0.70710677, %v4105_v55  ;;  %v13555_v33 = vpop.f32.mrb[139].mxu0  ;;  %v13557_v8 = vmul.f32 0.5, %v4105_v55  ;;  %v11051_v7 = vld [vmem:[#allocation3 + $0x108] sm:$0xff]   ;;  %10490 = vmatprep.subr.bf16.mxu1 %v11050_v59 }
 0x254   : > { %v9761_v50 = vpack.c.bf16 %v4321_v54, %v4321_v54  ;;  %v4322_v14 = vmul.f32 %v4290_v32, %v4194_v29  ;;  %v4231_v45 = vmul.f32 0.70710677, %v4097_v2  ;;  %v13560_v26 = vadd.f32 %v10763_v61, %v13407_v20  ;;  %10491 = vmatpush3.bf16.msra.mxu1 %v11051_v7 }
 0x255   : > { %v9759_v22 = vpack.c.bf16 %v4319_v19, %v4319_v19  ;;  %v4320_v27 = vmul.f32 %v4288_v58, %v4192_v12  ;;  %11145 = verf.f32 %v4233_v3  ;;  %v13562_v36 = vmul.f32 0.5, %v4097_v2 }
 0x256   : > { %v4576_v46 = vshrl.u32 %v9761_v50, 16  ;;  %v9762_v48 = vpack.c.bf16 %v4322_v14, %v4322_v14  ;;  %11147 = verf.f32 %v4231_v45  ;;  %v4579_v11 = vshll.u32 %v9761_v50, 16  ;;  %v4880_v14 = vld [vmem:[#allocation2 + $0xc] sm:$0xf] }
 0x257   : > { %v11138_v10 = vpop.eup %11137  ;;  %v4559_v47 = vshrl.u32 %v9759_v22, 16  ;;  %v4562_v38 = vshll.u32 %v9759_v22, 16  ;;  %v9760_v29 = vpack.c.bf16 %v4320_v27, %v4320_v27 }
 0x258   : > { %v11140_v55 = vpop.eup %11139  ;;  %v4578_v31 = vrot.slane %v4576_v46, 7  ;;  %v4584_v12 = vshrl.u32 %v9762_v48, 16  ;;  %v4587_v39 = vshll.u32 %v9762_v48, 16  ;;  %v4293_v56 = vadd.f32 1.0, %v11138_v10  ;;  %v13564_v20 = vpop.f32.mrb[140].mxu0 }
 0x259   : > { %v4561_v32 = vrot.slane %v4559_v47, 7  ;;  %v4567_v2 = vshrl.u32 %v9760_v29, 16  ;;  %v4570_v61 = vshll.u32 %v9760_v29, 16  ;;  %v4291_v19 = vadd.f32 1.0, %v11140_v55  ;;  %v13572_v58 = vpop.f32.mrb[141].mxu0  ;;  %v11142_v55 = vpop.eup %11141 }
 0x25a   : > { %v4581_v3 = vor.u32 %v4579_v11, %v4578_v31  ;;  %v4582_v50 = vrot.slane %v4578_v31, 4  ;;  %v4586_v45 = vrot.slane %v4584_v12, 7  ;;  %v4325_v22 = vmul.f32 %v4293_v56, %v13543_v35  ;;  %v13575_v27 = vpop.f32.mrb[142].mxu0  ;;  %v4891_v47 = vld [vmem:[#allocation2 + $0x20] sm:$0x1]  ;;  %v11056_v56 = vld [vmem:[#allocation3 + $0x150] sm:$0xff]  }
 0x25b   : > { %v4564_v46 = vor.u32 %v4562_v38, %v4561_v32  ;;  %v4565_v48 = vrot.slane %v4561_v32, 4  ;;  %v4569_v29 = vrot.slane %v4567_v2, 7  ;;  %v4323_v11 = vmul.f32 %v4291_v19, %v13545_v62  ;;  %v13584_v59 = vpop.f32.mrb[143].mxu0  ;;  %v4884_v38 = vld [vmem:[#allocation2 + $0x14] sm:$0x1]  ;;  %v11144_v32 = vpop.eup %11143  ;;  %10492 = vmatprep.subr.bf16.mxu1 %v11056_v56 }
 0x25c   : > { %v4888_v35 = vsel %vm13568_vm13, %v4581_v3, %v4887_v51  ;;  %v4589_v31 = vor.u32 %v4587_v39, %v4586_v45  ;;  %v4591_v7 = vrot.slane %v4586_v45, 4  ;;  %v9765_v12 = vpack.c.bf16 %v4325_v22, %v4325_v22 }
 0x25d   : > { %4889 = vst [vmem:[#allocation2 + $0x18] sm:$0xf] %v4888_v35  ;;  %v4881_v18 = vsel %vm13568_vm13, %v4564_v46, %v4880_v14  ;;  %v4572_v5 = vor.u32 %v4570_v61, %v4569_v29  ;;  %v4574_v2 = vrot.slane %v4569_v29, 4  ;;  %v9763_v25 = vpack.c.bf16 %v4323_v11, %v4323_v11  ;;  %v4901_v14 = vld [vmem:[#allocation2 + $0x30] sm:$0xf] }
 0x25e   : > { %4882 = vst [vmem:[#allocation2 + $0xc] sm:$0xf] %v4881_v18  ;;  %v4590_v62 = vsel %vm13579_vm14, %v4582_v50, %v4589_v31  ;;  %v4892_v51 = vsel %vm13383_vm8, %v4591_v7, %v4891_v47  ;;  %v4610_v39 = vshrl.u32 %v9765_v12, 16  ;;  %v4613_v19 = vshll.u32 %v9765_v12, 16  ;;  %v4894_v12 = vld [vmem:[#allocation2 + $0x24] sm:$0xf] }
 0x25f   : > { %v11146_v3 = vpop.eup %11145  ;;  %4890 = vst [vmem:[#allocation2 + $0x1c] sm:$0xf] %v4590_v62  ;;  %4893 = vst [vmem:[#allocation2 + $0x20] sm:$0x1] %v4892_v51  ;;  %v4573_v45 = vsel %vm13579_vm14, %v4565_v48, %v4572_v5  ;;  %v4885_v61 = vsel %vm13383_vm8, %v4574_v2, %v4884_v38  ;;  %v4593_v18 = vshrl.u32 %v9763_v25, 16  ;;  %v4596_v22 = vshll.u32 %v9763_v25, 16 }
 0x260   : > { %v11148_v46 = vpop.eup %11147  ;;  %4883 = vst [vmem:[#allocation2 + $0x10] sm:$0xf] %v4573_v45  ;;  %4886 = vst [vmem:[#allocation2 + $0x14] sm:$0x1] %v4885_v61  ;;  %v13598_v50 = vrot.slane %v4610_v39, 7  ;;  %v4294_v47 = vadd.f32 1.0, %v11142_v55  ;;  %v13605_v48 = vadd.f32 %v13555_v33, %v13391_v63 }
 0x261   : > { %v4292_v29 = vadd.f32 1.0, %v11144_v32  ;;  %v4297_v11 = vadd.f32 1.0, %v11146_v3  ;;  %v13600_v35 = vpop.f32.mrb[144].mxu0  ;;  %v4595_v31 = vrot.slane %v4593_v18, 7  ;;  %v4295_v7 = vadd.f32 1.0, %v11148_v46  ;;  %v11057_v18 = vld [vmem:[#allocation3 + $0x110] sm:$0xff]  }
 0x262   : > { %v4234_v5 = vmul.f32 0.70710677, %v13560_v26  ;;  %v13607_v38 = vpop.f32.mrb[145].mxu0  ;;  %v4615_v25 = vor.u32 %v4613_v19, %v13598_v50  ;;  %v4326_v56 = vmul.f32 %v4294_v47, %v13547_v13  ;;  %v4616_v2 = vrot.slane %v13598_v50, 4  ;;  %v4905_v50 = vld [vmem:[#allocation2 + $0x38] sm:$0x1]  ;;  %10493 = vmatpush3.bf16.msra.mxu1 %v11057_v18 }
 0x263   : > { %v4324_v55 = vmul.f32 %v4292_v29, %v13549_v34  ;;  %v13612_v32 = vpop.f32.mrb[146].mxu0  ;;  %v4598_v62 = vor.u32 %v4596_v22, %v4595_v31  ;;  %v4329_v51 = vmul.f32 %v4297_v11, %v13557_v8  ;;  %v4327_v39 = vmul.f32 %v4295_v7, %v13562_v36  ;;  %v4898_v47 = vld [vmem:[#allocation2 + $0x2c] sm:$0x1] }
 0x264   : > { %v13617_v63 = vpop.f32.mrb[147].mxu0  ;;  %v4902_v33 = vsel %vm13568_vm13, %v4615_v25, %v4901_v14  ;;  %v9766_v19 = vpack.c.bf16 %v4326_v56, %v4326_v56  ;;  %11149 = verf.f32 %v4234_v5  ;;  %v4599_v13 = vrot.slane %v4595_v31, 4 }
 0x265   : > { %v9764_v3 = vpack.c.bf16 %v4324_v55, %v4324_v55  ;;  %4903 = vst [vmem:[#allocation2 + $0x30] sm:$0xf] %v4902_v33  ;;  %v4895_v34 = vsel %vm13568_vm13, %v4598_v62, %v4894_v12  ;;  %v9769_v45 = vpack.c.bf16 %v4329_v51, %v4329_v51  ;;  %v9767_v61 = vpack.c.bf16 %v4327_v39, %v4327_v39  ;;  %v4915_v62 = vld [vmem:[#allocation2 + $0x48] sm:$0xf] }
 0x266   : > { %4896 = vst [vmem:[#allocation2 + $0x24] sm:$0xf] %v4895_v34  ;;  %v4618_v8 = vshrl.u32 %v9766_v19, 16  ;;  %v4621_v22 = vshll.u32 %v9766_v19, 16  ;;  %v4232_v25 = vmul.f32 0.70710677, %v13605_v48  ;;  %v4121_v12 = vadd.f32 %v13564_v20, %v13427_v4 }
 0x267   : > { %v4601_v36 = vshrl.u32 %v9764_v3, 16  ;;  %v4604_v46 = vshll.u32 %v9764_v3, 16  ;;  %v4644_v29 = vshrl.u32 %v9769_v45, 16  ;;  %v4647_v14 = vshll.u32 %v9769_v45, 16  ;;  %v4908_v4 = vld [vmem:[#allocation2 + $0x3c] sm:$0xf] }
 0x268   : > { %v4627_v11 = vshrl.u32 %v9767_v61, 16  ;;  %v4630_v7 = vshll.u32 %v9767_v61, 16  ;;  %v4620_v5 = vrot.slane %v4618_v8, 7  ;;  %v4113_v39 = vadd.f32 %v13572_v58, %v13417_v52 }
 0x269   : > { %v4603_v31 = vrot.slane %v4601_v36, 7  ;;  %v13626_v56 = vpop.f32.mrb[148].mxu0  ;;  %v13628_v55 = vrot.slane %v4644_v29, 7  ;;  %v4124_v33 = vadd.f32 %v13575_v27, %v13431_v53  ;;  %v4202_v36 = vmul.f32 0.5, %v13560_v26 }
 0x26a   : > { %v13630_v51 = vrot.slane %v4627_v11, 7  ;;  %v13636_v19 = vpop.f32.mrb[149].mxu0  ;;  %v4623_v3 = vor.u32 %v4621_v22, %v4620_v5  ;;  %v4625_v34 = vrot.slane %v4620_v5, 4  ;;  %11151 = verf.f32 %v4232_v25 }
 0x26b   : > { %v4606_v45 = vor.u32 %v4604_v46, %v4603_v31  ;;  %v4608_v61 = vrot.slane %v4603_v31, 4  ;;  %v13638_v20 = vpop.f32.mrb[150].mxu0  ;;  %v4649_v18 = vor.u32 %v4647_v14, %v13628_v55  ;;  %v4235_v14 = vmul.f32 0.70710677, %v4113_v39 }
 0x26c   : > { %v4632_v8 = vor.u32 %v4630_v7, %v13630_v51  ;;  %v13643_v29 = vpop.f32.mrb[151].mxu0  ;;  %v4624_v52 = vsel %vm13579_vm14, %v4616_v2, %v4623_v3  ;;  %v4906_v53 = vsel %vm13383_vm8, %v4625_v34, %v4905_v50  ;;  %v13658_v2 = vmul.f32 0.5, %v13605_v48  ;;  %v11062_v48 = vld [vmem:[#allocation3 + $0x158] sm:$0xff]  }
 0x26d   : > { %v4607_v58 = vsel %vm13579_vm14, %v4599_v13, %v4606_v45  ;;  %v4899_v27 = vsel %vm13383_vm8, %v4608_v61, %v4898_v47  ;;  %4904 = vst [vmem:[#allocation2 + $0x34] sm:$0xf] %v4624_v52  ;;  %4907 = vst [vmem:[#allocation2 + $0x38] sm:$0x1] %v4906_v53  ;;  %v4916_v26 = vsel %vm13568_vm13, %v4649_v18, %v4915_v62  ;;  %v4650_v13 = vrot.slane %v13628_v55, 4 }
 0x26e   : > { %4897 = vst [vmem:[#allocation2 + $0x28] sm:$0xf] %v4607_v58  ;;  %4900 = vst [vmem:[#allocation2 + $0x2c] sm:$0x1] %v4899_v27  ;;  %v4909_v22 = vsel %vm13568_vm13, %v4632_v8, %v4908_v4  ;;  %v11150_v46 = vpop.eup %11149  ;;  %v4633_v50 = vrot.slane %v13630_v51, 4  ;;  %v4116_v5 = vadd.f32 %v13584_v59, %v13421_v49  ;;  %v4137_v31 = vadd.f32 %v13600_v35, %v13447_v41 }
 0x26f   : > { %4917 = vst [vmem:[#allocation2 + $0x48] sm:$0xf] %v4916_v26  ;;  %4910 = vst [vmem:[#allocation2 + $0x3c] sm:$0xf] %v4909_v22  ;;  %v4237_v47 = vmul.f32 0.70710677, %v4121_v12  ;;  %v4129_v25 = vadd.f32 %v13607_v38, %v13439_v42  ;;  %v4140_v62 = vadd.f32 %v13612_v32, %v13449_v17  ;;  %v4132_v3 = vadd.f32 %v13617_v63, %v13441_v37 }
 0x270   : > { %v4298_v11 = vadd.f32 1.0, %v11150_v46  ;;  %v4238_v7 = vmul.f32 0.70710677, %v4124_v33  ;;  %v13674_v61 = vmul.f32 0.5, %v4121_v12  ;;  %v4236_v49 = vmul.f32 0.70710677, %v4116_v5  ;;  %10494 = vmatprep.subr.bf16.mxu1 %v11062_v48 }
 0x271   : > { %11153 = verf.f32 %v4237_v47  ;;  %v13672_v34 = vpop.f32.mrb[152].mxu0  ;;  %v13678_v41 = vmul.f32 0.5, %v4113_v39  ;;  %v13680_v35 = vmul.f32 0.5, %v4124_v33  ;;  %v4241_v42 = vmul.f32 0.70710677, %v4137_v31  ;;  %v11063_v39 = vld [vmem:[#allocation3 + $0x118] sm:$0xff]  }
 0x272   : > { %v4330_v45 = vmul.f32 %v4298_v11, %v4202_v36  ;;  %11155 = verf.f32 %v4235_v14  ;;  %v13676_v59 = vpop.f32.mrb[153].mxu0  ;;  %v13684_v37 = vmul.f32 0.5, %v4116_v5  ;;  %v4239_v32 = vmul.f32 0.70710677, %v4129_v25  ;;  %v5600_v52 = vld [vmem:[#allocation2 + $0xc] sm:$0xf]  ;;  %10495 = vmatpush3.bf16.msra.mxu1 %v11063_v39 }
 0x273   : > { %11157 = verf.f32 %v4238_v7  ;;  %v13682_v17 = vpop.f32.mrb[154].mxu0  ;;  %v13688_v12 = vmul.f32 0.5, %v4137_v31  ;;  %v4242_v4 = vmul.f32 0.70710677, %v4140_v62  ;;  %v4240_v18 = vmul.f32 0.70710677, %v4132_v3 }
 0x274   : > { %v9770_v38 = vpack.c.bf16 %v4330_v45, %v4330_v45  ;;  %11159 = verf.f32 %v4236_v49  ;;  %v13686_v63 = vpop.f32.mrb[155].mxu0  ;;  %v13690_v33 = vmul.f32 0.5, %v4129_v25  ;;  %v4153_v36 = vadd.f32 %v13626_v56, %v13473_v9  ;;  %v11152_v22 = vpop.eup %11151  ;;  %v4919_v14 = vld [vmem:[#allocation2 + $0x50] sm:$0x1] }
 0x275   : > { %11161 = verf.f32 %v4241_v42  ;;  %v13694_v53 = vmul.f32 0.5, %v4140_v62  ;;  %v13696_v58 = vmul.f32 0.5, %v4132_v3  ;;  %v4145_v27 = vadd.f32 %v13636_v19, %v13461_v28  ;;  %v13713_v45 = vld [vmem:[#allocation2 + $0x10] sm:$0xf] }
 0x276   : > { %v4652_v8 = vshrl.u32 %v9770_v38, 16  ;;  %11163 = verf.f32 %v4239_v32  ;;  %v4156_v26 = vadd.f32 %v13638_v20, %v13475_v21  ;;  %v4655_v47 = vshll.u32 %v9770_v38, 16 }
 0x277   : > { %11165 = verf.f32 %v4242_v4  ;;  %v4245_v11 = vmul.f32 0.70710677, %v4153_v36  ;;  %v4296_v7 = vadd.f32 1.0, %v11152_v22  ;;  %v4243_v9 = vmul.f32 0.70710677, %v4145_v27 }
 0x278   : > { %v4654_v46 = vrot.slane %v4652_v8, 7  ;;  %11167 = verf.f32 %v4240_v18  ;;  %v5649_v56 = vshrl.u32 %v5600_v52, 16  ;;  %v13704_v25 = vmul.f32 0.5, %v4153_v36 }
 0x279   : > { %v13702_v5 = vpop.f32.mrb[156].mxu0  ;;  %v4246_v28 = vmul.f32 0.70710677, %v4156_v26  ;;  %v4328_v20 = vmul.f32 %v4296_v7, %v13658_v2  ;;  %v13709_v62 = vmul.f32 0.5, %v4145_v27  ;;  %v13711_v3 = vmul.f32 0.5, %v4156_v26 }
 0x27a   : > { %v4657_v31 = vor.u32 %v4655_v47, %v4654_v46  ;;  %v4659_v48 = vrot.slane %v4654_v46, 4  ;;  %v13706_v19 = vpop.f32.mrb[157].mxu0  ;;  %v5652_v49 = vshll.u32 %v5600_v52, 16  ;;  %11169 = verf.f32 %v4245_v11 }
 0x27b   : > { %v11154_v21 = vpop.eup %11153  ;;  %v13715_v42 = vpop.f32.mrb[158].mxu0  ;;  %v9768_v8 = vpack.c.bf16 %v4328_v20, %v4328_v20  ;;  %11171 = verf.f32 %v4243_v9  ;;  %v13725_v27 = vrot.slane %v5649_v56, 4 }
 0x27c   : > { %v11156_v38 = vpop.eup %11155  ;;  %v4658_v32 = vsel %vm13579_vm14, %v4650_v13, %v4657_v31  ;;  %v4920_v4 = vsel %vm13383_vm8, %v4659_v48, %v4919_v14  ;;  %v4301_v18 = vadd.f32 1.0, %v11154_v21  ;;  %v13723_v2 = vpop.f32.mrb[159].mxu0  ;;  %11173 = verf.f32 %v4246_v28  ;;  %v11068_v31 = vld [vmem:[#allocation3 + $0x160] sm:$0xff]  }
 0x27d   : > { %v11158_v39 = vpop.eup %11157  ;;  %4918 = vst [vmem:[#allocation2 + $0x4c] sm:$0xf] %v4658_v32  ;;  %4921 = vst [vmem:[#allocation2 + $0x50] sm:$0x1] %v4920_v4  ;;  %v4299_v36 = vadd.f32 1.0, %v11156_v38  ;;  %v9584_v13 = vcombine.low %v5600_v52, %v13713_v45  ;;  %v4635_v47 = vshrl.u32 %v9768_v8, 16  ;;  %10496 = vmatprep.subr.bf16.mxu1 %v11068_v31 }
 0x27e   : > { %v11160_v26 = vpop.eup %11159  ;;  %v4333_v55 = vmul.f32 %v4301_v18, %v13674_v61  ;;  %v4302_v22 = vadd.f32 1.0, %v11158_v39  ;;  %v13730_v7 = vrot.slane %v5652_v49, 5  ;;  %v11069_v48 = vld [vmem:[#allocation3 + $0x1c0] sm:$0xff]   ;;  %v4638_v9 = vshll.u32 %v9768_v8, 16  ;;  %v4912_v4 = vld [vmem:[#allocation2 + $0x44] sm:$0x1] }
 0x27f   : > { %v11162_v46 = vpop.eup %11161  ;;  %v4331_v14 = vmul.f32 %v4299_v36, %v13678_v41  ;;  %v4300_v11 = vadd.f32 1.0, %v11160_v26  ;;  %8217 = vmatprep.mubr.bf16.mxu0 %v9584_v13  ;;  %v4637_v61 = vrot.slane %v4635_v47, 7  ;;  %v15929_v41 = vcombine.low %v13503_v57, %v13507_v44  ;;  %10600 = vmatprep.subr.bf16.mxu0 %v11069_v48  ;;  %v11070_v48 = vld [vmem:[#allocation3 + $0x120] sm:$0xff]  }
 0x280   : > { %v11164_v21 = vpop.eup %11163  ;;  %v9773_v56 = vpack.c.bf16 %v4333_v55, %v4333_v55  ;;  %v4334_v20 = vmul.f32 %v4302_v22, %v13680_v35  ;;  %v4305_v38 = vadd.f32 1.0, %v11162_v46  ;;  %10497 = vmatpush3.bf16.msra.mxu1 %v11070_v48 }
 0x281   : > { %v9771_v28 = vpack.c.bf16 %v4331_v14, %v4331_v14  ;;  %v4332_v52 = vmul.f32 %v4300_v11, %v13684_v37  ;;  %v4303_v32 = vadd.f32 1.0, %v11164_v21  ;;  %8218 = vmatmul.mubr.bf16.vlgmr.msra.gmra.mrb[160].mxu0 %v15929_v41  ;;  %v11166_v49 = vpop.eup %11165  ;;  %v4640_v26 = vor.u32 %v4638_v9, %v4637_v61  ;;  %v4929_v11 = vld [vmem:[#allocation2 + $0x60] sm:$0xf] }
 0x282   : > { %v4678_v18 = vshrl.u32 %v9773_v56, 16  ;;  %v4681_v39 = vshll.u32 %v9773_v56, 16  ;;  %v9774_v8 = vpack.c.bf16 %v4334_v20, %v4334_v20  ;;  %v4337_v36 = vmul.f32 %v4305_v38, %v13688_v12  ;;  %v11168_v35 = vpop.eup %11167  ;;  %v4922_v20 = vld [vmem:[#allocation2 + $0x54] sm:$0xf] }
 0x283   : > { %v4642_v55 = vrot.slane %v4637_v61, 4  ;;  %v4661_v22 = vshrl.u32 %v9771_v28, 16  ;;  %v4664_v13 = vshll.u32 %v9771_v28, 16  ;;  %v9772_v14 = vpack.c.bf16 %v4332_v52, %v4332_v52  ;;  %v11071_v28 = vld [vmem:[#allocation3 + $0x180] sm:$0xff]  }
 0x284   : > { %v4680_v37 = vrot.slane %v4678_v18, 7  ;;  %v4686_v46 = vshrl.u32 %v9774_v8, 16  ;;  %v4689_v47 = vshll.u32 %v9774_v8, 16  ;;  %v4641_v57 = vsel %vm13579_vm14, %v4633_v50, %v4640_v26  ;;  %v11170_v21 = vpop.eup %11169  ;;  %v4933_v50 = vld [vmem:[#allocation2 + $0x68] sm:$0x1]  ;;  %10601 = vmatpush3.bf16.msra.mxu0 %v11071_v28 }
 0x285   : > { %v4913_v44 = vsel %vm13383_vm8, %v4642_v55, %v4912_v4  ;;  %v4663_v12 = vrot.slane %v4661_v22, 7  ;;  %v9777_v31 = vpack.c.bf16 %v4337_v36, %v4337_v36  ;;  %4911 = vst [vmem:[#allocation2 + $0x40] sm:$0xf] %v4641_v57  ;;  %v4669_v61 = vshrl.u32 %v9772_v14, 16  ;;  %v11172_v51 = vpop.eup %11171 }
 0x286   : > { %4914 = vst [vmem:[#allocation2 + $0x44] sm:$0x1] %v4913_v44  ;;  %v4683_v9 = vor.u32 %v4681_v39, %v4680_v37  ;;  %v4684_v56 = vrot.slane %v4680_v37, 4  ;;  %v4688_v38 = vrot.slane %v4686_v46, 7  ;;  %v4672_v18 = vshll.u32 %v9772_v14, 16  ;;  %v11174_v4 = vpop.eup %11173 }
 0x287   : > { %v4666_v52 = vor.u32 %v4664_v13, %v4663_v12  ;;  %v4667_v41 = vrot.slane %v4663_v12, 4  ;;  %v4712_v8 = vshrl.u32 %v9777_v31, 16  ;;  %v4671_v22 = vrot.slane %v4669_v61, 7  ;;  %v4926_v37 = vld [vmem:[#allocation2 + $0x5c] sm:$0x1] }
 0x288   : > { %v4930_v36 = vsel %vm13568_vm13, %v4683_v9, %v4929_v11  ;;  %v4691_v26 = vor.u32 %v4689_v47, %v4688_v38  ;;  %v4693_v55 = vrot.slane %v4688_v38, 4  ;;  %v4715_v13 = vshll.u32 %v9777_v31, 16  ;;  %v4943_v12 = vld [vmem:[#allocation2 + $0x78] sm:$0xf] }
 0x289   : > { %4931 = vst [vmem:[#allocation2 + $0x60] sm:$0xf] %v4930_v36  ;;  %v4923_v39 = vsel %vm13568_vm13, %v4666_v52, %v4922_v20  ;;  %v13748_v46 = vrot.slane %v4712_v8, 7  ;;  %v4335_v14 = vmul.f32 %v4303_v32, %v13690_v33  ;;  %v4674_v44 = vor.u32 %v4672_v18, %v4671_v22 }
 0x28a   : > { %4924 = vst [vmem:[#allocation2 + $0x54] sm:$0xf] %v4923_v39  ;;  %v4692_v57 = vsel %vm13579_vm14, %v4684_v56, %v4691_v26  ;;  %v4934_v47 = vsel %vm13383_vm8, %v4693_v55, %v4933_v50  ;;  %v4676_v11 = vrot.slane %v4671_v22, 4  ;;  %v4306_v20 = vadd.f32 1.0, %v11166_v49  ;;  %v11076_v55 = vld [vmem:[#allocation3 + $0x168] sm:$0xff]  }
 0x28b   : > { %4932 = vst [vmem:[#allocation2 + $0x64] sm:$0xf] %v4692_v57  ;;  %4935 = vst [vmem:[#allocation2 + $0x68] sm:$0x1] %v4934_v47  ;;  %v4717_v48 = vor.u32 %v4715_v13, %v13748_v46  ;;  %v9775_v9 = vpack.c.bf16 %v4335_v14, %v4335_v14  ;;  %v5658_v31 = vshll.u32 %v13713_v45, 16  ;;  %v4675_v33 = vsel %vm13579_vm14, %v4667_v41, %v4674_v44  ;;  %v11077_v22 = vld [vmem:[#allocation3 + $0x1c8] sm:$0xff]  }
 0x28c   : > { %v4927_v32 = vsel %vm13383_vm8, %v4676_v11, %v4926_v37  ;;  %v4304_v56 = vadd.f32 1.0, %v11168_v35  ;;  %v4309_v38 = vadd.f32 1.0, %v11170_v21  ;;  %4925 = vst [vmem:[#allocation2 + $0x58] sm:$0xf] %v4675_v33  ;;  %v4338_v52 = vmul.f32 %v4306_v20, %v13694_v53  ;;  %v4936_v39 = vld [vmem:[#allocation2 + $0x6c] sm:$0xf]  ;;  %10498 = vmatprep.subr.bf16.mxu1 %v11076_v55  ;;  %10602 = vmatprep.subr.bf16.mxu0 %v11077_v22 }
 0x28d   : > { %4928 = vst [vmem:[#allocation2 + $0x5c] sm:$0x1] %v4927_v32  ;;  %v4944_v61 = vsel %vm13568_vm13, %v4717_v48, %v4943_v12  ;;  %v4695_v28 = vshrl.u32 %v9775_v9, 16  ;;  %v5662_v49 = vshrl.u32 %v13713_v45, 16  ;;  %v4307_v18 = vadd.f32 1.0, %v11172_v51  ;;  %v11078_v32 = vld [vmem:[#allocation3 + $0x128] sm:$0xff]  }
 0x28e   : > { %4945 = vst [vmem:[#allocation2 + $0x78] sm:$0xf] %v4944_v61  ;;  %v4336_v50 = vmul.f32 %v4304_v56, %v13696_v58  ;;  %v4341_v41 = vmul.f32 %v4309_v38, %v13704_v25  ;;  %v4310_v8 = vadd.f32 1.0, %v11174_v4  ;;  %v4698_v35 = vshll.u32 %v9775_v9, 16  ;;  %v4947_v48 = vld [vmem:[#allocation2 + $0x80] sm:$0x1]  ;;  %10499 = vmatpush3.bf16.msra.mxu1 %v11078_v32 }
 0x28f   : > { %v4697_v36 = vrot.slane %v4695_v28, 7  ;;  %v9778_v21 = vpack.c.bf16 %v4338_v52, %v4338_v52  ;;  %v5655_v26 = vor.u32 %v13730_v7, %v13725_v27  ;;  %v4339_v45 = vmul.f32 %v4307_v18, %v13709_v62  ;;  %v4957_v28 = vld [vmem:[#allocation2 + $0x90] sm:$0xf] }
 0x290   : > { %v9776_v37 = vpack.c.bf16 %v4336_v50, %v4336_v50  ;;  %v9781_v53 = vpack.c.bf16 %v4341_v41, %v4341_v41  ;;  %v4342_v13 = vmul.f32 %v4310_v8, %v13711_v3  ;;  %v4718_v58 = vrot.slane %v13748_v46, 4  ;;  %v4940_v46 = vld [vmem:[#allocation2 + $0x74] sm:$0x1]  ;;  %v11079_v50 = vld [vmem:[#allocation3 + $0x188] sm:$0xff]  }
 0x291   : > { %v4700_v25 = vor.u32 %v4698_v35, %v4697_v36  ;;  %v4720_v51 = vshrl.u32 %v9778_v21, 16  ;;  %v13772_v4 = vrot.slane %v5658_v31, 5  ;;  %v4723_v14 = vshll.u32 %v9778_v21, 16  ;;  %10603 = vmatpush3.bf16.msra.mxu0 %v11079_v50 }
 0x292   : > { %v4703_v57 = vshrl.u32 %v9776_v37, 16  ;;  %v4706_v47 = vshll.u32 %v9776_v37, 16  ;;  %v4746_v44 = vshrl.u32 %v9781_v53, 16  ;;  %v9779_v62 = vpack.c.bf16 %v4339_v45, %v4339_v45  ;;  %v4950_v37 = vld [vmem:[#allocation2 + $0x84] sm:$0xf] }
 0x293   : > { %v4937_v11 = vsel %vm13568_vm13, %v4700_v25, %v4936_v39  ;;  %v4722_v12 = vrot.slane %v4720_v51, 7  ;;  %v9782_v9 = vpack.c.bf16 %v4342_v13, %v4342_v13  ;;  %v4749_v33 = vshll.u32 %v9781_v53, 16  ;;  %v4961_v25 = vld [vmem:[#allocation2 + $0x98] sm:$0x1] }
 0x294   : > { %4938 = vst [vmem:[#allocation2 + $0x6c] sm:$0xf] %v4937_v11  ;;  %v4705_v3 = vrot.slane %v4703_v57, 7  ;;  %v4748_v20 = vrot.slane %v4746_v44, 7  ;;  %v4148_v31 = vadd.f32 %v13643_v29, %v13465_v30  ;;  %v4701_v56 = vrot.slane %v4697_v36, 4 }
 0x295   : > { %v4725_v38 = vor.u32 %v4723_v14, %v4722_v12  ;;  %v4727_v61 = vrot.slane %v4722_v12, 4  ;;  %v4729_v52 = vshrl.u32 %v9779_v62, 16  ;;  %v4732_v35 = vshll.u32 %v9779_v62, 16  ;;  %v13791_v14 = vld [vmem:[#allocation2 + $0x1c] sm:$0xf] }
 0x296   : > { %v4708_v41 = vor.u32 %v4706_v47, %v4705_v3  ;;  %v4710_v18 = vrot.slane %v4705_v3, 4  ;;  %v4751_v8 = vor.u32 %v4749_v33, %v4748_v20  ;;  %v4754_v30 = vshrl.u32 %v9782_v9, 16  ;;  %v13795_v12 = vld [vmem:[#allocation2 + $0xc] sm:$0xf]  ;;  %v13806_v3 = vld [vmem:[#allocation2 + $0x10] sm:$0xf] }
 0x297   : > { %v4726_v21 = vsel %vm13579_vm14, %v4718_v58, %v4725_v38  ;;  %v4948_v55 = vsel %vm13383_vm8, %v4727_v61, %v4947_v48  ;;  %v13782_v22 = vrot.slane %v4729_v52, 7  ;;  %v5664_v53 = vrot.slane %v5662_v49, 4  ;;  %v11084_v52 = vld [vmem:[#allocation3 + $0x170] sm:$0xff]  }
 0x298   : > { %4946 = vst [vmem:[#allocation2 + $0x7c] sm:$0xf] %v4726_v21  ;;  %4949 = vst [vmem:[#allocation2 + $0x80] sm:$0x1] %v4948_v55  ;;  %v4709_v29 = vsel %vm13579_vm14, %v4701_v56, %v4708_v41  ;;  %v4941_v36 = vsel %vm13383_vm8, %v4710_v18, %v4940_v46  ;;  %v4958_v39 = vsel %vm13568_vm13, %v4751_v8, %v4957_v28  ;;  %v4756_v13 = vrot.slane %v4754_v30, 7  ;;  %v11085_v21 = vld [vmem:[#allocation3 + $0x1d0] sm:$0xff]  }
 0x299   : > { %4939 = vst [vmem:[#allocation2 + $0x70] sm:$0xf] %v4709_v29  ;;  %4942 = vst [vmem:[#allocation2 + $0x74] sm:$0x1] %v4941_v36  ;;  %v4734_v45 = vor.u32 %v4732_v35, %v13782_v22  ;;  %v4757_v58 = vshll.u32 %v9782_v9, 16  ;;  %v4752_v57 = vrot.slane %v4748_v20, 4  ;;  %v5665_v62 = vor.u32 %v5664_v53, %v13772_v4  ;;  %10500 = vmatprep.subr.bf16.mxu1 %v11084_v52 }
 0x29a   : > { %4959 = vst [vmem:[#allocation2 + $0x90] sm:$0xf] %v4958_v39  ;;  %v4244_v51 = vmul.f32 0.70710677, %v4148_v31  ;;  %v4761_v11 = vrot.slane %v4756_v13, 4  ;;  %v4735_v49 = vrot.slane %v13782_v22, 4  ;;  %v4169_v27 = vadd.f32 %v13672_v34, %v13499_v24  ;;  %10604 = vmatprep.subr.bf16.mxu0 %v11085_v21 }
 0x29b   : > { %v4951_v47 = vsel %vm13568_vm13, %v4734_v45, %v4950_v37  ;;  %v4759_v44 = vor.u32 %v4757_v58, %v4756_v13  ;;  %v13801_v48 = vrot.slane %v5655_v26, 4  ;;  %v13804_v9 = vld [vmem:[#allocation2 + $0x18] sm:$0xf]  ;;  %v4161_v7 = vadd.f32 %v13676_v59, %v13487_v6  ;;  %v5025_v56 = vld [vmem:[#allocation2 + $0x14] sm:$0x1] }
 0x29c   : > { %4952 = vst [vmem:[#allocation2 + $0x84] sm:$0xf] %v4951_v47  ;;  %11175 = verf.f32 %v4244_v51  ;;  %v4962_v20 = vsel %vm13383_vm8, %v4761_v11, %v4961_v25  ;;  %v9585_v33 = vcombine.low %v13804_v9, %v13791_v14  ;;  %v4172_v26 = vadd.f32 %v13682_v17, %v13511_v40  ;;  %v5425_v35 = vld [vmem:[#allocation2 + $0xc] sm:$0xe]  ;;  %v13833_v37 = vld [vmem:[#allocation2 + $0x18] sm:$0xf] }
 0x29d   : > { %v4760_v46 = vsel %vm13579_vm14, %v4752_v57, %v4759_v44  ;;  %4963 = vst [vmem:[#allocation2 + $0x98] sm:$0x1] %v4962_v20  ;;  %v4164_v32 = vadd.f32 %v13686_v63, %v13489_v15  ;;  %v5065_v38 = vshrl.u32 %v13795_v12, 16  ;;  %v5673_v61 = vshrl.u32 %v13804_v9, 16  ;;  %v13835_v25 = vld [vmem:[#allocation2 + $0x24] sm:$0xf] }
 0x29e   : > { %4960 = vst [vmem:[#allocation2 + $0x94] sm:$0xf] %v4760_v46  ;;  %8225 = vmatprep.mubr.bf16.mxu0 %v9585_v33  ;;  %v4249_v28 = vmul.f32 0.70710677, %v4169_v27  ;;  %v5068_v24 = vshll.u32 %v13795_v12, 16  ;;  %v5074_v34 = vshll.u32 %v13806_v3, 16 }
 0x29f   : > { %v4212_v50 = vmul.f32 0.5, %v4148_v31  ;;  %v5676_v6 = vshll.u32 %v13804_v9, 16  ;;  %v4247_v59 = vmul.f32 0.70710677, %v4161_v7  ;;  %v4250_v40 = vmul.f32 0.70710677, %v4172_v26 }
 0x2a0   : > { %v13827_v17 = vrot.slane %v5665_v62, 4  ;;  %11177 = verf.f32 %v4249_v28  ;;  %v4248_v15 = vmul.f32 0.70710677, %v4164_v32  ;;  %v5067_v63 = vrot.slane %v5065_v38, 4  ;;  %v13841_v62 = vld [vmem:[#allocation2 + $0x28] sm:$0xf] }
 0x2a1   : > { %11179 = verf.f32 %v4247_v59  ;;  %v5070_v41 = vrot.slane %v5068_v24, 5  ;;  %v5076_v18 = vrot.slane %v5074_v34, 5  ;;  %v5078_v8 = vshrl.u32 %v13806_v3, 16  ;;  %v11086_v46 = vld [vmem:[#allocation3 + $0x130] sm:$0xff]   ;;  %v13854_v34 = vld [vmem:[#allocation2 + $0x20] sm:$0x1] }
 0x2a2   : > { %v13830_v55 = vrot.slane %v5673_v61, 4  ;;  %11181 = verf.f32 %v4250_v40  ;;  %v5084_v31 = vshll.u32 %v5025_v56, 16  ;;  %v5497_v30 = vrot.slane %v13806_v3, 5  ;;  %10501 = vmatpush3.bf16.msra.mxu1 %v11086_v46  ;;  %v11087_v40 = vld [vmem:[#allocation3 + $0x190] sm:$0xff]  }
 0x2a3   : > { %v4217_v29 = vmul.f32 0.5, %v4169_v27  ;;  %11183 = verf.f32 %v4248_v15  ;;  %v5071_v36 = vor.u32 %v5070_v41, %v5067_v63  ;;  %v5080_v39 = vrot.slane %v5078_v8, 4  ;;  %10605 = vmatpush3.bf16.msra.mxu0 %v11087_v40  ;;  %v11095_v40 = vld [vmem:[#allocation3 + $0x178] sm:$0xff]  }
 0x2a4   : > { %v4215_v53 = vmul.f32 0.5, %v4161_v7  ;;  %v9489_v45 = vrot.slane %v5425_v35, 9  ;;  %v5499_v13 = vrot.slane %v5497_v30, 4  ;;  %v5500_v58 = vrot.slane %v5025_v56, 5  ;;  %v13847_v56 = vld [vmem:[#allocation2 + $0x1c] sm:$0xf]  ;;  %10502 = vmatprep.subr.bf16.mxu1 %v11095_v40 }
 0x2a5   : > { %v13837_v57 = vmul.f32 0.5, %v4172_v26  ;;  %v13839_v47 = vmul.f32 0.5, %v4164_v32  ;;  %v5072_v44 = vrot.slane %v5071_v36, 4  ;;  %v5081_v11 = vor.u32 %v5080_v39, %v5076_v18 }
 0x2a6   : > { %v11176_v51 = vpop.eup %11175  ;;  %v5086_v33 = vrot.slane %v5084_v31, 5  ;;  %v5498_v27 = vsel %vm11642_vm5, %v9489_v45, %v5497_v30  ;;  %v5501_v7 = vsel %vm11642_vm5, %v5499_v13, %v5500_v58  ;;  %v9537_v32 = vcombine.low %v13795_v12, %v13806_v3  ;;  %v11090_v31 = vld [vmem:[#allocation3 + $0x1d8] sm:$0xff]   ;;  %v11092_v58 = vld [vmem:[#allocation3 + $0x1e0] sm:$0xff]  }
 0x2a7   : > { %v4308_v20 = vadd.f32 1.0, %v11176_v51  ;;  %v5082_v38 = vrot.slane %v5081_v11, 4  ;;  %v9569_v26 = vcombine.low %v5498_v27, %v5501_v7  ;;  %v5697_v61 = vshrl.u32 %v13835_v25, 16  ;;  %v11091_v30 = vld [vmem:[#allocation3 + $0x198] sm:$0xff]   ;;  %10606 = vmatprep.subr.bf16.mxu0 %v11090_v31 }
 0x2a8   : > { %v9586_v24 = vcombine.low %v13835_v25, %v13841_v62  ;;  %v5089_v52 = vshrl.u32 %v13833_v37, 16  ;;  %v5092_v59 = vshll.u32 %v13833_v37, 16  ;;  %v5077_v15 = vsel %vm11631_vm4, %v5072_v44, %v5076_v18  ;;  %10607 = vmatpush3.bf16.msra.mxu0 %v11091_v30 }
 0x2a9   : > { %v4340_v28 = vmul.f32 %v4308_v20, %v4212_v50  ;;  %v5087_v12 = vsel %vm11631_vm4, %v5082_v38, %v5086_v33  ;;  %8226 = vmatmul.mubr.bf16.gmra.mrb[164].mxu0 %v9569_v26  ;;  %v5098_v3 = vshll.u32 %v13847_v56, 16  ;;  %v5102_v50 = vshrl.u32 %v13847_v56, 16  ;;  %10608 = vmatprep.subr.bf16.mxu0 %v11092_v58 }
 0x2aa   : > { %v11178_v63 = vpop.eup %11177  ;;  %v9553_v8 = vcombine.low %v5077_v15, %v5087_v12  ;;  %8233 = vmatprep.mubr.bf16.mxu0 %v9586_v24  ;;  %v5091_v35 = vrot.slane %v5089_v52, 4  ;;  %v5094_v21 = vrot.slane %v5092_v59, 5  ;;  %v5108_v13 = vshll.u32 %v13854_v34, 16  ;;  %v11096_v15 = vld [vmem:[#allocation3 + $0x1a0] sm:$0xff]   ;;  %v4954_v12 = vld [vmem:[#allocation2 + $0x8c] sm:$0x1] }
 0x2ab   : > { %v9780_v41 = vpack.c.bf16 %v4340_v28, %v4340_v28  ;;  %v11180_v36 = vpop.eup %11179  ;;  %v4313_v39 = vadd.f32 1.0, %v11178_v63  ;;  %v13864_v18 = vrot.slane %v5098_v3, 5  ;;  %v5104_v45 = vrot.slane %v5102_v50, 4 }
 0x2ac   : > { %v11182_v51 = vpop.eup %11181  ;;  %v4311_v46 = vadd.f32 1.0, %v11180_v36  ;;  %8064 = vmatprep.mubr.bf16.mxu1 %v9553_v8  ;;  %v5095_v20 = vor.u32 %v5094_v21, %v5091_v35  ;;  %v13870_v26 = vadd.f32 %v13702_v5, %v13530_v1  ;;  %v5110_v21 = vrot.slane %v5108_v13, 5  ;;  %10609 = vmatpush3.bf16.msra.mxu0 %v11096_v15 }
 0x2ad   : > { %v4737_v44 = vshrl.u32 %v9780_v41, 16  ;;  %v4740_v11 = vshll.u32 %v9780_v41, 16  ;;  %v11184_v33 = vpop.eup %11183  ;;  %v4345_v27 = vmul.f32 %v4313_v39, %v4217_v29  ;;  %v4314_v7 = vadd.f32 1.0, %v11182_v51  ;;  %8065 = vmatmul.mubr.bf16.gmra.mrb[132].mxu1 %v9537_v32  ;;  %v11098_v39 = vld [vmem:[#allocation3 + $0x1e8] sm:$0xff]  }
 0x2ae   : > { %v5105_v38 = vor.u32 %v5104_v45, %v13864_v18  ;;  %v4343_v24 = vmul.f32 %v4311_v46, %v4215_v53  ;;  %v4312_v52 = vadd.f32 1.0, %v11184_v33  ;;  %v5096_v59 = vrot.slane %v5095_v20, 4  ;;  %v11099_v45 = vld [vmem:[#allocation3 + $0x1a8] sm:$0xff]   ;;  %10610 = vmatprep.subr.bf16.mxu0 %v11098_v39  ;;  %v15931_v39 = vld [vmem:[#allocation17_spill] sm:$0xff] }
 0x2af   : > { %v4739_v28 = vrot.slane %v4737_v44, 7  ;;  %v9785_v3 = vpack.c.bf16 %v4345_v27, %v4345_v27  ;;  %v4346_v50 = vmul.f32 %v4314_v7, %v13837_v57  ;;  %v5700_v29 = vshll.u32 %v13835_v25, 16  ;;  %v11100_v44 = vld [vmem:[#allocation3 + $0x1f0] sm:$0xff]   ;;  %v4964_v27 = vld [vmem:[#allocation2 + $0x9c] sm:$0xf] }
 0x2b0   : > { %v5106_v32 = vrot.slane %v5105_v38, 4  ;;  %v9783_v8 = vpack.c.bf16 %v4343_v24, %v4343_v24  ;;  %v4344_v1 = vmul.f32 %v4312_v52, %v13839_v47  ;;  %v5101_v36 = vsel %vm11631_vm4, %v5096_v59, %v13864_v18  ;;  %v11097_v47 = vld [vmem:[#allocation3 + $0x138] sm:$0xff]   ;;  %10611 = vmatpush3.bf16.msra.mxu0 %v11099_v45 }
 0x2b1   : > { %v4742_v63 = vor.u32 %v4740_v11, %v4739_v28  ;;  %v4744_v41 = vrot.slane %v4739_v28, 4  ;;  %v4780_v5 = vshrl.u32 %v9785_v3, 16  ;;  %v4783_v53 = vshll.u32 %v9785_v3, 16  ;;  %10503 = vmatpush3.bf16.msra.mxu1 %v11097_v47  ;;  %v4975_v59 = vld [vmem:[#allocation2 + $0xb0] sm:$0x1]  ;;  %10612 = vmatprep.subr.bf16.mxu0 %v11100_v44 }
 0x2b2   : > { %v9786_v35 = vpack.c.bf16 %v4346_v50, %v4346_v50  ;;  %v4763_v30 = vshrl.u32 %v9783_v8, 16  ;;  %v4766_v58 = vshll.u32 %v9783_v8, 16  ;;  %v9784_v51 = vpack.c.bf16 %v4344_v1, %v4344_v1 }
 0x2b3   : > { %v4743_v31 = vsel %vm13579_vm14, %v4735_v49, %v4742_v63  ;;  %v4955_v57 = vsel %vm13383_vm8, %v4744_v41, %v4954_v12  ;;  %v4782_v13 = vrot.slane %v4780_v5, 7  ;;  %v4971_v49 = vld [vmem:[#allocation2 + $0xa8] sm:$0xf]  ;;  %v5111_v46 = vsel %vm11631_vm4, %v5106_v32, %v5110_v21  ;;  %v4968_v32 = vld [vmem:[#allocation2 + $0xa4] sm:$0x1] }
 0x2b4   : > { %4953 = vst [vmem:[#allocation2 + $0x88] sm:$0xf] %v4743_v31  ;;  %4956 = vst [vmem:[#allocation2 + $0x8c] sm:$0x1] %v4955_v57  ;;  %v4788_v22 = vshrl.u32 %v9786_v35, 16  ;;  %v4765_v11 = vrot.slane %v4763_v30, 7  ;;  %v13889_v18 = vadd.f32 %v13706_v19, %v13517_v60  ;;  %v9554_v15 = vcombine.low %v5101_v36, %v5111_v46 }
 0x2b5   : > { %v4253_v20 = vmul.f32 0.70710677, %v13870_v26  ;;  %v4785_v33 = vor.u32 %v4783_v53, %v4782_v13  ;;  %v4791_v38 = vshll.u32 %v9786_v35, 16  ;;  %v4771_v28 = vshrl.u32 %v9784_v51, 16  ;;  %v11102_v12 = vld [vmem:[#allocation3 + $0x1b0] sm:$0xff]   ;;  %v11103_v53 = vld [vmem:[#allocation3 + $0x1f8] sm:$0xff]  }
 0x2b6   : > { %v4790_v7 = vrot.slane %v4788_v22, 7  ;;  %v4786_v24 = vrot.slane %v4782_v13, 4  ;;  %v4768_v52 = vor.u32 %v4766_v58, %v4765_v11  ;;  %v4774_v40 = vshll.u32 %v9784_v51, 16  ;;  %v4457_v63 = vld [vmem:[#allocation2 + $0xc8] sm:$0x1]  ;;  %8072 = vmatprep.mubr.bf16.mxu1 %v9554_v15  ;;  %10613 = vmatpush3.bf16.msra.mxu0 %v11102_v12  ;;  %v11104_v58 = vld [vmem:[#allocation3 + $0x1b8] sm:$0xff]  }
 0x2b7   : > { %v4972_v3 = vsel %vm13568_vm13, %v4785_v33, %v4971_v49  ;;  %v4773_v19 = vrot.slane %v4771_v28, 7  ;;  %v4769_v41 = vrot.slane %v4765_v11, 4  ;;  %11185 = verf.f32 %v4253_v20  ;;  %v4454_v5 = vld [vmem:[#allocation2 + $0xbc] sm:$0x1]  ;;  %v5426_v13 = vld [vmem:[#allocation2 + $0x18] sm:$0xe]  ;;  %10614 = vmatprep.subr.bf16.mxu0 %v11103_v53 }
 0x2b8   : > { %v4793_v50 = vor.u32 %v4791_v38, %v4790_v7  ;;  %v4795_v60 = vrot.slane %v4790_v7, 4  ;;  %4973 = vst [vmem:[#allocation2 + $0xa8] sm:$0xf] %v4972_v3  ;;  %v4965_v8 = vsel %vm13568_vm13, %v4768_v52, %v4964_v27  ;;  %v4251_v1 = vmul.f32 0.70710677, %v13889_v18  ;;  %v11106_v3 = vld [vmem:[#allocation3 + $0x200] sm:$0xff]  }
 0x2b9   : > { %4966 = vst [vmem:[#allocation2 + $0x9c] sm:$0xf] %v4965_v8  ;;  %v4776_v31 = vor.u32 %v4774_v40, %v4773_v19  ;;  %v4778_v57 = vrot.slane %v4773_v19, 4  ;;  %v4188_v30 = vadd.f32 %v13715_v42, %v13534_v43  ;;  %v4458_v47 = vsel %vm13397_vm10, 0, %v4457_v63  ;;  %v13916_v42 = vld [vmem:[#allocation2 + $0x30] sm:$0xf]  ;;  %10784 = vmatprep.subr.bf16.mxu1 %v11106_v3 }
 0x2ba   : > { %v4794_v35 = vsel %vm13579_vm14, %v4786_v24, %v4793_v50  ;;  %v4976_v21 = vsel %vm13383_vm8, %v4795_v60, %v4975_v59  ;;  %11187 = verf.f32 %v4251_v1  ;;  %v4180_v45 = vadd.f32 %v13723_v2, %v15931_v39  ;;  %4459 = vst [vmem:[#allocation2 + $0xc8] sm:$0x1] %v4458_v47  ;;  %v13918_v2 = vld [vmem:[#allocation2 + $0x24] sm:$0xf]  ;;  %v13933_v7 = vld [vmem:[#allocation2 + $0x28] sm:$0xf]  ;;  %10615 = vmatpush3.bf16.msra.mxu0 %v11104_v58 }
 0x2bb   : > { %4974 = vst [vmem:[#allocation2 + $0xac] sm:$0xf] %v4794_v35  ;;  %4977 = vst [vmem:[#allocation2 + $0xb0] sm:$0x1] %v4976_v21  ;;  %v13908_v22 = vrot.slane %v5676_v6, 5  ;;  %v4777_v51 = vsel %vm13579_vm14, %v4769_v41, %v4776_v31  ;;  %v4969_v44 = vsel %vm13383_vm8, %v4778_v57, %v4968_v32  ;;  %v4455_v43 = vsel %vm13397_vm10, 0, %v4454_v5 }
 0x2bc   : > { %4967 = vst [vmem:[#allocation2 + $0xa0] sm:$0xf] %v4777_v51  ;;  %4970 = vst [vmem:[#allocation2 + $0xa4] sm:$0x1] %v4969_v44  ;;  %v4254_v6 = vmul.f32 0.70710677, %v4188_v30  ;;  %v9538_v27 = vcombine.low %v13833_v37, %v13847_v56 }
 0x2bd   : > { %v4252_v11 = vmul.f32 0.70710677, %v4180_v45  ;;  %4456 = vst [vmem:[#allocation2 + $0xbc] sm:$0x1] %v4455_v43  ;;  %v13924_v46 = vrot.slane %v5697_v61, 4  ;;  %v13928_v20 = vrot.slane %v5700_v29, 5 }
 0x2be   : > { %v5504_v33 = vrot.slane %v13847_v56, 5  ;;  %v4221_v38 = vmul.f32 0.5, %v13870_v26  ;;  %v4219_v28 = vmul.f32 0.5, %v13889_v18  ;;  %11189 = verf.f32 %v4254_v6  ;;  %v13937_v52 = vld [vmem:[#allocation2 + $0x34] sm:$0xf]  ;;  %8073 = vmatmul.mubr.bf16.gmra.mrb[136].mxu1 %v9538_v27 }
 0x2bf   : > { %v9490_v24 = vrot.slane %v5426_v13, 9  ;;  %v13939_v61 = vmul.f32 0.5, %v4188_v30  ;;  %11191 = verf.f32 %v4252_v11  ;;  %v5507_v29 = vrot.slane %v13854_v34, 5  ;;  %v5027_v56 = vld [vmem:[#allocation2 + $0x2c] sm:$0x1] }
 0x2c0   : > { %v5506_v25 = vrot.slane %v5504_v33, 4  ;;  %v5721_v37 = vshrl.u32 %v13916_v42, 16  ;;  %v5113_v59 = vshrl.u32 %v13918_v2, 16  ;;  %v5116_v26 = vshll.u32 %v13918_v2, 16  ;;  %v5427_v5 = vld [vmem:[#allocation2 + $0x24] sm:$0xe] }
 0x2c1   : > { %v5122_v18 = vshll.u32 %v13933_v7, 16  ;;  %v5505_v40 = vsel %vm11642_vm5, %v9490_v24, %v5504_v33  ;;  %v9587_v12 = vcombine.low %v13916_v42, %v13937_v52  ;;  %v5126_v34 = vshrl.u32 %v13933_v7, 16  ;;  %v11186_v50 = vpop.eup %11185  ;;  %v13958_v6 = vld [vmem:[#allocation2 + $0x40] sm:$0xf]  ;;  %v13960_v24 = vld [vmem:[#allocation2 + $0x30] sm:$0xf] }
 0x2c2   : > { %v5508_v15 = vsel %vm11642_vm5, %v5506_v25, %v5507_v29  ;;  %v5115_v19 = vrot.slane %v5113_v59, 4  ;;  %v5118_v32 = vrot.slane %v5116_v26, 5  ;;  %v4317_v41 = vadd.f32 1.0, %v11186_v50  ;;  %v13970_v59 = vld [vmem:[#allocation2 + $0x3c] sm:$0xf] }
 0x2c3   : > { %v9570_v60 = vcombine.low %v5505_v40, %v5508_v15  ;;  %v5124_v63 = vrot.slane %v5122_v18, 5  ;;  %v5128_v8 = vrot.slane %v5126_v34, 4  ;;  %v5132_v1 = vshll.u32 %v5027_v56, 16  ;;  %v14174_v57 = vld [vmem:[#allocation2 + $0x94] sm:$0xf] }
 0x2c4   : > { %v5511_v53 = vrot.slane %v13933_v7, 5  ;;  %v11188_v35 = vpop.eup %11187  ;;  %v4220_v21 = vmul.f32 0.5, %v4180_v45  ;;  %v5724_v31 = vshll.u32 %v13916_v42, 16  ;;  %v5119_v30 = vor.u32 %v5118_v32, %v5115_v19  ;;  %15934 = vst [vmem:[#allocation23_spill] sm:$0xff] %v14174_v57  ;;  %v5435_v49 = vld [vmem:[#allocation2 + $0x84] sm:$0xe] }
 0x2c5   : > { %8234 = vmatmul.mubr.bf16.gmra.mrb[168].mxu0 %v9570_v60  ;;  %v4349_v36 = vmul.f32 %v4317_v41, %v4221_v38  ;;  %v4315_v47 = vadd.f32 1.0, %v11188_v35  ;;  %v13956_v39 = vrot.slane %v5721_v37, 4  ;;  %v5129_v13 = vor.u32 %v5128_v8, %v5124_v63 }
 0x2c6   : > { %8241 = vmatprep.mubr.bf16.mxu0 %v9587_v12  ;;  %v5120_v58 = vrot.slane %v5119_v30, 4  ;;  %v9491_v51 = vrot.slane %v5427_v5, 9  ;;  %v5513_v44 = vrot.slane %v5511_v53, 4  ;;  %v5514_v43 = vrot.slane %v5027_v56, 5 }
 0x2c7   : > { %v9789_v11 = vpack.c.bf16 %v4349_v36, %v4349_v36  ;;  %v4347_v45 = vmul.f32 %v4315_v47, %v4219_v28  ;;  %v5130_v33 = vrot.slane %v5129_v13, 4  ;;  %v5134_v27 = vrot.slane %v5132_v1, 5  ;;  %v4978_v47 = vld [vmem:[#allocation2 + $0xb4] sm:$0xf] }
 0x2c8   : > { %v11190_v25 = vpop.eup %11189  ;;  %v5125_v38 = vsel %vm11631_vm4, %v5120_v58, %v5124_v63  ;;  %v5512_v29 = vsel %vm11642_vm5, %v9491_v51, %v5511_v53  ;;  %v5515_v37 = vsel %vm11642_vm5, %v5513_v44, %v5514_v43  ;;  %v9539_v56 = vcombine.low %v13918_v2, %v13933_v7  ;;  %v13978_v7 = vld [vmem:[#allocation2 + $0x34] sm:$0xf]  ;;  %v4985_v63 = vld [vmem:[#allocation2 + $0xc0] sm:$0xf] }
 0x2c9   : > { %v11192_v28 = vpop.eup %11191  ;;  %v4814_v26 = vshrl.u32 %v9789_v11, 16  ;;  %v9787_v18 = vpack.c.bf16 %v4347_v45, %v4347_v45  ;;  %v4318_v40 = vadd.f32 1.0, %v11190_v25  ;;  %v9588_v15 = vcombine.low %v13970_v59, %v13958_v6  ;;  %v5028_v45 = vld [vmem:[#allocation2 + $0x38] sm:$0x1] }
 0x2ca   : > { %v4316_v12 = vadd.f32 1.0, %v11192_v28  ;;  %v5135_v34 = vsel %vm11631_vm4, %v5130_v33, %v5134_v27  ;;  %v9571_v3 = vcombine.low %v5512_v29, %v5515_v37  ;;  %v5137_v50 = vshrl.u32 %v13960_v24, 16 }
 0x2cb   : > { %v4816_v60 = vrot.slane %v4814_v26, 7  ;;  %v4817_v19 = vshll.u32 %v9789_v11, 16  ;;  %v4797_v32 = vshrl.u32 %v9787_v18, 16  ;;  %v4350_v2 = vmul.f32 %v4318_v40, %v13939_v61  ;;  %v4989_v40 = vld [vmem:[#allocation2 + $0xc8] sm:$0x1] }
 0x2cc   : > { %v4348_v41 = vmul.f32 %v4316_v12, %v4220_v21  ;;  %v9555_v8 = vcombine.low %v5125_v38, %v5135_v34  ;;  %v5139_v1 = vrot.slane %v5137_v50, 4  ;;  %v5140_v5 = vshll.u32 %v13960_v24, 16 }
 0x2cd   : > { %8242 = vmatmul.mubr.bf16.gmra.mrb[172].mxu0 %v9571_v3  ;;  %v4819_v53 = vor.u32 %v4817_v19, %v4816_v60  ;;  %v4799_v35 = vrot.slane %v4797_v32, 7  ;;  %v4800_v30 = vshll.u32 %v9787_v18, 16  ;;  %v9790_v36 = vpack.c.bf16 %v4350_v2, %v4350_v2  ;;  %v5428_v18 = vld [vmem:[#allocation2 + $0x30] sm:$0xe] }
 0x2ce   : > { %8249 = vmatprep.mubr.bf16.mxu0 %v9588_v15  ;;  %v9788_v13 = vpack.c.bf16 %v4348_v41, %v4348_v41  ;;  %8080 = vmatprep.mubr.bf16.mxu1 %v9555_v8  ;;  %v5142_v58 = vrot.slane %v5140_v5, 5  ;;  %v5146_v61 = vshll.u32 %v13978_v7, 16  ;;  %v5150_v51 = vshrl.u32 %v13978_v7, 16 }
 0x2cf   : > { %v4986_v21 = vsel %vm13568_vm13, %v4819_v53, %v4985_v63  ;;  %v4802_v44 = vor.u32 %v4800_v30, %v4799_v35  ;;  %v4822_v43 = vshrl.u32 %v9790_v36, 16  ;;  %8081 = vmatmul.mubr.bf16.gmra.mrb[140].mxu1 %v9539_v56  ;;  %v5745_v11 = vshrl.u32 %v13970_v59, 16 }
 0x2d0   : > { %v4820_v33 = vrot.slane %v4816_v60, 4  ;;  %4987 = vst [vmem:[#allocation2 + $0xc0] sm:$0xf] %v4986_v21  ;;  %v4825_v27 = vshll.u32 %v9790_v36, 16  ;;  %v4805_v25 = vshrl.u32 %v9788_v13, 16  ;;  %v5143_v38 = vor.u32 %v5142_v58, %v5139_v1 }
 0x2d1   : > { %v4979_v29 = vsel %vm13568_vm13, %v4802_v44, %v4978_v47  ;;  %v4824_v37 = vrot.slane %v4822_v43, 7  ;;  %v5148_v28 = vrot.slane %v5146_v61, 5  ;;  %v5152_v26 = vrot.slane %v5150_v51, 4  ;;  %v4982_v60 = vld [vmem:[#allocation2 + $0xbc] sm:$0x1] }
 0x2d2   : > { %4980 = vst [vmem:[#allocation2 + $0xb4] sm:$0xf] %v4979_v29  ;;  %v4807_v15 = vrot.slane %v4805_v25, 7  ;;  %v4808_v12 = vshll.u32 %v9788_v13, 16  ;;  %v5144_v56 = vrot.slane %v5143_v38, 4  ;;  %v5156_v34 = vshll.u32 %v5028_v45, 16 }
 0x2d3   : > { %v4827_v3 = vor.u32 %v4825_v27, %v4824_v37  ;;  %v4829_v50 = vrot.slane %v4824_v37, 4  ;;  %v5153_v19 = vor.u32 %v5152_v26, %v5148_v28  ;;  %v5518_v32 = vrot.slane %v13978_v7, 5  ;;  %v5610_v13 = vld [vmem:[#allocation2 + $0x48] sm:$0xf]  ;;  %v13997_v58 = vld [vmem:[#allocation2 + $0x3c] sm:$0xf] }
 0x2d4   : > { %v4803_v2 = vrot.slane %v4799_v35, 4  ;;  %v4810_v63 = vor.u32 %v4808_v12, %v4807_v15  ;;  %v4812_v54 = vrot.slane %v4807_v15, 4  ;;  %v9492_v41 = vrot.slane %v5428_v18, 9  ;;  %v14009_v21 = vld [vmem:[#allocation2 + $0x4c] sm:$0xf] }
 0x2d5   : > { %v4828_v8 = vsel %vm13579_vm14, %v4820_v33, %v4827_v3  ;;  %v4990_v1 = vsel %vm13383_vm8, %v4829_v50, %v4989_v40  ;;  %v5154_v5 = vrot.slane %v5153_v19, 4  ;;  %v5158_v53 = vrot.slane %v5156_v34, 5  ;;  %v14011_v44 = vld [vmem:[#allocation2 + $0x40] sm:$0xf]  ;;  %v5029_v25 = vld [vmem:[#allocation2 + $0x44] sm:$0x1] }
 0x2d6   : > { %4988 = vst [vmem:[#allocation2 + $0xc4] sm:$0xf] %v4828_v8  ;;  %4991 = vst [vmem:[#allocation2 + $0xc8] sm:$0x1] %v4990_v1  ;;  %v4811_v30 = vsel %vm13579_vm14, %v4803_v2, %v4810_v63  ;;  %v4983_v36 = vsel %vm13383_vm8, %v4812_v54, %v4982_v60  ;;  %v5520_v35 = vrot.slane %v5518_v32, 4  ;;  %v5521_v47 = vrot.slane %v5028_v45, 5 }
 0x2d7   : > { %4981 = vst [vmem:[#allocation2 + $0xb8] sm:$0xf] %v4811_v30  ;;  %4984 = vst [vmem:[#allocation2 + $0xbc] sm:$0x1] %v4983_v36  ;;  %v14001_v61 = vrot.slane %v5724_v31, 5  ;;  %v14003_v51 = vrot.slane %v5745_v11, 4  ;;  %v5149_v10 = vsel %vm11631_vm4, %v5144_v56, %v5148_v28  ;;  %v5159_v23 = vsel %vm11631_vm4, %v5154_v5, %v5158_v53 }
 0x2d8   : > { %v5748_v43 = vshll.u32 %v13970_v59, 16  ;;  %v9556_v45 = vcombine.low %v5149_v10, %v5159_v23  ;;  %v5519_v42 = vsel %vm11642_vm5, %v9492_v41, %v5518_v32  ;;  %v5522_v31 = vsel %vm11642_vm5, %v5520_v35, %v5521_v47  ;;  %v5429_v26 = vld [vmem:[#allocation2 + $0x3c] sm:$0xe]  ;;  %v14027_v3 = vld [vmem:[#allocation2 + $0x48] sm:$0xf] }
 0x2d9   : > { %v9572_v11 = vcombine.low %v5519_v42, %v5522_v31  ;;  %v9540_v33 = vcombine.low %v13960_v24, %v13978_v7  ;;  %v5769_v27 = vshrl.u32 %v5610_v13, 16  ;;  %v5161_v38 = vshrl.u32 %v13997_v58, 16  ;;  %v14034_v8 = vld [vmem:[#allocation2 + $0x4c] sm:$0xf]  ;;  %v14042_v30 = vld [vmem:[#allocation2 + $0x58] sm:$0xf] }
 0x2da   : > { %8088 = vmatprep.mubr.bf16.mxu1 %v9556_v45  ;;  %v9589_v29 = vcombine.low %v5610_v13, %v14009_v21  ;;  %v5164_v59 = vshll.u32 %v13997_v58, 16  ;;  %v5170_v37 = vshll.u32 %v14011_v44, 16  ;;  %v5174_v28 = vshrl.u32 %v14011_v44, 16  ;;  %v5030_v36 = vld [vmem:[#allocation2 + $0x50] sm:$0x1] }
 0x2db   : > { %8250 = vmatmul.mubr.bf16.gmra.mrb[176].mxu0 %v9572_v11  ;;  %8089 = vmatmul.mubr.bf16.gmra.mrb[144].mxu1 %v9540_v33  ;;  %v5772_v40 = vshll.u32 %v5610_v13, 16  ;;  %v5163_v24 = vrot.slane %v5161_v38, 4  ;;  %v5525_v7 = vrot.slane %v14011_v44, 5  ;;  %v5180_v34 = vshll.u32 %v5029_v25, 16  ;;  %v5622_v18 = vld [vmem:[#allocation2 + $0x90] sm:$0xf] }
 0x2dc   : > { %8257 = vmatprep.mubr.bf16.mxu0 %v9589_v29  ;;  %v5166_v15 = vrot.slane %v5164_v59, 5  ;;  %v5172_v12 = vrot.slane %v5170_v37, 5  ;;  %v5176_v56 = vrot.slane %v5174_v28, 4  ;;  %v14029_v50 = vrot.slane %v5748_v43, 5  ;;  %v5612_v43 = vld [vmem:[#allocation2 + $0x54] sm:$0xf] }
 0x2dd   : > { %v9493_v60 = vrot.slane %v5429_v26, 9  ;;  %v5527_v19 = vrot.slane %v5525_v7, 4  ;;  %v5528_v32 = vrot.slane %v5029_v25, 5  ;;  %v14031_v2 = vrot.slane %v5769_v27, 4  ;;  %v5430_v29 = vld [vmem:[#allocation2 + $0x48] sm:$0xe] }
 0x2de   : > { %v5167_v54 = vor.u32 %v5166_v15, %v5163_v24  ;;  %v5177_v41 = vor.u32 %v5176_v56, %v5172_v12  ;;  %v14036_v1 = vrot.slane %v5772_v40, 5  ;;  %v5185_v35 = vshrl.u32 %v14027_v3, 16  ;;  %v14053_v40 = vld [vmem:[#allocation2 + $0x60] sm:$0xf]  ;;  %v14058_v56 = vld [vmem:[#allocation2 + $0x64] sm:$0xf] }
 0x2df   : > { %v5526_v5 = vsel %vm11642_vm5, %v9493_v60, %v5525_v7  ;;  %v5529_v53 = vsel %vm11642_vm5, %v5527_v19, %v5528_v32  ;;  %v5182_v10 = vrot.slane %v5180_v34, 5  ;;  %v5188_v42 = vshll.u32 %v14027_v3, 16 }
 0x2e0   : > { %v5168_v47 = vrot.slane %v5167_v54, 4  ;;  %v5178_v13 = vrot.slane %v5177_v41, 4  ;;  %v9573_v23 = vcombine.low %v5526_v5, %v5529_v53  ;;  %v5187_v45 = vrot.slane %v5185_v35, 4  ;;  %v14061_v54 = vld [vmem:[#allocation2 + $0x54] sm:$0xf] }
 0x2e1   : > { %v5194_v31 = vshll.u32 %v14034_v8, 16  ;;  %v5198_v11 = vshrl.u32 %v14034_v8, 16  ;;  %v9590_v25 = vcombine.low %v5612_v43, %v14042_v30  ;;  %v5204_v38 = vshll.u32 %v5030_v36, 16  ;;  %v14063_v41 = vld [vmem:[#allocation2 + $0x58] sm:$0xf] }
 0x2e2   : > { %v5173_v33 = vsel %vm11631_vm4, %v5168_v47, %v5172_v12  ;;  %v5183_v27 = vsel %vm11631_vm4, %v5178_v13, %v5182_v10  ;;  %v5190_v37 = vrot.slane %v5188_v42, 5  ;;  %v9541_v24 = vcombine.low %v13997_v58, %v14011_v44 }
 0x2e3   : > { %v9557_v59 = vcombine.low %v5173_v33, %v5183_v27  ;;  %8258 = vmatmul.mubr.bf16.gmra.mrb[180].mxu0 %v9573_v23  ;;  %v5196_v28 = vrot.slane %v5194_v31, 5  ;;  %v5200_v26 = vrot.slane %v5198_v11, 4  ;;  %v5793_v7 = vshrl.u32 %v5612_v43, 16 }
 0x2e4   : > { %v5796_v15 = vshll.u32 %v5612_v43, 16  ;;  %8265 = vmatprep.mubr.bf16.mxu0 %v9590_v25  ;;  %v5532_v12 = vrot.slane %v14034_v8, 5  ;;  %v5191_v60 = vor.u32 %v5190_v37, %v5187_v45  ;;  %v9494_v32 = vrot.slane %v5430_v29, 9  ;;  %v5031_v43 = vld [vmem:[#allocation2 + $0x5c] sm:$0x1] }
 0x2e5   : > { %8096 = vmatprep.mubr.bf16.mxu1 %v9557_v59  ;;  %v5201_v19 = vor.u32 %v5200_v26, %v5196_v28  ;;  %v5206_v5 = vrot.slane %v5204_v38, 5  ;;  %v5535_v44 = vrot.slane %v5030_v36, 5  ;;  %v5817_v53 = vshrl.u32 %v14053_v40, 16  ;;  %v5431_v37 = vld [vmem:[#allocation2 + $0x54] sm:$0xe] }
 0x2e6   : > { %8097 = vmatmul.mubr.bf16.gmra.mrb[148].mxu1 %v9541_v24  ;;  %v5534_v58 = vrot.slane %v5532_v12, 4  ;;  %v5192_v35 = vrot.slane %v5191_v60, 4  ;;  %v5533_v13 = vsel %vm11642_vm5, %v9494_v32, %v5532_v12  ;;  %v9591_v10 = vcombine.low %v14053_v40, %v14058_v56 }
 0x2e7   : > { %v5202_v47 = vrot.slane %v5201_v19, 4  ;;  %v5209_v45 = vshrl.u32 %v14061_v54, 16  ;;  %v5212_v42 = vshll.u32 %v14061_v54, 16  ;;  %v5218_v36 = vshll.u32 %v14063_v41, 16 }
 0x2e8   : > { %v5536_v23 = vsel %vm11642_vm5, %v5534_v58, %v5535_v44  ;;  %v5197_v31 = vsel %vm11631_vm4, %v5192_v35, %v5196_v28  ;;  %v5222_v27 = vshrl.u32 %v14063_v41, 16  ;;  %v14080_v26 = vrot.slane %v5793_v7, 4  ;;  %v14088_v58 = vld [vmem:[#allocation2 + $0x60] sm:$0xf] }
 0x2e9   : > { %v5207_v11 = vsel %vm11631_vm4, %v5202_v47, %v5206_v5  ;;  %v9574_v33 = vcombine.low %v5533_v13, %v5536_v23  ;;  %v5211_v38 = vrot.slane %v5209_v45, 4  ;;  %v5214_v29 = vrot.slane %v5212_v42, 5  ;;  %v14090_v13 = vld [vmem:[#allocation2 + $0x6c] sm:$0xf] }
 0x2ea   : > { %v9558_v25 = vcombine.low %v5197_v31, %v5207_v11  ;;  %v5220_v59 = vrot.slane %v5218_v36, 5  ;;  %v5224_v24 = vrot.slane %v5222_v27, 4  ;;  %v5228_v12 = vshll.u32 %v5031_v43, 16  ;;  %v14101_v36 = vld [vmem:[#allocation2 + $0x70] sm:$0xf] }
 0x2eb   : > { %8266 = vmatmul.mubr.bf16.gmra.mrb[184].mxu0 %v9574_v33  ;;  %v5539_v60 = vrot.slane %v14063_v41, 5  ;;  %v14083_v19 = vrot.slane %v5796_v15, 5  ;;  %v9542_v28 = vcombine.low %v14027_v3, %v14034_v8  ;;  %v5820_v32 = vshll.u32 %v14053_v40, 16  ;;  %v14095_v3 = vld [vmem:[#allocation2 + $0x64] sm:$0xf] }
 0x2ec   : > { %8104 = vmatprep.mubr.bf16.mxu1 %v9558_v25  ;;  %8273 = vmatprep.mubr.bf16.mxu0 %v9591_v10  ;;  %v5215_v5 = vor.u32 %v5214_v29, %v5211_v38  ;;  %v5225_v44 = vor.u32 %v5224_v24, %v5220_v59  ;;  %v9495_v7 = vrot.slane %v5431_v37, 9  ;;  %v5542_v47 = vrot.slane %v5031_v43, 5  ;;  %v5032_v43 = vld [vmem:[#allocation2 + $0x68] sm:$0x1]  ;;  %v5432_v24 = vld [vmem:[#allocation2 + $0x60] sm:$0xe] }
 0x2ed   : > { %v5541_v35 = vrot.slane %v5539_v60, 4  ;;  %v14092_v23 = vrot.slane %v5817_v53, 4  ;;  %v5230_v42 = vrot.slane %v5228_v12, 5  ;;  %v5233_v31 = vshrl.u32 %v14088_v58, 16 }
 0x2ee   : > { %8105 = vmatmul.mubr.bf16.gmra.mrb[152].mxu1 %v9542_v28  ;;  %v5216_v45 = vrot.slane %v5215_v5, 4  ;;  %v5226_v8 = vrot.slane %v5225_v44, 4  ;;  %v5540_v40 = vsel %vm11642_vm5, %v9495_v7, %v5539_v60  ;;  %v5841_v33 = vshrl.u32 %v14090_v13, 16 }
 0x2ef   : > { %v5543_v10 = vsel %vm11642_vm5, %v5541_v35, %v5542_v47  ;;  %v5236_v27 = vshll.u32 %v14088_v58, 16  ;;  %v5235_v38 = vrot.slane %v5233_v31, 4  ;;  %v5242_v29 = vshll.u32 %v14095_v3, 16  ;;  %v5618_v47 = vld [vmem:[#allocation2 + $0x78] sm:$0xf] }
 0x2f0   : > { %v5221_v53 = vsel %vm11631_vm4, %v5216_v45, %v5220_v59  ;;  %v9575_v11 = vcombine.low %v5540_v40, %v5543_v10  ;;  %v5231_v25 = vsel %vm11631_vm4, %v5226_v8, %v5230_v42  ;;  %v5246_v37 = vshrl.u32 %v14095_v3, 16  ;;  %v14121_v10 = vld [vmem:[#allocation2 + $0x7c] sm:$0xf]  ;;  %v14123_v31 = vld [vmem:[#allocation2 + $0x6c] sm:$0xf] }
 0x2f1   : > { %v9559_v12 = vcombine.low %v5221_v53, %v5231_v25  ;;  %v9592_v60 = vcombine.low %v14090_v13, %v14101_v36  ;;  %v5238_v28 = vrot.slane %v5236_v27, 5  ;;  %v5252_v59 = vshll.u32 %v5032_v43, 16  ;;  %15932 = vst [vmem:[#allocation24_spill] sm:$0xff] %v14121_v10  ;;  %v14126_v25 = vld [vmem:[#allocation2 + $0x70] sm:$0xf] }
 0x2f2   : > { %v14114_v5 = vrot.slane %v5820_v32, 5  ;;  %v5244_v44 = vrot.slane %v5242_v29, 5  ;;  %v5248_v7 = vrot.slane %v5246_v37, 4  ;;  %v5546_v35 = vrot.slane %v14095_v3, 5 }
 0x2f3   : > { %8274 = vmatmul.mubr.bf16.gmra.mrb[188].mxu0 %v9575_v11  ;;  %8112 = vmatprep.mubr.bf16.mxu1 %v9559_v12  ;;  %v9543_v45 = vcombine.low %v14061_v54, %v14063_v41  ;;  %v14119_v42 = vrot.slane %v5841_v33, 4  ;;  %v5239_v8 = vor.u32 %v5238_v28, %v5235_v38  ;;  %v9496_v40 = vrot.slane %v5432_v24, 9  ;;  %v5033_v12 = vld [vmem:[#allocation2 + $0x74] sm:$0x1] }
 0x2f4   : > { %8281 = vmatprep.mubr.bf16.mxu0 %v9592_v60  ;;  %v5844_v32 = vshll.u32 %v14090_v13, 16  ;;  %v5249_v53 = vor.u32 %v5248_v7, %v5244_v44  ;;  %v5548_v11 = vrot.slane %v5546_v35, 4  ;;  %v5549_v27 = vrot.slane %v5032_v43, 5 }
 0x2f5   : > { %v5240_v29 = vrot.slane %v5239_v8, 4  ;;  %v5254_v37 = vrot.slane %v5252_v59, 5  ;;  %v5547_v54 = vsel %vm11642_vm5, %v9496_v40, %v5546_v35  ;;  %v5865_v41 = vshrl.u32 %v5618_v47, 16  ;;  %v5433_v40 = vld [vmem:[#allocation2 + $0x6c] sm:$0xe] }
 0x2f6   : > { %8113 = vmatmul.mubr.bf16.gmra.mrb[156].mxu1 %v9543_v45  ;;  %v5250_v33 = vrot.slane %v5249_v53, 4  ;;  %v5550_v38 = vsel %vm11642_vm5, %v5548_v11, %v5549_v27  ;;  %v5868_v24 = vshll.u32 %v5618_v47, 16  ;;  %v5257_v13 = vshrl.u32 %v14123_v31, 16 }
 0x2f7   : > { %v5245_v43 = vsel %vm11631_vm4, %v5240_v29, %v5244_v44  ;;  %v9593_v60 = vcombine.low %v5618_v47, %v14121_v10  ;;  %v5260_v28 = vshll.u32 %v14123_v31, 16  ;;  %v5266_v59 = vshll.u32 %v14126_v25, 16 }
 0x2f8   : > { %v5255_v7 = vsel %vm11631_vm4, %v5250_v33, %v5254_v37  ;;  %v9576_v35 = vcombine.low %v5547_v54, %v5550_v38  ;;  %v5259_v45 = vrot.slane %v5257_v13, 4  ;;  %v5270_v8 = vshrl.u32 %v14126_v25, 16  ;;  %v14149_v13 = vld [vmem:[#allocation2 + $0x78] sm:$0xf] }
 0x2f9   : > { %v9560_v53 = vcombine.low %v5245_v43, %v5255_v7  ;;  %v5262_v11 = vrot.slane %v5260_v28, 5  ;;  %v5268_v27 = vrot.slane %v5266_v59, 5  ;;  %v5276_v15 = vshll.u32 %v5033_v12, 16  ;;  %v14152_v7 = vld [vmem:[#allocation2 + $0x7c] sm:$0xf] }
 0x2fa   : > { %v14141_v34 = vrot.slane %v5844_v32, 5  ;;  %v5272_v47 = vrot.slane %v5270_v8, 4  ;;  %v5553_v29 = vrot.slane %v14126_v25, 5  ;;  %v9544_v37 = vcombine.low %v14088_v58, %v14095_v3  ;;  %v5034_v3 = vld [vmem:[#allocation2 + $0x80] sm:$0x1] }
 0x2fb   : > { %8282 = vmatmul.mubr.bf16.gmra.mrb[192].mxu0 %v9576_v35  ;;  %8120 = vmatprep.mubr.bf16.mxu1 %v9560_v53  ;;  %v14147_v54 = vrot.slane %v5865_v41, 4  ;;  %v5263_v33 = vor.u32 %v5262_v11, %v5259_v45  ;;  %v9497_v38 = vrot.slane %v5433_v40, 9  ;;  %v5556_v59 = vrot.slane %v5033_v12, 5  ;;  %v14160_v45 = vld [vmem:[#allocation2 + $0x88] sm:$0xf] }
 0x2fc   : > { %8289 = vmatprep.mubr.bf16.mxu0 %v9593_v60  ;;  %v5273_v43 = vor.u32 %v5272_v47, %v5268_v27  ;;  %v5555_v28 = vrot.slane %v5553_v29, 4  ;;  %v14154_v35 = vrot.slane %v5868_v24, 5  ;;  %v5278_v53 = vrot.slane %v5276_v15, 5  ;;  %15933 = vst [vmem:[#allocation20_spill] sm:$0xff] %v14160_v45  ;;  %v5620_v47 = vld [vmem:[#allocation2 + $0x84] sm:$0xf] }
 0x2fd   : > { %v5264_v8 = vrot.slane %v5263_v33, 4  ;;  %v5554_v58 = vsel %vm11642_vm5, %v9497_v38, %v5553_v29  ;;  %v5281_v40 = vshrl.u32 %v14149_v13, 16  ;;  %v5284_v12 = vshll.u32 %v14149_v13, 16 }
 0x2fe   : > { %8121 = vmatmul.mubr.bf16.gmra.mrb[160].mxu1 %v9544_v37  ;;  %v5274_v41 = vrot.slane %v5273_v43, 4  ;;  %v5557_v60 = vsel %vm11642_vm5, %v5555_v28, %v5556_v59  ;;  %v5290_v15 = vshll.u32 %v14152_v7, 16  ;;  %v5294_v29 = vshrl.u32 %v14152_v7, 16  ;;  %v5434_v28 = vld [vmem:[#allocation2 + $0x78] sm:$0xe] }
 0x2ff   : > { %v5269_v24 = vsel %vm11631_vm4, %v5264_v8, %v5268_v27  ;;  %v9577_v11 = vcombine.low %v5554_v58, %v5557_v60  ;;  %v5283_v33 = vrot.slane %v5281_v40, 4  ;;  %v5286_v38 = vrot.slane %v5284_v12, 5 }
 0x300   : > { %v5279_v37 = vsel %vm11631_vm4, %v5274_v41, %v5278_v53  ;;  %v5300_v43 = vshll.u32 %v5034_v3, 16  ;;  %v9594_v32 = vcombine.low %v5620_v47, %v14160_v45  ;;  %v5292_v44 = vrot.slane %v5290_v15, 5 }
 0x301   : > { %v9561_v59 = vcombine.low %v5269_v24, %v5279_v37  ;;  %v5296_v63 = vrot.slane %v5294_v29, 4  ;;  %v9545_v27 = vcombine.low %v14123_v31, %v14126_v25  ;;  %v5889_v8 = vshrl.u32 %v5620_v47, 16  ;;  %v14177_v24 = vld [vmem:[#allocation2 + $0x84] sm:$0xf]  ;;  %v14179_v25 = vld [vmem:[#allocation2 + $0x88] sm:$0xf] }
 0x302   : > { %v5287_v58 = vor.u32 %v5286_v38, %v5283_v33  ;;  %v5560_v60 = vrot.slane %v14152_v7, 5  ;;  %v5892_v53 = vshll.u32 %v5620_v47, 16  ;;  %v9498_v12 = vrot.slane %v5434_v28, 9  ;;  %v5035_v28 = vld [vmem:[#allocation2 + $0x8c] sm:$0x1] }
 0x303   : > { %8290 = vmatmul.mubr.bf16.gmra.mrb[196].mxu0 %v9577_v11  ;;  %8128 = vmatprep.mubr.bf16.mxu1 %v9561_v59  ;;  %v5297_v40 = vor.u32 %v5296_v63, %v5292_v44  ;;  %v5302_v15 = vrot.slane %v5300_v43, 5  ;;  %v5563_v31 = vrot.slane %v5034_v3, 5  ;;  %v5913_v38 = vshrl.u32 %v5622_v18, 16 }
 0x304   : > { %8297 = vmatprep.mubr.bf16.mxu0 %v9594_v32  ;;  %v5288_v11 = vrot.slane %v5287_v58, 4  ;;  %v5562_v29 = vrot.slane %v5560_v60, 4  ;;  %v5561_v33 = vsel %vm11642_vm5, %v9498_v12, %v5560_v60  ;;  %v5916_v47 = vshll.u32 %v5622_v18, 16 }
 0x305   : > { %v5298_v37 = vrot.slane %v5297_v40, 4  ;;  %v9595_v63 = vcombine.low %v5622_v18, %v14174_v57  ;;  %v5305_v59 = vshrl.u32 %v14177_v24, 16  ;;  %v5308_v43 = vshll.u32 %v14177_v24, 16  ;;  %v5626_v57 = vld [vmem:[#allocation2 + $0xa8] sm:$0xf] }
 0x306   : > { %8129 = vmatmul.mubr.bf16.gmra.mrb[164].mxu1 %v9545_v27  ;;  %v5564_v32 = vsel %vm11642_vm5, %v5562_v29, %v5563_v31  ;;  %v5293_v3 = vsel %vm11631_vm4, %v5288_v11, %v5292_v44  ;;  %v5314_v58 = vshll.u32 %v14179_v25, 16  ;;  %v5318_v60 = vshrl.u32 %v14179_v25, 16 }
 0x307   : > { %v5303_v27 = vsel %vm11631_vm4, %v5298_v37, %v5302_v15  ;;  %v9578_v12 = vcombine.low %v5561_v33, %v5564_v32  ;;  %v5307_v29 = vrot.slane %v5305_v59, 4  ;;  %v5310_v31 = vrot.slane %v5308_v43, 5  ;;  %v14201_v37 = vld [vmem:[#allocation2 + $0x90] sm:$0xf] }
 0x308   : > { %v9562_v40 = vcombine.low %v5293_v3, %v5303_v27  ;;  %v5316_v18 = vrot.slane %v5314_v58, 5  ;;  %v5320_v41 = vrot.slane %v5318_v60, 4  ;;  %v5324_v9 = vshll.u32 %v5035_v28, 16  ;;  %v14204_v3 = vld [vmem:[#allocation2 + $0x9c] sm:$0xf] }
 0x309   : > { %v5567_v45 = vrot.slane %v14179_v25, 5  ;;  %v14195_v10 = vrot.slane %v5889_v8, 4  ;;  %v14197_v44 = vrot.slane %v5892_v53, 5  ;;  %v9546_v11 = vcombine.low %v14149_v13, %v14152_v7  ;;  %v14210_v60 = vld [vmem:[#allocation2 + $0x94] sm:$0xf] }
 0x30a   : > { %8136 = vmatprep.mubr.bf16.mxu1 %v9562_v40  ;;  %v5311_v15 = vor.u32 %v5310_v31, %v5307_v29  ;;  %v5321_v32 = vor.u32 %v5320_v41, %v5316_v18  ;;  %v5570_v43 = vrot.slane %v5035_v28, 5  ;;  %v14206_v8 = vrot.slane %v5913_v38, 4 }
 0x30b   : > { %15935 = vst [vmem:[#allocation12_spill] sm:$0xff] %v14195_v10  ;;  %15936 = vst [vmem:[#allocation13_spill] sm:$0xff] %v14197_v44  ;;  %8298 = vmatmul.mubr.bf16.gmra.mrb[200].mxu0 %v9578_v12  ;;  %v5569_v59 = vrot.slane %v5567_v45, 4  ;;  %v14208_v53 = vrot.slane %v5916_v47, 5  ;;  %v9499_v58 = vrot.slane %v5435_v49, 9  ;;  %v5326_v7 = vrot.slane %v5324_v9, 5 }
 0x30c   : > { %8305 = vmatprep.mubr.bf16.mxu0 %v9595_v63  ;;  %15937 = vst [vmem:[#allocation15_spill] sm:$0xff] %v14206_v8  ;;  %v5312_v27 = vrot.slane %v5311_v15, 4  ;;  %v5322_v13 = vrot.slane %v5321_v32, 4  ;;  %v5036_v63 = vld [vmem:[#allocation2 + $0x98] sm:$0x1]  ;;  %v5329_v41 = vshrl.u32 %v14201_v37, 16 }
 0x30d   : > { %15938 = vst [vmem:[#allocation11_spill] sm:$0xff] %v14208_v53  ;;  %v5571_v40 = vsel %vm11642_vm5, %v5569_v59, %v5570_v43  ;;  %v5568_v38 = vsel %vm11642_vm5, %v9499_v58, %v5567_v45  ;;  %v14219_v47 = vld [vmem:[#allocation2 + $0xa0] sm:$0xf]  ;;  %v5937_v49 = vshrl.u32 %v14204_v3, 16  ;;  %v5332_v12 = vshll.u32 %v14201_v37, 16 }
 0x30e   : > { %8137 = vmatmul.mubr.bf16.gmra.mrb[168].mxu1 %v9546_v11  ;;  %v5317_v28 = vsel %vm11631_vm4, %v5312_v27, %v5316_v18  ;;  %15939 = vst [vmem:[#allocation18_spill] sm:$0xff] %v14219_v47  ;;  %v5327_v9 = vsel %vm11631_vm4, %v5322_v13, %v5326_v7  ;;  %v5331_v29 = vrot.slane %v5329_v41, 4  ;;  %v5338_v31 = vshll.u32 %v14210_v60, 16  ;;  %v5436_v43 = vld [vmem:[#allocation2 + $0x90] sm:$0xe] }
 0x30f   : > { %v5342_v11 = vshrl.u32 %v14210_v60, 16  ;;  %v9563_v15 = vcombine.low %v5317_v28, %v5327_v9  ;;  %v9579_v32 = vcombine.low %v5568_v38, %v5571_v40  ;;  %v5334_v18 = vrot.slane %v5332_v12, 5  ;;  %v14234_v28 = vld [vmem:[#allocation2 + $0x9c] sm:$0xf] }
 0x310   : > { %v5348_v59 = vshll.u32 %v5036_v63, 16  ;;  %v9596_v45 = vcombine.low %v14204_v3, %v14219_v47  ;;  %v5340_v27 = vrot.slane %v5338_v31, 5  ;;  %v5574_v33 = vrot.slane %v14210_v60, 5  ;;  %v5437_v47 = vld [vmem:[#allocation2 + $0x9c] sm:$0xe] }
 0x311   : > { %v5344_v58 = vrot.slane %v5342_v11, 4  ;;  %8144 = vmatprep.mubr.bf16.mxu1 %v9563_v15  ;;  %v9547_v13 = vcombine.low %v14177_v24, %v14179_v25  ;;  %v5940_v7 = vshll.u32 %v14204_v3, 16  ;;  %v5335_v41 = vor.u32 %v5334_v18, %v5331_v29  ;;  %v14236_v11 = vld [vmem:[#allocation2 + $0xa0] sm:$0xf]  ;;  %v5037_v29 = vld [vmem:[#allocation2 + $0xa4] sm:$0x1] }
 0x312   : > { %v9500_v12 = vrot.slane %v5436_v43, 9  ;;  %v5576_v9 = vrot.slane %v5574_v33, 4  ;;  %v5577_v31 = vrot.slane %v5036_v63, 5  ;;  %v14238_v53 = vrot.slane %v5937_v49, 4  ;;  %v14247_v43 = vld [vmem:[#allocation2 + $0xac] sm:$0xf] }
 0x313   : > { %8306 = vmatmul.mubr.bf16.gmra.mrb[204].mxu0 %v9579_v32  ;;  %v5345_v38 = vor.u32 %v5344_v58, %v5340_v27  ;;  %v5336_v15 = vrot.slane %v5335_v41, 4  ;;  %v5350_v32 = vrot.slane %v5348_v59, 5  ;;  %v5961_v8 = vshrl.u32 %v5626_v57, 16  ;;  %15941 = vst [vmem:[#allocation14_spill] sm:$0xff] %v14247_v43 }
 0x314   : > { %8313 = vmatprep.mubr.bf16.mxu0 %v9596_v45  ;;  %15940 = vst [vmem:[#allocation19_spill] sm:$0xff] %v14238_v53  ;;  %v5575_v25 = vsel %vm11642_vm5, %v9500_v12, %v5574_v33  ;;  %v5578_v3 = vsel %vm11642_vm5, %v5576_v9, %v5577_v31  ;;  %v5353_v18 = vshrl.u32 %v14234_v28, 16  ;;  %v5964_v49 = vshll.u32 %v5626_v57, 16 }
 0x315   : > { %v5346_v24 = vrot.slane %v5345_v38, 4  ;;  %v5341_v63 = vsel %vm11631_vm4, %v5336_v15, %v5340_v27  ;;  %v5356_v59 = vshll.u32 %v14234_v28, 16  ;;  %v5362_v45 = vshll.u32 %v14236_v11, 16 }
 0x316   : > { %8145 = vmatmul.mubr.bf16.gmra.mrb[172].mxu1 %v9547_v13  ;;  %v9580_v33 = vcombine.low %v5575_v25, %v5578_v3  ;;  %v5355_v13 = vrot.slane %v5353_v18, 4  ;;  %v5366_v41 = vshrl.u32 %v14236_v11, 16  ;;  %v5372_v31 = vshll.u32 %v5037_v29, 16  ;;  %v14263_v18 = vld [vmem:[#allocation2 + $0xa8] sm:$0xf] }
 0x317   : > { %v5351_v58 = vsel %vm11631_vm4, %v5346_v24, %v5350_v32  ;;  %v5358_v12 = vrot.slane %v5356_v59, 5  ;;  %v5364_v9 = vrot.slane %v5362_v45, 5  ;;  %v14254_v40 = vrot.slane %v5940_v7, 5  ;;  %v14267_v45 = vld [vmem:[#allocation2 + $0xac] sm:$0xf] }
 0x318   : > { %v9564_v38 = vcombine.low %v5341_v63, %v5351_v58  ;;  %v9597_v27 = vcombine.low %v5626_v57, %v14247_v43  ;;  %v5368_v15 = vrot.slane %v5366_v41, 4  ;;  %v5581_v53 = vrot.slane %v14236_v11, 5 }
 0x319   : > { %15942 = vst [vmem:[#allocation10_spill] sm:$0xff] %v14254_v40  ;;  %v9548_v32 = vcombine.low %v14201_v37, %v14210_v60  ;;  %v14260_v24 = vrot.slane %v5961_v8, 4  ;;  %v5359_v3 = vor.u32 %v5358_v12, %v5355_v13  ;;  %v14265_v7 = vrot.slane %v5964_v49, 5  ;;  %v5038_v8 = vld [vmem:[#allocation2 + $0xb0] sm:$0x1] }
 0x31a   : > { %8152 = vmatprep.mubr.bf16.mxu1 %v9564_v38  ;;  %v5369_v57 = vor.u32 %v5368_v15, %v5364_v9  ;;  %v5583_v63 = vrot.slane %v5581_v53, 4  ;;  %v5584_v59 = vrot.slane %v5037_v29, 5  ;;  %v9501_v41 = vrot.slane %v5437_v47, 9  ;;  %v14279_v47 = vld [vmem:[#allocation2 + $0xb4] sm:$0xf] }
 0x31b   : > { %8314 = vmatmul.mubr.bf16.gmra.mrb[208].mxu0 %v9580_v33  ;;  %15943 = vst [vmem:[#allocation16_spill] sm:$0xff] %v14260_v24  ;;  %15944 = vst [vmem:[#allocation21_spill] sm:$0xff] %v14265_v7  ;;  %v5360_v58 = vrot.slane %v5359_v3, 4  ;;  %v5374_v33 = vrot.slane %v5372_v31, 5  ;;  %v9549_v37 = vcombine.low %v14234_v28, %v14236_v11  ;;  %v5377_v49 = vshrl.u32 %v14263_v18, 16 }
 0x31c   : > { %8321 = vmatprep.mubr.bf16.mxu0 %v9597_v27  ;;  %v5370_v60 = vrot.slane %v5369_v57, 4  ;;  %v5585_v13 = vsel %vm11642_vm5, %v5583_v63, %v5584_v59  ;;  %v5380_v38 = vshll.u32 %v14263_v18, 16  ;;  %v5582_v12 = vsel %vm11642_vm5, %v9501_v41, %v5581_v53  ;;  %15945 = vst [vmem:[#allocation9_spill] sm:$0xff] %v14279_v47  ;;  %v14281_v31 = vld [vmem:[#allocation2 + $0xb8] sm:$0xf] }
 0x31d   : > { %v5365_v29 = vsel %vm11631_vm4, %v5360_v58, %v5364_v9  ;;  %15946 = vst [vmem:[#allocation22_spill] sm:$0xff] %v14281_v31  ;;  %v5386_v28 = vshll.u32 %v14267_v45, 16  ;;  %v5390_v11 = vshrl.u32 %v14267_v45, 16  ;;  %v5379_v15 = vrot.slane %v5377_v49, 4  ;;  %v5438_v57 = vld [vmem:[#allocation2 + $0xa8] sm:$0xe] }
 0x31e   : > { %8153 = vmatmul.mubr.bf16.gmra.mrb[176].mxu1 %v9548_v32  ;;  %v5375_v27 = vsel %vm11631_vm4, %v5370_v60, %v5374_v33  ;;  %v5382_v32 = vrot.slane %v5380_v38, 5  ;;  %v5396_v3 = vshll.u32 %v5038_v8, 16  ;;  %v9581_v9 = vcombine.low %v5582_v12, %v5585_v13  ;;  %v5630_v7 = vld [vmem:[#allocation2 + $0xc0] sm:$0xf]  ;;  %v5631_v24 = vld [vmem:[#allocation2 + $0xc4] sm:$0xf] }
 0x31f   : > { %v9565_v63 = vcombine.low %v5365_v29, %v5375_v27  ;;  %v5388_v59 = vrot.slane %v5386_v28, 5  ;;  %v5392_v58 = vrot.slane %v5390_v11, 4  ;;  %v9598_v41 = vcombine.low %v14279_v47, %v14281_v31  ;;  %v14293_v38 = vld [vmem:[#allocation2 + $0xb4] sm:$0xf]  ;;  %v14295_v27 = vld [vmem:[#allocation2 + $0xb8] sm:$0xf] }
 0x320   : > { %v5383_v25 = vor.u32 %v5382_v32, %v5379_v15  ;;  %v5588_v43 = vrot.slane %v14267_v45, 5  ;;  %v9502_v13 = vrot.slane %v5438_v57, 9  ;;  %v5398_v12 = vrot.slane %v5396_v3, 5  ;;  %v5039_v60 = vld [vmem:[#allocation2 + $0xbc] sm:$0x1] }
 0x321   : > { %8160 = vmatprep.mubr.bf16.mxu1 %v9565_v63  ;;  %v5393_v49 = vor.u32 %v5392_v58, %v5388_v59  ;;  %v5591_v11 = vrot.slane %v5038_v8, 5  ;;  %v9550_v63 = vcombine.low %v14263_v18, %v14267_v45  ;;  %v14301_v58 = vpop.f32.mrb[128].mxu1  ;;  %v5401_v3 = vshrl.u32 %v14293_v38, 16 }
 0x322   : > { %v5384_v29 = vrot.slane %v5383_v25, 4  ;;  %v5590_v28 = vrot.slane %v5588_v43, 4  ;;  %v5589_v32 = vsel %vm11642_vm5, %v9502_v13, %v5588_v43  ;;  %15947 = vst [vmem:[#allocation17_spill] sm:$0xff] %v14301_v58  ;;  %v5404_v57 = vshll.u32 %v14293_v38, 16  ;;  %v14309_v43 = vpop.f32.mrb[129].mxu1 }
 0x323   : > { %8322 = vmatmul.mubr.bf16.gmra.mrb[212].mxu0 %v9581_v9  ;;  %v5394_v15 = vrot.slane %v5393_v49, 4  ;;  %v9599_v9 = vcombine.low %v5630_v7, %v5631_v24  ;;  %15948 = vst [vmem:[#allocation25_spill] sm:$0xff] %v14309_v43  ;;  %v5410_v7 = vshll.u32 %v14295_v27, 16  ;;  %v5414_v45 = vshrl.u32 %v14295_v27, 16 }
 0x324   : > { %8329 = vmatprep.mubr.bf16.mxu0 %v9598_v41  ;;  %v5389_v25 = vsel %vm11631_vm4, %v5384_v29, %v5388_v59  ;;  %v5592_v8 = vsel %vm11642_vm5, %v5590_v28, %v5591_v11  ;;  %v5439_v41 = vld [vmem:[#allocation2 + $0xb4] sm:$0xe]  ;;  %v5403_v49 = vrot.slane %v5401_v3, 4  ;;  %v5406_v13 = vrot.slane %v5404_v57, 5  ;;  %v14317_v28 = vld [vmem:[#allocation2 + $0x18] sm:$0xf] }
 0x325   : > { %v5399_v24 = vsel %vm11631_vm4, %v5394_v15, %v5398_v12  ;;  %v9582_v18 = vcombine.low %v5589_v32, %v5592_v8  ;;  %v5420_v29 = vshll.u32 %v5039_v60, 16  ;;  %v5412_v33 = vrot.slane %v5410_v7, 5  ;;  %v14322_v15 = vld [vmem:[#allocation2 + $0x1c] sm:$0xf]  ;;  %v6241_v3 = vld [vmem:[#allocation2 + $0x20] sm:$0x1] }
 0x326   : > { %8161 = vmatmul.mubr.bf16.gmra.mrb[180].mxu1 %v9549_v37  ;;  %v14315_v37 = vpop.f32.mrb[130].mxu1  ;;  %v9566_v59 = vcombine.low %v5389_v25, %v5399_v24  ;;  %v5416_v53 = vrot.slane %v5414_v45, 4  ;;  %v9503_v31 = vrot.slane %v5439_v41, 9  ;;  %v5595_v12 = vrot.slane %v14295_v27, 5 }
 0x327   : > { %15949 = vst [vmem:[#allocation26_spill] sm:$0xff] %v14315_v37  ;;  %v14319_v11 = vpop.f32.mrb[131].mxu1  ;;  %v5407_v32 = vor.u32 %v5406_v13, %v5403_v49  ;;  %v5422_v8 = vrot.slane %v5420_v29, 5  ;;  %v5598_v40 = vrot.slane %v5039_v60, 5  ;;  %v9551_v25 = vcombine.low %v14293_v38, %v14295_v27  ;;  %v5632_v49 = vld [vmem:[#allocation2 + $0x14] sm:$0x1] }
 0x328   : > { %15950 = vst [vmem:[#allocation27_spill] sm:$0xff] %v14319_v11  ;;  %8168 = vmatprep.mubr.bf16.mxu1 %v9566_v59  ;;  %v5417_v57 = vor.u32 %v5416_v53, %v5412_v33  ;;  %v5596_v24 = vsel %vm11642_vm5, %v9503_v31, %v5595_v12  ;;  %v5597_v7 = vrot.slane %v5595_v12, 4  ;;  %v6258_v41 = vshrl.u32 %v14317_v28, 16 }
 0x329   : > { %v5408_v45 = vrot.slane %v5407_v32, 4  ;;  %v6261_v47 = vshll.u32 %v14317_v28, 16  ;;  %v6267_v59 = vshll.u32 %v14322_v15, 16  ;;  %v6271_v60 = vshrl.u32 %v14322_v15, 16 }
 0x32a   : > { %v5418_v13 = vrot.slane %v5417_v57, 4  ;;  %v5599_v38 = vsel %vm11642_vm5, %v5597_v7, %v5598_v40  ;;  %v6260_v53 = vrot.slane %v6258_v41, 4  ;;  %v6277_v27 = vshll.u32 %v6241_v3, 16  ;;  %v11239_v40 = vld [vmem:[#allocation2 + $0x10] sm:$0xf] }
 0x32b   : > { %8330 = vmatmul.mubr.bf16.gmra.mrb[216].mxu0 %v9582_v18  ;;  %v6032_v18 = vld [vmem:[#allocation2 + $0xc] sm:$0xe]  ;;  %v5413_v31 = vsel %vm11631_vm4, %v5408_v45, %v5412_v33  ;;  %v6263_v29 = vrot.slane %v6261_v47, 5  ;;  %v6269_v12 = vrot.slane %v6267_v59, 5  ;;  %v6273_v11 = vrot.slane %v6271_v60, 4 }
 0x32c   : > { %8337 = vmatprep.mubr.bf16.mxu0 %v9599_v9  ;;  %v9583_v9 = vcombine.low %v5596_v24, %v5599_v38  ;;  %v5423_v32 = vsel %vm11631_vm4, %v5418_v13, %v5422_v8  ;;  %v6279_v37 = vrot.slane %v6277_v27, 5  ;;  %v5668_v43 = vshll.u32 %v5632_v49, 16  ;;  %v14338_v3 = vld [vmem:[#allocation2 + $0x24] sm:$0xf]  ;;  %v14342_v33 = vld [vmem:[#allocation2 + $0x28] sm:$0xf] }
 0x32d   : > { %v9567_v57 = vcombine.low %v5413_v31, %v5423_v32  ;;  %v6264_v58 = vor.u32 %v6263_v29, %v6260_v53  ;;  %v9504_v44 = vrot.slane %v6032_v18, 9  ;;  %v6098_v7 = vrot.slane %v11239_v40, 5  ;;  %v6033_v27 = vld [vmem:[#allocation2 + $0x18] sm:$0xe] }
 0x32e   : > { %8169 = vmatmul.mubr.bf16.gmra.mrb[184].mxu1 %v9550_v63  ;;  %v6274_v63 = vor.u32 %v6273_v11, %v6269_v12  ;;  %v5670_v41 = vrot.slane %v5668_v43, 5  ;;  %v6101_v10 = vrot.slane %v5632_v49, 5  ;;  %v9632_v47 = vcombine.low %v14317_v28, %v14322_v15  ;;  %v6242_v28 = vld [vmem:[#allocation2 + $0x2c] sm:$0x1] }
 0x32f   : > { %8176 = vmatprep.mubr.bf16.mxu1 %v9567_v57  ;;  %v6265_v8 = vrot.slane %v6264_v58, 4  ;;  %v6099_v24 = vsel %vm11642_vm5, %v9504_v44, %v6098_v7  ;;  %v6100_v45 = vrot.slane %v6098_v7, 4  ;;  %v5661_v59 = vsel %vm11631_vm4, %v13801_v48, %v13772_v4  ;;  %v6642_v48 = vld [vmem:[#allocation2 + $0x24] sm:$0xe] }
 0x330   : > { %v6275_v11 = vrot.slane %v6274_v63, 4  ;;  %v5671_v43 = vsel %vm11631_vm4, %v13827_v17, %v5670_v41  ;;  %v6282_v15 = vshrl.u32 %v14338_v3, 16  ;;  %v6285_v58 = vshll.u32 %v14338_v3, 16  ;;  %v11240_v41 = vld [vmem:[#allocation2 + $0x1c] sm:$0xf] }
 0x331   : > { %v6270_v44 = vsel %vm11631_vm4, %v6265_v8, %v6269_v12  ;;  %v6102_v60 = vsel %vm11642_vm5, %v6100_v45, %v6101_v10  ;;  %v9600_v49 = vcombine.low %v5661_v59, %v5671_v43  ;;  %v6291_v4 = vshll.u32 %v14342_v33, 16  ;;  %v5633_v12 = vld [vmem:[#allocation2 + $0x20] sm:$0x1] }
 0x332   : > { %v6280_v13 = vsel %vm11631_vm4, %v6275_v11, %v6279_v37  ;;  %v9616_v38 = vcombine.low %v6099_v24, %v6102_v60  ;;  %v6284_v17 = vrot.slane %v6282_v15, 4  ;;  %v6287_v53 = vrot.slane %v6285_v58, 5 }
 0x333   : > { %8338 = vmatmul.mubr.bf16.gmra.mrb[220].mxu0 %v9583_v9  ;;  %v9648_v18 = vcombine.low %v6270_v44, %v6280_v13  ;;  %v6293_v31 = vrot.slane %v6291_v4, 5  ;;  %v6295_v9 = vshrl.u32 %v14342_v33, 16  ;;  %v6301_v29 = vshll.u32 %v6242_v28, 16  ;;  %v14382_v13 = vld [vmem:[#allocation2 + $0x34] sm:$0xf] }
 0x334   : > { %v6288_v10 = vor.u32 %v6287_v53, %v6284_v17  ;;  %v9521_v32 = vrot.slane %v6642_v48, 9  ;;  %v6714_v57 = vrot.slane %v14342_v33, 5  ;;  %v6717_v40 = vrot.slane %v6242_v28, 5  ;;  %v14380_v48 = vld [vmem:[#allocation2 + $0x30] sm:$0xf]  ;;  %v11109_v53 = vld [vmem:[#allocation3 + $0x208] sm:$0xff]  }
 0x335   : > { %8539 = vmatprep.mubr.bf16.mxu0 %v9648_v18  ;;  %v6297_v7 = vrot.slane %v6295_v9, 4  ;;  %v6303_v37 = vrot.slane %v6301_v29, 5  ;;  %v9505_v63 = vrot.slane %v6033_v27, 9  ;;  %v6105_v8 = vrot.slane %v11240_v41, 5 }
 0x336   : > { %8177 = vmatmul.mubr.bf16.gmra.mrb[188].mxu1 %v9551_v25  ;;  %v6289_v24 = vrot.slane %v6288_v10, 4  ;;  %v14366_v25 = vsel %vm11642_vm5, %v9521_v32, %v6714_v57  ;;  %v6716_v45 = vrot.slane %v6714_v57, 4  ;;  %v6108_v59 = vrot.slane %v5633_v12, 5  ;;  %v6034_v57 = vld [vmem:[#allocation2 + $0x24] sm:$0xe] }
 0x337   : > { %8378 = vmatprep.mubr.bf16.mxu1 %v9616_v38  ;;  %v6298_v11 = vor.u32 %v6297_v7, %v6293_v31  ;;  %v6106_v43 = vsel %vm11642_vm5, %v9505_v63, %v6105_v8  ;;  %v6107_v15 = vrot.slane %v6105_v8, 4  ;;  %v9633_v28 = vcombine.low %v14338_v3, %v14342_v33 }
 0x338   : > { %v6294_v58 = vsel %vm11631_vm4, %v6289_v24, %v6293_v31  ;;  %v14376_v44 = vsel %vm11642_vm5, %v6716_v45, %v6717_v40  ;;  %v5679_v60 = vor.u32 %v13908_v22, %v13830_v55  ;;  %v5682_v4 = vshll.u32 %v11240_v41, 16  ;;  %v6243_v22 = vld [vmem:[#allocation2 + $0x38] sm:$0x1]  ;;  %v11112_v45 = vld [vmem:[#allocation3 + $0x210] sm:$0xff]  }
 0x339   : > { %v6299_v38 = vrot.slane %v6298_v11, 4  ;;  %v15951_v33 = vshrl.u32 %v13791_v14, 16  ;;  %v5692_v55 = vshll.u32 %v5633_v12, 16  ;;  %v6306_v29 = vshrl.u32 %v14380_v48, 16  ;;  %v11241_v14 = vld [vmem:[#allocation3 + $0x200] sm:$0xff]  }
 0x33a   : > { %v5680_v18 = vrot.slane %v5679_v60, 4  ;;  %v5684_v31 = vrot.slane %v5682_v4, 5  ;;  %v6309_v10 = vshll.u32 %v14380_v48, 16  ;;  %v6315_v32 = vshll.u32 %v14382_v13, 16 }
 0x33b   : > { %8540 = vmatmul.mubr.bf16.vlgmr.msra.gmra.mrb[224].mxu0 %v9632_v47  ;;  %v6109_v47 = vsel %vm11642_vm5, %v6107_v15, %v6108_v59  ;;  %v5688_v17 = vrot.slane %v15951_v33, 4  ;;  %v6304_v9 = vsel %vm11631_vm4, %v6299_v38, %v6303_v37  ;;  %v5694_v63 = vrot.slane %v5692_v55, 5  ;;  %v11242_v15 = vld [vmem:[#allocation2 + $0x28] sm:$0xf] }
 0x33c   : > { %v9617_v27 = vcombine.low %v6106_v43, %v6109_v47  ;;  %v9649_v40 = vcombine.low %v6294_v58, %v6304_v9  ;;  %v5685_v7 = vsel %vm11631_vm4, %v5680_v18, %v5684_v31  ;;  %v6308_v41 = vrot.slane %v6306_v29, 4  ;;  %v14406_v29 = vld [vmem:[#allocation2 + $0x3c] sm:$0xf] }
 0x33d   : > { %v5689_v12 = vor.u32 %v5688_v17, %v5684_v31  ;;  %v6311_v8 = vrot.slane %v6309_v10, 5  ;;  %v6317_v37 = vrot.slane %v6315_v32, 5  ;;  %v6319_v24 = vshrl.u32 %v14382_v13, 16  ;;  %v14408_v10 = vld [vmem:[#allocation2 + $0x40] sm:$0xf] }
 0x33e   : > { %8379 = vmatmul.mubr.bf16.vlgmr.msra.gmra.mrb[192].mxu1 %v9600_v49  ;;  %v5634_v49 = vld [vmem:[#allocation2 + $0x2c] sm:$0x1]  ;;  %8547 = vmatprep.mubr.bf16.mxu0 %v9649_v40  ;;  %v6325_v11 = vshll.u32 %v6243_v22, 16  ;;  %v9506_v43 = vrot.slane %v6034_v57, 9  ;;  %v6112_v58 = vrot.slane %v11242_v15, 5  ;;  %v9634_v47 = vcombine.low %v14380_v48, %v14382_v13 }
 0x33f   : > { %8386 = vmatprep.mubr.bf16.mxu1 %v9617_v27  ;;  %10785 = vmatpush3.bf16.msra.mxu1 %v11241_v14  ;;  %v5690_v59 = vrot.slane %v5689_v12, 4  ;;  %v6312_v60 = vor.u32 %v6311_v8, %v6308_v41  ;;  %v6321_v4 = vrot.slane %v6319_v24, 4  ;;  %v6115_v38 = vrot.slane %v5634_v49, 5  ;;  %v6244_v40 = vld [vmem:[#allocation2 + $0x44] sm:$0x1] }
 0x340   : > { %10786 = vmatprep.subr.bf16.mxu1 %v11109_v53  ;;  %v6327_v17 = vrot.slane %v6325_v11, 5  ;;  %v6113_v27 = vsel %vm11642_vm5, %v9506_v43, %v6112_v58  ;;  %v6114_v18 = vrot.slane %v6112_v58, 4  ;;  %v5703_v9 = vor.u32 %v13928_v20, %v13924_v46  ;;  %v11119_v11 = vld [vmem:[#allocation3 + $0x220] sm:$0xff]  }
 0x341   : > { %v5695_v33 = vsel %vm11631_vm4, %v5690_v59, %v5694_v63  ;;  %v6313_v55 = vrot.slane %v6312_v60, 4  ;;  %v6322_v22 = vor.u32 %v6321_v4, %v6317_v37  ;;  %v5706_v13 = vshll.u32 %v11242_v15, 16  ;;  %v6035_v4 = vld [vmem:[#allocation2 + $0x30] sm:$0xe] }
 0x342   : > { %v9601_v31 = vcombine.low %v5685_v7, %v5695_v33  ;;  %v6116_v48 = vsel %vm11642_vm5, %v6114_v18, %v6115_v38  ;;  %v15952_v32 = vshrl.u32 %v13841_v62, 16  ;;  %v5704_v7 = vrot.slane %v5703_v9, 4 }
 0x343   : > { %8548 = vmatmul.mubr.bf16.gmra.mrb[228].mxu0 %v9633_v28  ;;  %10787 = vmatpush3.bf16.msra.mxu1 %v11109_v53  ;;  %v11115_v28 = vld [vmem:[#allocation3 + $0x218] sm:$0xff]   ;;  %v5716_v53 = vshll.u32 %v5634_v49, 16  ;;  %v6318_v14 = vsel %vm11631_vm4, %v6313_v55, %v6317_v37  ;;  %v6323_v46 = vrot.slane %v6322_v22, 4  ;;  %v9618_v20 = vcombine.low %v6113_v27, %v6116_v48  ;;  %v6644_v37 = vld [vmem:[#allocation2 + $0x3c] sm:$0xe] }
 0x344   : > { %10788 = vmatprep.subr.bf16.mxu1 %v11112_v45  ;;  %v5712_v57 = vrot.slane %v15952_v32, 4  ;;  %v5708_v12 = vrot.slane %v5706_v13, 5  ;;  %v6330_v41 = vshrl.u32 %v14406_v29, 16  ;;  %v6333_v8 = vshll.u32 %v14406_v29, 16  ;;  %v5635_v27 = vld [vmem:[#allocation2 + $0x38] sm:$0x1] }
 0x345   : > { %v5718_v63 = vrot.slane %v5716_v53, 5  ;;  %v6328_v62 = vsel %vm11631_vm4, %v6323_v46, %v6327_v17  ;;  %v6339_v49 = vshll.u32 %v14408_v10, 16  ;;  %v6343_v24 = vshrl.u32 %v14408_v10, 16  ;;  %v11243_v32 = vld [vmem:[#allocation2 + $0x34] sm:$0xf]  ;;  %v11122_v53 = vld [vmem:[#allocation3 + $0x228] sm:$0xff]  }
 0x346   : > { %8387 = vmatmul.mubr.bf16.gmra.mrb[196].mxu1 %v9601_v31  ;;  %v6349_v59 = vshll.u32 %v6244_v40, 16  ;;  %v9650_v43 = vcombine.low %v6318_v14, %v6328_v62  ;;  %v5709_v15 = vsel %vm11631_vm4, %v5704_v7, %v5708_v12  ;;  %v5713_v58 = vor.u32 %v5712_v57, %v5708_v12 }
 0x347   : > { %10789 = vmatpush3.bf16.msra.mxu1 %v11112_v45  ;;  %8394 = vmatprep.mubr.bf16.mxu1 %v9618_v20  ;;  %v6332_v60 = vrot.slane %v6330_v41, 4  ;;  %v6335_v45 = vrot.slane %v6333_v8, 5  ;;  %v6341_v38 = vrot.slane %v6339_v49, 5  ;;  %v6345_v33 = vrot.slane %v6343_v24, 4  ;;  %v14441_v49 = vld [vmem:[#allocation2 + $0x48] sm:$0xf] }
 0x348   : > { %10790 = vmatprep.subr.bf16.mxu1 %v11115_v28  ;;  %v6351_v17 = vrot.slane %v6349_v59, 5  ;;  %8555 = vmatprep.mubr.bf16.mxu0 %v9650_v43  ;;  %v5714_v18 = vrot.slane %v5713_v58, 4  ;;  %v9523_v31 = vrot.slane %v6644_v37, 9  ;;  %v6728_v55 = vrot.slane %v14408_v10, 5 }
 0x349   : > { %v6731_v22 = vrot.slane %v6244_v40, 5  ;;  %v6336_v9 = vor.u32 %v6335_v45, %v6332_v60  ;;  %v6346_v48 = vor.u32 %v6345_v33, %v6341_v38  ;;  %v9507_v13 = vrot.slane %v6035_v4, 9  ;;  %v6036_v60 = vld [vmem:[#allocation2 + $0x3c] sm:$0xe]  ;;  %v11125_v4 = vld [vmem:[#allocation3 + $0x230] sm:$0xff]  }
 0x34a   : > { %v6119_v57 = vrot.slane %v11243_v32, 5  ;;  %v5719_v14 = vsel %vm11631_vm4, %v5714_v18, %v5718_v63  ;;  %v14429_v46 = vsel %vm11642_vm5, %v9523_v31, %v6728_v55  ;;  %v6730_v20 = vrot.slane %v6728_v55, 4  ;;  %v5636_v18 = vld [vmem:[#allocation2 + $0x44] sm:$0x1] }
 0x34b   : > { %10791 = vmatpush3.bf16.msra.mxu1 %v11115_v28  ;;  %8556 = vmatmul.mubr.bf16.gmra.mrb[232].mxu0 %v9634_v47  ;;  %15953 = vst [vmem:[#allocation28_spill] sm:$0xff] %v14429_v46  ;;  %v6122_v7 = vrot.slane %v5635_v27, 5  ;;  %v9602_v12 = vcombine.low %v5709_v15, %v5719_v14  ;;  %v6337_v40 = vrot.slane %v6336_v9, 4  ;;  %v6347_v28 = vrot.slane %v6346_v48, 4  ;;  %v14449_v15 = vld [vmem:[#allocation2 + $0x4c] sm:$0xf] }
 0x34c   : > { %10792 = vmatprep.subr.bf16.mxu1 %v11119_v11  ;;  %v6120_v47 = vsel %vm11642_vm5, %v9507_v13, %v6119_v57  ;;  %v14435_v41 = vsel %vm11642_vm5, %v6730_v20, %v6731_v22  ;;  %v6121_v8 = vrot.slane %v6119_v57, 4  ;;  %v9635_v63 = vcombine.low %v14406_v29, %v14408_v10  ;;  %v6245_v29 = vld [vmem:[#allocation2 + $0x50] sm:$0x1] }
 0x34d   : > { %15954 = vst [vmem:[#allocation29_spill] sm:$0xff] %v14435_v41  ;;  %v5727_v62 = vor.u32 %v14001_v61, %v13956_v39  ;;  %v6342_v24 = vsel %vm11631_vm4, %v6337_v40, %v6341_v38  ;;  %v6352_v59 = vsel %vm11631_vm4, %v6347_v28, %v6351_v17  ;;  %v5730_v43 = vshll.u32 %v11243_v32, 16  ;;  %v11127_v14 = vld [vmem:[#allocation3 + $0x238] sm:$0xff]  }
 0x34e   : > { %8395 = vmatmul.mubr.bf16.gmra.mrb[200].mxu1 %v9602_v12  ;;  %v9651_v10 = vcombine.low %v6342_v24, %v6352_v59  ;;  %v6123_v39 = vsel %vm11642_vm5, %v6121_v8, %v6122_v7  ;;  %v5740_v33 = vshll.u32 %v5635_v27, 16  ;;  %v6354_v17 = vshrl.u32 %v14441_v49, 16  ;;  %v11244_v8 = vld [vmem:[#allocation2 + $0x40] sm:$0xf] }
 0x34f   : > { %10793 = vmatpush3.bf16.msra.mxu1 %v11119_v11  ;;  %v5728_v61 = vrot.slane %v5727_v62, 4  ;;  %v15955_v11 = vshrl.u32 %v13937_v52, 16  ;;  %v9619_v45 = vcombine.low %v6120_v47, %v6123_v39  ;;  %v5732_v38 = vrot.slane %v5730_v43, 5 }
 0x350   : > { %10794 = vmatprep.subr.bf16.mxu1 %v11122_v53  ;;  %8563 = vmatprep.mubr.bf16.mxu0 %v9651_v10  ;;  %v6357_v31 = vshll.u32 %v14441_v49, 16  ;;  %v6363_v55 = vshll.u32 %v14449_v15, 16  ;;  %v6367_v22 = vshrl.u32 %v14449_v15, 16  ;;  %v6373_v9 = vshll.u32 %v6245_v29, 16 }
 0x351   : > { %v5736_v58 = vrot.slane %v15955_v11, 4  ;;  %8402 = vmatprep.mubr.bf16.mxu1 %v9619_v45  ;;  %v5733_v52 = vsel %vm11631_vm4, %v5728_v61, %v5732_v38  ;;  %v5742_v13 = vrot.slane %v5740_v33, 5  ;;  %v6356_v32 = vrot.slane %v6354_v17, 4 }
 0x352   : > { %v6359_v20 = vrot.slane %v6357_v31, 5  ;;  %v6365_v7 = vrot.slane %v6363_v55, 5  ;;  %v6369_v12 = vrot.slane %v6367_v22, 4  ;;  %v6375_v40 = vrot.slane %v6373_v9, 5  ;;  %v14483_v31 = vld [vmem:[#allocation2 + $0x58] sm:$0xf] }
 0x353   : > { %10795 = vmatpush3.bf16.msra.mxu1 %v11122_v53  ;;  %8564 = vmatmul.mubr.bf16.gmra.mrb[236].mxu0 %v9635_v63  ;;  %v5737_v27 = vor.u32 %v5736_v58, %v5732_v38  ;;  %v9508_v47 = vrot.slane %v6036_v60, 9  ;;  %v6126_v63 = vrot.slane %v11244_v8, 5  ;;  %v6129_v62 = vrot.slane %v5636_v18, 5  ;;  %v14477_v60 = vld [vmem:[#allocation2 + $0x54] sm:$0xf] }
 0x354   : > { %v14459_v48 = vpop.f32.mrb[160].mxu0  ;;  %10796 = vmatprep.subr.bf16.mxu1 %v11125_v4  ;;  %v6360_v59 = vor.u32 %v6359_v20, %v6356_v32  ;;  %v6370_v43 = vor.u32 %v6369_v12, %v6365_v7  ;;  %v9636_v29 = vcombine.low %v14441_v49, %v14449_v15  ;;  %v5751_v10 = vor.u32 %v14029_v50, %v14003_v51 }
 0x355   : > { %v14463_v57 = vpop.f32.mrb[161].mxu0  ;;  %v5738_v53 = vrot.slane %v5737_v27, 4  ;;  %v6127_v61 = vsel %vm11642_vm5, %v9508_v47, %v6126_v63  ;;  %v6128_v11 = vrot.slane %v6126_v63, 4  ;;  %v5754_v58 = vshll.u32 %v11244_v8, 16 }
 0x356   : > { %v14465_v28 = vpop.f32.mrb[162].mxu0  ;;  %v6361_v38 = vrot.slane %v6360_v59, 4  ;;  %v6371_v33 = vrot.slane %v6370_v43, 4  ;;  %v5752_v17 = vrot.slane %v5751_v10, 4  ;;  %v15956_v50 = vshrl.u32 %v13958_v6, 16 }
 0x357   : > { %v14467_v24 = vpop.f32.mrb[163].mxu0  ;;  %10797 = vmatpush3.bf16.msra.mxu1 %v11125_v4  ;;  %v5743_v39 = vsel %vm11631_vm4, %v5738_v53, %v5742_v13  ;;  %v6130_v49 = vsel %vm11642_vm5, %v6128_v11, %v6129_v62  ;;  %v5756_v51 = vrot.slane %v5754_v58, 5  ;;  %v5764_v4 = vshll.u32 %v5636_v18, 16  ;;  %v6646_v13 = vld [vmem:[#allocation2 + $0x54] sm:$0xe] }
 0x358   : > { %10798 = vmatprep.subr.bf16.mxu1 %v11127_v14  ;;  %v9603_v45 = vcombine.low %v5733_v52, %v5743_v39  ;;  %v5760_v15 = vrot.slane %v15956_v50, 4  ;;  %v6366_v55 = vsel %vm11631_vm4, %v6361_v38, %v6365_v7  ;;  %v6376_v22 = vsel %vm11631_vm4, %v6371_v33, %v6375_v40  ;;  %v6246_v52 = vld [vmem:[#allocation2 + $0x5c] sm:$0x1]  ;;  %v6037_v59 = vld [vmem:[#allocation2 + $0x48] sm:$0xe] }
 0x359   : > { %v9620_v9 = vcombine.low %v6127_v61, %v6130_v49  ;;  %v6378_v27 = vshrl.u32 %v14477_v60, 16  ;;  %v9652_v32 = vcombine.low %v6366_v55, %v6376_v22  ;;  %v5757_v6 = vsel %vm11631_vm4, %v5752_v17, %v5756_v51  ;;  %v5637_v61 = vld [vmem:[#allocation2 + $0x50] sm:$0x1]  ;;  %v11245_v50 = vld [vmem:[#allocation2 + $0x4c] sm:$0xf] }
 0x35a   : > { %8403 = vmatmul.mubr.bf16.gmra.mrb[204].mxu1 %v9603_v45  ;;  %v5761_v20 = vor.u32 %v5760_v15, %v5756_v51  ;;  %v5766_v18 = vrot.slane %v5764_v4, 5  ;;  %v6381_v53 = vshll.u32 %v14477_v60, 16  ;;  %v6387_v7 = vshll.u32 %v14483_v31, 16 }
 0x35b   : > { %10799 = vmatpush3.bf16.msra.mxu1 %v11127_v14  ;;  %8410 = vmatprep.mubr.bf16.mxu1 %v9620_v9  ;;  %v6380_v12 = vrot.slane %v6378_v27, 4  ;;  %v6391_v40 = vshrl.u32 %v14483_v31, 16  ;;  %v6397_v8 = vshll.u32 %v6246_v52, 16  ;;  %v9525_v63 = vrot.slane %v6646_v13, 9  ;;  %v14512_v13 = vld [vmem:[#allocation2 + $0x60] sm:$0xf] }
 0x35c   : > { %8571 = vmatprep.mubr.bf16.mxu0 %v9652_v32  ;;  %v5762_v47 = vrot.slane %v5761_v20, 4  ;;  %v6742_v62 = vrot.slane %v14483_v31, 5  ;;  %v6383_v43 = vrot.slane %v6381_v53, 5  ;;  %v6389_v10 = vrot.slane %v6387_v7, 5 }
 0x35d   : > { %8572 = vmatmul.mubr.bf16.gmra.mrb[240].mxu0 %v9636_v29  ;;  %v6393_v39 = vrot.slane %v6391_v40, 4  ;;  %v6745_v14 = vrot.slane %v6246_v52, 5  ;;  %v6399_v58 = vrot.slane %v6397_v8, 5  ;;  %v9509_v51 = vrot.slane %v6037_v59, 9  ;;  %v6247_v8 = vld [vmem:[#allocation2 + $0x68] sm:$0x1] }
 0x35e   : > { %v5767_v11 = vsel %vm11631_vm4, %v5762_v47, %v5766_v18  ;;  %v14500_v45 = vsel %vm11642_vm5, %v9525_v63, %v6742_v62  ;;  %v6744_v38 = vrot.slane %v6742_v62, 4  ;;  %v6384_v17 = vor.u32 %v6383_v43, %v6380_v12  ;;  %v15985_v52 = vld [vmem:[#allocation23_spill] sm:$0xff] }
 0x35f   : > { %15957 = vst [vmem:[#allocation30_spill] sm:$0xff] %v14500_v45  ;;  %v9604_v33 = vcombine.low %v5757_v6, %v5767_v11  ;;  %v6394_v49 = vor.u32 %v6393_v39, %v6389_v10  ;;  %v6133_v15 = vrot.slane %v11245_v50, 5  ;;  %v6136_v4 = vrot.slane %v5637_v61, 5  ;;  %v5638_v39 = vld [vmem:[#allocation2 + $0x5c] sm:$0x1] }
 0x360   : > { %v14504_v29 = vsel %vm11642_vm5, %v6744_v38, %v6745_v14  ;;  %v9637_v55 = vcombine.low %v14477_v60, %v14483_v31  ;;  %v6385_v22 = vrot.slane %v6384_v17, 4  ;;  %v5775_v27 = vor.u32 %v14036_v1, %v14031_v2  ;;  %v14518_v60 = vld [vmem:[#allocation2 + $0x64] sm:$0xf] }
 0x361   : > { %15958 = vst [vmem:[#allocation31_spill] sm:$0xff] %v14504_v29  ;;  %v6395_v9 = vrot.slane %v6394_v49, 4  ;;  %v6134_v32 = vsel %vm11642_vm5, %v9509_v51, %v6133_v15  ;;  %v6135_v6 = vrot.slane %v6133_v15, 4  ;;  %v5778_v20 = vshll.u32 %v11245_v50, 16  ;;  %v11246_v15 = vld [vmem:[#allocation2 + $0x58] sm:$0xf] }
 0x362   : > { %8411 = vmatmul.mubr.bf16.gmra.mrb[208].mxu1 %v9604_v33  ;;  %v15959_v18 = vshrl.u32 %v14009_v21, 16  ;;  %v6390_v31 = vsel %vm11631_vm4, %v6385_v22, %v6389_v10  ;;  %v5776_v7 = vrot.slane %v5775_v27, 4  ;;  %v5788_v2 = vshll.u32 %v5637_v61, 16  ;;  %v6038_v21 = vld [vmem:[#allocation2 + $0x54] sm:$0xe] }
 0x363   : > { %v6400_v53 = vsel %vm11631_vm4, %v6395_v9, %v6399_v58  ;;  %v6137_v40 = vsel %vm11642_vm5, %v6135_v6, %v6136_v4  ;;  %v5780_v47 = vrot.slane %v5778_v20, 5  ;;  %v6402_v63 = vshrl.u32 %v14512_v13, 16 }
 0x364   : > { %v5784_v12 = vrot.slane %v15959_v18, 4  ;;  %v9653_v1 = vcombine.low %v6390_v31, %v6400_v53  ;;  %v9621_v62 = vcombine.low %v6134_v32, %v6137_v40  ;;  %v5790_v59 = vrot.slane %v5788_v2, 5  ;;  %v14540_v31 = vld [vmem:[#allocation2 + $0x6c] sm:$0xf]  ;;  %v14542_v40 = vld [vmem:[#allocation2 + $0x70] sm:$0xf] }
 0x365   : > { %v6405_v43 = vshll.u32 %v14512_v13, 16  ;;  %v6411_v10 = vshll.u32 %v14518_v60, 16  ;;  %v5781_v14 = vsel %vm11631_vm4, %v5776_v7, %v5780_v47  ;;  %v6404_v11 = vrot.slane %v6402_v63, 4 }
 0x366   : > { %8579 = vmatprep.mubr.bf16.mxu0 %v9653_v1  ;;  %v5785_v61 = vor.u32 %v5784_v12, %v5780_v47  ;;  %v6415_v58 = vshrl.u32 %v14518_v60, 16  ;;  %8418 = vmatprep.mubr.bf16.mxu1 %v9621_v62  ;;  %v6421_v17 = vshll.u32 %v6247_v8, 16  ;;  %v9510_v49 = vrot.slane %v6038_v21, 9  ;;  %v6248_v62 = vld [vmem:[#allocation2 + $0x74] sm:$0x1] }
 0x367   : > { %8580 = vmatmul.mubr.bf16.gmra.mrb[244].mxu0 %v9637_v55  ;;  %v6407_v38 = vrot.slane %v6405_v43, 5  ;;  %v6413_v33 = vrot.slane %v6411_v10, 5  ;;  %v6140_v4 = vrot.slane %v11246_v15, 5  ;;  %v6143_v22 = vrot.slane %v5638_v39, 5 }
 0x368   : > { %v5786_v51 = vrot.slane %v5785_v61, 4  ;;  %v6417_v50 = vrot.slane %v6415_v58, 4  ;;  %v6423_v27 = vrot.slane %v6421_v17, 5  ;;  %v9638_v32 = vcombine.low %v14512_v13, %v14518_v60 }
 0x369   : > { %v6408_v9 = vor.u32 %v6407_v38, %v6404_v11  ;;  %v5799_v6 = vor.u32 %v14083_v19, %v14080_v26  ;;  %v6141_v18 = vsel %vm11642_vm5, %v9510_v49, %v6140_v4  ;;  %v6142_v12 = vrot.slane %v6140_v4, 4 }
 0x36a   : > { %v5791_v55 = vsel %vm11631_vm4, %v5786_v51, %v5790_v59  ;;  %v6418_v20 = vor.u32 %v6417_v50, %v6413_v33  ;;  %v5802_v1 = vshll.u32 %v11246_v15, 16  ;;  %v15960_v19 = vshrl.u32 %v14042_v30, 16  ;;  %v6648_v30 = vld [vmem:[#allocation2 + $0x6c] sm:$0xe] }
 0x36b   : > { %v9605_v53 = vcombine.low %v5781_v14, %v5791_v55  ;;  %v6409_v7 = vrot.slane %v6408_v9, 4  ;;  %v5800_v2 = vrot.slane %v5799_v6, 4  ;;  %v6144_v26 = vsel %vm11642_vm5, %v6142_v12, %v6143_v22 }
 0x36c   : > { %v6419_v13 = vrot.slane %v6418_v20, 4  ;;  %v5808_v60 = vrot.slane %v15960_v19, 4  ;;  %v5812_v47 = vshll.u32 %v5638_v39, 16  ;;  %v9622_v63 = vcombine.low %v6141_v18, %v6144_v26 }
 0x36d   : > { %8419 = vmatmul.mubr.bf16.gmra.mrb[212].mxu1 %v9605_v53  ;;  %v6414_v8 = vsel %vm11631_vm4, %v6409_v7, %v6413_v33  ;;  %v5804_v21 = vrot.slane %v5802_v1, 5  ;;  %v6426_v59 = vshrl.u32 %v14540_v31, 16  ;;  %v6429_v14 = vshll.u32 %v14540_v31, 16  ;;  %v6039_v33 = vld [vmem:[#allocation2 + $0x60] sm:$0xe] }
 0x36e   : > { %v6424_v43 = vsel %vm11631_vm4, %v6419_v13, %v6423_v27  ;;  %v5814_v10 = vrot.slane %v5812_v47, 5  ;;  %v6435_v61 = vshll.u32 %v14542_v40, 16  ;;  %8426 = vmatprep.mubr.bf16.mxu1 %v9622_v63  ;;  %v6439_v51 = vshrl.u32 %v14542_v40, 16  ;;  %v5639_v27 = vld [vmem:[#allocation2 + $0x68] sm:$0x1] }
 0x36f   : > { %v9654_v11 = vcombine.low %v6414_v8, %v6424_v43  ;;  %v5805_v39 = vsel %vm11631_vm4, %v5800_v2, %v5804_v21  ;;  %v5809_v58 = vor.u32 %v5808_v60, %v5804_v21  ;;  %v6428_v38 = vrot.slane %v6426_v59, 4  ;;  %v11247_v2 = vld [vmem:[#allocation2 + $0x64] sm:$0xf]  ;;  %v14573_v21 = vld [vmem:[#allocation2 + $0x78] sm:$0xf] }
 0x370   : > { %v6431_v17 = vrot.slane %v6429_v14, 5  ;;  %v6437_v49 = vrot.slane %v6435_v61, 5  ;;  %v6445_v50 = vshll.u32 %v6248_v62, 16  ;;  %v9527_v4 = vrot.slane %v6648_v30, 9  ;;  %v14581_v14 = vld [vmem:[#allocation2 + $0x7c] sm:$0xf] }
 0x371   : > { %8587 = vmatprep.mubr.bf16.mxu0 %v9654_v11  ;;  %v5810_v15 = vrot.slane %v5809_v58, 4  ;;  %v6756_v22 = vrot.slane %v14542_v40, 5  ;;  %v6759_v9 = vrot.slane %v6248_v62, 5  ;;  %v6441_v55 = vrot.slane %v6439_v51, 4 }
 0x372   : > { %8588 = vmatmul.mubr.bf16.gmra.mrb[248].mxu0 %v9638_v32  ;;  %v6432_v6 = vor.u32 %v6431_v17, %v6428_v38  ;;  %v6447_v20 = vrot.slane %v6445_v50, 5  ;;  %v9511_v18 = vrot.slane %v6039_v33, 9  ;;  %v6147_v1 = vrot.slane %v11247_v2, 5 }
 0x373   : > { %v5815_v12 = vsel %vm11631_vm4, %v5810_v15, %v5814_v10  ;;  %v14563_v53 = vsel %vm11642_vm5, %v9527_v4, %v6756_v22  ;;  %v6758_v7 = vrot.slane %v6756_v22, 4  ;;  %v6442_v19 = vor.u32 %v6441_v55, %v6437_v49  ;;  %v5640_v15 = vld [vmem:[#allocation2 + $0x74] sm:$0x1] }
 0x374   : > { %15961 = vst [vmem:[#allocation32_spill] sm:$0xff] %v14563_v53  ;;  %v9606_v13 = vcombine.low %v5805_v39, %v5815_v12  ;;  %v6433_v26 = vrot.slane %v6432_v6, 4  ;;  %v6150_v60 = vrot.slane %v5639_v27, 5  ;;  %v6148_v47 = vsel %vm11642_vm5, %v9511_v18, %v6147_v1  ;;  %v6249_v39 = vld [vmem:[#allocation2 + $0x80] sm:$0x1] }
 0x375   : > { %v14567_v32 = vsel %vm11642_vm5, %v6758_v7, %v6759_v9  ;;  %v6149_v8 = vrot.slane %v6147_v1, 4  ;;  %v9639_v63 = vcombine.low %v14540_v31, %v14542_v40  ;;  %v6443_v59 = vrot.slane %v6442_v19, 4 }
 0x376   : > { %15962 = vst [vmem:[#allocation33_spill] sm:$0xff] %v14567_v32  ;;  %8427 = vmatmul.mubr.bf16.gmra.mrb[216].mxu1 %v9606_v13  ;;  %v6438_v62 = vsel %vm11631_vm4, %v6433_v26, %v6437_v49  ;;  %v5823_v10 = vor.u32 %v14114_v5, %v14092_v23  ;;  %v5826_v30 = vshll.u32 %v11247_v2, 16  ;;  %v15963_v31 = vshrl.u32 %v14058_v56, 16  ;;  %v6040_v49 = vld [vmem:[#allocation2 + $0x6c] sm:$0xe] }
 0x377   : > { %v6151_v61 = vsel %vm11642_vm5, %v6149_v8, %v6150_v60  ;;  %v5836_v11 = vshll.u32 %v5639_v27, 16  ;;  %v6448_v58 = vsel %vm11631_vm4, %v6443_v59, %v6447_v20  ;;  %v6450_v17 = vshrl.u32 %v14573_v21, 16 }
 0x378   : > { %v5832_v40 = vrot.slane %v15963_v31, 4  ;;  %v9623_v38 = vcombine.low %v6148_v47, %v6151_v61  ;;  %v5824_v33 = vrot.slane %v5823_v10, 4  ;;  %v9655_v23 = vcombine.low %v6438_v62, %v6448_v58  ;;  %v11248_v47 = vld [vmem:[#allocation2 + $0x70] sm:$0xf] }
 0x379   : > { %v5828_v5 = vrot.slane %v5826_v30, 5  ;;  %v5838_v51 = vrot.slane %v5836_v11, 5  ;;  %v6453_v50 = vshll.u32 %v14573_v21, 16  ;;  %v6452_v4 = vrot.slane %v6450_v17, 4  ;;  %v14609_v30 = vld [vmem:[#allocation2 + $0x84] sm:$0xf] }
 0x37a   : > { %8434 = vmatprep.mubr.bf16.mxu1 %v9623_v38  ;;  %v6459_v56 = vshll.u32 %v14581_v14, 16  ;;  %v6463_v22 = vshrl.u32 %v14581_v14, 16  ;;  %v6469_v9 = vshll.u32 %v6249_v39, 16  ;;  %8595 = vmatprep.mubr.bf16.mxu0 %v9655_v23  ;;  %v9640_v18 = vcombine.low %v14573_v21, %v14581_v14 }
 0x37b   : > { %v5829_v6 = vsel %vm11631_vm4, %v5824_v33, %v5828_v5  ;;  %v5833_v55 = vor.u32 %v5832_v40, %v5828_v5  ;;  %v6455_v20 = vrot.slane %v6453_v50, 5  ;;  %8596 = vmatmul.mubr.bf16.gmra.mrb[252].mxu0 %v9639_v63  ;;  %v9512_v13 = vrot.slane %v6040_v49, 9  ;;  %v6250_v50 = vld [vmem:[#allocation2 + $0x8c] sm:$0x1] }
 0x37c   : > { %v14593_v27 = vpop.f32.mrb[164].mxu0  ;;  %v6461_v7 = vrot.slane %v6459_v56, 5  ;;  %v6465_v2 = vrot.slane %v6463_v22, 4  ;;  %v6471_v1 = vrot.slane %v6469_v9, 5  ;;  %v6154_v8 = vrot.slane %v11248_v47, 5 }
 0x37d   : > { %v14599_v12 = vpop.f32.mrb[165].mxu0  ;;  %v5834_v19 = vrot.slane %v5833_v55, 4  ;;  %v6456_v60 = vor.u32 %v6455_v20, %v6452_v4  ;;  %v6157_v62 = vrot.slane %v5640_v15, 5  ;;  %v5847_v21 = vor.u32 %v14141_v34, %v14119_v42  ;;  %v6650_v20 = vld [vmem:[#allocation2 + $0x84] sm:$0xe] }
 0x37e   : > { %v14601_v26 = vpop.f32.mrb[166].mxu0  ;;  %v6466_v10 = vor.u32 %v6465_v2, %v6461_v7  ;;  %v5850_v14 = vshll.u32 %v11248_v47, 16  ;;  %v15964_v63 = vshrl.u32 %v14101_v36, 16  ;;  %v6155_v39 = vsel %vm11642_vm5, %v9512_v13, %v6154_v8  ;;  %v14619_v36 = vld [vmem:[#allocation2 + $0x88] sm:$0xf] }
 0x37f   : > { %v14603_v59 = vpop.f32.mrb[167].mxu0  ;;  %v5839_v40 = vsel %vm11631_vm4, %v5834_v19, %v5838_v51  ;;  %v6457_v11 = vrot.slane %v6456_v60, 4  ;;  %v6156_v58 = vrot.slane %v6154_v8, 4  ;;  %v5848_v42 = vrot.slane %v5847_v21, 4 }
 0x380   : > { %v5856_v61 = vrot.slane %v15964_v63, 4  ;;  %v14611_v31 = vpop.f32.mrb[132].mxu1  ;;  %v9607_v33 = vcombine.low %v5829_v6, %v5839_v40  ;;  %v6467_v34 = vrot.slane %v6466_v10, 4  ;;  %v5852_v17 = vrot.slane %v5850_v14, 5  ;;  %v6041_v14 = vld [vmem:[#allocation2 + $0x78] sm:$0xe] }
 0x381   : > { %v14617_v38 = vpop.f32.mrb[133].mxu1  ;;  %v6462_v23 = vsel %vm11631_vm4, %v6457_v11, %v6461_v7  ;;  %v6158_v5 = vsel %vm11642_vm5, %v6156_v58, %v6157_v62  ;;  %v5860_v51 = vshll.u32 %v5640_v15, 16  ;;  %v6474_v4 = vshrl.u32 %v14609_v30, 16 }
 0x382   : > { %v14621_v49 = vpop.f32.mrb[134].mxu1  ;;  %8435 = vmatmul.mubr.bf16.gmra.mrb[220].mxu1 %v9607_v33  ;;  %v6472_v22 = vsel %vm11631_vm4, %v6467_v34, %v6471_v1  ;;  %v9624_v9 = vcombine.low %v6155_v39, %v6158_v5  ;;  %v5853_v6 = vsel %vm11631_vm4, %v5848_v42, %v5852_v17  ;;  %v5857_v55 = vor.u32 %v5856_v61, %v5852_v17  ;;  %v5641_v39 = vld [vmem:[#allocation2 + $0x80] sm:$0x1] }
 0x383   : > { %v14628_v56 = vpop.f32.mrb[135].mxu1  ;;  %v9656_v7 = vcombine.low %v6462_v23, %v6472_v22  ;;  %v5862_v2 = vrot.slane %v5860_v51, 5  ;;  %v6476_v13 = vrot.slane %v6474_v4, 4  ;;  %v6477_v15 = vshll.u32 %v14609_v30, 16 }
 0x384   : > { %8442 = vmatprep.mubr.bf16.mxu1 %v9624_v9  ;;  %v5858_v19 = vrot.slane %v5857_v55, 4  ;;  %v6483_v60 = vshll.u32 %v14619_v36, 16  ;;  %v6487_v47 = vshrl.u32 %v14619_v36, 16  ;;  %v6493_v8 = vshll.u32 %v6250_v50, 16 }
 0x385   : > { %8603 = vmatprep.mubr.bf16.mxu0 %v9656_v7  ;;  %v6479_v1 = vrot.slane %v6477_v15, 5  ;;  %v9529_v62 = vrot.slane %v6650_v20, 9  ;;  %v6770_v10 = vrot.slane %v14619_v36, 5  ;;  %v6773_v21 = vrot.slane %v6250_v50, 5  ;;  %v15967_v15 = vld [vmem:[#allocation24_spill] sm:$0xff] }
 0x386   : > { %8604 = vmatmul.mubr.bf16.gmra.mrb[0].mxu0 %v9640_v18  ;;  %v5863_v63 = vsel %vm11631_vm4, %v5858_v19, %v5862_v2  ;;  %v6485_v61 = vrot.slane %v6483_v60, 5  ;;  %v6489_v40 = vrot.slane %v6487_v47, 4  ;;  %v6495_v11 = vrot.slane %v6493_v8, 5  ;;  %v11249_v18 = vld [vmem:[#allocation2 + $0x7c] sm:$0xf] }
 0x387   : > { %v9608_v58 = vcombine.low %v5853_v6, %v5863_v63  ;;  %v6480_v33 = vor.u32 %v6479_v1, %v6476_v13  ;;  %v14642_v34 = vsel %vm11642_vm5, %v9529_v62, %v6770_v10  ;;  %v6772_v42 = vrot.slane %v6770_v10, 4  ;;  %v14652_v6 = vld [vmem:[#allocation2 + $0x90] sm:$0xf]  ;;  %v6251_v1 = vld [vmem:[#allocation2 + $0x98] sm:$0x1] }
 0x388   : > { %15965 = vst [vmem:[#allocation34_spill] sm:$0xff] %v14642_v34  ;;  %v6490_v17 = vor.u32 %v6489_v40, %v6485_v61  ;;  %v9641_v23 = vcombine.low %v14609_v30, %v14619_v36  ;;  %v9513_v5 = vrot.slane %v6041_v14, 9  ;;  %v6161_v51 = vrot.slane %v11249_v18, 5 }
 0x389   : > { %v6481_v50 = vrot.slane %v6480_v33, 4  ;;  %v14648_v4 = vsel %vm11642_vm5, %v6772_v42, %v6773_v21  ;;  %v6164_v22 = vrot.slane %v5641_v39, 5  ;;  %v5871_v9 = vor.u32 %v14154_v35, %v14147_v54  ;;  %v14662_v54 = vld [vmem:[#allocation2 + $0x94] sm:$0xf] }
 0x38a   : > { %15966 = vst [vmem:[#allocation35_spill] sm:$0xff] %v14648_v4  ;;  %8443 = vmatmul.mubr.bf16.gmra.mrb[224].mxu1 %v9608_v58  ;;  %v6491_v55 = vrot.slane %v6490_v17, 4  ;;  %v6162_v30 = vsel %vm11642_vm5, %v9513_v5, %v6161_v51  ;;  %v6163_v36 = vrot.slane %v6161_v51, 4  ;;  %v5874_v13 = vshll.u32 %v11249_v18, 16  ;;  %v5642_v18 = vld [vmem:[#allocation2 + $0x8c] sm:$0x1] }
 0x38b   : > { %v6486_v7 = vsel %vm11631_vm4, %v6481_v50, %v6485_v61  ;;  %v5872_v2 = vrot.slane %v5871_v9, 4  ;;  %v15968_v19 = vshrl.u32 %v15967_v15, 16  ;;  %v5884_v8 = vshll.u32 %v5641_v39, 16  ;;  %v6042_v61 = vld [vmem:[#allocation2 + $0x84] sm:$0xe] }
 0x38c   : > { %v6496_v35 = vsel %vm11631_vm4, %v6491_v55, %v6495_v11  ;;  %v6165_v47 = vsel %vm11642_vm5, %v6163_v36, %v6164_v22  ;;  %v6498_v62 = vshrl.u32 %v14652_v6, 16  ;;  %v5876_v14 = vrot.slane %v5874_v13, 5  ;;  %v11250_v13 = vld [vmem:[#allocation2 + $0x88] sm:$0xf]  ;;  %v11252_v4 = vld [vmem:[#allocation2 + $0xa0] sm:$0xf] }
 0x38d   : > { %v5880_v60 = vrot.slane %v15968_v19, 4  ;;  %v9657_v10 = vcombine.low %v6486_v7, %v6496_v35  ;;  %v9625_v21 = vcombine.low %v6162_v30, %v6165_v47  ;;  %v6501_v63 = vshll.u32 %v14652_v6, 16  ;;  %v15969_v35 = vld [vmem:[#allocation12_spill] sm:$0xff]  ;;  %v15970_v47 = vld [vmem:[#allocation13_spill] sm:$0xff] }
 0x38e   : > { %v5886_v40 = vrot.slane %v5884_v8, 5  ;;  %v6500_v58 = vrot.slane %v6498_v62, 4  ;;  %v6507_v33 = vshll.u32 %v14662_v54, 16  ;;  %v6511_v42 = vshrl.u32 %v14662_v54, 16 }
 0x38f   : > { %8611 = vmatprep.mubr.bf16.mxu0 %v9657_v10  ;;  %8450 = vmatprep.mubr.bf16.mxu1 %v9625_v21  ;;  %v5877_v11 = vsel %vm11631_vm4, %v5872_v2, %v5876_v14  ;;  %v5881_v39 = vor.u32 %v5880_v60, %v5876_v14  ;;  %v6503_v17 = vrot.slane %v6501_v63, 5  ;;  %v6517_v5 = vshll.u32 %v6251_v1, 16  ;;  %v14688_v21 = vld [vmem:[#allocation2 + $0x9c] sm:$0xf] }
 0x390   : > { %8612 = vmatmul.mubr.bf16.gmra.mrb[4].mxu0 %v9641_v23  ;;  %v6509_v51 = vrot.slane %v6507_v33, 5  ;;  %v6513_v50 = vrot.slane %v6511_v42, 4  ;;  %v9642_v22 = vcombine.low %v14652_v6, %v14662_v54  ;;  %v9514_v9 = vrot.slane %v6042_v61, 9  ;;  %v14692_v42 = vld [vmem:[#allocation2 + $0xa0] sm:$0xf] }
 0x391   : > { %v14676_v55 = vpop.f32.mrb[136].mxu1  ;;  %v5882_v30 = vrot.slane %v5881_v39, 4  ;;  %v6504_v36 = vor.u32 %v6503_v17, %v6500_v58  ;;  %v6519_v7 = vrot.slane %v6517_v5, 5  ;;  %v6168_v15 = vrot.slane %v11250_v13, 5  ;;  %v15971_v17 = vld [vmem:[#allocation20_spill] sm:$0xff] }
 0x392   : > { %v14678_v19 = vpop.f32.mrb[137].mxu1  ;;  %v6514_v2 = vor.u32 %v6513_v50, %v6509_v51  ;;  %v6171_v60 = vrot.slane %v5642_v18, 5  ;;  %v5895_v23 = vor.u32 %v15970_v47, %v15969_v35  ;;  %v5898_v8 = vshll.u32 %v11250_v13, 16 }
 0x393   : > { %v14682_v1 = vpop.f32.mrb[138].mxu1  ;;  %v5887_v6 = vsel %vm11631_vm4, %v5882_v30, %v5886_v40  ;;  %v6505_v54 = vrot.slane %v6504_v36, 4  ;;  %v6169_v62 = vsel %vm11642_vm5, %v9514_v9, %v6168_v15  ;;  %v6170_v10 = vrot.slane %v6168_v15, 4  ;;  %v6252_v30 = vld [vmem:[#allocation2 + $0xa4] sm:$0x1] }
 0x394   : > { %v14690_v14 = vpop.f32.mrb[139].mxu1  ;;  %v9609_v63 = vcombine.low %v5877_v11, %v5887_v6  ;;  %v6515_v61 = vrot.slane %v6514_v2, 4  ;;  %v5896_v58 = vrot.slane %v5895_v23, 4  ;;  %v5900_v33 = vrot.slane %v5898_v8, 5  ;;  %v6652_v2 = vld [vmem:[#allocation2 + $0x9c] sm:$0xe] }
 0x395   : > { %v6510_v39 = vsel %vm11631_vm4, %v6505_v54, %v6509_v51  ;;  %v6172_v40 = vsel %vm11642_vm5, %v6170_v10, %v6171_v60  ;;  %v15972_v5 = vshrl.u32 %v15971_v17, 16  ;;  %v5908_v9 = vshll.u32 %v5642_v18, 16 }
 0x396   : > { %8451 = vmatmul.mubr.bf16.gmra.mrb[228].mxu1 %v9609_v63  ;;  %v6520_v11 = vsel %vm11631_vm4, %v6515_v61, %v6519_v7  ;;  %v9626_v13 = vcombine.low %v6169_v62, %v6172_v40  ;;  %v5901_v15 = vsel %vm11631_vm4, %v5896_v58, %v5900_v33  ;;  %v6522_v51 = vshrl.u32 %v14688_v21, 16 }
 0x397   : > { %v5904_v50 = vrot.slane %v15972_v5, 4  ;;  %v9658_v60 = vcombine.low %v6510_v39, %v6520_v11  ;;  %v5910_v23 = vrot.slane %v5908_v9, 5  ;;  %v6525_v18 = vshll.u32 %v14688_v21, 16  ;;  %v6043_v39 = vld [vmem:[#allocation2 + $0x90] sm:$0xe] }
 0x398   : > { %v14700_v36 = vpop.f32.mrb[168].mxu0  ;;  %8458 = vmatprep.mubr.bf16.mxu1 %v9626_v13  ;;  %v6524_v6 = vrot.slane %v6522_v51, 4  ;;  %v6531_v7 = vshll.u32 %v14692_v42, 16  ;;  %v6535_v54 = vshrl.u32 %v14692_v42, 16  ;;  %v6541_v62 = vshll.u32 %v6252_v30, 16 }
 0x399   : > { %v14707_v35 = vpop.f32.mrb[169].mxu0  ;;  %v5905_v47 = vor.u32 %v5904_v50, %v5900_v33  ;;  %8619 = vmatprep.mubr.bf16.mxu0 %v9658_v60  ;;  %v6527_v61 = vrot.slane %v6525_v18, 5  ;;  %v9531_v58 = vrot.slane %v6652_v2, 9  ;;  %v6784_v33 = vrot.slane %v14692_v42, 5  ;;  %v14717_v9 = vld [vmem:[#allocation2 + $0x98] sm:$0x1] }
 0x39a   : > { %v14710_v8 = vpop.f32.mrb[170].mxu0  ;;  %8620 = vmatmul.mubr.bf16.gmra.mrb[8].mxu0 %v9642_v22  ;;  %v6533_v40 = vrot.slane %v6531_v7, 5  ;;  %v6537_v17 = vrot.slane %v6535_v54, 4  ;;  %v6543_v5 = vrot.slane %v6541_v62, 5  ;;  %v6787_v50 = vrot.slane %v6252_v30, 5 }
 0x39b   : > { %v14714_v10 = vpop.f32.mrb[171].mxu0  ;;  %v5906_v63 = vrot.slane %v5905_v47, 4  ;;  %v6528_v13 = vor.u32 %v6527_v61, %v6524_v6  ;;  %v14723_v51 = vsel %vm11642_vm5, %v9531_v58, %v6784_v33  ;;  %v6786_v60 = vrot.slane %v6784_v33, 4  ;;  %v11251_v54 = vld [vmem:[#allocation2 + $0x94] sm:$0xf]  ;;  %v15976_v61 = vld [vmem:[#allocation25_spill] sm:$0xff] }
 0x39c   : > { %15973 = vst [vmem:[#allocation24_spill] sm:$0xff] %v14723_v51  ;;  %v6538_v47 = vor.u32 %v6537_v17, %v6533_v40  ;;  %v9643_v22 = vcombine.low %v14688_v21, %v14692_v42  ;;  %v9515_v18 = vrot.slane %v6043_v39, 9  ;;  %v6175_v62 = vrot.slane %v11251_v54, 5  ;;  %v14735_v6 = vld [vmem:[%s15792_s4] ss:$0 sm:$0xff]  ;;  %v15975_v42 = vld [vmem:[#allocation17_spill] sm:$0xff] }
 0x39d   : > { %v5911_v11 = vsel %vm11631_vm4, %v5906_v63, %v5910_v23  ;;  %v6529_v7 = vrot.slane %v6528_v13, 4  ;;  %v14729_v30 = vsel %vm11642_vm5, %v6786_v60, %v6787_v50  ;;  %v6178_v23 = vrot.slane %v14717_v9, 5  ;;  %v15977_v33 = vld [vmem:[#allocation26_spill] sm:$0xff]  ;;  %v15978_v39 = vld [vmem:[#allocation27_spill] sm:$0xff] }
 0x39e   : > { %v9610_v2 = vcombine.low %v5901_v15, %v5911_v11  ;;  %15974 = vst [vmem:[#allocation12_spill] sm:$0xff] %v14729_v30  ;;  %v6539_v63 = vrot.slane %v6538_v47, 4  ;;  %v10282_v58 = vadd.f32 %v15976_v61, %v15975_v42  ;;  %v10285_v17 = vadd.f32 %v15978_v39, %v15977_v33  ;;  %v15980_v21 = vld [vmem:[#allocation11_spill] sm:$0xff] }
 0x39f   : > { %v6534_v11 = vsel %vm11631_vm4, %v6529_v7, %v6533_v40  ;;  %v6176_v13 = vsel %vm11642_vm5, %v9515_v18, %v6175_v62  ;;  %v6177_v60 = vrot.slane %v6175_v62, 4  ;;  %v10397_v39 = vadd.f32 %v14467_v24, %v14465_v28  ;;  %v14761_v40 = vld [vmem:[#allocation2 + $0xa8] sm:$0xf] }
 0x3a0   : > { %v14737_v15 = vpop.f32.mrb[172].mxu0  ;;  %8459 = vmatmul.mubr.bf16.gmra.mrb[232].mxu1 %v9610_v2  ;;  %v10394_v2 = vadd.f32 %v14463_v57, %v14459_v48  ;;  %v6544_v42 = vsel %vm11631_vm4, %v6539_v63, %v6543_v5  ;;  %v8059_v61 = vadd.f32 %v10282_v58, %v14735_v6  ;;  %v8062_v33 = vadd.f32 %v10285_v17, %v14735_v6  ;;  %v15979_v57 = vld [vmem:[#allocation15_spill] sm:$0xff]  ;;  %v14773_v17 = vld [vmem:[#allocation2 + $0xb0] sm:$0x1] }
 0x3a1   : > { %v14745_v50 = vpop.f32.mrb[173].mxu0  ;;  %v9659_v62 = vcombine.low %v6534_v11, %v6544_v42  ;;  %v6179_v48 = vsel %vm11642_vm5, %v6177_v60, %v6178_v23  ;;  %v5919_v5 = vor.u32 %v15980_v21, %v15979_v57  ;;  %v5922_v63 = vshll.u32 %v11251_v54, 16  ;;  %v14771_v58 = vld [vmem:[#allocation2 + $0xac] sm:$0xf]  ;;  %15982 = vst [vmem:[#allocation20_spill] sm:$0xff] %v14773_v17 }
 0x3a2   : > { %v14753_v47 = vpop.f32.mrb[174].mxu0  ;;  %v14763_v7 = vpop.f32.mrb[140].mxu1  ;;  %15981 = vst [vmem:[#allocation13_spill] sm:$0xff] %v14771_v58  ;;  %v9627_v28 = vcombine.low %v6176_v13, %v6179_v48  ;;  %v14777_v24 = vadd.f32 %v10394_v2, %v8059_v61  ;;  %v14779_v43 = vadd.f32 %v10397_v39, %v8062_v33  ;;  %v15986_v11 = vshrl.u32 %v15985_v52, 16  ;;  %v15987_v33 = vld [vmem:[#allocation9_spill] sm:$0xff] }
 0x3a3   : > { %v14765_v18 = vpop.f32.mrb[175].mxu0  ;;  %v14775_v20 = vpop.f32.mrb[141].mxu1  ;;  %8627 = vmatprep.mubr.bf16.mxu0 %v9659_v62  ;;  %v5920_v23 = vrot.slane %v5919_v5, 4  ;;  %v5924_v21 = vrot.slane %v5922_v63, 5  ;;  %v5932_v54 = vshll.u32 %v14717_v9, 16  ;;  %v6546_v60 = vshrl.u32 %v14761_v40, 16 }
 0x3a4   : > { %15983 = vst [vmem:[#allocation17_spill] sm:$0xff] %v14777_v24  ;;  %15984 = vst [vmem:[#allocation25_spill] sm:$0xff] %v14779_v43  ;;  %v5928_v42 = vrot.slane %v15986_v11, 4  ;;  %v14783_v37 = vpop.f32.mrb[142].mxu1  ;;  %8466 = vmatprep.mubr.bf16.mxu1 %v9627_v28  ;;  %8628 = vmatmul.mubr.bf16.gmra.mrb[12].mxu0 %v9643_v22  ;;  %v6549_v13 = vshll.u32 %v14761_v40, 16  ;;  %v6555_v2 = vshll.u32 %v14771_v58, 16 }
 0x3a5   : > { %v14787_v57 = vpop.f32.mrb[143].mxu1  ;;  %v6559_v52 = vshrl.u32 %v14771_v58, 16  ;;  %v6565_v61 = vshll.u32 %v14773_v17, 16  ;;  %v15988_v39 = vshrl.u32 %v15987_v33, 16  ;;  %v15989_v9 = vshll.u32 %v15987_v33, 16 }
 0x3a6   : > { %v5929_v5 = vor.u32 %v5928_v42, %v5924_v21  ;;  %v6548_v63 = vrot.slane %v6546_v60, 4  ;;  %v6044_v28 = vld [vmem:[#allocation2 + $0x9c] sm:$0xe]  ;;  %v5925_v22 = vsel %vm11631_vm4, %v5920_v23, %v5924_v21  ;;  %v6551_v11 = vrot.slane %v6549_v13, 5  ;;  %v5644_v24 = vld [vmem:[#allocation2 + $0xa4] sm:$0x1] }
 0x3a7   : > { %v14795_v62 = vrot.slane %v15988_v39, 4  ;;  %v14799_v48 = vrot.slane %v15989_v9, 5  ;;  %v6557_v3 = vrot.slane %v6555_v2, 5  ;;  %v6561_v43 = vrot.slane %v6559_v52, 4 }
 0x3a8   : > { %v5930_v30 = vrot.slane %v5929_v5, 4  ;;  %v5934_v51 = vrot.slane %v5932_v54, 5  ;;  %v6567_v17 = vrot.slane %v6565_v61, 5  ;;  %v6182_v39 = vrot.slane %v11252_v4, 5  ;;  %v14827_v61 = vld [vmem:[#allocation2 + $0xb4] sm:$0xf] }
 0x3a9   : > { %v6552_v34 = vor.u32 %v6551_v11, %v6548_v63  ;;  %v6562_v32 = vor.u32 %v6561_v43, %v6557_v3  ;;  %v9516_v33 = vrot.slane %v6044_v28, 9  ;;  %v14805_v42 = vadd.f32 %v14599_v12, %v14593_v27  ;;  %v6254_v5 = vld [vmem:[#allocation2 + $0xbc] sm:$0x1]  ;;  %v15995_v11 = vld [vmem:[#allocation18_spill] sm:$0xff] }
 0x3aa   : > { %v5935_v60 = vsel %vm11631_vm4, %v5930_v30, %v5934_v51  ;;  %v6184_v23 = vrot.slane %v6182_v39, 4  ;;  %v6185_v21 = vrot.slane %v5644_v24, 5  ;;  %v14811_v13 = vadd.f32 %v14617_v38, %v14611_v31  ;;  %v15993_v30 = vld [vmem:[#allocation19_spill] sm:$0xff]  ;;  %v15994_v31 = vld [vmem:[#allocation10_spill] sm:$0xff] }
 0x3ab   : > { %15990 = vst [vmem:[#allocation26_spill] sm:$0xff] %v14805_v42  ;;  %v9611_v54 = vcombine.low %v5925_v22, %v5935_v60  ;;  %v6553_v2 = vrot.slane %v6552_v34, 4  ;;  %v6563_v52 = vrot.slane %v6562_v32, 4  ;;  %v14815_v43 = vadd.f32 %v14603_v59, %v14601_v26  ;;  %v14829_v32 = vld [vmem:[#allocation2 + $0xb8] sm:$0xf] }
 0x3ac   : > { %v6183_v27 = vsel %vm11642_vm5, %v9516_v33, %v6182_v39  ;;  %v6186_v12 = vsel %vm11642_vm5, %v6184_v23, %v6185_v21  ;;  %v14823_v51 = vadd.f32 %v14628_v56, %v14621_v49  ;;  %v5943_v38 = vor.u32 %v15994_v31, %v15993_v30  ;;  %v6654_v60 = vld [vmem:[#allocation2 + $0xb4] sm:$0xe]  ;;  %v14865_v42 = vld [vmem:[#allocation2 + $0xb0] sm:$0x1] }
 0x3ad   : > { %15991 = vst [vmem:[#allocation27_spill] sm:$0xff] %v14815_v43  ;;  %8467 = vmatmul.mubr.bf16.gmra.mrb[236].mxu1 %v9611_v54  ;;  %v6558_v26 = vsel %vm11631_vm4, %v6553_v2, %v6557_v3  ;;  %v6568_v59 = vsel %vm11631_vm4, %v6563_v52, %v6567_v17  ;;  %v9628_v34 = vcombine.low %v6183_v27, %v6186_v12  ;;  %v5946_v9 = vshll.u32 %v11252_v4, 16  ;;  %v14853_v52 = vld [vmem:[#allocation2 + $0xc0] sm:$0xf] }
 0x3ae   : > { %15992 = vst [vmem:[#allocation15_spill] sm:$0xff] %v14823_v51  ;;  %v14835_v63 = vpop.f32.mrb[176].mxu0  ;;  %v14837_v49 = vpop.f32.mrb[144].mxu1  ;;  %v9644_v56 = vcombine.low %v14761_v40, %v14771_v58  ;;  %v9660_v28 = vcombine.low %v6558_v26, %v6568_v59  ;;  %v5944_v22 = vrot.slane %v5943_v38, 4  ;;  %v15996_v39 = vshrl.u32 %v15995_v11, 16 }
 0x3af   : > { %v14843_v3 = vpop.f32.mrb[177].mxu0  ;;  %v14845_v23 = vpop.f32.mrb[145].mxu1  ;;  %8474 = vmatprep.mubr.bf16.mxu1 %v9628_v34  ;;  %v5948_v4 = vrot.slane %v5946_v9, 5  ;;  %v5956_v17 = vshll.u32 %v5644_v24, 16  ;;  %v6570_v21 = vshrl.u32 %v14827_v61, 16  ;;  %v6573_v54 = vshll.u32 %v14827_v61, 16 }
 0x3b0   : > { %v5952_v33 = vrot.slane %v15996_v39, 4  ;;  %v14849_v2 = vpop.f32.mrb[178].mxu0  ;;  %v14851_v40 = vpop.f32.mrb[146].mxu1  ;;  %8635 = vmatprep.mubr.bf16.mxu0 %v9660_v28  ;;  %v6579_v12 = vshll.u32 %v14829_v32, 16  ;;  %v6583_v30 = vshrl.u32 %v14829_v32, 16  ;;  %v6589_v31 = vshll.u32 %v6254_v5, 16 }
 0x3b1   : > { %v14858_v38 = vpop.f32.mrb[179].mxu0  ;;  %v14860_v24 = vpop.f32.mrb[147].mxu1  ;;  %8636 = vmatmul.mubr.bf16.gmra.mrb[16].mxu0 %v9644_v56  ;;  %v5949_v26 = vsel %vm11631_vm4, %v5944_v22, %v5948_v4  ;;  %v6572_v34 = vrot.slane %v6570_v21, 4  ;;  %v9533_v9 = vrot.slane %v6654_v60, 9  ;;  %v5958_v11 = vrot.slane %v5956_v17, 5 }
 0x3b2   : > { %v5953_v59 = vor.u32 %v5952_v33, %v5948_v4  ;;  %v6575_v39 = vrot.slane %v6573_v54, 5  ;;  %v6581_v27 = vrot.slane %v6579_v12, 5  ;;  %v6585_v28 = vrot.slane %v6583_v30, 4  ;;  %v6045_v58 = vld [vmem:[#allocation2 + $0xa8] sm:$0xe] }
 0x3b3   : > { %v6591_v29 = vrot.slane %v6589_v31, 5  ;;  %v6798_v45 = vrot.slane %v14829_v32, 5  ;;  %v6801_v43 = vrot.slane %v6254_v5, 5  ;;  %v9645_v22 = vcombine.low %v14827_v61, %v14829_v32  ;;  %v11254_v33 = vld [vmem:[#allocation2 + $0xac] sm:$0xf] }
 0x3b4   : > { %v5954_v53 = vrot.slane %v5953_v59, 4  ;;  %v6576_v41 = vor.u32 %v6575_v39, %v6572_v34  ;;  %v6586_v56 = vor.u32 %v6585_v28, %v6581_v27  ;;  %v6189_v4 = vrot.slane %v11254_v33, 5  ;;  %v14918_v39 = vld [vmem:[#allocation2 + $0xc4] sm:$0xf]  ;;  %v16004_v28 = vld [vmem:[#allocation16_spill] sm:$0xff] }
 0x3b5   : > { %v14873_v17 = vsel %vm11642_vm5, %v9533_v9, %v6798_v45  ;;  %v6800_v21 = vrot.slane %v6798_v45, 4  ;;  %v9517_v54 = vrot.slane %v6045_v58, 9  ;;  %v6192_v59 = vrot.slane %v14865_v42, 5  ;;  %16003 = vst [vmem:[#allocation36_spill] sm:$0xff] %v14918_v39 }
 0x3b6   : > { %v5959_v60 = vsel %vm11631_vm4, %v5954_v53, %v5958_v11  ;;  %15997 = vst [vmem:[#allocation11_spill] sm:$0xff] %v14873_v17  ;;  %v14875_v12 = vpop.f32.mrb[180].mxu0  ;;  %v6577_v30 = vrot.slane %v6576_v41, 4  ;;  %v6587_v31 = vrot.slane %v6586_v56, 4  ;;  %v6191_v53 = vrot.slane %v6189_v4, 4  ;;  %v16005_v56 = vld [vmem:[#allocation21_spill] sm:$0xff] }
 0x3b7   : > { %v9612_v5 = vcombine.low %v5949_v26, %v5959_v60  ;;  %v14878_v34 = vpop.f32.mrb[181].mxu0  ;;  %v14882_v61 = vsel %vm11642_vm5, %v6800_v21, %v6801_v43  ;;  %v14886_v32 = vadd.f32 %v14707_v35, %v14700_v36  ;;  %v14890_v45 = vadd.f32 %v14678_v19, %v14676_v55  ;;  %v14904_v35 = vld [vmem:[#allocation2 + $0xc0] sm:$0xf] }
 0x3b8   : > { %15998 = vst [vmem:[#allocation23_spill] sm:$0xff] %v14882_v61  ;;  %v14892_v58 = vpop.f32.mrb[182].mxu0  ;;  %v6582_v41 = vsel %vm11631_vm4, %v6577_v30, %v6581_v27  ;;  %v6592_v26 = vsel %vm11631_vm4, %v6587_v31, %v6591_v29  ;;  %v14902_v36 = vadd.f32 %v14714_v10, %v14710_v8  ;;  %v6190_v27 = vsel %vm11642_vm5, %v9517_v54, %v6189_v4  ;;  %v14926_v4 = vld [vmem:[#allocation2 + $0xc8] sm:$0x1] }
 0x3b9   : > { %15999 = vst [vmem:[#allocation9_spill] sm:$0xff] %v14886_v32  ;;  %16000 = vst [vmem:[#allocation19_spill] sm:$0xff] %v14890_v45  ;;  %8475 = vmatmul.mubr.bf16.gmra.mrb[240].mxu1 %v9612_v5  ;;  %v14906_v55 = vpop.f32.mrb[148].mxu1  ;;  %v14908_v19 = vpop.f32.mrb[183].mxu0  ;;  %v9661_v9 = vcombine.low %v6582_v41, %v6592_v26  ;;  %v6193_v29 = vsel %vm11642_vm5, %v6191_v53, %v6192_v59  ;;  %v14916_v11 = vadd.f32 %v14690_v14, %v14682_v1  ;;  %v16006_v5 = vld [vmem:[#allocation14_spill] sm:$0xff] }
 0x3ba   : > { %16001 = vst [vmem:[#allocation10_spill] sm:$0xff] %v14902_v36  ;;  %v14920_v8 = vpop.f32.mrb[149].mxu1  ;;  %v9629_v10 = vcombine.low %v6190_v27, %v6193_v29  ;;  %v5967_v60 = vor.u32 %v16005_v56, %v16004_v28  ;;  %v5970_v21 = vshll.u32 %v11254_v33, 16  ;;  %v16007_v30 = vshrl.u32 %v16006_v5, 16  ;;  %16008 = vst [vmem:[#allocation16_spill] sm:$0xff] %v14926_v4 }
 0x3bb   : > { %16002 = vst [vmem:[#allocation18_spill] sm:$0xff] %v14916_v11  ;;  %v14928_v54 = vpop.f32.mrb[150].mxu1  ;;  %v6012_v59 = vshll.u32 %v14853_v52, 16  ;;  %8643 = vmatprep.mubr.bf16.mxu0 %v9661_v9  ;;  %v5980_v1 = vshll.u32 %v14865_v42, 16  ;;  %v6594_v14 = vshrl.u32 %v14904_v35, 16  ;;  %v6597_v53 = vshll.u32 %v14904_v35, 16 }
 0x3bc   : > { %v5976_v31 = vrot.slane %v16007_v30, 4  ;;  %v14934_v41 = vpop.f32.mrb[151].mxu1  ;;  %8482 = vmatprep.mubr.bf16.mxu1 %v9629_v10  ;;  %8644 = vmatmul.mubr.bf16.gmra.mrb[20].mxu0 %v9645_v22  ;;  %v5968_v33 = vrot.slane %v5967_v60, 4  ;;  %v5972_v26 = vrot.slane %v5970_v21, 5  ;;  %v6603_v27 = vshll.u32 %v14918_v39, 16 }
 0x3bd   : > { %v6607_v29 = vshrl.u32 %v14918_v39, 16  ;;  %v6596_v28 = vrot.slane %v6594_v14, 4  ;;  %v6599_v56 = vrot.slane %v6597_v53, 5  ;;  %v6613_v9 = vshll.u32 %v14926_v4, 16  ;;  %v6046_v5 = vld [vmem:[#allocation2 + $0xb4] sm:$0xe] }
 0x3be   : > { %v14939_v42 = vpop.f32.mrb[184].mxu0  ;;  %v14941_v30 = vld [vmem:[#allocation2 + $0xc4] sm:$0xf]  ;;  %v5977_v61 = vor.u32 %v5976_v31, %v5972_v26  ;;  %v6605_v10 = vrot.slane %v6603_v27, 5  ;;  %v5973_v21 = vsel %vm11631_vm4, %v5968_v33, %v5972_v26  ;;  %v5982_v17 = vrot.slane %v5980_v1, 5 }
 0x3bf   : > { %v6609_v22 = vrot.slane %v6607_v29, 4  ;;  %v14944_v60 = vpop.f32.mrb[185].mxu0  ;;  %v6600_v14 = vor.u32 %v6599_v56, %v6596_v28  ;;  %v6615_v53 = vrot.slane %v6613_v9, 5  ;;  %v5646_v36 = vld [vmem:[#allocation2 + $0xbc] sm:$0x1]  ;;  %v9518_v11 = vrot.slane %v6046_v5, 9 }
 0x3c0   : > { %v14948_v4 = vpop.f32.mrb[186].mxu0  ;;  %v5978_v32 = vrot.slane %v5977_v61, 4  ;;  %v11256_v45 = vld [vmem:[#allocation2 + $0xb8] sm:$0xf]  ;;  %v14956_v29 = vadd.f32 %v14745_v50, %v14737_v15  ;;  %v14960_v1 = vadd.f32 %v14775_v20, %v14763_v7  ;;  %v14964_v61 = vadd.f32 %v14765_v18, %v14753_v47 }
 0x3c1   : > { %v6610_v46 = vor.u32 %v6609_v22, %v6605_v10  ;;  %v6196_v51 = vrot.slane %v11256_v45, 5  ;;  %v14950_v43 = vpop.f32.mrb[152].mxu1  ;;  %v14952_v31 = vpop.f32.mrb[187].mxu0  ;;  %v6601_v27 = vrot.slane %v6600_v14, 4  ;;  %v6199_v9 = vrot.slane %v5646_v36, 5 }
 0x3c2   : > { %16009 = vst [vmem:[#allocation21_spill] sm:$0xff] %v14956_v29  ;;  %16010 = vst [vmem:[#allocation14_spill] sm:$0xff] %v14964_v61  ;;  %v14966_v33 = vpop.f32.mrb[153].mxu1  ;;  %v5983_v26 = vsel %vm11631_vm4, %v5978_v32, %v5982_v17  ;;  %v14978_v47 = vadd.f32 %v14787_v57, %v14783_v37  ;;  %v5991_v17 = vor.u32 %v14799_v48, %v14795_v62  ;;  %v5994_v32 = vshll.u32 %v11256_v45, 16  ;;  %v16013_v37 = vld [vmem:[#allocation22_spill] sm:$0xff] }
 0x3c3   : > { %v6611_v28 = vrot.slane %v6610_v46, 4  ;;  %v6198_v56 = vrot.slane %v6196_v51, 4  ;;  %v14970_v5 = vpop.f32.mrb[154].mxu1  ;;  %v9613_v15 = vcombine.low %v5973_v21, %v5983_v26  ;;  %v6606_v50 = vsel %vm11631_vm4, %v6601_v27, %v6605_v10  ;;  %v6047_v14 = vld [vmem:[#allocation2 + $0xc0] sm:$0xe] }
 0x3c4   : > { %v6197_v20 = vsel %vm11642_vm5, %v9518_v11, %v6196_v51  ;;  %16011 = vst [vmem:[#allocation37_spill] sm:$0xff] %v14978_v47  ;;  %v14980_v7 = vpop.f32.mrb[155].mxu1  ;;  %v16012_v10 = vshrl.u32 %v14853_v52, 16  ;;  %v16014_v57 = vshrl.u32 %v16013_v37, 16  ;;  %v9646_v26 = vcombine.low %v14904_v35, %v14918_v39  ;;  %v5647_v62 = vld [vmem:[#allocation2 + $0xc8] sm:$0x1] }
 0x3c5   : > { %v6616_v46 = vsel %vm11631_vm4, %v6611_v28, %v6615_v53  ;;  %v6200_v18 = vsel %vm11642_vm5, %v6198_v56, %v6199_v9  ;;  %8483 = vmatmul.mubr.bf16.gmra.mrb[244].mxu1 %v9613_v15  ;;  %v6014_v53 = vrot.slane %v6012_v59, 5  ;;  %v5996_v28 = vrot.slane %v5994_v32, 5 }
 0x3c6   : > { %v6011_v22 = vrot.slane %v16012_v10, 4  ;;  %v9662_v51 = vcombine.low %v6606_v50, %v6616_v46  ;;  %v9630_v11 = vcombine.low %v6197_v20, %v6200_v18  ;;  %v6000_v21 = vrot.slane %v16014_v57, 4  ;;  %v14992_v27 = vpop.f32.mrb[188].mxu0  ;;  %v15013_v20 = vld [vmem:[#allocation2 + $0xcc] sm:$0xf] }
 0x3c7   : > { %v6004_v56 = vshll.u32 %v5646_v36, 16  ;;  %v14996_v48 = vpop.f32.mrb[189].mxu0  ;;  %v6203_v52 = vrot.slane %v14941_v30, 5  ;;  %v15001_v45 = vadd.f32 %v14843_v3, %v14835_v63  ;;  %v15005_v9 = vadd.f32 %v14845_v23, %v14837_v49 }
 0x3c8   : > { %8651 = vmatprep.mubr.bf16.mxu0 %v9662_v51  ;;  %8490 = vmatprep.mubr.bf16.mxu1 %v9630_v11  ;;  %v15007_v59 = vpop.f32.mrb[190].mxu0  ;;  %v5992_v35 = vrot.slane %v5991_v17, 4  ;;  %v6001_v36 = vor.u32 %v6000_v21, %v5996_v28  ;;  %v9519_v15 = vrot.slane %v6047_v14, 9  ;;  %v15011_v50 = vadd.f32 %v14858_v38, %v14849_v2 }
 0x3c9   : > { %16015 = vst [vmem:[#allocation22_spill] sm:$0xff] %v15001_v45  ;;  %16016 = vst [vmem:[#allocation38_spill] sm:$0xff] %v15005_v9  ;;  %8652 = vmatmul.mubr.bf16.gmra.mrb[24].mxu0 %v9646_v26  ;;  %v15015_v46 = vpop.f32.mrb[156].mxu1  ;;  %v15017_v63 = vpop.f32.mrb[191].mxu0  ;;  %v6006_v3 = vrot.slane %v6004_v56, 5  ;;  %v6205_v18 = vrot.slane %v6203_v52, 4  ;;  %v15021_v23 = vadd.f32 %v14860_v24, %v14851_v40  ;;  %v6015_v10 = vor.u32 %v6014_v53, %v6011_v22 }
 0x3ca   : > { %16017 = vst [vmem:[#allocation39_spill] sm:$0xff] %v15011_v50  ;;  %v6206_v49 = vrot.slane %v5647_v62, 5  ;;  %v15023_v17 = vpop.f32.mrb[157].mxu1  ;;  %v6002_v32 = vrot.slane %v6001_v36, 4  ;;  %v6018_v2 = vshll.u32 %v14941_v30, 16  ;;  %v16019_v38 = vshrl.u32 %v14941_v30, 16 }
 0x3cb   : > { %16018 = vst [vmem:[#allocation40_spill] sm:$0xff] %v15021_v23  ;;  %v15028_v11 = vpop.f32.mrb[158].mxu1  ;;  %v6204_v37 = vsel %vm11642_vm5, %v9519_v15, %v6203_v52  ;;  %v6028_v21 = vshll.u32 %v5647_v62, 16  ;;  %v15034_v40 = vld [vmem:[#allocation2 + $0xd0] sm:$0xf]  ;;  %v6618_v24 = vshrl.u32 %v15013_v20, 16  ;;  %v5997_v22 = vsel %vm11631_vm4, %v5992_v35, %v5996_v28 }
 0x3cc   : > { %v6024_v51 = vrot.slane %v16019_v38, 4  ;;  %v6207_v57 = vsel %vm11642_vm5, %v6205_v18, %v6206_v49  ;;  %v15037_v14 = vpop.f32.mrb[159].mxu1  ;;  %v6007_v30 = vsel %vm11631_vm4, %v6002_v32, %v6006_v3  ;;  %v6020_v26 = vrot.slane %v6018_v2, 5  ;;  %v6256_v56 = vld [vmem:[#allocation2 + $0xd4] sm:$0x1] }
 0x3cd   : > { %v9631_v53 = vcombine.low %v6204_v37, %v6207_v57  ;;  %v6656_v52 = vld [vmem:[#allocation2 + $0xcc] sm:$0xe]  ;;  %v9614_v36 = vcombine.low %v5997_v22, %v6007_v30  ;;  %v6016_v15 = vrot.slane %v6015_v10, 4  ;;  %v6620_v18 = vrot.slane %v6618_v24, 4  ;;  %v6641_v35 = vld [vmem:[#allocation2 + $0x18] sm:$0xe] }
 0x3ce   : > { %v6621_v62 = vshll.u32 %v15013_v20, 16  ;;  %v15044_v49 = vpop.f32.mrb[192].mxu0  ;;  %v6025_v38 = vor.u32 %v6024_v51, %v6020_v26  ;;  %v6030_v50 = vrot.slane %v6028_v21, 5  ;;  %v6627_v45 = vshll.u32 %v15034_v40, 16 }
 0x3cf   : > { %v6631_v28 = vshrl.u32 %v15034_v40, 16  ;;  %v15048_v61 = vpop.f32.mrb[193].mxu0  ;;  %8491 = vmatmul.mubr.bf16.gmra.mrb[248].mxu1 %v9614_v36  ;;  %v6637_v32 = vshll.u32 %v6256_v56, 16  ;;  %v9535_v2 = vrot.slane %v6656_v52, 9  ;;  %v6812_v10 = vrot.slane %v15034_v40, 5 }
 0x3d0   : > { %v6623_v3 = vrot.slane %v6621_v62, 5  ;;  %v15051_v37 = vpop.f32.mrb[194].mxu0  ;;  %8498 = vmatprep.mubr.bf16.mxu1 %v9631_v53  ;;  %v6026_v57 = vrot.slane %v6025_v38, 4  ;;  %v6629_v24 = vrot.slane %v6627_v45, 5  ;;  %v6815_v21 = vrot.slane %v6256_v56, 5 }
 0x3d1   : > { %v6633_v51 = vrot.slane %v6631_v28, 4  ;;  %v15053_v22 = vpop.f32.mrb[160].mxu1  ;;  %v15055_v30 = vpop.f32.mrb[195].mxu0  ;;  %v15059_v36 = vsel %vm11642_vm5, %v9535_v2, %v6812_v10  ;;  %v6814_v62 = vrot.slane %v6812_v10, 4  ;;  %v6021_v39 = vsel %vm11631_vm4, %v6016_v15, %v6020_v26  ;;  %v11257_v2 = vld [vmem:[#allocation2 + $0x1c] sm:$0xf] }
 0x3d2   : > { %v6624_v29 = vor.u32 %v6623_v3, %v6620_v18  ;;  %v15061_v52 = vpop.f32.mrb[161].mxu1  ;;  %v6031_v45 = vsel %vm11631_vm4, %v6026_v57, %v6030_v50  ;;  %v6639_v56 = vrot.slane %v6637_v32, 5  ;;  %v9520_v3 = vrot.slane %v6641_v35, 9  ;;  %v11258_v32 = vld [vmem:[#allocation2 + $0x20] sm:$0x1] }
 0x3d3   : > { %v6634_v53 = vor.u32 %v6633_v51, %v6629_v24  ;;  %v15067_v38 = vpop.f32.mrb[162].mxu1  ;;  %v15071_v18 = vsel %vm11642_vm5, %v6814_v62, %v6815_v21  ;;  %v6707_v10 = vrot.slane %v11257_v2, 5  ;;  %v9615_v9 = vcombine.low %v6021_v39, %v6031_v45 }
 0x3d4   : > { %v6625_v28 = vrot.slane %v6624_v29, 4  ;;  %v15073_v23 = vpop.f32.mrb[163].mxu1  ;;  %v9679_v26 = vcombine.low %v15059_v36, %v15071_v18  ;;  %v15079_v50 = vadd.f32 %v14878_v34, %v14875_v12  ;;  %v6710_v57 = vrot.slane %v11258_v32, 5 }
 0x3d5   : > { %v6635_v47 = vrot.slane %v6634_v53, 4  ;;  %v6709_v15 = vrot.slane %v6707_v10, 4  ;;  %v15085_v35 = vadd.f32 %v14920_v8, %v14906_v55  ;;  %v9647_v21 = vcombine.low %v15013_v20, %v15034_v40  ;;  %v6643_v8 = vld [vmem:[#allocation2 + $0x30] sm:$0xe] }
 0x3d6   : > { %v6630_v29 = vsel %vm11631_vm4, %v6625_v28, %v6629_v24  ;;  %v10446_v51 = vpop.f32.mrb[196].mxu0  ;;  %v15093_v12 = vadd.f32 %v14908_v19, %v14892_v58  ;;  %v15097_v34 = vadd.f32 %v14934_v41, %v14928_v54  ;;  %v6708_v55 = vsel %vm11642_vm5, %v9520_v3, %v6707_v10 }
 0x3d7   : > { %v6640_v39 = vsel %vm11631_vm4, %v6635_v47, %v6639_v56  ;;  %v10447_v24 = vpop.f32.mrb[197].mxu0  ;;  %8499 = vmatmul.mubr.bf16.gmra.mrb[252].mxu1 %v9615_v9  ;;  %v6711_v16 = vsel %vm11642_vm5, %v6709_v15, %v6710_v57  ;;  %v11259_v47 = vld [vmem:[#allocation2 + $0x34] sm:$0xf]  ;;  %v15105_v58 = vadd.f32 %v14944_v60, %v14939_v42  ;;  %v11260_v9 = vld [vmem:[#allocation2 + $0x38] sm:$0x1]  ;;  %v15109_v56 = vadd.f32 %v14966_v33, %v14950_v43 }
 0x3d8   : > { %v9663_v62 = vcombine.low %v6630_v29, %v6640_v39  ;;  %v6721_v20 = vrot.slane %v11259_v47, 5  ;;  %v10449_v40 = vpop.f32.mrb[198].mxu0  ;;  %v9664_v45 = vcombine.low %v6708_v55, %v6711_v16  ;;  %v6724_v53 = vrot.slane %v11260_v9, 5  ;;  %v11261_v29 = vld [vmem:[#allocation2 + $0x4c] sm:$0xf] }
 0x3d9   : > { %v10334_v19 = vpop.f32.mrb[164].mxu1  ;;  %v10450_v54 = vpop.f32.mrb[199].mxu0  ;;  %v15113_v28 = vadd.f32 %v14952_v31, %v14948_v4  ;;  %v9522_v2 = vrot.slane %v6643_v8, 9  ;;  %v15117_v42 = vadd.f32 %v14980_v7, %v14970_v5  ;;  %v6735_v15 = vrot.slane %v11261_v29, 5  ;;  %v11262_v39 = vld [vmem:[#allocation2 + $0x64] sm:$0xf] }
 0x3da   : > { %8659 = vmatprep.mubr.bf16.mxu0 %v9663_v62  ;;  %v6723_v41 = vrot.slane %v6721_v20, 4  ;;  %v10335_v3 = vpop.f32.mrb[165].mxu1  ;;  %10800 = vmatprep.mubr.bf16.mxu1 %v9664_v45  ;;  %v15123_v43 = vadd.f32 %v14996_v48, %v14992_v27  ;;  %v10324_v4 = vadd.f32 %v15023_v17, %v15015_v46  ;;  %v15131_v5 = vadd.f32 %v15017_v63, %v15007_v59  ;;  %v6645_v62 = vld [vmem:[#allocation2 + $0x48] sm:$0xe]  ;;  %v11263_v16 = vld [vmem:[#allocation2 + $0x50] sm:$0x1] }
 0x3db   : > { %8660 = vmatmul.mubr.bf16.gmra.mrb[28].mxu0 %v9647_v21  ;;  %v10337_v60 = vpop.f32.mrb[166].mxu1  ;;  %v6722_v33 = vsel %vm11642_vm5, %v9522_v2, %v6721_v20  ;;  %v10327_v7 = vadd.f32 %v15037_v14, %v15028_v11  ;;  %v6749_v21 = vrot.slane %v11262_v39, 5  ;;  %v15137_v27 = vadd.f32 %v15048_v61, %v15044_v49  ;;  %v16021_v61 = vld [vmem:[#allocation15_spill] sm:$0xff]  ;;  %v16024_v45 = vld [vmem:[#allocation37_spill] sm:$0xff]  ;;  %v16025_v2 = vld [vmem:[#allocation38_spill] sm:$0xff] }
 0x3dc   : > { %v6725_v10 = vsel %vm11642_vm5, %v6723_v41, %v6724_v53  ;;  %v10338_v31 = vpop.f32.mrb[167].mxu1  ;;  %v16020_v46 = vcombine.low %v14366_v25, %v14376_v44  ;;  %v6737_v17 = vrot.slane %v6735_v15, 4  ;;  %v10330_v59 = vadd.f32 %v15061_v52, %v15053_v22  ;;  %v16022_v25 = vld [vmem:[#allocation19_spill] sm:$0xff]  ;;  %v16023_v52 = vld [vmem:[#allocation18_spill] sm:$0xff] }
 0x3dd   : > { %v9666_v57 = vcombine.low %v6722_v33, %v6725_v10  ;;  %v15146_v63 = vadd.f32 %v15055_v30, %v15051_v37  ;;  %v15150_v14 = vadd.f32 %v14811_v13, %v14735_v6  ;;  %v15154_v49 = vadd.f32 %v16021_v61, %v14735_v6  ;;  %v15192_v61 = vld [vmem:[#allocation2 + $0x7c] sm:$0xf] }
 0x3de   : > { %v10452_v32 = vpop.f32.mrb[200].mxu0  ;;  %v15158_v44 = vadd.f32 %v16022_v25, %v14735_v6  ;;  %v10333_v22 = vadd.f32 %v15073_v23, %v15067_v38  ;;  %v15164_v55 = vadd.f32 %v16023_v52, %v14735_v6  ;;  %v15168_v13 = vadd.f32 %v14960_v1, %v14735_v6 }
 0x3df   : > { %v10453_v48 = vpop.f32.mrb[201].mxu0  ;;  %10801 = vmatmul.mubr.bf16.vlgmr.msra.gmra.mrb[0].mxu1 %v16020_v46  ;;  %v6738_v8 = vrot.slane %v11263_v16, 5  ;;  %v15170_v47 = vadd.f32 %v10447_v24, %v10446_v51  ;;  %v15174_v41 = vadd.f32 %v16024_v45, %v14735_v6  ;;  %v6751_v23 = vrot.slane %v6749_v21, 4  ;;  %v6647_v51 = vld [vmem:[#allocation2 + $0x60] sm:$0xe]  ;;  %v16027_v45 = vld [vmem:[#allocation28_spill] sm:$0xff] }
 0x3e0   : > { %v10455_v11 = vpop.f32.mrb[202].mxu0  ;;  %10804 = vmatprep.mubr.bf16.mxu1 %v9666_v57  ;;  %v10336_v38 = vadd.f32 %v10335_v3, %v10334_v19  ;;  %v15176_v9 = vadd.f32 %v10450_v54, %v10449_v40  ;;  %v15180_v10 = vadd.f32 %v16025_v2, %v14735_v6  ;;  %v9524_v1 = vrot.slane %v6645_v62, 9  ;;  %v16026_v57 = vld [vmem:[#allocation40_spill] sm:$0xff]  ;;  %v11264_v54 = vld [vmem:[#allocation2 + $0x68] sm:$0x1]  ;;  %v16028_v2 = vld [vmem:[#allocation29_spill] sm:$0xff] }
 0x3e1   : > { %v10340_v37 = vpop.f32.mrb[168].mxu1  ;;  %v10456_v30 = vpop.f32.mrb[203].mxu0  ;;  %v6739_v29 = vsel %vm11642_vm5, %v6737_v17, %v6738_v8  ;;  %v10339_v24 = vadd.f32 %v10338_v31, %v10337_v60  ;;  %v8094_v39 = vadd.f32 %v16026_v57, %v14735_v6  ;;  %v8099_v19 = vadd.f32 %v15085_v35, %v14735_v6 }
 0x3e2   : > { %v10341_v20 = vpop.f32.mrb[169].mxu1  ;;  %v8102_v40 = vadd.f32 %v15097_v34, %v14735_v6  ;;  %v6752_v3 = vrot.slane %v11264_v54, 5  ;;  %v6736_v46 = vsel %vm11642_vm5, %v9524_v1, %v6735_v15  ;;  %v6763_v17 = vrot.slane %v15192_v61, 5  ;;  %v6655_v54 = vld [vmem:[#allocation2 + $0xc0] sm:$0xe] }
 0x3e3   : > { %v10343_v53 = vpop.f32.mrb[170].mxu1  ;;  %v15195_v60 = vadd.f32 %v10453_v48, %v10452_v32  ;;  %v10342_v31 = vadd.f32 %v10341_v20, %v10340_v37  ;;  %v9668_v62 = vcombine.low %v6736_v46, %v6739_v29  ;;  %v9526_v52 = vrot.slane %v6647_v51, 9  ;;  %v16030_v46 = vld [vmem:[#allocation36_spill] sm:$0xff] }
 0x3e4   : > { %v10344_v33 = vpop.f32.mrb[171].mxu1  ;;  %v6753_v35 = vsel %vm11642_vm5, %v6751_v23, %v6752_v3  ;;  %v15199_v16 = vadd.f32 %v10456_v30, %v10455_v11  ;;  %v8107_v8 = vadd.f32 %v15109_v56, %v14735_v6  ;;  %v8110_v15 = vadd.f32 %v15117_v42, %v14735_v6 }
 0x3e5   : > { %v16029_v32 = vcombine.low %v16027_v45, %v16028_v2  ;;  %v8115_v48 = vadd.f32 %v10324_v4, %v14735_v6  ;;  %v10345_v37 = vadd.f32 %v10344_v33, %v10343_v53  ;;  %v8118_v23 = vadd.f32 %v10327_v7, %v14735_v6  ;;  %v11266_v53 = vld [vmem:[#allocation2 + $0x80] sm:$0x1] }
 0x3e6   : > { %v10458_v25 = vpop.f32.mrb[204].mxu0  ;;  %v6750_v11 = vsel %vm11642_vm5, %v9526_v52, %v6749_v21  ;;  %v8123_v30 = vadd.f32 %v10330_v59, %v14735_v6  ;;  %v8126_v51 = vadd.f32 %v10333_v22, %v14735_v6  ;;  %v6765_v4 = vrot.slane %v6763_v17, 4  ;;  %v16031_v22 = vld [vmem:[#allocation26_spill] sm:$0xff] }
 0x3e7   : > { %v10459_v34 = vpop.f32.mrb[205].mxu0  ;;  %10805 = vmatmul.mubr.bf16.gmra.mrb[4].mxu1 %v16029_v32  ;;  %v9670_v29 = vcombine.low %v6750_v11, %v6753_v35  ;;  %v6766_v33 = vrot.slane %v11266_v53, 5  ;;  %v8131_v7 = vadd.f32 %v10336_v38, %v14735_v6  ;;  %v15227_v35 = vadd.f32 %v16031_v22, %v15150_v14  ;;  %v16033_v38 = vld [vmem:[#allocation9_spill] sm:$0xff]  ;;  %v16035_v14 = vld [vmem:[#allocation10_spill] sm:$0xff] }
 0x3e8   : > { %v10461_v20 = vpop.f32.mrb[206].mxu0  ;;  %10808 = vmatprep.mubr.bf16.mxu1 %v9668_v62  ;;  %v15213_v1 = vadd.f32 %v10459_v34, %v10458_v25  ;;  %v6805_v25 = vrot.slane %v16030_v46, 5  ;;  %v8134_v62 = vadd.f32 %v10339_v24, %v14735_v6  ;;  %v16032_v34 = vld [vmem:[#allocation27_spill] sm:$0xff]  ;;  %v15235_v2 = vadd.f32 %v16033_v38, %v15158_v44  ;;  %v16037_v44 = vld [vmem:[#allocation14_spill] sm:$0xff] }
 0x3e9   : > { %v10346_v56 = vpop.f32.mrb[172].mxu1  ;;  %v10462_v42 = vpop.f32.mrb[207].mxu0  ;;  %v15231_v45 = vadd.f32 %v16032_v34, %v15154_v49  ;;  %v8139_v32 = vadd.f32 %v10342_v31, %v14735_v6  ;;  %v9534_v11 = vrot.slane %v6655_v54, 9  ;;  %v16036_v49 = vld [vmem:[#allocation21_spill] sm:$0xff]  ;;  %v15251_v22 = vadd.f32 %v16037_v44, %v15174_v41  ;;  %v16039_v34 = vld [vmem:[#allocation39_spill] sm:$0xff] }
 0x3ea   : > { %v10347_v57 = vpop.f32.mrb[173].mxu1  ;;  %v15221_v59 = vadd.f32 %v10462_v42, %v10461_v20  ;;  %v6807_v42 = vrot.slane %v6805_v25, 4  ;;  %v15247_v46 = vadd.f32 %v16036_v49, %v15168_v13  ;;  %v15265_v38 = vadd.f32 %v15079_v50, %v8099_v19  ;;  %v16040_v13 = vld [vmem:[#allocation30_spill] sm:$0xff]  ;;  %v6649_v50 = vld [vmem:[#allocation2 + $0x78] sm:$0xe] }
 0x3eb   : > { %v15219_v3 = vadd.f32 %v10347_v57, %v10346_v56  ;;  %v10349_v21 = vpop.f32.mrb[174].mxu1  ;;  %v16034_v56 = vld [vmem:[#allocation16_spill] sm:$0xff]  ;;  %v15243_v57 = vadd.f32 %v16035_v14, %v15164_v55  ;;  %v15255_v31 = vsel %vm11642_vm5, %v9534_v11, %v6805_v25  ;;  %v15262_v55 = vadd.f32 %v16039_v34, %v8094_v39 }
 0x3ec   : > { %v10350_v52 = vpop.f32.mrb[175].mxu1  ;;  %v6808_v24 = vrot.slane %v16034_v56, 5  ;;  %v16041_v56 = vld [vmem:[#allocation31_spill] sm:$0xff]  ;;  %v15280_v39 = vadd.f32 %v15105_v58, %v8107_v8  ;;  %v15296_v58 = vadd.f32 %v15137_v27, %v8123_v30  ;;  %v15299_v8 = vadd.f32 %v15146_v63, %v8126_v51  ;;  %v11267_v63 = vld [vmem:[#allocation2 + $0x94] sm:$0xf] }
 0x3ed   : > { %v15238_v20 = vadd.f32 %v10350_v52, %v10349_v21  ;;  %v16038_v21 = vld [vmem:[#allocation22_spill] sm:$0xff]  ;;  %v16042_v14 = vcombine.low %v16040_v13, %v16041_v56  ;;  %v6767_v27 = vsel %vm11642_vm5, %v6765_v4, %v6766_v33  ;;  %v6777_v30 = vrot.slane %v11267_v63, 5  ;;  %v6651_v13 = vld [vmem:[#allocation2 + $0x90] sm:$0xe] }
 0x3ee   : > { %v10464_v53 = vpop.f32.mrb[208].mxu0  ;;  %v15259_v52 = vadd.f32 %v16038_v21, %v15180_v10  ;;  %v15272_v41 = vsel %vm11642_vm5, %v6807_v42, %v6808_v24  ;;  %v15277_v10 = vadd.f32 %v15093_v12, %v8102_v40  ;;  %v15285_v21 = vadd.f32 %v15113_v28, %v8110_v15 }
 0x3ef   : > { %v10465_v54 = vpop.f32.mrb[209].mxu0  ;;  %10809 = vmatmul.mubr.bf16.gmra.mrb[8].mxu1 %v16042_v14  ;;  %v9678_v19 = vcombine.low %v15255_v31, %v15272_v41  ;;  %v15288_v24 = vadd.f32 %v15123_v43, %v8115_v48  ;;  %v15291_v42 = vadd.f32 %v15131_v5, %v8118_v23  ;;  %v8142_v28 = vadd.f32 %v10345_v37, %v14735_v6  ;;  %v11268_v14 = vld [vmem:[#allocation2 + $0x98] sm:$0x1] }
 0x3f0   : > { %v15274_v25 = vadd.f32 %v10465_v54, %v10464_v53  ;;  %v10467_v11 = vpop.f32.mrb[210].mxu0  ;;  %10812 = vmatprep.mubr.bf16.mxu1 %v9670_v29  ;;  %v15302_v29 = vadd.f32 %v15170_v47, %v8131_v7  ;;  %v15308_v5 = vadd.f32 %v15176_v9, %v8134_v62  ;;  %v15311_v48 = vadd.f32 %v15195_v60, %v8139_v32  ;;  %v16043_v32 = vld [vmem:[#allocation32_spill] sm:$0xff]  ;;  %v16044_v53 = vld [vmem:[#allocation33_spill] sm:$0xff] }
 0x3f1   : > { %v10352_v49 = vpop.f32.mrb[176].mxu1  ;;  %v10468_v44 = vpop.f32.mrb[211].mxu0  ;;  %v9528_v23 = vrot.slane %v6649_v50, 9  ;;  %v15322_v60 = vadd.f32 %v15199_v16, %v8142_v28  ;;  %v16045_v54 = vcombine.low %v16043_v32, %v16044_v53  ;;  %v6779_v4 = vrot.slane %v6777_v30, 4  ;;  %v16046_v28 = vld [vmem:[#allocation13_spill] sm:$0xff]  ;;  %v16048_v32 = vld [vmem:[#allocation35_spill] sm:$0xff] }
 0x3f2   : > { %v10353_v12 = vpop.f32.mrb[177].mxu1  ;;  %v15293_v40 = vadd.f32 %v10468_v44, %v10467_v11  ;;  %v9530_v44 = vrot.slane %v6651_v13, 9  ;;  %v6653_v13 = vld [vmem:[#allocation2 + $0xa8] sm:$0xe] }
 0x3f3   : > { %v15305_v15 = vadd.f32 %v10353_v12, %v10352_v49  ;;  %v10355_v43 = vpop.f32.mrb[178].mxu1  ;;  %v6764_v37 = vsel %vm11642_vm5, %v9528_v23, %v6763_v17  ;;  %v6780_v17 = vrot.slane %v11268_v14, 5  ;;  %v16050_v14 = vld [vmem:[#allocation20_spill] sm:$0xff] }
 0x3f4   : > { %v10356_v51 = vpop.f32.mrb[179].mxu1  ;;  %v9672_v9 = vcombine.low %v6764_v37, %v6767_v27  ;;  %v8147_v27 = vadd.f32 %v15219_v3, %v14735_v6  ;;  %v8150_v3 = vadd.f32 %v15238_v20, %v14735_v6 }
 0x3f5   : > { %v15315_v47 = vadd.f32 %v10356_v51, %v10355_v43  ;;  %v6781_v12 = vsel %vm11642_vm5, %v6779_v4, %v6780_v17  ;;  %v6791_v43 = vrot.slane %v16046_v28, 5  ;;  %v6778_v51 = vsel %vm11642_vm5, %v9530_v44, %v6777_v30 }
 0x3f6   : > { %v10470_v7 = vpop.f32.mrb[212].mxu0  ;;  %v15350_v30 = vadd.f32 %v15213_v1, %v8147_v27  ;;  %v6794_v17 = vrot.slane %v16050_v14, 5  ;;  %v9532_v28 = vrot.slane %v6653_v13, 9  ;;  %v15360_v6 = vadd.f32 %v15221_v59, %v8150_v3 }
 0x3f7   : > { %v10471_v62 = vpop.f32.mrb[213].mxu0  ;;  %10813 = vmatmul.mubr.bf16.gmra.mrb[12].mxu1 %v16045_v54  ;;  %v6793_v54 = vrot.slane %v6791_v43, 4 }
 0x3f8   : > { %v15327_v33 = vadd.f32 %v10471_v62, %v10470_v7  ;;  %v10473_v34 = vpop.f32.mrb[214].mxu0  ;;  %10816 = vmatprep.mubr.bf16.mxu1 %v9672_v9  ;;  %v9674_v7 = vcombine.low %v6778_v51, %v6781_v12  ;;  %v16047_v62 = vld [vmem:[#allocation34_spill] sm:$0xff]  ;;  %v6792_v1 = vsel %vm11642_vm5, %v9532_v28, %v6791_v43 }
 0x3f9   : > { %v10358_v61 = vpop.f32.mrb[180].mxu1  ;;  %v10474_v56 = vpop.f32.mrb[215].mxu0  ;;  %v16049_v53 = vcombine.low %v16047_v62, %v16048_v32  ;;  %v16052_v62 = vld [vmem:[#allocation12_spill] sm:$0xff] }
 0x3fa   : > { %v10359_v11 = vpop.f32.mrb[181].mxu1  ;;  %v15329_v50 = vadd.f32 %v10474_v56, %v10473_v34 }
 0x3fb   : > { %v15331_v49 = vadd.f32 %v10359_v11, %v10358_v61  ;;  %v10361_v16 = vpop.f32.mrb[182].mxu1 }
 0x3fc   : > { %v10362_v23 = vpop.f32.mrb[183].mxu1 }
 0x3fd   : > { %v15338_v63 = vadd.f32 %v10362_v23, %v10361_v16  ;;  %v6795_v23 = vsel %vm11642_vm5, %v6793_v54, %v6794_v17 }
 0x3fe   : > { %v10476_v37 = vpop.f32.mrb[216].mxu0  ;;  %v9676_v27 = vcombine.low %v6792_v1, %v6795_v23  ;;  %v16054_v23 = vld [vmem:[#allocation11_spill] sm:$0xff] }
 0x3ff   : > { %v10477_v9 = vpop.f32.mrb[217].mxu0  ;;  %10817 = vmatmul.mubr.bf16.gmra.mrb[16].mxu1 %v16049_v53  ;;  %v15370_v53 = vld [vmem:[%s15792_s4] ss:$0 sm:$0xff] }
 0x400   : > { %v15345_v4 = vadd.f32 %v10477_v9, %v10476_v37  ;;  %v10479_v34 = vpop.f32.mrb[218].mxu0  ;;  %10820 = vmatprep.mubr.bf16.mxu1 %v9674_v7  ;;  %v16051_v9 = vld [vmem:[#allocation24_spill] sm:$0xff]  ;;  %v8155_v54 = vadd.f32 %v15370_v53, %v15305_v15  ;;  %v8158_v14 = vadd.f32 %v15370_v53, %v15315_v47 }
 0x401   : > { %v10364_v61 = vpop.f32.mrb[184].mxu1  ;;  %v10480_v56 = vpop.f32.mrb[219].mxu0  ;;  %v16053_v32 = vcombine.low %v16051_v9, %v16052_v62 }
 0x402   : > { %v10365_v11 = vpop.f32.mrb[185].mxu1  ;;  %v15353_v16 = vadd.f32 %v10480_v56, %v10479_v34 }
 0x403   : > { %v10366_v44 = vadd.f32 %v10365_v11, %v10364_v61  ;;  %v10367_v12 = vpop.f32.mrb[186].mxu1  ;;  %v15381_v11 = vadd.f32 %v15274_v25, %v8155_v54 }
 0x404   : > { %v10368_v51 = vpop.f32.mrb[187].mxu1 }
 0x405   : > { %v15357_v37 = vadd.f32 %v10368_v51, %v10367_v12  ;;  %v16055_v51 = vld [vmem:[#allocation23_spill] sm:$0xff]  ;;  %v8171_v18 = vadd.f32 %v15370_v53, %v10366_v44 }
 0x406   : > { %v10482_v20 = vpop.f32.mrb[220].mxu0  ;;  %v16056_v1 = vcombine.low %v16054_v23, %v16055_v51 }
 0x407   : > { %v10483_v7 = vpop.f32.mrb[221].mxu0  ;;  %10821 = vmatmul.mubr.bf16.gmra.mrb[20].mxu1 %v16053_v32 }
 0x408   : > { %v15374_v59 = vadd.f32 %v10483_v7, %v10482_v20  ;;  %v10485_v34 = vpop.f32.mrb[222].mxu0  ;;  %10824 = vmatprep.mubr.bf16.mxu1 %v9676_v27  ;;  %v15389_v7 = vadd.f32 %v15293_v40, %v8158_v14  ;;  %v16058_v14 = vld [vmem:[#allocation25_spill] sm:$0xff] }
 0x409   : > { %v10370_v0 = vpop.f32.mrb[188].mxu1  ;;  %v10486_v43 = vpop.f32.mrb[223].mxu0 }
 0x40a   : > { %v10371_v13 = vpop.f32.mrb[189].mxu1  ;;  %v15376_v3 = vadd.f32 %v10486_v43, %v10485_v34  ;;  %v16057_v43 = vld [vmem:[#allocation17_spill] sm:$0xff] }
 0x40b   : > { %v10372_v61 = vadd.f32 %v10371_v13, %v10370_v0  ;;  %v10373_v56 = vpop.f32.mrb[190].mxu1  ;;  %v8163_v0 = vadd.f32 %v15370_v53, %v15331_v49 }
 0x40c   : > { %v10374_v17 = vpop.f32.mrb[191].mxu1 }
 0x40d   : > { %v10375_v12 = vadd.f32 %v10374_v17, %v10373_v56  ;;  %v15408_v49 = vadd.f32 %v15327_v33, %v8163_v0  ;;  %v8179_v44 = vadd.f32 %v15370_v53, %v10372_v61 }
 0x40e   : > { %v10616_v15 = vpop.f32.mrb[224].mxu0 }
 0x40f   : > { %v10617_v28 = vpop.f32.mrb[225].mxu0  ;;  %10825 = vmatmul.mubr.bf16.gmra.mrb[24].mxu1 %v16056_v1 }
 0x410   : > { %v15386_v20 = vadd.f32 %v10617_v28, %v10616_v15  ;;  %v10619_v27 = vpop.f32.mrb[226].mxu0  ;;  %10828 = vmatprep.mubr.bf16.mxu1 %v9678_v19  ;;  %v8166_v15 = vadd.f32 %v15370_v53, %v15338_v63 }
 0x411   : > { %v10504_v47 = vpop.f32.mrb[192].mxu1  ;;  %v10620_v25 = vpop.f32.mrb[227].mxu0 }
 0x412   : > { %v10505_v9 = vpop.f32.mrb[193].mxu1  ;;  %v15394_v62 = vadd.f32 %v10620_v25, %v10619_v27  ;;  %v15412_v36 = vadd.f32 %v15329_v50, %v8166_v15 }
 0x413   : > { %v10506_v32 = vadd.f32 %v10505_v9, %v10504_v47  ;;  %v10507_v54 = vpop.f32.mrb[194].mxu1 }
 0x414   : > { %v10508_v34 = vpop.f32.mrb[195].mxu1 }
 0x415   : > { %v8381_v13 = vadd.f32 %v10506_v32, %v16057_v43  ;;  %v10509_v56 = vadd.f32 %v10508_v34, %v10507_v54  ;;  %v8174_v43 = vadd.f32 %v15370_v53, %v15357_v37 }
 0x416   : > { %v10622_v40 = vpop.f32.mrb[228].mxu0 }
 0x417   : > { %v15400_v17 = vadd.f32 %v10509_v56, %v16058_v14  ;;  %v10623_v31 = vpop.f32.mrb[229].mxu0  ;;  %10829 = vmatmul.mubr.bf16.gmra.mrb[28].mxu1 %v9679_v26 }
 0x418   : > { %v10624_v41 = vadd.f32 %v10623_v31, %v10622_v40  ;;  %v10625_v19 = vpop.f32.mrb[230].mxu0 }
 0x419   : > { %v10510_v28 = vpop.f32.mrb[196].mxu1  ;;  %v10626_v23 = vpop.f32.mrb[231].mxu0 }
 0x41a   : > { %v10511_v51 = vpop.f32.mrb[197].mxu1  ;;  %v10627_v1 = vadd.f32 %v10626_v23, %v10625_v19  ;;  %v15424_v23 = vadd.f32 %v15353_v16, %v8174_v43 }
 0x41b   : > { %v10512_v27 = vadd.f32 %v10511_v51, %v10510_v28  ;;  %v10513_v47 = vpop.f32.mrb[198].mxu1 }
 0x41c   : > { %v10514_v25 = vpop.f32.mrb[199].mxu1 }
 0x41d   : > { %v8389_v9 = vadd.f32 %v10512_v27, %v15227_v35  ;;  %v10515_v32 = vadd.f32 %v10514_v25, %v10513_v47  ;;  %v15419_v35 = vadd.f32 %v15345_v4, %v8171_v18  ;;  %v8182_v25 = vadd.f32 %v15370_v53, %v10375_v12 }
 0x41e   : > { %v10628_v63 = vpop.f32.mrb[232].mxu0  ;;  %v15429_v18 = vadd.f32 %v15374_v59, %v8179_v44 }
 0x41f   : > { %v8392_v26 = vadd.f32 %v10515_v32, %v15231_v45  ;;  %v10629_v54 = vpop.f32.mrb[233].mxu0 }
 0x420   : > { %v10630_v34 = vadd.f32 %v10629_v54, %v10628_v63  ;;  %v10631_v33 = vpop.f32.mrb[234].mxu0 }
 0x421   : > { %v10632_v0 = vpop.f32.mrb[235].mxu0  ;;  %v10516_v56 = vpop.f32.mrb[200].mxu1 }
 0x422   : > { %v10633_v40 = vadd.f32 %v10632_v0, %v10631_v33  ;;  %v10517_v14 = vpop.f32.mrb[201].mxu1 }
 0x423   : > { %v10518_v50 = vadd.f32 %v10517_v14, %v10516_v56  ;;  %v10519_v31 = vpop.f32.mrb[202].mxu1  ;;  %v15435_v56 = vadd.f32 %v10624_v41, %v8389_v9 }
 0x424   : > { %v10520_v19 = vpop.f32.mrb[203].mxu1 }
 0x425   : > { %v8397_v45 = vadd.f32 %v10518_v50, %v15235_v2  ;;  %v10521_v15 = vadd.f32 %v10520_v19, %v10519_v31  ;;  %v15432_v2 = vadd.f32 %v15376_v3, %v8182_v25  ;;  %v15439_v50 = vadd.f32 %v15386_v20, %v8381_v13 }
 0x426   : > { %v10634_v28 = vpop.f32.mrb[236].mxu0  ;;  %v15441_v3 = vadd.f32 %v10627_v1, %v8392_v26 }
 0x427   : > { %v10635_v51 = vpop.f32.mrb[237].mxu0  ;;  %v8400_v37 = vadd.f32 %v10521_v15, %v15243_v57  ;;  %v15451_v1 = vadd.f32 %v10630_v34, %v8397_v45 }
 0x428   : > { %v10636_v27 = vadd.f32 %v10635_v51, %v10634_v28  ;;  %v10637_v47 = vpop.f32.mrb[238].mxu0 }
 0x429   : > { %v10638_v4 = vpop.f32.mrb[239].mxu0 }
 0x42a   : > { %v10639_v32 = vadd.f32 %v10638_v4, %v10637_v47 }
 0x42d   : > { %v10522_v61 = vpop.f32.mrb[204].mxu1 }
 0x42e   : > { %v10523_v63 = vpop.f32.mrb[205].mxu1 }
 0x42f   : > { %v10524_v54 = vadd.f32 %v10523_v63, %v10522_v61  ;;  %v10525_v16 = vpop.f32.mrb[206].mxu1 }
 0x430   : > { %v10526_v33 = vpop.f32.mrb[207].mxu1  ;;  %v10640_v43 = vpop.f32.mrb[240].mxu0 }
 0x431   : > { %v8405_v0 = vadd.f32 %v10524_v54, %v15247_v46  ;;  %v10527_v57 = vadd.f32 %v10526_v33, %v10525_v16  ;;  %v10641_v14 = vpop.f32.mrb[241].mxu0  ;;  %v15445_v46 = vadd.f32 %v15394_v62, %v15400_v17  ;;  %v15455_v17 = vadd.f32 %v10633_v40, %v8400_v37 }
 0x432   : > { %v10642_v12 = vadd.f32 %v10641_v14, %v10640_v43  ;;  %v10643_v59 = vpop.f32.mrb[242].mxu0 }
 0x433   : > { %v8408_v53 = vadd.f32 %v10527_v57, %v15251_v22  ;;  %v10644_v31 = vpop.f32.mrb[243].mxu0  ;;  %v15448_v47 = vadd.f32 %v10636_v27, %v8405_v0 }
 0x434   : > { %v10645_v44 = vadd.f32 %v10644_v31, %v10643_v59 }
 0x435   : > { %v10528_v19 = vpop.f32.mrb[208].mxu1  ;;  %v15453_v62 = vadd.f32 %v10639_v32, %v8408_v53 }
 0x436   : > { %v10529_v15 = vpop.f32.mrb[209].mxu1 }
 0x437   : > { %v10530_v41 = vadd.f32 %v10529_v15, %v10528_v19  ;;  %v10531_v9 = vpop.f32.mrb[210].mxu1 }
 0x438   : > { %v10532_v28 = vpop.f32.mrb[211].mxu1 }
 0x439   : > { %v8413_v22 = vadd.f32 %v10530_v41, %v15259_v52  ;;  %v10533_v51 = vadd.f32 %v10532_v28, %v10531_v9 }
 0x43a   : > { %v10646_v13 = vpop.f32.mrb[244].mxu0 }
 0x43b   : > { %v8416_v20 = vadd.f32 %v10533_v51, %v15262_v55  ;;  %v10647_v26 = vpop.f32.mrb[245].mxu0  ;;  %v15457_v27 = vadd.f32 %v10642_v12, %v8413_v22 }
 0x43c   : > { %v10648_v4 = vadd.f32 %v10647_v26, %v10646_v13  ;;  %v10649_v25 = vpop.f32.mrb[246].mxu0 }
 0x43d   : > { %v10650_v61 = vpop.f32.mrb[247].mxu0  ;;  %v15460_v57 = vadd.f32 %v10645_v44, %v8416_v20 }
 0x43e   : > { %v10651_v63 = vadd.f32 %v10650_v61, %v10649_v25 }
 0x440   : > { %v10534_v54 = vpop.f32.mrb[212].mxu1 }
 0x441   : > { %v10535_v16 = vpop.f32.mrb[213].mxu1 }
 0x442   : > { %v10536_v52 = vadd.f32 %v10535_v16, %v10534_v54  ;;  %v10537_v33 = vpop.f32.mrb[214].mxu1 }
 0x443   : > { %v10538_v0 = vpop.f32.mrb[215].mxu1 }
 0x444   : > { %v8421_v55 = vadd.f32 %v10536_v52, %v15265_v38  ;;  %v10539_v34 = vadd.f32 %v10538_v0, %v10537_v33 }
 0x445   : > { %v10652_v45 = vpop.f32.mrb[248].mxu0 }
 0x446   : > { %v8424_v43 = vadd.f32 %v10539_v34, %v15277_v10  ;;  %v10653_v32 = vpop.f32.mrb[249].mxu0  ;;  %v15463_v14 = vadd.f32 %v10648_v4, %v8421_v55 }
 0x447   : > { %v10654_v40 = vadd.f32 %v10653_v32, %v10652_v45  ;;  %v10655_v37 = vpop.f32.mrb[250].mxu0 }
 0x448   : > { %v10656_v53 = vpop.f32.mrb[251].mxu0  ;;  %v15465_v59 = vadd.f32 %v10651_v63, %v8424_v43 }
 0x449   : > { %v10540_v31 = vpop.f32.mrb[216].mxu1  ;;  %v10657_v12 = vadd.f32 %v10656_v53, %v10655_v37 }
 0x44a   : > { %v10541_v19 = vpop.f32.mrb[217].mxu1 }
 0x44b   : > { %v10542_v15 = vadd.f32 %v10541_v19, %v10540_v31  ;;  %v10543_v41 = vpop.f32.mrb[218].mxu1 }
 0x44c   : > { %v10544_v38 = vpop.f32.mrb[219].mxu1 }
 0x44d   : > { %v8429_v9 = vadd.f32 %v10542_v15, %v15280_v39  ;;  %v10545_v44 = vadd.f32 %v10544_v38, %v10543_v41 }
 0x44e   : > { %v10658_v10 = vpop.f32.mrb[252].mxu0 }
 0x44f   : > { %v8432_v28 = vadd.f32 %v10545_v44, %v15285_v21  ;;  %v15469_v22 = vadd.f32 %v10654_v40, %v8429_v9  ;;  %v10659_v51 = vpop.f32.mrb[253].mxu0 }
 0x450   : > { %v10660_v20 = vadd.f32 %v10659_v51, %v10658_v10  ;;  %v10661_v13 = vpop.f32.mrb[254].mxu0 }
 0x451   : > { %v15471_v26 = vadd.f32 %v10657_v12, %v8432_v28  ;;  %v10662_v4 = vpop.f32.mrb[255].mxu0 }
 0x452   : > { %v10663_v25 = vadd.f32 %v10662_v4, %v10661_v13 }
 0x455   : > { %v10546_v61 = vpop.f32.mrb[220].mxu1 }
 0x456   : > { %v10547_v63 = vpop.f32.mrb[221].mxu1 }
 0x457   : > { %v10548_v54 = vadd.f32 %v10547_v63, %v10546_v61  ;;  %v10549_v16 = vpop.f32.mrb[222].mxu1 }
 0x458   : > { %v10550_v52 = vpop.f32.mrb[223].mxu1 }
 0x459   : > { %v8437_v39 = vadd.f32 %v10548_v54, %v15288_v24  ;;  %v10551_v33 = vadd.f32 %v10550_v52, %v10549_v16  ;;  %v10664_v0 = vpop.f32.mrb[0].mxu0 }
 0x45a   : > { %v10665_v21 = vpop.f32.mrb[1].mxu0 }
 0x45b   : > { %v8440_v55 = vadd.f32 %v10551_v33, %v15291_v42  ;;  %v10666_v34 = vadd.f32 %v10665_v21, %v10664_v0  ;;  %v10667_v45 = vpop.f32.mrb[2].mxu0  ;;  %v15475_v43 = vadd.f32 %v10660_v20, %v8437_v39 }
 0x45c   : > { %v10668_v32 = vpop.f32.mrb[3].mxu0 }
 0x45d   : > { %v10552_v40 = vpop.f32.mrb[224].mxu1  ;;  %v10669_v37 = vadd.f32 %v10668_v32, %v10667_v45  ;;  %v15477_v53 = vadd.f32 %v10663_v25, %v8440_v55 }
 0x45e   : > { %v10553_v31 = vpop.f32.mrb[225].mxu1 }
 0x45f   : > { %v10554_v12 = vadd.f32 %v10553_v31, %v10552_v40  ;;  %v10555_v19 = vpop.f32.mrb[226].mxu1 }
 0x460   : > { %v10556_v15 = vpop.f32.mrb[227].mxu1 }
 0x461   : > { %v8445_v24 = vadd.f32 %v10554_v12, %v15296_v58  ;;  %v10557_v41 = vadd.f32 %v10556_v15, %v10555_v19 }
 0x463   : > { %v8448_v38 = vadd.f32 %v10557_v41, %v15299_v8  ;;  %v10670_v9 = vpop.f32.mrb[4].mxu0  ;;  %v15481_v42 = vadd.f32 %v10666_v34, %v8445_v24 }
 0x464   : > { %v10671_v44 = vpop.f32.mrb[5].mxu0 }
 0x465   : > { %v10672_v28 = vadd.f32 %v10671_v44, %v10670_v9  ;;  %v10673_v10 = vpop.f32.mrb[6].mxu0  ;;  %v15483_v51 = vadd.f32 %v10669_v37, %v8448_v38 }
 0x466   : > { %v10674_v20 = vpop.f32.mrb[7].mxu0 }
 0x467   : > { %v10675_v13 = vadd.f32 %v10674_v20, %v10673_v10 }
 0x469   : > { %v10558_v4 = vpop.f32.mrb[228].mxu1 }
 0x46a   : > { %v10559_v25 = vpop.f32.mrb[229].mxu1 }
 0x46b   : > { %v10560_v61 = vadd.f32 %v10559_v25, %v10558_v4  ;;  %v10561_v63 = vpop.f32.mrb[230].mxu1 }
 0x46c   : > { %v10562_v54 = vpop.f32.mrb[231].mxu1 }
 0x46d   : > { %v8453_v58 = vadd.f32 %v10560_v61, %v15302_v29  ;;  %v10563_v16 = vadd.f32 %v10562_v54, %v10561_v63  ;;  %v10676_v52 = vpop.f32.mrb[8].mxu0 }
 0x46e   : > { %v10677_v8 = vpop.f32.mrb[9].mxu0 }
 0x46f   : > { %v8456_v39 = vadd.f32 %v10563_v16, %v15308_v5  ;;  %v10678_v33 = vadd.f32 %v10677_v8, %v10676_v52  ;;  %v10679_v0 = vpop.f32.mrb[10].mxu0  ;;  %v15487_v21 = vadd.f32 %v10672_v28, %v8453_v58 }
 0x470   : > { %v10680_v55 = vpop.f32.mrb[11].mxu0 }
 0x471   : > { %v10681_v45 = vadd.f32 %v10680_v55, %v10679_v0  ;;  %v15489_v32 = vadd.f32 %v10675_v13, %v8456_v39 }
 0x473   : > { %v10564_v34 = vpop.f32.mrb[232].mxu1 }
 0x474   : > { %v10565_v40 = vpop.f32.mrb[233].mxu1 }
 0x475   : > { %v10566_v37 = vadd.f32 %v10565_v40, %v10564_v34  ;;  %v10567_v31 = vpop.f32.mrb[234].mxu1 }
 0x476   : > { %v10568_v12 = vpop.f32.mrb[235].mxu1 }
 0x477   : > { %v8461_v29 = vadd.f32 %v10566_v37, %v15311_v48  ;;  %v10569_v19 = vadd.f32 %v10568_v12, %v10567_v31  ;;  %v10682_v24 = vpop.f32.mrb[12].mxu0 }
 0x478   : > { %v10683_v41 = vpop.f32.mrb[13].mxu0 }
 0x479   : > { %v8464_v15 = vadd.f32 %v10569_v19, %v15322_v60  ;;  %v15493_v5 = vadd.f32 %v10678_v33, %v8461_v29  ;;  %v10684_v38 = vadd.f32 %v10683_v41, %v10682_v24  ;;  %v10685_v9 = vpop.f32.mrb[14].mxu0 }
 0x47a   : > { %v10686_v28 = vpop.f32.mrb[15].mxu0 }
 0x47b   : > { %v15495_v44 = vadd.f32 %v10681_v45, %v8464_v15  ;;  %v10687_v10 = vadd.f32 %v10686_v28, %v10685_v9 }
 0x480   : > { %v10570_v20 = vpop.f32.mrb[236].mxu1 }
 0x481   : > { %v10571_v13 = vpop.f32.mrb[237].mxu1 }
 0x482   : > { %v10572_v4 = vadd.f32 %v10571_v13, %v10570_v20  ;;  %v10573_v25 = vpop.f32.mrb[238].mxu1 }
 0x483   : > { %v10574_v61 = vpop.f32.mrb[239].mxu1 }
 0x484   : > { %v8469_v48 = vadd.f32 %v10572_v4, %v15350_v30  ;;  %v10575_v63 = vadd.f32 %v10574_v61, %v10573_v25  ;;  %v10688_v54 = vpop.f32.mrb[16].mxu0 }
 0x485   : > { %v10689_v60 = vpop.f32.mrb[17].mxu0 }
 0x486   : > { %v8472_v58 = vadd.f32 %v10575_v63, %v15360_v6  ;;  %v10690_v16 = vadd.f32 %v10689_v60, %v10688_v54  ;;  %v10691_v52 = vpop.f32.mrb[18].mxu0  ;;  %v15499_v8 = vadd.f32 %v10684_v38, %v8469_v48 }
 0x487   : > { %v10692_v39 = vpop.f32.mrb[19].mxu0 }
 0x488   : > { %v10693_v33 = vadd.f32 %v10692_v39, %v10691_v52  ;;  %v15501_v0 = vadd.f32 %v10687_v10, %v8472_v58 }
 0x48c   : > { %v10576_v55 = vpop.f32.mrb[240].mxu1 }
 0x48d   : > { %v10577_v34 = vpop.f32.mrb[241].mxu1 }
 0x48e   : > { %v10578_v45 = vadd.f32 %v10577_v34, %v10576_v55  ;;  %v10579_v40 = vpop.f32.mrb[242].mxu1 }
 0x48f   : > { %v10580_v37 = vpop.f32.mrb[243].mxu1  ;;  %v10694_v12 = vpop.f32.mrb[20].mxu0 }
 0x490   : > { %v8477_v30 = vadd.f32 %v10578_v45, %v15381_v11  ;;  %v10581_v31 = vadd.f32 %v10580_v37, %v10579_v40  ;;  %v10695_v29 = vpop.f32.mrb[21].mxu0 }
 0x491   : > { %v10696_v19 = vadd.f32 %v10695_v29, %v10694_v12  ;;  %v10697_v15 = vpop.f32.mrb[22].mxu0 }
 0x492   : > { %v8480_v6 = vadd.f32 %v10581_v31, %v15389_v7  ;;  %v15505_v24 = vadd.f32 %v10690_v16, %v8477_v30  ;;  %v10698_v41 = vpop.f32.mrb[23].mxu0 }
 0x493   : > { %v10699_v38 = vadd.f32 %v10698_v41, %v10697_v15 }
 0x494   : > { %v15507_v9 = vadd.f32 %v10693_v33, %v8480_v6 }
 0x498   : > { %v10582_v28 = vpop.f32.mrb[244].mxu1 }
 0x499   : > { %v10583_v10 = vpop.f32.mrb[245].mxu1 }
 0x49a   : > { %v10584_v20 = vadd.f32 %v10583_v10, %v10582_v28  ;;  %v10585_v13 = vpop.f32.mrb[246].mxu1 }
 0x49b   : > { %v10586_v4 = vpop.f32.mrb[247].mxu1 }
 0x49c   : > { %v10700_v25 = vpop.f32.mrb[24].mxu0  ;;  %v8485_v11 = vadd.f32 %v10584_v20, %v15408_v49  ;;  %v10587_v61 = vadd.f32 %v10586_v4, %v10585_v13 }
 0x49d   : > { %v10701_v48 = vpop.f32.mrb[25].mxu0 }
 0x49e   : > { %v10702_v63 = vadd.f32 %v10701_v48, %v10700_v25  ;;  %v10703_v7 = vpop.f32.mrb[26].mxu0  ;;  %v8488_v54 = vadd.f32 %v10587_v61, %v15412_v36  ;;  %v15511_v58 = vadd.f32 %v10696_v19, %v8485_v11 }
 0x49f   : > { %v10704_v60 = vpop.f32.mrb[27].mxu0 }
 0x4a0   : > { %v10705_v16 = vadd.f32 %v10704_v60, %v10703_v7  ;;  %v15513_v52 = vadd.f32 %v10699_v38, %v8488_v54 }
 0x4a2   : > { %v10588_v39 = vpop.f32.mrb[248].mxu1 }
 0x4a3   : > { %v10589_v33 = vpop.f32.mrb[249].mxu1 }
 0x4a4   : > { %v10590_v55 = vadd.f32 %v10589_v33, %v10588_v39  ;;  %v10591_v34 = vpop.f32.mrb[250].mxu1 }
 0x4a5   : > { %v10592_v45 = vpop.f32.mrb[251].mxu1 }
 0x4a6   : > { %v8493_v40 = vadd.f32 %v10590_v55, %v15419_v35  ;;  %v10593_v49 = vadd.f32 %v10592_v45, %v10591_v34 }
 0x4a8   : > { %v8496_v37 = vadd.f32 %v10593_v49, %v15424_v23  ;;  %v15517_v30 = vadd.f32 %v10702_v63, %v8493_v40 }
 0x4aa   : > { %v10594_v31 = vpop.f32.mrb[252].mxu1  ;;  %v15519_v36 = vadd.f32 %v10705_v16, %v8496_v37 }
 0x4ab   : > { %v10595_v12 = vpop.f32.mrb[253].mxu1 }
 0x4ac   : > { %v10596_v29 = vadd.f32 %v10595_v12, %v10594_v31  ;;  %v10597_v6 = vpop.f32.mrb[254].mxu1 }
 0x4ad   : > { %v10598_v15 = vpop.f32.mrb[255].mxu1 }
 0x4ae   : > { %v10706_v19 = vpop.f32.mrb[28].mxu0  ;;  %v8501_v41 = vadd.f32 %v10596_v29, %v15429_v18  ;;  %v10599_v38 = vadd.f32 %v10598_v15, %v10597_v6 }
 0x4af   : > { %v10707_v28 = vpop.f32.mrb[29].mxu0 }
 0x4b0   : > { %v10708_v10 = vadd.f32 %v10707_v28, %v10706_v19  ;;  %v10709_v20 = vpop.f32.mrb[30].mxu0  ;;  %v8504_v35 = vadd.f32 %v10599_v38, %v15432_v2 }
 0x4b1   : > { %v10710_v13 = vpop.f32.mrb[31].mxu0 }
 0x4b2   : > { %v10711_v23 = vadd.f32 %v10710_v13, %v10709_v20  ;;  %v15523_v4 = vadd.f32 %v10708_v10, %v8501_v41  ;;  %v10802_v25 = vpop.f32.mrb[0].mxu1 }
 0x4b3   : > { %v15526_v11 = vadd.f32 %v10802_v25, %v15435_v56  ;;  %v8702_v61 = vpop.f32.mrb[1].mxu1 }
 0x4b4   : > { %v15528_v48 = vadd.f32 %v10711_v23, %v8504_v35  ;;  %v15531_v63 = vadd.f32 %v8702_v61, %v15439_v50  ;;  %v10803_v18 = vpop.f32.mrb[2].mxu1 }
 0x4b5   : > { %v15534_v7 = vadd.f32 %v10803_v18, %v15441_v3  ;;  %v8705_v54 = vpop.f32.mrb[3].mxu1 }
 0x4b6   : > { %v15537_v2 = vadd.f32 %v8705_v54, %v15445_v46 }
 0x4b8   : > { %v8829_v60 = vadd.f32 %v15537_v2, %v15531_v63 }
 0x4ba   : > { %v8830_v56 = vadd.f32 %v8829_v60, %v15526_v11  ;;  %v10806_v16 = vpop.f32.mrb[4].mxu1 }
 0x4bb   : > { %v15543_v39 = vadd.f32 %v10806_v16, %v15448_v47  ;;  %v8718_v33 = vpop.f32.mrb[5].mxu1 }
 0x4bc   : > { %v15546_v50 = vadd.f32 %v8718_v33, %v15451_v1  ;;  %v8831_v3 = vadd.f32 %v8830_v56, %v15534_v7  ;;  %v10807_v55 = vpop.f32.mrb[6].mxu1 }
 0x4bd   : > { %v15550_v34 = vadd.f32 %v10807_v55, %v15453_v62  ;;  %v8721_v46 = vpop.f32.mrb[7].mxu1 }
 0x4be   : > { %v8832_v45 = vadd.f32 %v8831_v3, %v15546_v50  ;;  %v15554_v40 = vadd.f32 %v8721_v46, %v15455_v17 }
 0x4c0   : > { %v8833_v49 = vadd.f32 %v8832_v45, %v15554_v40 }
 0x4c2   : > { %v8834_v47 = vadd.f32 %v8833_v49, %v15543_v39  ;;  %v10810_v37 = vpop.f32.mrb[8].mxu1 }
 0x4c3   : > { %v15559_v1 = vadd.f32 %v10810_v37, %v15463_v14  ;;  %v8734_v31 = vpop.f32.mrb[9].mxu1 }
 0x4c4   : > { %v15562_v12 = vadd.f32 %v8734_v31, %v15457_v27  ;;  %v8835_v62 = vadd.f32 %v8834_v47, %v15550_v34  ;;  %v10811_v29 = vpop.f32.mrb[10].mxu1 }
 0x4c5   : > { %v15566_v6 = vadd.f32 %v10811_v29, %v15465_v59  ;;  %v8737_v17 = vpop.f32.mrb[11].mxu1 }
 0x4c6   : > { %v8836_v19 = vadd.f32 %v8835_v62, %v15562_v12  ;;  %v15570_v15 = vadd.f32 %v8737_v17, %v15460_v57 }
 0x4c8   : > { %v8837_v41 = vadd.f32 %v8836_v19, %v15570_v15 }
 0x4ca   : > { %v8838_v14 = vadd.f32 %v8837_v41, %v15559_v1  ;;  %v10814_v38 = vpop.f32.mrb[12].mxu1 }
 0x4cb   : > { %v15575_v27 = vadd.f32 %v10814_v38, %v15475_v43  ;;  %v8750_v28 = vpop.f32.mrb[13].mxu1 }
 0x4cc   : > { %v15578_v10 = vadd.f32 %v8750_v28, %v15469_v22  ;;  %v8839_v59 = vadd.f32 %v8838_v14, %v15566_v6  ;;  %v10815_v20 = vpop.f32.mrb[14].mxu1 }
 0x4cd   : > { %v15582_v35 = vadd.f32 %v10815_v20, %v15477_v53  ;;  %v8753_v57 = vpop.f32.mrb[15].mxu1 }
 0x4ce   : > { %v8840_v13 = vadd.f32 %v8839_v59, %v15578_v10  ;;  %v15586_v23 = vadd.f32 %v8753_v57, %v15471_v26 }
 0x4d0   : > { %v8841_v25 = vadd.f32 %v8840_v13, %v15586_v23 }
 0x4d2   : > { %v8842_v43 = vadd.f32 %v8841_v25, %v15575_v27  ;;  %v10818_v61 = vpop.f32.mrb[16].mxu1 }
 0x4d3   : > { %v15591_v22 = vadd.f32 %v10818_v61, %v15487_v21  ;;  %v8766_v18 = vpop.f32.mrb[17].mxu1 }
 0x4d4   : > { %v15594_v54 = vadd.f32 %v8766_v18, %v15481_v42  ;;  %v8843_v53 = vadd.f32 %v8842_v43, %v15582_v35  ;;  %v10819_v60 = vpop.f32.mrb[18].mxu1 }
 0x4d5   : > { %v15598_v56 = vadd.f32 %v10819_v60, %v15489_v32  ;;  %v8769_v26 = vpop.f32.mrb[19].mxu1 }
 0x4d6   : > { %v8844_v16 = vadd.f32 %v8843_v53, %v15594_v54  ;;  %v15602_v33 = vadd.f32 %v8769_v26, %v15483_v51 }
 0x4d8   : > { %v8845_v3 = vadd.f32 %v8844_v16, %v15602_v33 }
 0x4da   : > { %v8846_v21 = vadd.f32 %v8845_v3, %v15591_v22  ;;  %v10822_v55 = vpop.f32.mrb[20].mxu1 }
 0x4db   : > { %v15607_v42 = vadd.f32 %v10822_v55, %v15499_v8  ;;  %v8782_v46 = vpop.f32.mrb[21].mxu1 }
 0x4dc   : > { %v15610_v45 = vadd.f32 %v8782_v46, %v15493_v5  ;;  %v8847_v32 = vadd.f32 %v8846_v21, %v15598_v56  ;;  %v10823_v49 = vpop.f32.mrb[22].mxu1 }
 0x4dd   : > { %v15614_v47 = vadd.f32 %v10823_v49, %v15501_v0  ;;  %v8785_v51 = vpop.f32.mrb[23].mxu1  ;;  %v8874_v49 = vld [vmem:[%s15794_s6] sm:$0x3] }
 0x4de   : > { %v8848_v37 = vadd.f32 %v8847_v32, %v15610_v45  ;;  %v15618_v31 = vadd.f32 %v8785_v51, %v15495_v44 }
 0x4e0   : > { %v8849_v62 = vadd.f32 %v8848_v37, %v15618_v31 }
 0x4e2   : > { %v8850_v8 = vadd.f32 %v8849_v62, %v15607_v42  ;;  %v10826_v29 = vpop.f32.mrb[24].mxu1 }
 0x4e3   : > { %v15623_v5 = vadd.f32 %v10826_v29, %v15511_v58  ;;  %v8798_v17 = vpop.f32.mrb[25].mxu1 }
 0x4e4   : > { %v15626_v19 = vadd.f32 %v8798_v17, %v15505_v24  ;;  %v8851_v0 = vadd.f32 %v8850_v8, %v15614_v47  ;;  %v10827_v41 = vpop.f32.mrb[26].mxu1  ;;  %v8877_v8 = vld [vmem:[%s15795_s7] sm:$0x3] }
 0x4e5   : > { %v15630_v14 = vadd.f32 %v10827_v41, %v15513_v52  ;;  %v8801_v44 = vpop.f32.mrb[27].mxu1 }
 0x4e6   : > { %v8852_v38 = vadd.f32 %v8851_v0, %v15626_v19  ;;  %v15634_v28 = vadd.f32 %v8801_v44, %v15507_v9 }
 0x4e8   : > { %v8853_v59 = vadd.f32 %v8852_v38, %v15634_v28 }
 0x4ea   : > { %v8854_v58 = vadd.f32 %v8853_v59, %v15623_v5  ;;  %v10830_v20 = vpop.f32.mrb[28].mxu1 }
 0x4eb   : > { %v15639_v24 = vadd.f32 %v10830_v20, %v15523_v4  ;;  %v8814_v57 = vpop.f32.mrb[29].mxu1  ;;  %v8891_v20 = vld [vmem:[%s15796_s8] sm:$0x1] }
 0x4ec   : > { %v15642_v13 = vadd.f32 %v8814_v57, %v15517_v30  ;;  %v8855_v52 = vadd.f32 %v8854_v58, %v15630_v14  ;;  %v10831_v25 = vpop.f32.mrb[30].mxu1 }
 0x4ed   : > { %v15646_v43 = vadd.f32 %v10831_v25, %v15528_v48  ;;  %v8817_v9 = vpop.f32.mrb[31].mxu1  ;;  %v8868_v48 = vld [vmem:[%s15793_s5] sm:$0x3] }
 0x4ee   : > { %v8856_v61 = vadd.f32 %v8855_v52, %v15642_v13  ;;  %v15650_v18 = vadd.f32 %v8817_v9, %v15519_v36 }
 0x4f0   : > { %v8857_v53 = vadd.f32 %v8856_v61, %v15650_v18 }
 0x4f2   : > { %v8858_v4 = vadd.f32 %v8857_v53, %v15639_v24  ;;  %v8899_v53 = vlaneseq }
 0x4f4   : > { %v8859_v60 = vadd.f32 %v8858_v4, %v15646_v43  ;;  %v8900_v4 = vshrl.u32 %v8899_v53, 7 }
 0x4f6   : > { %v8860_v30 = vrot.slane %v8859_v60, 4 }
 0x4f8   : > { %v8861_v26 = vadd.f32 %v8860_v30, %v8859_v60  ;;  %v8901_v60 = vsub.s32 0, %v8900_v4 }
 0x4fa   : > { %v8862_v16 = vrot.slane %v8861_v26, 2 }
 0x4fc   : > { %v8863_v3 = vadd.f32 %v8862_v16, %v8861_v26 }
 0x4fe   : > { %v8864_v21 = vrot.slane %v8863_v3, 1 }
 0x500   : > { %v8865_v55 = vadd.f32 %v8864_v21, %v8863_v3 }
 0x502   : > { %v8867_v46 = vmul.f32 0.00390625, %v8865_v55 }
 0x504   : > { %v8869_v36 = vmul.f32 %v8868_v48, %v8867_v46 }
 0x506   : > { %v8871_v32 = vsel %vm8870_vm15, %v8869_v36, 0.0 }
 0x507   : > { %8872 = vadd.xlane.f32.xlu0 %v8871_v32 }
 0x594   : > { %v8873_v51 = vpop.xlane.xlu0 %8872 }
 0x595   : > { %v8875_v37 = vadd.f32 %v8874_v49, %v8873_v51 }
 0x597   : > { %v8876_v62 = vmax.f32 %v8875_v37, 0.0 }
 0x599   : > { %8880 = vperm.xlu0 %10888, %v8876_v62  }
 0x618   : > { %v8881_v29 = vpop.permute.xlu0 %8880 }
 0x619   : > { %v8883_v17 = vmul.f32 %v8881_v29, %v8877_v8 }
 0x61b   : > { %v8884_v0 = vsel %vm8870_vm15, %v8883_v17, 0.0 }
 0x61c   : > { %v8885_v41 = vrot.slane %v8884_v0, 4 }
 0x61e   : > { %v8886_v44 = vadd.f32 %v8885_v41, %v8884_v0 }
 0x620   : > { %v8887_v38 = vrot.slane %v8886_v44, 2 }
 0x622   : > { %v8888_v59 = vadd.f32 %v8887_v38, %v8886_v44 }
 0x624   : > { %v8889_v58 = vrot.slane %v8888_v59, 1 }
 0x626   : > { %v8890_v57 = vadd.f32 %v8889_v58, %v8888_v59 }
 0x628   : > { %v8892_v52 = vadd.f32 %v8891_v20, %v8890_v57 }
 0x62a   : > { %v9753_v25 = vmul.f32 -1.442695, %v8892_v52 }
 0x62c   : > { %11193 = vpow2.f32 %v9753_v25 }
 0x636   : > { %v11194_v9 = vpop.eup %11193 }
 0x637   : > { %v8896_v61 = vadd.f32 1.0, %v11194_v9 }
 0x639   : > { %11195 = vrcp.f32 %v8896_v61 }
 0x643   : > { %v11196_v30 = vpop.eup %11195 }
 0x644   : > { %v8902_v26 = vrot.slane %v11196_v30, %v8901_v60 }
 0x646   : > { %v8903_v16 = vmul.f32 %v8902_v26, %v15531_v63  ;;  %v8904_v3 = vmul.f32 %v8902_v26, %v15537_v2  ;;  %v8905_v21 = vmul.f32 %v8902_v26, %v15526_v11  ;;  %v8906_v55 = vmul.f32 %v8902_v26, %v15534_v7 }
 0x647   : > { %v8907_v48 = vmul.f32 %v8902_v26, %v15546_v50  ;;  %v8908_v46 = vmul.f32 %v8902_v26, %v15554_v40  ;;  %v8909_v36 = vmul.f32 %v8902_v26, %v15543_v39  ;;  %v8910_v32 = vmul.f32 %v8902_v26, %v15550_v34 }
 0x648   : > { %v8911_v49 = vmul.f32 %v8902_v26, %v15562_v12  ;;  %v8912_v51 = vmul.f32 %v8902_v26, %v15570_v15  ;;  %v8913_v63 = vmul.f32 %v8902_v26, %v15559_v1  ;;  %v8914_v2 = vmul.f32 %v8902_v26, %v15566_v6  ;;  %8935 = vst [vmem:[%s15682_s23] sm:$0xff] %v8903_v16 }
 0x649   : > { %8936 = vst [vmem:[%s15682_s23 + $0x8] sm:$0xff] %v8904_v3  ;;  %8937 = vst [vmem:[%s15682_s23 + $0x10] sm:$0xff] %v8905_v21  ;;  %v8915_v11 = vmul.f32 %v8902_v26, %v15578_v10  ;;  %v8916_v7 = vmul.f32 %v8902_v26, %v15586_v23  ;;  %v8917_v39 = vmul.f32 %v8902_v26, %v15575_v27 }
 0x64a   : > { %8938 = vst [vmem:[%s15682_s23 + $0x18] sm:$0xff] %v8906_v55  ;;  %v8918_v50 = vmul.f32 %v8902_v26, %v15582_v35  ;;  %8939 = vst [vmem:[%s15682_s23 + $0x20] sm:$0xff] %v8907_v48  ;;  %v8919_v34 = vmul.f32 %v8902_v26, %v15594_v54  ;;  %v8920_v40 = vmul.f32 %v8902_v26, %v15602_v33 }
 0x64b   : > { %8940 = vst [vmem:[%s15682_s23 + $0x28] sm:$0xff] %v8908_v46  ;;  %8941 = vst [vmem:[%s15682_s23 + $0x30] sm:$0xff] %v8909_v36  ;;  %v8921_v1 = vmul.f32 %v8902_v26, %v15591_v22  ;;  %v8922_v12 = vmul.f32 %v8902_v26, %v15598_v56  ;;  %v8923_v6 = vmul.f32 %v8902_v26, %v15610_v45 }
 0x64c   : > { %8942 = vst [vmem:[%s15682_s23 + $0x38] sm:$0xff] %v8910_v32  ;;  %8943 = vst [vmem:[%s15682_s23 + $0x40] sm:$0xff] %v8911_v49  ;;  %v8924_v15 = vmul.f32 %v8902_v26, %v15618_v31  ;;  %v8925_v27 = vmul.f32 %v8902_v26, %v15607_v42  ;;  %v8926_v10 = vmul.f32 %v8902_v26, %v15614_v47 }
 0x64d   : > { %8944 = vst [vmem:[%s15682_s23 + $0x48] sm:$0xff] %v8912_v51  ;;  %8945 = vst [vmem:[%s15682_s23 + $0x50] sm:$0xff] %v8913_v63  ;;  %v8927_v35 = vmul.f32 %v8902_v26, %v15626_v19  ;;  %v8928_v23 = vmul.f32 %v8902_v26, %v15634_v28  ;;  %v8929_v22 = vmul.f32 %v8902_v26, %v15623_v5 }
 0x64e   : > { %8946 = vst [vmem:[%s15682_s23 + $0x58] sm:$0xff] %v8914_v2  ;;  %8947 = vst [vmem:[%s15682_s23 + $0x60] sm:$0xff] %v8915_v11  ;;  %v8930_v54 = vmul.f32 %v8902_v26, %v15630_v14  ;;  %v8931_v56 = vmul.f32 %v8902_v26, %v15642_v13  ;;  %v8932_v33 = vmul.f32 %v8902_v26, %v15650_v18 }
 0x64f   : > { %8948 = vst [vmem:[%s15682_s23 + $0x68] sm:$0xff] %v8916_v7  ;;  %8949 = vst [vmem:[%s15682_s23 + $0x70] sm:$0xff] %v8917_v39  ;;  %v8933_v42 = vmul.f32 %v8902_v26, %v15639_v24  ;;  %v8934_v45 = vmul.f32 %v8902_v26, %v15646_v43 }
 0x650   : > { %8950 = vst [vmem:[%s15682_s23 + $0x78] sm:$0xff] %v8918_v50  ;;  %8951 = vst [vmem:[%s15682_s23 + $0x80] sm:$0xff] %v8919_v34 }
 0x651   : > { %8952 = vst [vmem:[%s15682_s23 + $0x88] sm:$0xff] %v8920_v40  ;;  %8953 = vst [vmem:[%s15682_s23 + $0x90] sm:$0xff] %v8921_v1 }
 0x652   : > { %8954 = vst [vmem:[%s15682_s23 + $0x98] sm:$0xff] %v8922_v12  ;;  %8955 = vst [vmem:[%s15682_s23 + $0xa0] sm:$0xff] %v8923_v6 }
 0x653   : > { %8956 = vst [vmem:[%s15682_s23 + $0xa8] sm:$0xff] %v8924_v15  ;;  %8957 = vst [vmem:[%s15682_s23 + $0xb0] sm:$0xff] %v8925_v27 }
 0x654   : > { %8958 = vst [vmem:[%s15682_s23 + $0xb8] sm:$0xff] %v8926_v10  ;;  %8959 = vst [vmem:[%s15682_s23 + $0xc0] sm:$0xff] %v8927_v35 }
 0x655   : > { %8960 = vst [vmem:[%s15682_s23 + $0xc8] sm:$0xff] %v8928_v23  ;;  %8961 = vst [vmem:[%s15682_s23 + $0xd0] sm:$0xff] %v8929_v22 }
 0x656   : > { %8962 = vst [vmem:[%s15682_s23 + $0xd8] sm:$0xff] %v8930_v54  ;;  %8963 = vst [vmem:[%s15682_s23 + $0xe0] sm:$0xff] %v8931_v56 }
 0x657   : > { %8964 = vst [vmem:[%s15682_s23 + $0xe8] sm:$0xff] %v8932_v33  ;;  %8965 = vst [vmem:[%s15682_s23 + $0xf0] sm:$0xff] %v8933_v42 }
 0x658   : > { %8966 = vst [vmem:[%s15682_s23 + $0xf8] sm:$0xff] %v8934_v45 }
 0x659   : > { %11311 = shalt.err (!%p11308_p7)
}
 0x65a   : > { %s11312_s14 = scalar_lea.hbm %s15725_s25, 4096  ;;  %s11316_s17 = scalar_lea.hbm %s15797_s9, 8192 }
 0x65b   : > { %p11313_p8 = scmp.ne.s32.totalorder %s15725_s25, %s11312_s14  ;;  %p11317_p1 = scmp.lt.u32.totalorder %s15725_s25, %s15797_s9 }
 0x65c   : > { %p11318_p0 = scmp.lt.u32.totalorder %s11316_s17, %s11312_s14  ;;  %p11320_p6 = scmp.lt.u32.totalorder %s11312_s14, %s15725_s25 }
 0x65d   : > { %p11314_p11 = pnand %p11313_p8, %p16059_p9 }
 0x65e   : > { %p11319_p5 = por %p11318_p0, %p11317_p1 }
 0x65f   : > { %p11315_p13 = pneg %p11314_p11 }
 0x660   : > { %p11321_p10 = por %p11320_p6, %p11319_p5 }
 0x662   : > { %p11322_p12 = pnand %p11321_p10, %p11315_p13 }
 0x664   : > { %11325 = shalt.err (!%p11322_p12)
}
 0x665   : > { %s11371_s28 = smov 128   ;;  %s11372_s21 = smov 8  }
 0x666   : > { %10837 = dma.vmem_to_hbm [thread:$0]  (%p16059_p9), %s15727_s22, 4096, %s15725_s25, %s15747_s26, %s11371_s28, %s11371_s28, %s11372_s21  }
 0x667 PF: > { %p10849_p2 = scmp.ge.s32.totalorder %s11364_s12, 2  ;;  %s8996_s27 = sand.u32 1, %s11352_s30  }
 0x668   : > { %p16060_p3 = scmp.ne.s32.totalorder %s15838_s20, 0  ;;  %s8997_s29 = scalar_lea.sflag [#allocation5], %s8996_s27 }
 0x66a   : > { %p10844_p4 = pnand %p10849_p2, %p16060_p3 }
 0x66c   : > { %11347 = dma.done.wait (!%p10844_p4), %s8997_s29, 4096  }
 0x66d   : > { %11349 = vsyncadd (!%p10844_p4), %s8997_s29, 4294963200  ;;  %p20_p7 = scmp.ge.s32.totalorder %s11448_s15, 4   ;;  %s16061_s30 = smov %s11356_s10 }
 0x66e   : > { %s16062_s10 = smov %s11360_s11  ;;  %s16063_s11 = smov %s11459_s18 }
 0x66f   : > { %s16064_s12 = smov %s11448_s15  ;;  %22 = sbr.rel (!%p20_p7) target bundleno = 4 (0x4), region = 101 }
 0x676   :  { %9002 = vsyncpa [#allocation4], 1 }
 0x677   :  { %9004 = vsyncpa [#allocation4 + $0x1], 1 }
 0x678   :  { %9005 = vsyncpa [#allocation5], 1 }
 0x679   :  { %9007 = vsyncpa [#allocation5 + $0x1], 1 }

</bundles_post_ra>
